<compile_context>
chip_gen: v7x
topology: tpu7x:2x2x1
jax: 0.10.0
libtpu: 0.0.40
codegen_flags: <defaults>
</compile_context>

<pallas_src>
import math

import jax
import jax.numpy as jnp
from jax.experimental import pallas as pl
from jax.experimental.pallas import tpu as pltpu

HIDDEN = 384
NUM_HEADS = 12
HEAD_DIM = HIDDEN // NUM_HEADS          # 32
HEAD_PAD = 128                          # per-head [q|k|v|pad] column group (lane aligned)
QKV_COLS = NUM_HEADS * HEAD_PAD         # 1536
INTERMEDIATE = 1536
NUM_LAYERS = 2                          # TODO(synk): real xtremedistil-l12 has 12 layers; 2 kept for a small synthetic run.
VOCAB = 128
MAX_POS = 64
LN_EPS = 1e-12

NUM_CLASSES = 43
L2_DIM, L3_DIM = 200, 100
L2_PAD, L3_PAD, OUT_PAD = 256, 128, 128   # lane-padded head widths (multiples of 128)


# ---------------------------------------------------------------------------
# In-kernel helpers
# ---------------------------------------------------------------------------
def _ln(x, g, b):
    """LayerNorm in f32. x: (rows, D); g, b: (1, D)."""
    mean = jnp.mean(x, axis=-1, keepdims=True)
    var = jnp.mean((x - mean) ** 2, axis=-1, keepdims=True)
    return (x - mean) * jax.lax.rsqrt(var + LN_EPS) * g + b


def _bf16_dot(x, w):
    """bf16 operands into the MXU, f32 accumulation (w is already bf16)."""
    return jnp.dot(x.astype(jnp.bfloat16), w, preferred_element_type=jnp.float32)


# ---------------------------------------------------------------------------
# Fused kernel: emb-LN (layer 0) -> L x encoder layer -> CLS pool -> head
# ---------------------------------------------------------------------------
def _make_encoder_kernel(bblk, seq, n_layers):
    rows = bblk * seq

    def kernel(x_emb_ref, mask_ref,
               wqkv_ref, bqkv_ref, wo_ref, bo_ref, ln1g_ref, ln1b_ref,
               w1_ref, b1_ref, w2_ref, b2_ref, ln2g_ref, ln2b_ref,
               embg_ref, embb_ref,
               prew_ref, preb_ref, l2w_ref, l2b_ref,
               l3w_ref, l3b_ref, clsw_ref, clsb_ref,
               out_ref, x_state):
        layer = pl.program_id(1)

        # Embedding LayerNorm fused into the first layer step.
        @pl.when(layer == 0)
        def _():
            xe = x_emb_ref[0].astype(jnp.float32)                 # (rows, HIDDEN)
            x_state[...] = _ln(xe, embg_ref[...], embb_ref[...])

        x = x_state[...]                                          # (rows, HIDDEN) f32
        mask = mask_ref[0]                                        # (rows, rows) additive

        # ---- fused QKV projection: one lane-dense (384 x 1536) matmul ------
        qkv = _bf16_dot(x, wqkv_ref[0]) + bqkv_ref[0]             # (rows, 1536) f32

        # ---- head-batched relayout via 128-aligned per-head column groups --
        hqkv = jnp.concatenate(
            [qkv[:, h * HEAD_PAD:(h + 1) * HEAD_PAD].reshape(1, rows, HEAD_PAD)
             for h in range(NUM_HEADS)], axis=0)                  # (H, rows, 128)
        q3 = hqkv[:, :, 0:HEAD_DIM].astype(jnp.bfloat16)          # (H, rows, 32)
        k3 = hqkv[:, :, HEAD_DIM:2 * HEAD_DIM].astype(jnp.bfloat16)
        v3 = hqkv[:, :, 2 * HEAD_DIM:3 * HEAD_DIM].astype(jnp.bfloat16)

        # ---- all heads at once: two 3-D batched einsums ---------------------
        # 1/sqrt(head_dim) is pre-folded into the Q weights.
        s = jnp.einsum('hqd,hkd->hqk', q3, k3,
                       preferred_element_type=jnp.float32)        # (H, rows, rows)
        s = s + mask[None, :, :]     # block-diag seq mask + key padding mask
        s = s - jnp.max(s, axis=-1, keepdims=True)
        p = jnp.exp(s)
        p = p * pl.reciprocal(jnp.sum(p, axis=-1, keepdims=True), approx=True)
        ctx = jnp.einsum('hqk,hkd->hqd', p.astype(jnp.bfloat16), v3,
                         preferred_element_type=jnp.float32)      # (H, rows, 32)

        # ---- O-projection with the head layout folded into wo ---------------
        o_parts = jnp.einsum('hrd,hde->hre', ctx.astype(jnp.bfloat16), wo_ref[0],
                             preferred_element_type=jnp.float32)  # (H, rows, 384)
        attn = o_parts[0]
        for h in range(1, NUM_HEADS):
            attn = attn + o_parts[h]
        attn = attn + bo_ref[0]

        x1 = _ln(attn + x, ln1g_ref[0], ln1b_ref[0])

        h1 = _bf16_dot(x1, w1_ref[0]) + b1_ref[0]
        h1 = jax.nn.gelu(h1, approximate=True)
        ffn = _bf16_dot(h1, w2_ref[0]) + b2_ref[0]
        x2 = _ln(ffn + x1, ln2g_ref[0], ln2b_ref[0])

        x_state[...] = x2     # carried in VMEM to the next layer grid step

        # ---- last layer: CLS pooling + fused classification head -----------
        @pl.when(layer == n_layers - 1)
        def _():
            cls = jnp.concatenate(
                [x2[b * seq:b * seq + 1, :] for b in range(bblk)], axis=0)  # (bblk, 384)
            y = jnp.maximum(_bf16_dot(cls, prew_ref[...]) + preb_ref[...], 0.0)
            # dropout(p=0.3) is identity at inference time
            y = jnp.maximum(_bf16_dot(y, l2w_ref[...]) + l2b_ref[...], 0.0)
            y = jnp.maximum(_bf16_dot(y, l3w_ref[...]) + l3b_ref[...], 0.0)
            out_ref[0] = (_bf16_dot(y, clsw_ref[...]) + clsb_ref[...]).astype(out_ref.dtype)

    return kernel


# ---------------------------------------------------------------------------
# Parameter init (deterministic, synthetic) in the fused/padded/bf16 layout
# ---------------------------------------------------------------------------
def init_params(key):
    def dense(k, fan_in, fan_out):
        w = jax.random.normal(k, (fan_in, fan_out), jnp.float32) * 0.02
        b = jnp.zeros((fan_out,), jnp.float32)
        return w, b

    def pad(w, r, c):
        return jnp.zeros((r, c), w.dtype).at[:w.shape[0], :w.shape[1]].set(w)

    keys = iter(jax.random.split(key, 8 * NUM_LAYERS + 16))
    p = {}
    p["word_emb"] = jax.random.normal(next(keys), (VOCAB, HIDDEN), jnp.float32) * 0.02
    p["pos_emb"] = jax.random.normal(next(keys), (MAX_POS, HIDDEN), jnp.float32) * 0.02
    p["emb_ln_g"] = jnp.ones((1, HIDDEN), jnp.float32)
    p["emb_ln_b"] = jnp.zeros((1, HIDDEN), jnp.float32)

    scale = 1.0 / math.sqrt(HEAD_DIM)     # softmax scale folded into the Q columns
    names = ["wqkv", "bqkv", "wo", "bo", "ln1_g", "ln1_b",
             "w1", "b1", "w2", "b2", "ln2_g", "ln2_b"]
    acc = {n: [] for n in names}
    zcol = jnp.zeros((HIDDEN, HEAD_PAD - 3 * HEAD_DIM), jnp.float32)
    zb = jnp.zeros((HEAD_PAD - 3 * HEAD_DIM,), jnp.float32)
    for _ in range(NUM_LAYERS):
        wq, bq = dense(next(keys), HIDDEN, HIDDEN)
        wk, bk = dense(next(keys), HIDDEN, HIDDEN)
        wv, bv = dense(next(keys), HIDDEN, HIDDEN)
        wo, bo = dense(next(keys), HIDDEN, HIDDEN)
        w1, b1 = dense(next(keys), HIDDEN, INTERMEDIATE)
        w2, b2 = dense(next(keys), INTERMEDIATE, HIDDEN)

        # Pack QKV columns head-major as [q_h | k_h | v_h | pad] = 128 per head,
        # so the in-kernel per-head slices are 128-lane aligned.
        cols, bias = [], []
        for h in range(NUM_HEADS):
            sl = slice(h * HEAD_DIM, (h + 1) * HEAD_DIM)
            cols += [wq[:, sl] * scale, wk[:, sl], wv[:, sl], zcol]
            bias += [bq[sl] * scale, bk[sl], bv[sl], zb]
        acc["wqkv"].append(jnp.concatenate(cols, axis=1).astype(jnp.bfloat16))
        acc["bqkv"].append(jnp.concatenate(bias).reshape(1, QKV_COLS))
        acc["wo"].append(wo.reshape(NUM_HEADS, HEAD_DIM, HIDDEN).astype(jnp.bfloat16))
        acc["bo"].append(bo.reshape(1, HIDDEN))
        acc["ln1_g"].append(jnp.ones((1, HIDDEN), jnp.float32))
        acc["ln1_b"].append(jnp.zeros((1, HIDDEN), jnp.float32))
        acc["w1"].append(w1.astype(jnp.bfloat16))
        acc["b1"].append(b1.reshape(1, INTERMEDIATE))
        acc["w2"].append(w2.astype(jnp.bfloat16))
        acc["b2"].append(b2.reshape(1, HIDDEN))
        acc["ln2_g"].append(jnp.ones((1, HIDDEN), jnp.float32))
        acc["ln2_b"].append(jnp.zeros((1, HIDDEN), jnp.float32))
    p["layers"] = {n: jnp.stack(v, axis=0) for n, v in acc.items()}   # leading layer dim

    # Classification head: exact PyTorch dims 384->384->200->100->43, with the
    # 200/100/43 widths zero-padded to 256/128/128 so every store is lane-dense.
    pre_w, pre_b = dense(next(keys), HIDDEN, HIDDEN)
    l2_w, l2_b = dense(next(keys), HIDDEN, L2_DIM)
    l3_w, l3_b = dense(next(keys), L2_DIM, L3_DIM)
    cls_w, cls_b = dense(next(keys), L3_DIM, NUM_CLASSES)
    p["pre_w"] = pre_w.astype(jnp.bfloat16)
    p["pre_b"] = pre_b.reshape(1, HIDDEN)
    p["l2_w"] = pad(l2_w, HIDDEN, L2_PAD).astype(jnp.bfloat16)
    p["l2_b"] = pad(l2_b.reshape(1, L2_DIM), 1, L2_PAD)
    p["l3_w"] = pad(l3_w, L2_PAD, L3_PAD).astype(jnp.bfloat16)
    p["l3_b"] = pad(l3_b.reshape(1, L3_DIM), 1, L3_PAD)
    p["cls_w"] = pad(cls_w, L3_PAD, OUT_PAD).astype(jnp.bfloat16)
    p["cls_b"] = pad(cls_b.reshape(1, NUM_CLASSES), 1, OUT_PAD)
    return p


# ---------------------------------------------------------------------------
# Forward pass (mirrors DistillBERTClass.forward) -- ONE pallas_call
# ---------------------------------------------------------------------------
def distillbert_forward(params, input_ids, attention_mask):
    B, S = input_ids.shape
    # Pack as many sequences as possible into one grid step (bigger MXU M).
    bblk = min(B, max(1, 256 // S))
    while B % bblk:
        bblk -= 1
    nb = B // bblk
    rows = bblk * S

    lw = params["layers"]
    n_layers = lw["wqkv"].shape[0]

    # --- embeddings (gather) + additive attention mask in plain JAX ---------
    emb = params["word_emb"][input_ids] + params["pos_emb"][jnp.arange(S)][None, :, :]
    x_emb = emb.reshape(nb, rows, HIDDEN)

    key_valid = attention_mask.reshape(nb, 1, rows).astype(jnp.float32) > 0.5
    r = jnp.arange(rows)
    same_seq = (r[:, None] // S) == (r[None, :] // S)             # block-diag per sequence
    mask_big = jnp.where(same_seq[None, :, :] & key_valid, 0.0, -1e9).astype(jnp.float32)

    # --- BlockSpecs ----------------------------------------------------------
    def amap(g, l): return (g, 0, 0)       # per-batch-block activations
    def wmap3(g, l): return (l, 0, 0)      # stream per-layer weights on the layer axis
    def wmap4(g, l): return (l, 0, 0, 0)
    def cmap2(g, l): return (0, 0)         # constant (head / emb-LN) params

    layer_specs = [
        pl.BlockSpec((1, HIDDEN, QKV_COLS), wmap3),                 # wqkv
        pl.BlockSpec((1, 1, QKV_COLS), wmap3),                      # bqkv
        pl.BlockSpec((1, NUM_HEADS, HEAD_DIM, HIDDEN), wmap4),      # wo (head-folded)
        pl.BlockSpec((1, 1, HIDDEN), wmap3),                        # bo
        pl.BlockSpec((1, 1, HIDDEN), wmap3),                        # ln1_g
        pl.BlockSpec((1, 1, HIDDEN), wmap3),                        # ln1_b
        pl.BlockSpec((1, HIDDEN, INTERMEDIATE), wmap3),             # w1
        pl.BlockSpec((1, 1, INTERMEDIATE), wmap3),                  # b1
        pl.BlockSpec((1, INTERMEDIATE, HIDDEN), wmap3),             # w2
        pl.BlockSpec((1, 1, HIDDEN), wmap3),                        # b2
        pl.BlockSpec((1, 1, HIDDEN), wmap3),                        # ln2_g
        pl.BlockSpec((1, 1, HIDDEN), wmap3),                        # ln2_b
    ]
    const_specs = [
        pl.BlockSpec((1, HIDDEN), cmap2),                           # emb_ln_g
        pl.BlockSpec((1, HIDDEN), cmap2),                           # emb_ln_b
        pl.BlockSpec((HIDDEN, HIDDEN), cmap2),                      # pre_w
        pl.BlockSpec((1, HIDDEN), cmap2),                           # pre_b
        pl.BlockSpec((HIDDEN, L2_PAD), cmap2),                      # l2_w
        pl.BlockSpec((1, L2_PAD), cmap2),                           # l2_b
        pl.BlockSpec((L2_PAD, L3_PAD), cmap2),                      # l3_w
        pl.BlockSpec((1, L3_PAD), cmap2),                           # l3_b
        pl.BlockSpec((L3_PAD, OUT_PAD), cmap2),                     # cls_w
        pl.BlockSpec((1, OUT_PAD), cmap2),                          # cls_b
    ]
    in_specs = ([pl.BlockSpec((1, rows, HIDDEN), amap),
                 pl.BlockSpec((1, rows, rows), amap)]
                + layer_specs + const_specs)
    out_spec = pl.BlockSpec((1, bblk, OUT_PAD), amap)

    # --- cost estimate for XLA's scheduler ------------------------------------
    flops_per_step = (
        2 * rows * HIDDEN * QKV_COLS
        + 2 * 2 * NUM_HEADS * rows * rows * HEAD_DIM
        + 2 * rows * HIDDEN * HIDDEN
        + 2 * 2 * rows * HIDDEN * INTERMEDIATE)
    head_flops = 2 * bblk * (HIDDEN * HIDDEN + HIDDEN * L2_PAD
                             + L2_PAD * L3_PAD + L3_PAD * OUT_PAD)
    weight_bytes = n_layers * (HIDDEN * QKV_COLS + HIDDEN * HIDDEN
                               + 2 * HIDDEN * INTERMEDIATE) * 2
    act_bytes = (x_emb.size + mask_big.size + nb * bblk * OUT_PAD) * 4
    cost = pl.CostEstimate(
        flops=int(nb * n_layers * flops_per_step + nb * head_flops),
        transcendentals=int(nb * n_layers * (NUM_HEADS * rows * rows + rows * INTERMEDIATE)),
        bytes_accessed=int(weight_bytes + act_bytes))

    logits_pad = pl.pallas_call(
        _make_encoder_kernel(bblk, S, n_layers),
        out_shape=jax.ShapeDtypeStruct((nb, bblk, OUT_PAD), jnp.float32),
        grid=(nb, n_layers),
        in_specs=in_specs,
        out_specs=out_spec,
        scratch_shapes=[pltpu.VMEM((rows, HIDDEN), jnp.float32)],   # x carried across layers
        compiler_params=pltpu.CompilerParams(
            dimension_semantics=("parallel", "arbitrary"),
            vmem_limit_bytes=64 * 1024 * 1024),
        cost_estimate=cost,
    )(x_emb, mask_big,
      lw["wqkv"], lw["bqkv"], lw["wo"], lw["bo"], lw["ln1_g"], lw["ln1_b"],
      lw["w1"], lw["b1"], lw["w2"], lw["b2"], lw["ln2_g"], lw["ln2_b"],
      params["emb_ln_g"], params["emb_ln_b"],
      params["pre_w"], params["pre_b"], params["l2_w"], params["l2_b"],
      params["l3_w"], params["l3_b"], params["cls_w"], params["cls_b"])

    return logits_pad.reshape(B, OUT_PAD)[:, :NUM_CLASSES]


# ---------------------------------------------------------------------------
if __name__ == "__main__":
    key = jax.random.PRNGKey(0)
    k_param, k_ids, _ = jax.random.split(key, 3)

    B, S = 2, 8
    params = init_params(k_param)
    input_ids = jax.random.randint(k_ids, (B, S), 0, VOCAB, dtype=jnp.int32)
    lengths = jnp.array([S, S - 3], dtype=jnp.int32)
    attention_mask = (jnp.arange(S)[None, :] < lengths[:, None]).astype(jnp.int32)

    out = jax.jit(distillbert_forward)(params, input_ids, attention_mask)
    out = jax.block_until_ready(out)

    assert out.shape == (B, NUM_CLASSES), out.shape
    assert jnp.all(jnp.isfinite(out))
    print("KERNEL_OK")
</pallas_src>

<mosaic_0001>
module attributes {stable_mosaic.version = 11 : i64} {
  func.func @kernel(%arg0: i32, %arg1: i32, %arg2: memref<1x16x384xf32, #tpu.memory_space<vmem>>, %arg3: memref<1x16x16xf32, #tpu.memory_space<vmem>>, %arg4: memref<1x384x1536xbf16, #tpu.memory_space<vmem>>, %arg5: memref<1x1x1536xf32, #tpu.memory_space<vmem>>, %arg6: memref<1x12x32x384xbf16, #tpu.memory_space<vmem>>, %arg7: memref<1x1x384xf32, #tpu.memory_space<vmem>>, %arg8: memref<1x1x384xf32, #tpu.memory_space<vmem>>, %arg9: memref<1x1x384xf32, #tpu.memory_space<vmem>>, %arg10: memref<1x384x1536xbf16, #tpu.memory_space<vmem>>, %arg11: memref<1x1x1536xf32, #tpu.memory_space<vmem>>, %arg12: memref<1x1536x384xbf16, #tpu.memory_space<vmem>>, %arg13: memref<1x1x384xf32, #tpu.memory_space<vmem>>, %arg14: memref<1x1x384xf32, #tpu.memory_space<vmem>>, %arg15: memref<1x1x384xf32, #tpu.memory_space<vmem>>, %arg16: memref<1x384xf32, #tpu.memory_space<vmem>>, %arg17: memref<1x384xf32, #tpu.memory_space<vmem>>, %arg18: memref<384x384xbf16, #tpu.memory_space<vmem>>, %arg19: memref<1x384xf32, #tpu.memory_space<vmem>>, %arg20: memref<384x256xbf16, #tpu.memory_space<vmem>>, %arg21: memref<1x256xf32, #tpu.memory_space<vmem>>, %arg22: memref<256x128xbf16, #tpu.memory_space<vmem>>, %arg23: memref<1x128xf32, #tpu.memory_space<vmem>>, %arg24: memref<128x128xbf16, #tpu.memory_space<vmem>>, %arg25: memref<1x128xf32, #tpu.memory_space<vmem>>, %arg26: memref<1x2x128xf32, #tpu.memory_space<vmem>>, %arg27: memref<16x384xf32, #tpu.memory_space<vmem>>) attributes {dimension_semantics = [#tpu.dimension_semantics<parallel>, #tpu.dimension_semantics<arbitrary>], iteration_bounds = array<i64: 1, 2>, scalar_prefetch = 0 : i64, scratch_operands = 1 : i64, tpu.core_type = #tpu.core_type<tc>, window_params = [{transform_indices = @transform_0, window_bounds = array<i64: 1, 16, 384>}, {transform_indices = @transform_1, window_bounds = array<i64: 1, 16, 16>}, {transform_indices = @transform_2, window_bounds = array<i64: 1, 384, 1536>}, {transform_indices = @transform_3, window_bounds = array<i64: 1, 1, 1536>}, {transform_indices = @transform_4, window_bounds = array<i64: 1, 12, 32, 384>}, {transform_indices = @transform_5, window_bounds = array<i64: 1, 1, 384>}, {transform_indices = @transform_6, window_bounds = array<i64: 1, 1, 384>}, {transform_indices = @transform_7, window_bounds = array<i64: 1, 1, 384>}, {transform_indices = @transform_8, window_bounds = array<i64: 1, 384, 1536>}, {transform_indices = @transform_9, window_bounds = array<i64: 1, 1, 1536>}, {transform_indices = @transform_10, window_bounds = array<i64: 1, 1536, 384>}, {transform_indices = @transform_11, window_bounds = array<i64: 1, 1, 384>}, {transform_indices = @transform_12, window_bounds = array<i64: 1, 1, 384>}, {transform_indices = @transform_13, window_bounds = array<i64: 1, 1, 384>}, {pipeline_mode = #tpu.pipeline_mode<synchronous>, transform_indices = @transform_14, window_bounds = array<i64: 1, 384>}, {pipeline_mode = #tpu.pipeline_mode<synchronous>, transform_indices = @transform_15, window_bounds = array<i64: 1, 384>}, {pipeline_mode = #tpu.pipeline_mode<synchronous>, transform_indices = @transform_16, window_bounds = array<i64: 384, 384>}, {pipeline_mode = #tpu.pipeline_mode<synchronous>, transform_indices = @transform_17, window_bounds = array<i64: 1, 384>}, {pipeline_mode = #tpu.pipeline_mode<synchronous>, transform_indices = @transform_18, window_bounds = array<i64: 384, 256>}, {pipeline_mode = #tpu.pipeline_mode<synchronous>, transform_indices = @transform_19, window_bounds = array<i64: 1, 256>}, {pipeline_mode = #tpu.pipeline_mode<synchronous>, transform_indices = @transform_20, window_bounds = array<i64: 256, 128>}, {pipeline_mode = #tpu.pipeline_mode<synchronous>, transform_indices = @transform_21, window_bounds = array<i64: 1, 128>}, {pipeline_mode = #tpu.pipeline_mode<synchronous>, transform_indices = @transform_22, window_bounds = array<i64: 128, 128>}, {pipeline_mode = #tpu.pipeline_mode<synchronous>, transform_indices = @transform_23, window_bounds = array<i64: 1, 128>}, {transform_indices = @transform_24, window_bounds = array<i64: 1, 2, 128>}]} {
    %c0_i32 = arith.constant 0 : i32
    %0 = arith.cmpi eq, %arg1, %c0_i32 : i32
    %1 = arith.extui %0 : i1 to i32
    %c0_i32_0 = arith.constant 0 : i32
    %2 = arith.cmpi ne, %1, %c0_i32_0 : i32
    scf.if %2 {
      %c0_66 = arith.constant 0 : index
      %c0_67 = arith.constant 0 : index
      %c0_68 = arith.constant 0 : index
      %191 = vector.load %arg2[%c0_66, %c0_67, %c0_68] : memref<1x16x384xf32, #tpu.memory_space<vmem>>, vector<1x16x384xf32>
      %192 = vector.shape_cast %191 : vector<1x16x384xf32> to vector<16x384xf32>
      %c0_69 = arith.constant 0 : index
      %c0_70 = arith.constant 0 : index
      %193 = vector.load %arg16[%c0_69, %c0_70] : memref<1x384xf32, #tpu.memory_space<vmem>>, vector<1x384xf32>
      %c0_71 = arith.constant 0 : index
      %c0_72 = arith.constant 0 : index
      %194 = vector.load %arg17[%c0_71, %c0_72] : memref<1x384xf32, #tpu.memory_space<vmem>>, vector<1x384xf32>
      %cst_73 = arith.constant dense<0.000000e+00> : vector<16xf32>
      %195 = vector.multi_reduction <add>, %192, %cst_73 [1] : vector<16x384xf32> to vector<16xf32>
      %196 = vector.shape_cast %195 : vector<16xf32> to vector<16x1xf32>
      %cst_74 = arith.constant 3.840000e+02 : f32
      %197 = vector.broadcast %cst_74 : f32 to vector<16x1xf32>
      %198 = arith.divf %196, %197 : vector<16x1xf32>
      %199 = vector.broadcast %198 : vector<16x1xf32> to vector<16x384xf32>
      %200 = arith.subf %192, %199 : vector<16x384xf32>
      %201 = arith.mulf %200, %200 : vector<16x384xf32>
      %cst_75 = arith.constant dense<0.000000e+00> : vector<16xf32>
      %202 = vector.multi_reduction <add>, %201, %cst_75 [1] : vector<16x384xf32> to vector<16xf32>
      %203 = vector.shape_cast %202 : vector<16xf32> to vector<16x1xf32>
      %cst_76 = arith.constant 3.840000e+02 : f32
      %204 = vector.broadcast %cst_76 : f32 to vector<16x1xf32>
      %205 = arith.divf %203, %204 : vector<16x1xf32>
      %206 = vector.broadcast %198 : vector<16x1xf32> to vector<16x384xf32>
      %207 = arith.subf %192, %206 : vector<16x384xf32>
      %cst_77 = arith.constant 9.99999996E-13 : f32
      %208 = vector.broadcast %cst_77 : f32 to vector<16x1xf32>
      %209 = arith.addf %205, %208 : vector<16x1xf32>
      %210 = math.rsqrt %209 : vector<16x1xf32>
      %211 = vector.broadcast %210 : vector<16x1xf32> to vector<16x384xf32>
      %212 = arith.mulf %207, %211 : vector<16x384xf32>
      %213 = vector.broadcast %193 : vector<1x384xf32> to vector<16x384xf32>
      %214 = arith.mulf %212, %213 : vector<16x384xf32>
      %215 = vector.broadcast %194 : vector<1x384xf32> to vector<16x384xf32>
      %216 = arith.addf %214, %215 : vector<16x384xf32>
      %c0_78 = arith.constant 0 : index
      %c0_79 = arith.constant 0 : index
      %217 = vector.load %arg27[%c0_78, %c0_79] : memref<16x384xf32, #tpu.memory_space<vmem>>, vector<16x384xf32>
      tpu.vector_store %arg27[%c0_78, %c0_79], %216 {strides = array<i32>} : memref<16x384xf32, #tpu.memory_space<vmem>>, vector<16x384xf32>,
    } else {
    }
    %c0 = arith.constant 0 : index
    %c0_1 = arith.constant 0 : index
    %3 = vector.load %arg27[%c0, %c0_1] : memref<16x384xf32, #tpu.memory_space<vmem>>, vector<16x384xf32>
    %c0_2 = arith.constant 0 : index
    %c0_3 = arith.constant 0 : index
    %c0_4 = arith.constant 0 : index
    %4 = vector.load %arg3[%c0_2, %c0_3, %c0_4] : memref<1x16x16xf32, #tpu.memory_space<vmem>>, vector<1x16x16xf32>
    %5 = vector.shape_cast %4 : vector<1x16x16xf32> to vector<16x16xf32>
    %c0_5 = arith.constant 0 : index
    %c0_6 = arith.constant 0 : index
    %c0_7 = arith.constant 0 : index
    %6 = vector.load %arg4[%c0_5, %c0_6, %c0_7] : memref<1x384x1536xbf16, #tpu.memory_space<vmem>>, vector<1x384x1536xbf16>
    %7 = vector.shape_cast %6 : vector<1x384x1536xbf16> to vector<384x1536xbf16>
    %8 = arith.truncf %3 : vector<16x384xf32> to vector<16x384xbf16>
    %cst = arith.constant dense<0.000000e+00> : vector<16x1536xf32>
    %9 = tpu.matmul %8, %7, %cst {dimension_numbers = #tpu.dot_dimension_numbers<[1], [0], [0], [1], [0, 0, 1, 1], [], []>} : vector<16x384xbf16>, vector<384x1536xbf16>, vector<16x1536xf32> -> vector<16x1536xf32>
    %c0_8 = arith.constant 0 : index
    %c0_9 = arith.constant 0 : index
    %c0_10 = arith.constant 0 : index
    %10 = vector.load %arg5[%c0_8, %c0_9, %c0_10] : memref<1x1x1536xf32, #tpu.memory_space<vmem>>, vector<1x1x1536xf32>
    %11 = vector.shape_cast %10 : vector<1x1x1536xf32> to vector<1x1536xf32>
    %12 = vector.broadcast %11 : vector<1x1536xf32> to vector<16x1536xf32>
    %13 = arith.addf %9, %12 : vector<16x1536xf32>
    %14 = vector.extract_strided_slice %13 {offsets = [0, 0], sizes = [16, 128], strides = [1, 1]} : vector<16x1536xf32> to vector<16x128xf32>
    %15 = vector.shape_cast %14 : vector<16x128xf32> to vector<1x16x128xf32>
    %16 = vector.extract_strided_slice %13 {offsets = [0, 128], sizes = [16, 128], strides = [1, 1]} : vector<16x1536xf32> to vector<16x128xf32>
    %17 = vector.shape_cast %16 : vector<16x128xf32> to vector<1x16x128xf32>
    %18 = vector.extract_strided_slice %13 {offsets = [0, 256], sizes = [16, 128], strides = [1, 1]} : vector<16x1536xf32> to vector<16x128xf32>
    %19 = vector.shape_cast %18 : vector<16x128xf32> to vector<1x16x128xf32>
    %20 = vector.extract_strided_slice %13 {offsets = [0, 384], sizes = [16, 128], strides = [1, 1]} : vector<16x1536xf32> to vector<16x128xf32>
    %21 = vector.shape_cast %20 : vector<16x128xf32> to vector<1x16x128xf32>
    %22 = vector.extract_strided_slice %13 {offsets = [0, 512], sizes = [16, 128], strides = [1, 1]} : vector<16x1536xf32> to vector<16x128xf32>
    %23 = vector.shape_cast %22 : vector<16x128xf32> to vector<1x16x128xf32>
    %24 = vector.extract_strided_slice %13 {offsets = [0, 640], sizes = [16, 128], strides = [1, 1]} : vector<16x1536xf32> to vector<16x128xf32>
    %25 = vector.shape_cast %24 : vector<16x128xf32> to vector<1x16x128xf32>
    %26 = vector.extract_strided_slice %13 {offsets = [0, 768], sizes = [16, 128], strides = [1, 1]} : vector<16x1536xf32> to vector<16x128xf32>
    %27 = vector.shape_cast %26 : vector<16x128xf32> to vector<1x16x128xf32>
    %28 = vector.extract_strided_slice %13 {offsets = [0, 896], sizes = [16, 128], strides = [1, 1]} : vector<16x1536xf32> to vector<16x128xf32>
    %29 = vector.shape_cast %28 : vector<16x128xf32> to vector<1x16x128xf32>
    %30 = vector.extract_strided_slice %13 {offsets = [0, 1024], sizes = [16, 128], strides = [1, 1]} : vector<16x1536xf32> to vector<16x128xf32>
    %31 = vector.shape_cast %30 : vector<16x128xf32> to vector<1x16x128xf32>
    %32 = vector.extract_strided_slice %13 {offsets = [0, 1152], sizes = [16, 128], strides = [1, 1]} : vector<16x1536xf32> to vector<16x128xf32>
    %33 = vector.shape_cast %32 : vector<16x128xf32> to vector<1x16x128xf32>
    %34 = vector.extract_strided_slice %13 {offsets = [0, 1280], sizes = [16, 128], strides = [1, 1]} : vector<16x1536xf32> to vector<16x128xf32>
    %35 = vector.shape_cast %34 : vector<16x128xf32> to vector<1x16x128xf32>
    %36 = vector.extract_strided_slice %13 {offsets = [0, 1408], sizes = [16, 128], strides = [1, 1]} : vector<16x1536xf32> to vector<16x128xf32>
    %37 = vector.shape_cast %36 : vector<16x128xf32> to vector<1x16x128xf32>
    %38 = tpu.concatenate %15, %17, %19, %21, %23, %25, %27, %29, %31, %33, %35, %37 in 0 : vector<1x16x128xf32>, vector<1x16x128xf32>, vector<1x16x128xf32>, vector<1x16x128xf32>, vector<1x16x128xf32>, vector<1x16x128xf32>, vector<1x16x128xf32>, vector<1x16x128xf32>, vector<1x16x128xf32>, vector<1x16x128xf32>, vector<1x16x128xf32>, vector<1x16x128xf32> -> vector<12x16x128xf32>
    %39 = vector.extract_strided_slice %38 {offsets = [0, 0, 0], sizes = [12, 16, 32], strides = [1, 1, 1]} : vector<12x16x128xf32> to vector<12x16x32xf32>
    %40 = arith.truncf %39 : vector<12x16x32xf32> to vector<12x16x32xbf16>
    %41 = vector.extract_strided_slice %38 {offsets = [0, 0, 32], sizes = [12, 16, 32], strides = [1, 1, 1]} : vector<12x16x128xf32> to vector<12x16x32xf32>
    %42 = arith.truncf %41 : vector<12x16x32xf32> to vector<12x16x32xbf16>
    %43 = vector.extract_strided_slice %38 {offsets = [0, 0, 64], sizes = [12, 16, 32], strides = [1, 1, 1]} : vector<12x16x128xf32> to vector<12x16x32xf32>
    %44 = arith.truncf %43 : vector<12x16x32xf32> to vector<12x16x32xbf16>
    "tpu.trace_start"() <{level = 10 : i32, message = "hqd,hkd->hqk"}> : () -> ()
    %cst_11 = arith.constant dense<0.000000e+00> : vector<12x16x16xf32>
    %45 = tpu.matmul %40, %42, %cst_11 {dimension_numbers = #tpu.dot_dimension_numbers<[2], [2], [1], [1], [0, 0, 0, 1, 1, 1], [0], [0]>} : vector<12x16x32xbf16>, vector<12x16x32xbf16>, vector<12x16x16xf32> -> vector<12x16x16xf32>
    "tpu.trace_stop"() : () -> ()
    %46 = vector.shape_cast %5 : vector<16x16xf32> to vector<1x16x16xf32>
    %47 = vector.broadcast %46 : vector<1x16x16xf32> to vector<12x16x16xf32>
    %48 = arith.addf %45, %47 : vector<12x16x16xf32>
    %cst_12 = arith.constant dense<0xFF800000> : vector<12x16xf32>
    %49 = vector.multi_reduction <maximumf>, %48, %cst_12 [2] : vector<12x16x16xf32> to vector<12x16xf32>
    %50 = vector.shape_cast %49 : vector<12x16xf32> to vector<12x16x1xf32>
    %51 = vector.broadcast %50 : vector<12x16x1xf32> to vector<12x16x16xf32>
    %52 = arith.subf %48, %51 : vector<12x16x16xf32>
    %53 = math.exp %52 : vector<12x16x16xf32>
    %cst_13 = arith.constant dense<0.000000e+00> : vector<12x16xf32>
    %54 = vector.multi_reduction <add>, %53, %cst_13 [2] : vector<12x16x16xf32> to vector<12x16xf32>
    %55 = vector.shape_cast %54 : vector<12x16xf32> to vector<12x16x1xf32>
    %56 = tpu.reciprocal %55 {approx = true} : vector<12x16x1xf32> -> vector<12x16x1xf32>
    %57 = vector.broadcast %56 : vector<12x16x1xf32> to vector<12x16x16xf32>
    %58 = arith.mulf %53, %57 : vector<12x16x16xf32>
    %59 = arith.truncf %58 : vector<12x16x16xf32> to vector<12x16x16xbf16>
    "tpu.trace_start"() <{level = 10 : i32, message = "hqk,hkd->hqd"}> : () -> ()
    %cst_14 = arith.constant dense<0.000000e+00> : vector<12x16x32xf32>
    %60 = tpu.matmul %59, %44, %cst_14 {dimension_numbers = #tpu.dot_dimension_numbers<[2], [1], [1], [2], [0, 0, 0, 1, 1, 2], [0], [0]>} : vector<12x16x16xbf16>, vector<12x16x32xbf16>, vector<12x16x32xf32> -> vector<12x16x32xf32>
    "tpu.trace_stop"() : () -> ()
    %61 = arith.truncf %60 : vector<12x16x32xf32> to vector<12x16x32xbf16>
    %c0_15 = arith.constant 0 : index
    %c0_16 = arith.constant 0 : index
    %c0_17 = arith.constant 0 : index
    %c0_18 = arith.constant 0 : index
    %62 = vector.load %arg6[%c0_15, %c0_16, %c0_17, %c0_18] : memref<1x12x32x384xbf16, #tpu.memory_space<vmem>>, vector<1x12x32x384xbf16>
    %63 = vector.shape_cast %62 : vector<1x12x32x384xbf16> to vector<12x32x384xbf16>
    "tpu.trace_start"() <{level = 10 : i32, message = "hrd,hde->hre"}> : () -> ()
    %cst_19 = arith.constant dense<0.000000e+00> : vector<12x16x384xf32>
    %64 = tpu.matmul %61, %63, %cst_19 {dimension_numbers = #tpu.dot_dimension_numbers<[2], [1], [1], [2], [0, 0, 0, 1, 1, 2], [0], [0]>} : vector<12x16x32xbf16>, vector<12x32x384xbf16>, vector<12x16x384xf32> -> vector<12x16x384xf32>
    "tpu.trace_stop"() : () -> ()
    %65 = vector.extract_strided_slice %64 {offsets = [0, 0, 0], sizes = [1, 16, 384], strides = [1, 1, 1]} : vector<12x16x384xf32> to vector<1x16x384xf32>
    %66 = vector.shape_cast %65 : vector<1x16x384xf32> to vector<16x384xf32>
    %67 = vector.extract_strided_slice %64 {offsets = [1, 0, 0], sizes = [1, 16, 384], strides = [1, 1, 1]} : vector<12x16x384xf32> to vector<1x16x384xf32>
    %68 = vector.shape_cast %67 : vector<1x16x384xf32> to vector<16x384xf32>
    %69 = arith.addf %66, %68 : vector<16x384xf32>
    %70 = vector.extract_strided_slice %64 {offsets = [2, 0, 0], sizes = [1, 16, 384], strides = [1, 1, 1]} : vector<12x16x384xf32> to vector<1x16x384xf32>
    %71 = vector.shape_cast %70 : vector<1x16x384xf32> to vector<16x384xf32>
    %72 = arith.addf %69, %71 : vector<16x384xf32>
    %73 = vector.extract_strided_slice %64 {offsets = [3, 0, 0], sizes = [1, 16, 384], strides = [1, 1, 1]} : vector<12x16x384xf32> to vector<1x16x384xf32>
    %74 = vector.shape_cast %73 : vector<1x16x384xf32> to vector<16x384xf32>
    %75 = arith.addf %72, %74 : vector<16x384xf32>
    %76 = vector.extract_strided_slice %64 {offsets = [4, 0, 0], sizes = [1, 16, 384], strides = [1, 1, 1]} : vector<12x16x384xf32> to vector<1x16x384xf32>
    %77 = vector.shape_cast %76 : vector<1x16x384xf32> to vector<16x384xf32>
    %78 = arith.addf %75, %77 : vector<16x384xf32>
    %79 = vector.extract_strided_slice %64 {offsets = [5, 0, 0], sizes = [1, 16, 384], strides = [1, 1, 1]} : vector<12x16x384xf32> to vector<1x16x384xf32>
    %80 = vector.shape_cast %79 : vector<1x16x384xf32> to vector<16x384xf32>
    %81 = arith.addf %78, %80 : vector<16x384xf32>
    %82 = vector.extract_strided_slice %64 {offsets = [6, 0, 0], sizes = [1, 16, 384], strides = [1, 1, 1]} : vector<12x16x384xf32> to vector<1x16x384xf32>
    %83 = vector.shape_cast %82 : vector<1x16x384xf32> to vector<16x384xf32>
    %84 = arith.addf %81, %83 : vector<16x384xf32>
    %85 = vector.extract_strided_slice %64 {offsets = [7, 0, 0], sizes = [1, 16, 384], strides = [1, 1, 1]} : vector<12x16x384xf32> to vector<1x16x384xf32>
    %86 = vector.shape_cast %85 : vector<1x16x384xf32> to vector<16x384xf32>
    %87 = arith.addf %84, %86 : vector<16x384xf32>
    %88 = vector.extract_strided_slice %64 {offsets = [8, 0, 0], sizes = [1, 16, 384], strides = [1, 1, 1]} : vector<12x16x384xf32> to vector<1x16x384xf32>
    %89 = vector.shape_cast %88 : vector<1x16x384xf32> to vector<16x384xf32>
    %90 = arith.addf %87, %89 : vector<16x384xf32>
    %91 = vector.extract_strided_slice %64 {offsets = [9, 0, 0], sizes = [1, 16, 384], strides = [1, 1, 1]} : vector<12x16x384xf32> to vector<1x16x384xf32>
    %92 = vector.shape_cast %91 : vector<1x16x384xf32> to vector<16x384xf32>
    %93 = arith.addf %90, %92 : vector<16x384xf32>
    %94 = vector.extract_strided_slice %64 {offsets = [10, 0, 0], sizes = [1, 16, 384], strides = [1, 1, 1]} : vector<12x16x384xf32> to vector<1x16x384xf32>
    %95 = vector.shape_cast %94 : vector<1x16x384xf32> to vector<16x384xf32>
    %96 = arith.addf %93, %95 : vector<16x384xf32>
    %97 = vector.extract_strided_slice %64 {offsets = [11, 0, 0], sizes = [1, 16, 384], strides = [1, 1, 1]} : vector<12x16x384xf32> to vector<1x16x384xf32>
    %98 = vector.shape_cast %97 : vector<1x16x384xf32> to vector<16x384xf32>
    %99 = arith.addf %96, %98 : vector<16x384xf32>
    %c0_20 = arith.constant 0 : index
    %c0_21 = arith.constant 0 : index
    %c0_22 = arith.constant 0 : index
    %100 = vector.load %arg7[%c0_20, %c0_21, %c0_22] : memref<1x1x384xf32, #tpu.memory_space<vmem>>, vector<1x1x384xf32>
    %101 = vector.shape_cast %100 : vector<1x1x384xf32> to vector<1x384xf32>
    %102 = vector.broadcast %101 : vector<1x384xf32> to vector<16x384xf32>
    %103 = arith.addf %99, %102 : vector<16x384xf32>
    %104 = arith.addf %103, %3 : vector<16x384xf32>
    %c0_23 = arith.constant 0 : index
    %c0_24 = arith.constant 0 : index
    %c0_25 = arith.constant 0 : index
    %105 = vector.load %arg8[%c0_23, %c0_24, %c0_25] : memref<1x1x384xf32, #tpu.memory_space<vmem>>, vector<1x1x384xf32>
    %106 = vector.shape_cast %105 : vector<1x1x384xf32> to vector<1x384xf32>
    %c0_26 = arith.constant 0 : index
    %c0_27 = arith.constant 0 : index
    %c0_28 = arith.constant 0 : index
    %107 = vector.load %arg9[%c0_26, %c0_27, %c0_28] : memref<1x1x384xf32, #tpu.memory_space<vmem>>, vector<1x1x384xf32>
    %108 = vector.shape_cast %107 : vector<1x1x384xf32> to vector<1x384xf32>
    %cst_29 = arith.constant dense<0.000000e+00> : vector<16xf32>
    %109 = vector.multi_reduction <add>, %104, %cst_29 [1] : vector<16x384xf32> to vector<16xf32>
    %110 = vector.shape_cast %109 : vector<16xf32> to vector<16x1xf32>
    %cst_30 = arith.constant 3.840000e+02 : f32
    %111 = vector.broadcast %cst_30 : f32 to vector<16x1xf32>
    %112 = arith.divf %110, %111 : vector<16x1xf32>
    %113 = vector.broadcast %112 : vector<16x1xf32> to vector<16x384xf32>
    %114 = arith.subf %104, %113 : vector<16x384xf32>
    %115 = arith.mulf %114, %114 : vector<16x384xf32>
    %cst_31 = arith.constant dense<0.000000e+00> : vector<16xf32>
    %116 = vector.multi_reduction <add>, %115, %cst_31 [1] : vector<16x384xf32> to vector<16xf32>
    %117 = vector.shape_cast %116 : vector<16xf32> to vector<16x1xf32>
    %cst_32 = arith.constant 3.840000e+02 : f32
    %118 = vector.broadcast %cst_32 : f32 to vector<16x1xf32>
    %119 = arith.divf %117, %118 : vector<16x1xf32>
    %120 = vector.broadcast %112 : vector<16x1xf32> to vector<16x384xf32>
    %121 = arith.subf %104, %120 : vector<16x384xf32>
    %cst_33 = arith.constant 9.99999996E-13 : f32
    %122 = vector.broadcast %cst_33 : f32 to vector<16x1xf32>
    %123 = arith.addf %119, %122 : vector<16x1xf32>
    %124 = math.rsqrt %123 : vector<16x1xf32>
    %125 = vector.broadcast %124 : vector<16x1xf32> to vector<16x384xf32>
    %126 = arith.mulf %121, %125 : vector<16x384xf32>
    %127 = vector.broadcast %106 : vector<1x384xf32> to vector<16x384xf32>
    %128 = arith.mulf %126, %127 : vector<16x384xf32>
    %129 = vector.broadcast %108 : vector<1x384xf32> to vector<16x384xf32>
    %130 = arith.addf %128, %129 : vector<16x384xf32>
    %c0_34 = arith.constant 0 : index
    %c0_35 = arith.constant 0 : index
    %c0_36 = arith.constant 0 : index
    %131 = vector.load %arg10[%c0_34, %c0_35, %c0_36] : memref<1x384x1536xbf16, #tpu.memory_space<vmem>>, vector<1x384x1536xbf16>
    %132 = vector.shape_cast %131 : vector<1x384x1536xbf16> to vector<384x1536xbf16>
    %133 = arith.truncf %130 : vector<16x384xf32> to vector<16x384xbf16>
    %cst_37 = arith.constant dense<0.000000e+00> : vector<16x1536xf32>
    %134 = tpu.matmul %133, %132, %cst_37 {dimension_numbers = #tpu.dot_dimension_numbers<[1], [0], [0], [1], [0, 0, 1, 1], [], []>} : vector<16x384xbf16>, vector<384x1536xbf16>, vector<16x1536xf32> -> vector<16x1536xf32>
    %c0_38 = arith.constant 0 : index
    %c0_39 = arith.constant 0 : index
    %c0_40 = arith.constant 0 : index
    %135 = vector.load %arg11[%c0_38, %c0_39, %c0_40] : memref<1x1x1536xf32, #tpu.memory_space<vmem>>, vector<1x1x1536xf32>
    %136 = vector.shape_cast %135 : vector<1x1x1536xf32> to vector<1x1536xf32>
    %137 = vector.broadcast %136 : vector<1x1536xf32> to vector<16x1536xf32>
    %138 = arith.addf %134, %137 : vector<16x1536xf32>
    %139 = arith.mulf %138, %138 : vector<16x1536xf32>
    %140 = arith.mulf %138, %139 : vector<16x1536xf32>
    %cst_41 = arith.constant 4.471500e-02 : f32
    %141 = vector.broadcast %cst_41 : f32 to vector<16x1536xf32>
    %142 = arith.mulf %141, %140 : vector<16x1536xf32>
    %143 = arith.addf %138, %142 : vector<16x1536xf32>
    %cst_42 = arith.constant 0.797884583 : f32
    %144 = vector.broadcast %cst_42 : f32 to vector<16x1536xf32>
    %145 = arith.mulf %144, %143 : vector<16x1536xf32>
    %146 = math.tanh %145 : vector<16x1536xf32>
    %cst_43 = arith.constant 1.000000e+00 : f32
    %147 = vector.broadcast %cst_43 : f32 to vector<16x1536xf32>
    %148 = arith.addf %147, %146 : vector<16x1536xf32>
    %cst_44 = arith.constant 5.000000e-01 : f32
    %149 = vector.broadcast %cst_44 : f32 to vector<16x1536xf32>
    %150 = arith.mulf %149, %148 : vector<16x1536xf32>
    %151 = arith.mulf %138, %150 : vector<16x1536xf32>
    %c0_45 = arith.constant 0 : index
    %c0_46 = arith.constant 0 : index
    %c0_47 = arith.constant 0 : index
    %152 = vector.load %arg12[%c0_45, %c0_46, %c0_47] : memref<1x1536x384xbf16, #tpu.memory_space<vmem>>, vector<1x1536x384xbf16>
    %153 = vector.shape_cast %152 : vector<1x1536x384xbf16> to vector<1536x384xbf16>
    %154 = arith.truncf %151 : vector<16x1536xf32> to vector<16x1536xbf16>
    %cst_48 = arith.constant dense<0.000000e+00> : vector<16x384xf32>
    %155 = tpu.matmul %154, %153, %cst_48 {dimension_numbers = #tpu.dot_dimension_numbers<[1], [0], [0], [1], [0, 0, 1, 1], [], []>} : vector<16x1536xbf16>, vector<1536x384xbf16>, vector<16x384xf32> -> vector<16x384xf32>
    %c0_49 = arith.constant 0 : index
    %c0_50 = arith.constant 0 : index
    %c0_51 = arith.constant 0 : index
    %156 = vector.load %arg13[%c0_49, %c0_50, %c0_51] : memref<1x1x384xf32, #tpu.memory_space<vmem>>, vector<1x1x384xf32>
    %157 = vector.shape_cast %156 : vector<1x1x384xf32> to vector<1x384xf32>
    %158 = vector.broadcast %157 : vector<1x384xf32> to vector<16x384xf32>
    %159 = arith.addf %155, %158 : vector<16x384xf32>
    %160 = arith.addf %159, %130 : vector<16x384xf32>
    %c0_52 = arith.constant 0 : index
    %c0_53 = arith.constant 0 : index
    %c0_54 = arith.constant 0 : index
    %161 = vector.load %arg14[%c0_52, %c0_53, %c0_54] : memref<1x1x384xf32, #tpu.memory_space<vmem>>, vector<1x1x384xf32>
    %162 = vector.shape_cast %161 : vector<1x1x384xf32> to vector<1x384xf32>
    %c0_55 = arith.constant 0 : index
    %c0_56 = arith.constant 0 : index
    %c0_57 = arith.constant 0 : index
    %163 = vector.load %arg15[%c0_55, %c0_56, %c0_57] : memref<1x1x384xf32, #tpu.memory_space<vmem>>, vector<1x1x384xf32>
    %164 = vector.shape_cast %163 : vector<1x1x384xf32> to vector<1x384xf32>
    %cst_58 = arith.constant dense<0.000000e+00> : vector<16xf32>
    %165 = vector.multi_reduction <add>, %160, %cst_58 [1] : vector<16x384xf32> to vector<16xf32>
    %166 = vector.shape_cast %165 : vector<16xf32> to vector<16x1xf32>
    %cst_59 = arith.constant 3.840000e+02 : f32
    %167 = vector.broadcast %cst_59 : f32 to vector<16x1xf32>
    %168 = arith.divf %166, %167 : vector<16x1xf32>
    %169 = vector.broadcast %168 : vector<16x1xf32> to vector<16x384xf32>
    %170 = arith.subf %160, %169 : vector<16x384xf32>
    %171 = arith.mulf %170, %170 : vector<16x384xf32>
    %cst_60 = arith.constant dense<0.000000e+00> : vector<16xf32>
    %172 = vector.multi_reduction <add>, %171, %cst_60 [1] : vector<16x384xf32> to vector<16xf32>
    %173 = vector.shape_cast %172 : vector<16xf32> to vector<16x1xf32>
    %cst_61 = arith.constant 3.840000e+02 : f32
    %174 = vector.broadcast %cst_61 : f32 to vector<16x1xf32>
    %175 = arith.divf %173, %174 : vector<16x1xf32>
    %176 = vector.broadcast %168 : vector<16x1xf32> to vector<16x384xf32>
    %177 = arith.subf %160, %176 : vector<16x384xf32>
    %cst_62 = arith.constant 9.99999996E-13 : f32
    %178 = vector.broadcast %cst_62 : f32 to vector<16x1xf32>
    %179 = arith.addf %175, %178 : vector<16x1xf32>
    %180 = math.rsqrt %179 : vector<16x1xf32>
    %181 = vector.broadcast %180 : vector<16x1xf32> to vector<16x384xf32>
    %182 = arith.mulf %177, %181 : vector<16x384xf32>
    %183 = vector.broadcast %162 : vector<1x384xf32> to vector<16x384xf32>
    %184 = arith.mulf %182, %183 : vector<16x384xf32>
    %185 = vector.broadcast %164 : vector<1x384xf32> to vector<16x384xf32>
    %186 = arith.addf %184, %185 : vector<16x384xf32>
    %c0_63 = arith.constant 0 : index
    %c0_64 = arith.constant 0 : index
    %187 = vector.load %arg27[%c0_63, %c0_64] : memref<16x384xf32, #tpu.memory_space<vmem>>, vector<16x384xf32>
    tpu.vector_store %arg27[%c0_63, %c0_64], %186 {strides = array<i32>} : memref<16x384xf32, #tpu.memory_space<vmem>>, vector<16x384xf32>,
    %c1_i32 = arith.constant 1 : i32
    %188 = arith.cmpi eq, %arg1, %c1_i32 : i32
    %189 = arith.extui %188 : i1 to i32
    %c0_i32_65 = arith.constant 0 : i32
    %190 = arith.cmpi ne, %189, %c0_i32_65 : i32
    scf.if %190 {
      %191 = vector.extract_strided_slice %186 {offsets = [0, 0], sizes = [1, 384], strides = [1, 1]} : vector<16x384xf32> to vector<1x384xf32>
      %192 = vector.extract_strided_slice %186 {offsets = [8, 0], sizes = [1, 384], strides = [1, 1]} : vector<16x384xf32> to vector<1x384xf32>
      %193 = tpu.concatenate %191, %192 in 0 : vector<1x384xf32>, vector<1x384xf32> -> vector<2x384xf32>
      %c0_66 = arith.constant 0 : index
      %c0_67 = arith.constant 0 : index
      %194 = vector.load %arg18[%c0_66, %c0_67] : memref<384x384xbf16, #tpu.memory_space<vmem>>, vector<384x384xbf16>
      %195 = arith.truncf %193 : vector<2x384xf32> to vector<2x384xbf16>
      %cst_68 = arith.constant dense<0.000000e+00> : vector<2x384xf32>
      %196 = tpu.matmul %195, %194, %cst_68 {dimension_numbers = #tpu.dot_dimension_numbers<[1], [0], [0], [1], [0, 0, 1, 1], [], []>} : vector<2x384xbf16>, vector<384x384xbf16>, vector<2x384xf32> -> vector<2x384xf32>
      %c0_69 = arith.constant 0 : index
      %c0_70 = arith.constant 0 : index
      %197 = vector.load %arg19[%c0_69, %c0_70] : memref<1x384xf32, #tpu.memory_space<vmem>>, vector<1x384xf32>
      %198 = vector.broadcast %197 : vector<1x384xf32> to vector<2x384xf32>
      %199 = arith.addf %196, %198 : vector<2x384xf32>
      %cst_71 = arith.constant 0.000000e+00 : f32
      %200 = vector.broadcast %cst_71 : f32 to vector<2x384xf32>
      %201 = arith.maximumf %199, %200 : vector<2x384xf32>
      %c0_72 = arith.constant 0 : index
      %c0_73 = arith.constant 0 : index
      %202 = vector.load %arg20[%c0_72, %c0_73] : memref<384x256xbf16, #tpu.memory_space<vmem>>, vector<384x256xbf16>
      %203 = arith.truncf %201 : vector<2x384xf32> to vector<2x384xbf16>
      %cst_74 = arith.constant dense<0.000000e+00> : vector<2x256xf32>
      %204 = tpu.matmul %203, %202, %cst_74 {dimension_numbers = #tpu.dot_dimension_numbers<[1], [0], [0], [1], [0, 0, 1, 1], [], []>} : vector<2x384xbf16>, vector<384x256xbf16>, vector<2x256xf32> -> vector<2x256xf32>
      %c0_75 = arith.constant 0 : index
      %c0_76 = arith.constant 0 : index
      %205 = vector.load %arg21[%c0_75, %c0_76] : memref<1x256xf32, #tpu.memory_space<vmem>>, vector<1x256xf32>
      %206 = vector.broadcast %205 : vector<1x256xf32> to vector<2x256xf32>
      %207 = arith.addf %204, %206 : vector<2x256xf32>
      %cst_77 = arith.constant 0.000000e+00 : f32
      %208 = vector.broadcast %cst_77 : f32 to vector<2x256xf32>
      %209 = arith.maximumf %207, %208 : vector<2x256xf32>
      %c0_78 = arith.constant 0 : index
      %c0_79 = arith.constant 0 : index
      %210 = vector.load %arg22[%c0_78, %c0_79] : memref<256x128xbf16, #tpu.memory_space<vmem>>, vector<256x128xbf16>
      %211 = arith.truncf %209 : vector<2x256xf32> to vector<2x256xbf16>
      %cst_80 = arith.constant dense<0.000000e+00> : vector<2x128xf32>
      %212 = tpu.matmul %211, %210, %cst_80 {dimension_numbers = #tpu.dot_dimension_numbers<[1], [0], [0], [1], [0, 0, 1, 1], [], []>} : vector<2x256xbf16>, vector<256x128xbf16>, vector<2x128xf32> -> vector<2x128xf32>
      %c0_81 = arith.constant 0 : index
      %c0_82 = arith.constant 0 : index
      %213 = vector.load %arg23[%c0_81, %c0_82] : memref<1x128xf32, #tpu.memory_space<vmem>>, vector<1x128xf32>
      %214 = vector.broadcast %213 : vector<1x128xf32> to vector<2x128xf32>
      %215 = arith.addf %212, %214 : vector<2x128xf32>
      %cst_83 = arith.constant 0.000000e+00 : f32
      %216 = vector.broadcast %cst_83 : f32 to vector<2x128xf32>
      %217 = arith.maximumf %215, %216 : vector<2x128xf32>
      %c0_84 = arith.constant 0 : index
      %c0_85 = arith.constant 0 : index
      %218 = vector.load %arg24[%c0_84, %c0_85] : memref<128x128xbf16, #tpu.memory_space<vmem>>, vector<128x128xbf16>
      %219 = arith.truncf %217 : vector<2x128xf32> to vector<2x128xbf16>
      %cst_86 = arith.constant dense<0.000000e+00> : vector<2x128xf32>
      %220 = tpu.matmul %219, %218, %cst_86 {dimension_numbers = #tpu.dot_dimension_numbers<[1], [0], [0], [1], [0, 0, 1, 1], [], []>} : vector<2x128xbf16>, vector<128x128xbf16>, vector<2x128xf32> -> vector<2x128xf32>
      %c0_87 = arith.constant 0 : index
      %c0_88 = arith.constant 0 : index
      %221 = vector.load %arg25[%c0_87, %c0_88] : memref<1x128xf32, #tpu.memory_space<vmem>>, vector<1x128xf32>
      %222 = vector.broadcast %221 : vector<1x128xf32> to vector<2x128xf32>
      %223 = arith.addf %220, %222 : vector<2x128xf32>
      %c0_89 = arith.constant 0 : index
      %c0_90 = arith.constant 0 : index
      %c0_91 = arith.constant 0 : index
      %224 = vector.load %arg26[%c0_89, %c0_90, %c0_91] : memref<1x2x128xf32, #tpu.memory_space<vmem>>, vector<1x2x128xf32>
      %225 = vector.shape_cast %224 : vector<1x2x128xf32> to vector<2x128xf32>
      %226 = vector.shape_cast %223 : vector<2x128xf32> to vector<1x2x128xf32>
      tpu.vector_store %arg26[%c0_89, %c0_90, %c0_91], %226 {strides = array<i32>} : memref<1x2x128xf32, #tpu.memory_space<vmem>>, vector<1x2x128xf32>,
    } else {
    }
    return
  }
  func.func @transform_0(%arg0: i32, %arg1: i32) -> (i32, i32, i32) {
    %c0_i32 = arith.constant 0 : i32
    %c0_i32_0 = arith.constant 0 : i32
    %c0_i32_1 = arith.constant 0 : i32
    return %arg0, %c0_i32, %c0_i32_0 : i32, i32, i32
  }
  func.func @transform_1(%arg0: i32, %arg1: i32) -> (i32, i32, i32) {
    %c0_i32 = arith.constant 0 : i32
    %c0_i32_0 = arith.constant 0 : i32
    %c0_i32_1 = arith.constant 0 : i32
    return %arg0, %c0_i32, %c0_i32_0 : i32, i32, i32
  }
  func.func @transform_2(%arg0: i32, %arg1: i32) -> (i32, i32, i32) {
    %c0_i32 = arith.constant 0 : i32
    %c0_i32_0 = arith.constant 0 : i32
    %c0_i32_1 = arith.constant 0 : i32
    return %arg1, %c0_i32, %c0_i32_0 : i32, i32, i32
  }
  func.func @transform_3(%arg0: i32, %arg1: i32) -> (i32, i32, i32) {
    %c0_i32 = arith.constant 0 : i32
    %c0_i32_0 = arith.constant 0 : i32
    %c0_i32_1 = arith.constant 0 : i32
    return %arg1, %c0_i32, %c0_i32_0 : i32, i32, i32
  }
  func.func @transform_4(%arg0: i32, %arg1: i32) -> (i32, i32, i32, i32) {
    %c0_i32 = arith.constant 0 : i32
    %c0_i32_0 = arith.constant 0 : i32
    %c0_i32_1 = arith.constant 0 : i32
    %c0_i32_2 = arith.constant 0 : i32
    return %arg1, %c0_i32, %c0_i32_0, %c0_i32_1 : i32, i32, i32, i32
  }
  func.func @transform_5(%arg0: i32, %arg1: i32) -> (i32, i32, i32) {
    %c0_i32 = arith.constant 0 : i32
    %c0_i32_0 = arith.constant 0 : i32
    %c0_i32_1 = arith.constant 0 : i32
    return %arg1, %c0_i32, %c0_i32_0 : i32, i32, i32
  }
  func.func @transform_6(%arg0: i32, %arg1: i32) -> (i32, i32, i32) {
    %c0_i32 = arith.constant 0 : i32
    %c0_i32_0 = arith.constant 0 : i32
    %c0_i32_1 = arith.constant 0 : i32
    return %arg1, %c0_i32, %c0_i32_0 : i32, i32, i32
  }
  func.func @transform_7(%arg0: i32, %arg1: i32) -> (i32, i32, i32) {
    %c0_i32 = arith.constant 0 : i32
    %c0_i32_0 = arith.constant 0 : i32
    %c0_i32_1 = arith.constant 0 : i32
    return %arg1, %c0_i32, %c0_i32_0 : i32, i32, i32
  }
  func.func @transform_8(%arg0: i32, %arg1: i32) -> (i32, i32, i32) {
    %c0_i32 = arith.constant 0 : i32
    %c0_i32_0 = arith.constant 0 : i32
    %c0_i32_1 = arith.constant 0 : i32
    return %arg1, %c0_i32, %c0_i32_0 : i32, i32, i32
  }
  func.func @transform_9(%arg0: i32, %arg1: i32) -> (i32, i32, i32) {
    %c0_i32 = arith.constant 0 : i32
    %c0_i32_0 = arith.constant 0 : i32
    %c0_i32_1 = arith.constant 0 : i32
    return %arg1, %c0_i32, %c0_i32_0 : i32, i32, i32
  }
  func.func @transform_10(%arg0: i32, %arg1: i32) -> (i32, i32, i32) {
    %c0_i32 = arith.constant 0 : i32
    %c0_i32_0 = arith.constant 0 : i32
    %c0_i32_1 = arith.constant 0 : i32
    return %arg1, %c0_i32, %c0_i32_0 : i32, i32, i32
  }
  func.func @transform_11(%arg0: i32, %arg1: i32) -> (i32, i32, i32) {
    %c0_i32 = arith.constant 0 : i32
    %c0_i32_0 = arith.constant 0 : i32
    %c0_i32_1 = arith.constant 0 : i32
    return %arg1, %c0_i32, %c0_i32_0 : i32, i32, i32
  }
  func.func @transform_12(%arg0: i32, %arg1: i32) -> (i32, i32, i32) {
    %c0_i32 = arith.constant 0 : i32
    %c0_i32_0 = arith.constant 0 : i32
    %c0_i32_1 = arith.constant 0 : i32
    return %arg1, %c0_i32, %c0_i32_0 : i32, i32, i32
  }
  func.func @transform_13(%arg0: i32, %arg1: i32) -> (i32, i32, i32) {
    %c0_i32 = arith.constant 0 : i32
    %c0_i32_0 = arith.constant 0 : i32
    %c0_i32_1 = arith.constant 0 : i32
    return %arg1, %c0_i32, %c0_i32_0 : i32, i32, i32
  }
  func.func @transform_14(%arg0: i32, %arg1: i32) -> (i32, i32) {
    %c0_i32 = arith.constant 0 : i32
    %c0_i32_0 = arith.constant 0 : i32
    %c0_i32_1 = arith.constant 0 : i32
    return %c0_i32, %c0_i32_0 : i32, i32
  }
  func.func @transform_15(%arg0: i32, %arg1: i32) -> (i32, i32) {
    %c0_i32 = arith.constant 0 : i32
    %c0_i32_0 = arith.constant 0 : i32
    %c0_i32_1 = arith.constant 0 : i32
    return %c0_i32, %c0_i32_0 : i32, i32
  }
  func.func @transform_16(%arg0: i32, %arg1: i32) -> (i32, i32) {
    %c0_i32 = arith.constant 0 : i32
    %c0_i32_0 = arith.constant 0 : i32
    %c0_i32_1 = arith.constant 0 : i32
    return %c0_i32, %c0_i32_0 : i32, i32
  }
  func.func @transform_17(%arg0: i32, %arg1: i32) -> (i32, i32) {
    %c0_i32 = arith.constant 0 : i32
    %c0_i32_0 = arith.constant 0 : i32
    %c0_i32_1 = arith.constant 0 : i32
    return %c0_i32, %c0_i32_0 : i32, i32
  }
  func.func @transform_18(%arg0: i32, %arg1: i32) -> (i32, i32) {
    %c0_i32 = arith.constant 0 : i32
    %c0_i32_0 = arith.constant 0 : i32
    %c0_i32_1 = arith.constant 0 : i32
    return %c0_i32, %c0_i32_0 : i32, i32
  }
  func.func @transform_19(%arg0: i32, %arg1: i32) -> (i32, i32) {
    %c0_i32 = arith.constant 0 : i32
    %c0_i32_0 = arith.constant 0 : i32
    %c0_i32_1 = arith.constant 0 : i32
    return %c0_i32, %c0_i32_0 : i32, i32
  }
  func.func @transform_20(%arg0: i32, %arg1: i32) -> (i32, i32) {
    %c0_i32 = arith.constant 0 : i32
    %c0_i32_0 = arith.constant 0 : i32
    %c0_i32_1 = arith.constant 0 : i32
    return %c0_i32, %c0_i32_0 : i32, i32
  }
  func.func @transform_21(%arg0: i32, %arg1: i32) -> (i32, i32) {
    %c0_i32 = arith.constant 0 : i32
    %c0_i32_0 = arith.constant 0 : i32
    %c0_i32_1 = arith.constant 0 : i32
    return %c0_i32, %c0_i32_0 : i32, i32
  }
  func.func @transform_22(%arg0: i32, %arg1: i32) -> (i32, i32) {
    %c0_i32 = arith.constant 0 : i32
    %c0_i32_0 = arith.constant 0 : i32
    %c0_i32_1 = arith.constant 0 : i32
    return %c0_i32, %c0_i32_0 : i32, i32
  }
  func.func @transform_23(%arg0: i32, %arg1: i32) -> (i32, i32) {
    %c0_i32 = arith.constant 0 : i32
    %c0_i32_0 = arith.constant 0 : i32
    %c0_i32_1 = arith.constant 0 : i32
    return %c0_i32, %c0_i32_0 : i32, i32
  }
  func.func @transform_24(%arg0: i32, %arg1: i32) -> (i32, i32, i32) {
    %c0_i32 = arith.constant 0 : i32
    %c0_i32_0 = arith.constant 0 : i32
    %c0_i32_1 = arith.constant 0 : i32
    return %arg0, %c0_i32, %c0_i32_0 : i32, i32, i32
  }
}

</mosaic_0001>

<bundles_post_ra>
// kernel: distillbert_forward.1
= control target key start
LH: loop header
LB: loop body
LE: loop exit
PB: predicated region body
PF: predicated region fallthrough
CT: control target
= control target key end

     0   :  { %s21489_s0 = inlined_call_operand.hbm [shape: f32[1,16,384], index: 0, kind: input, shape index: {}]   ;;  %s21490_s1 = inlined_call_operand.hbm [shape: f32[1,16,16], index: 1, kind: input, shape index: {}]   ;;  %s21491_s2 = inlined_call_operand.hbm [shape: bf16[2,384,1536], index: 2, kind: input, shape index: {}]   ;;  %s21492_s3 = inlined_call_operand.hbm [shape: f32[2,1,1536], index: 3, kind: input, shape index: {}]   ;;  %s21493_s4 = inlined_call_operand.hbm [shape: bf16[2,12,32,384], index: 4, kind: input, shape index: {}]   ;;  %s21494_s5 = inlined_call_operand.hbm [shape: f32[2,1,384], index: 5, kind: input, shape index: {}]   ;;  %s21495_s6 = inlined_call_operand.hbm [shape: f32[2,1,384], index: 6, kind: input, shape index: {}]   ;;  %s21496_s7 = inlined_call_operand.hbm [shape: f32[2,1,384], index: 7, kind: input, shape index: {}]   ;;  %s21497_s8 = inlined_call_operand.hbm [shape: bf16[2,384,1536], index: 8, kind: input, shape index: {}]   ;;  %s21498_s9 = inlined_call_operand.hbm [shape: f32[2,1,1536], index: 9, kind: input, shape index: {}]   ;;  %s21499_s10 = inlined_call_operand.hbm [shape: bf16[2,1536,384], index: 10, kind: input, shape index: {}]   ;;  %s21500_s11 = inlined_call_operand.hbm [shape: f32[2,1,384], index: 11, kind: input, shape index: {}]   ;;  %s21501_s12 = inlined_call_operand.hbm [shape: f32[2,1,384], index: 12, kind: input, shape index: {}]   ;;  %s21502_s13 = inlined_call_operand.hbm [shape: f32[2,1,384], index: 13, kind: input, shape index: {}]   ;;  %s21503_s14 = inlined_call_operand.hbm [shape: f32[1,384], index: 14, kind: input, shape index: {}]   ;;  %s21504_s15 = inlined_call_operand.hbm [shape: f32[1,384], index: 15, kind: input, shape index: {}]   ;;  %s21505_s16 = inlined_call_operand.hbm [shape: bf16[384,384], index: 16, kind: input, shape index: {}]   ;;  %s21506_s17 = inlined_call_operand.hbm [shape: f32[1,384], index: 17, kind: input, shape index: {}]   ;;  %s21507_s18 = inlined_call_operand.hbm [shape: bf16[384,256], index: 18, kind: input, shape index: {}]   ;;  %s21508_s19 = inlined_call_operand.hbm [shape: f32[1,256], index: 19, kind: input, shape index: {}]   ;;  %s21509_s20 = inlined_call_operand.hbm [shape: bf16[256,128], index: 20, kind: input, shape index: {}]   ;;  %s21510_s21 = inlined_call_operand.hbm [shape: f32[1,128], index: 21, kind: input, shape index: {}]   ;;  %s21511_s22 = inlined_call_operand.hbm [shape: bf16[128,128], index: 22, kind: input, shape index: {}]   ;;  %s21512_s23 = inlined_call_operand.hbm [shape: f32[1,128], index: 23, kind: input, shape index: {}]   ;;  %s21513_s24 = inlined_call_operand.hbm [shape: f32[1,2,128], index: 24, kind: output, shape index: {}]  }
   0x1   :  { %21582 = sst [smem:[#allocation55_spill]] %s21489_s0 }
   0x2   :  { %21583 = sst [smem:[#allocation56_spill]] %s21490_s1 }
   0x3   :  { %21584 = sst [smem:[#allocation57_spill]] %s21491_s2 }
   0x4   :  { %21585 = sst [smem:[#allocation58_spill]] %s21492_s3 }
   0x5   :  { %21586 = sst [smem:[#allocation59_spill]] %s21493_s4 }
   0x6   :  { %21587 = sst [smem:[#allocation60_spill]] %s21494_s5 }
   0x7   :  { %21588 = sst [smem:[#allocation61_spill]] %s21495_s6 }
   0x8   :  { %21589 = sst [smem:[#allocation62_spill]] %s21496_s7 }
   0x9   :  { %21590 = sst [smem:[#allocation63_spill]] %s21497_s8 }
   0xa   :  { %21591 = sst [smem:[#allocation64_spill]] %s21498_s9 }
   0xb   :  { %21592 = sst [smem:[#allocation65_spill]] %s21499_s10 }
   0xc   :  { %21593 = sst [smem:[#allocation66_spill]] %s21500_s11 }
   0xd   :  { %21594 = sst [smem:[#allocation67_spill]] %s21501_s12 }
   0xe   :  { %21595 = sst [smem:[#allocation68_spill]] %s21502_s13 }
   0xf   :  { %21596 = sst [smem:[#allocation69_spill]] %s21503_s14 }
  0x10   :  { %21597 = sst [smem:[#allocation70_spill]] %s21505_s16 }
  0x11   :  { %21598 = sst [smem:[#allocation71_spill]] %s21506_s17 }
  0x12   :  { %21599 = sst [smem:[#allocation72_spill]] %s21507_s18 }
  0x13   :  { %21600 = sst [smem:[#allocation73_spill]] %s21508_s19 }
  0x14   :  { %21601 = sst [smem:[#allocation74_spill]] %s21509_s20 }
  0x15   :  { %21602 = sst [smem:[#allocation75_spill]] %s21510_s21 }
  0x16   :  { %21603 = sst [smem:[#allocation76_spill]] %s21511_s22 }
  0x17   :  { %21604 = sst [smem:[#allocation77_spill]] %s21512_s23 }
  0x18   :  { %21605 = sst [smem:[#allocation78_spill]] %s21513_s24 }
  0x19   :  { %29 = vsyncpa [#allocation4], 0 }
  0x1a   :  { %30 = vsyncpa [#allocation7], 0 }
  0x1b   :  { %31 = vsyncpa [#allocation22], 0 }
  0x1c   :  { %32 = vsyncpa [#allocation25], 0 }
  0x1d   :  { %33 = vsyncpa [#allocation28], 0 }
  0x1e   :  { %34 = vsyncpa [#allocation31], 0 }
  0x1f   :  { %35 = vsyncpa [#allocation34], 0 }
  0x20   :  { %36 = vsyncpa [#allocation5], 0  ;;  %s18646_s5 = smov 0   ;;  %s18648_s26 = smov 0  }
  0x21   :  { %s18650_s27 = smov 0   ;;  %s18652_s28 = smov 0  }
  0x22   :  { %s18654_s6 = smov 0   ;;  %s18656_s2 = smov 0  }
  0x23 LB: > { %21606 = sst [smem:[#allocation46_spill]] %s18460_s26  ;;  %s18677_s29 = sadd.s32 4294967295, %s18476_s2   ;;  %s18476_s2 = sphi %s18656_s2, %s42_s2   ;;  %s18472_s6 = sphi %s18654_s6, %s21704_s6   ;;  %s18468_s28 = sphi %s18652_s28, %s21703_s28   ;;  %s18464_s27 = sphi %s18650_s27, %s21701_s27   ;;  %s18460_s26 = sphi %s18648_s26, %s21700_s26   ;;  %s18456_s5 = sphi %s18646_s5, %s21699_s5  }
  0x24   : > { %21607 = sst [smem:[#allocation47_spill]] %s18464_s27  ;;  %p13776_p0 = scmp.ge.s32.totalorder %s18476_s2, 1 }
  0x25   : > { %21608 = sst [smem:[#allocation48_spill]] %s18468_s28  ;;  %p21526_p1 = scmp.eq.s32.totalorder %s18677_s29, 0 }
  0x26   : > { %21609 = sst [smem:[#allocation49_spill]] %s18476_s2  ;;  %p659_p2 = scmp.lt.s32.totalorder %s18476_s2, 3 }
  0x27   : > { %21610 = sst [smem:[#allocation50_spill]] %s18677_s29  ;;  %s18478_s7 = smov [#allocation3]  }
  0x28   : > { %p18682_p3 = pnand %p13776_p0, %p659_p2  ;;  %s674_s30 = sshll.u32 %s18478_s7, 4  ;;  %s675_s30 = int_to_ptr.vmem [resolvable:$true] %s674_s30 }
  0x29   : > { %s21614_s4 = sld [smem:[#allocation55_spill]] }
  0x2a   : > { %s21611_s0 = scalar_select %p18682_p3, 1, 0 }
  0x2b   : > { %p15789_p4 = pneg %p18682_p3 }
  0x2c   : > { %21612 = sst [smem:[#allocation51_spill]] %s21611_s0 }
  0x2d   : > { %p18690_p5 = pnand %p15789_p4, %p21526_p1 }
  0x2f   : > { %s21613_s3 = scalar_select %p18690_p5, 1, 0 }
  0x30   : > { %s17668_s1 = scalar_lea.hbm %s21614_s4, 768  ;;  %p18702_p7 = pneg %p18690_p5 }
  0x31   : > { %p17669_p6 = scmp.ne.s32.totalorder %s21614_s4, %s17668_s1  ;;  %p17675_p10 = scmp.lt.u32.totalorder %s17668_s1, %s21614_s4 }
  0x32   : > { %s21615_s7 = scalar_select %p18702_p7, 1, 0 }
  0x33   : > { %p17671_p8 = pnand %p18702_p7, %p17669_p6 }
  0x35   : > { %p17672_p9 = pneg %p17671_p8 }
  0x37   : > { %p17677_p11 = pnand %p17675_p10, %p17672_p9 }
  0x39   : > { %17680 = shalt.err (!%p17677_p11)
}
  0x3a   : > { %s17681_s25 = scalar_lea.vmem %s675_s30, 768  ;;  %p17689_p2 = scmp.lt.s32.totalorder %s675_s30, %s675_s30 }
  0x3b   : > { %p17682_p12 = scmp.ne.s32.totalorder %s675_s30, %s17681_s25  ;;  %p17690_p4 = scmp.lt.s32.totalorder %s17681_s25, %s17681_s25 }
  0x3d   : > { %p17684_p13 = pnand %p17682_p12, %p18702_p7  ;;  %p17691_p1 = por %p17690_p4, %p17689_p2 }
  0x3f   : > { %p17685_p0 = pneg %p17684_p13 }
  0x41   : > { %p17692_p3 = pnand %p17691_p1, %p17685_p0 }
  0x43   : > { %17695 = shalt.err (!%p17692_p3)
}
  0x44   : > { %s18479_s24 = smov 384   ;;  %s18480_s13 = smov 24  }
  0x45   : > { %15792 = dma.hbm_to_vmem [thread:$0]  (!%p18690_p5), %s21614_s4, 768, %s675_s30, [#allocation4], %s18479_s24, %s18479_s24, %s18480_s13  }
  0x46   : > { %s51_s8 = sadd.s32 1, %s18472_s6  ;;  %s113_s1 = sadd.s32 1, %s18464_s27 }
  0x47   : > { %p52_p1 = scmp.ge.s32.totalorder %s51_s8, 2  ;;  %p120_p3 = scmp.ne.s32.totalorder %s18464_s27, %s18460_s26 }
  0x48   : > { %p121_p6 = scmp.eq.s32.totalorder %s18476_s2, 0  ;;  %p126_p9 = scmp.ne.s32.totalorder %s18460_s26, %s18456_s5 }
  0x49   : > { %s21706_s8 = smov (%p52_p1, %s51_s8), 0  ;;  %p15875_p10 = scmp.lt.s32.totalorder %s18476_s2, 2 }
  0x4a   : > { %21616 = sst [smem:[#allocation52_spill]] %s21706_s8  ;;  %p122_p8 = por %p121_p6, %p120_p3 }
  0x4b   : > { %s110_s25 = ssub.s32 %s18472_s6, %s21706_s8  ;;  %p21617_p12 = scmp.eq.s32.totalorder %s18677_s29, 0 }
  0x4c   : > { %p111_p11 = scmp.eq.s32.totalorder %s110_s25, 0  ;;  %s822_s30 = sand.u32 1, %s18476_s2  }
  0x4d   : > { %p18732_p13 = por %p21617_p12, %p126_p9  ;;  %s18738_s24 = sand.u32 1, %s18464_s27  }
  0x4e   : > { %s18741_s13 = scalar_select %p111_p11, %s18464_s27, %s113_s1  }
  0x4f   : > { %s21618_s23 = scalar_select %p18732_p13, 1, 0 }
  0x50   : > { %21620 = sst [smem:[#allocation54_spill]] %s18741_s13  ;;  %s18744_s28 = smul.u32 2304, %s18738_s24 }
  0x51   : > { %21619 = sst [smem:[#allocation53_spill]] %s21618_s23  ;;  %s18747_s0 = smul.u32 36864, %s18472_s6 }
  0x52   : > { %p18749_p0 = pnand %p15875_p10, %p122_p8  ;;  %s21622_s8 = sld [smem:[#allocation57_spill]] }
  0x53   : > { %s826_s1 = scalar_lea.vmem [#allocation8], %s18744_s28  ;;  %s21554_s27 = smul.u32 12, %s18738_s24 }
  0x54   : > { %s21621_s5 = scalar_select %p18749_p0, 1, 0 }
  0x55   : > { %s833_s13 = sshll.u32 %s826_s1, 4  ;;  %s18763_s23 = scalar_lea.sflag [#allocation4], %s822_s30  ;;  %s18760_s13 = int_to_ptr.vmem [resolvable:$true] %s833_s13 }
  0x56   : > { %p18769_p4 = pneg %p18749_p0 }
  0x58   : > { %s18757_s2 = scalar_lea.hbm %s21622_s8, %s18747_s0  ;;  %s17701_s1 = scalar_lea.hbm %s21622_s8, 73728 }
  0x59   : > { %s17696_s26 = scalar_lea.hbm %s18757_s2, 36864  ;;  %p17702_p6 = scmp.lt.u32.totalorder %s18757_s2, %s21622_s8 }
  0x5a   : > { %p17697_p2 = scmp.ne.s32.totalorder %s18757_s2, %s17696_s26  ;;  %p17703_p8 = scmp.lt.u32.totalorder %s17701_s1, %s17696_s26 }
  0x5b   : > { %s21623_s29 = scalar_select %p18769_p4, 1, 0 }
  0x5c   : > { %p17699_p1 = pnand %p18769_p4, %p17697_p2  ;;  %p17704_p9 = por %p17703_p8, %p17702_p6 }
  0x5d   : > { %p17705_p10 = scmp.lt.u32.totalorder %s17696_s26, %s18757_s2 }
  0x5e   : > { %p17700_p3 = pneg %p17699_p1 }
  0x5f   : > { %p17706_p11 = por %p17705_p10, %p17704_p9 }
  0x61   : > { %p17707_p12 = pnand %p17706_p11, %p17700_p3 }
  0x63   : > { %17710 = shalt.err (!%p17707_p12)
}
  0x64   : > { %s17711_s30 = scalar_lea.vmem %s18760_s13, 36864  ;;  %s18481_s4 = smov [#allocation8]  }
  0x65   : > { %p17712_p2 = scmp.ne.s32.totalorder %s18760_s13, %s17711_s30  ;;  %s17716_s25 = sshll.u32 %s18481_s4, 4  ;;  %s17717_s25 = int_to_ptr.vmem [resolvable:$false] %s17716_s25 }
  0x66   : > { %s17718_s20 = scalar_lea.vmem %s17717_s25, 73728  ;;  %p17719_p5 = scmp.lt.s32.totalorder %s18760_s13, %s17717_s25 }
  0x67   : > { %p17714_p1 = pnand %p17712_p2, %p18769_p4  ;;  %p17720_p7 = scmp.lt.s32.totalorder %s17718_s20, %s17711_s30 }
  0x69   : > { %p17715_p13 = pneg %p17714_p1  ;;  %p17721_p6 = por %p17720_p7, %p17719_p5 }
  0x6b   : > { %p17722_p8 = pnand %p17721_p6, %p17715_p13 }
  0x6d   : > { %17725 = shalt.err (!%p17722_p8)
}
  0x6e   : > { %s21556_s22 = smov 768   ;;  %s21557_s26 = smov 48  }
  0x6f   : > { %15829 = dma.hbm_to_vmem [thread:$0]  (!%p18749_p0), %s18757_s2, 36864, %s18760_s13, %s18763_s23, %s21556_s22, %s21556_s22, %s21557_s26  }
  0x70   : > { %s21555_s1 = smul.u32 192, %s18472_s6  ;;  %s847_s30 = scalar_lea.vmem [#allocation9], %s21554_s27 }
  0x71   : > { %s855_s4 = sshll.u32 %s847_s30, 4  ;;  %s21624_s8 = sld [smem:[#allocation58_spill]]  ;;  %s856_s4 = int_to_ptr.vmem [resolvable:$true] %s855_s4 }
  0x77   : > { %s853_s18 = scalar_lea.hbm %s21624_s8, %s21555_s1  ;;  %s17731_s21 = scalar_lea.hbm %s21624_s8, 384 }
  0x78   : > { %s17726_s16 = scalar_lea.hbm %s853_s18, 192  ;;  %p17732_p3 = scmp.lt.u32.totalorder %s853_s18, %s21624_s8 }
  0x79   : > { %p17727_p5 = scmp.ne.s32.totalorder %s853_s18, %s17726_s16  ;;  %p17733_p9 = scmp.lt.u32.totalorder %s17731_s21, %s17726_s16 }
  0x7a   : > { %p17735_p11 = scmp.lt.u32.totalorder %s17726_s16, %s853_s18 }
  0x7b   : > { %p17729_p7 = pnand %p17727_p5, %p18769_p4  ;;  %p17734_p10 = por %p17733_p9, %p17732_p3 }
  0x7d   : > { %p17730_p13 = pneg %p17729_p7  ;;  %p17736_p12 = por %p17735_p11, %p17734_p10 }
  0x7f   : > { %p17737_p2 = pnand %p17736_p12, %p17730_p13 }
  0x81   : > { %17740 = shalt.err (!%p17737_p2)
}
  0x82   : > { %s17741_s30 = scalar_lea.vmem %s856_s4, 192  ;;  %s18484_s25 = smov [#allocation9]  }
  0x83   : > { %p17742_p1 = scmp.ne.s32.totalorder %s856_s4, %s17741_s30  ;;  %s17746_s20 = sshll.u32 %s18484_s25, 4  ;;  %s17747_s20 = int_to_ptr.vmem [resolvable:$false] %s17746_s20 }
  0x84   : > { %s17748_s12 = scalar_lea.vmem %s17747_s20, 384  ;;  %p17749_p5 = scmp.lt.s32.totalorder %s856_s4, %s17747_s20 }
  0x85   : > { %p17744_p6 = pnand %p17742_p1, %p18769_p4  ;;  %p17750_p7 = scmp.lt.s32.totalorder %s17748_s12, %s17741_s30 }
  0x87   : > { %p17745_p8 = pneg %p17744_p6  ;;  %p17751_p0 = por %p17750_p7, %p17749_p5 }
  0x89   : > { %p17752_p3 = pnand %p17751_p0, %p17745_p8 }
  0x8b   : > { %17755 = shalt.err (!%p17752_p3)
}
  0x8c   : > { %p21625_p9 = scmp.ne.s32.totalorder %s21621_s5, 0  ;;  %s15689_s14 = smul.u32 576, %s18738_s24 }
  0x8d   : > { %s15690_s16 = smul.u32 9216, %s18472_s6  ;;  %s21626_s25 = sld [smem:[#allocation59_spill]] }
  0x8e   : > { %15832 = dma.hbm_to_vmem [thread:$0]  (!%p21625_p9), %s853_s18, 192, %s856_s4, %s18763_s23  }
  0x8f   : > { %s18820_s21 = smul.u32 3, %s18738_s24  ;;  %s866_s30 = scalar_lea.vmem [#allocation10], %s15689_s14 }
  0x90   : > { %s873_s12 = sshll.u32 %s866_s30, 4  ;;  %s18827_s12 = int_to_ptr.vmem [resolvable:$true] %s873_s12 }
  0x93   : > { %s18825_s20 = scalar_lea.hbm %s21626_s25, %s15690_s16  ;;  %s17761_s1 = scalar_lea.hbm %s21626_s25, 18432 }
  0x94   : > { %s17756_s27 = scalar_lea.hbm %s18825_s20, 9216  ;;  %p17762_p11 = scmp.lt.u32.totalorder %s18825_s20, %s21626_s25 }
  0x95   : > { %p17757_p0 = scmp.ne.s32.totalorder %s18825_s20, %s17756_s27  ;;  %p17763_p12 = scmp.lt.u32.totalorder %s17761_s1, %s17756_s27 }
  0x96   : > { %p17765_p1 = scmp.lt.u32.totalorder %s17756_s27, %s18825_s20 }
  0x97   : > { %p17759_p13 = pnand %p17757_p0, %p18769_p4  ;;  %p17764_p2 = por %p17763_p12, %p17762_p11 }
  0x99   : > { %p17760_p10 = pneg %p17759_p13  ;;  %p17766_p6 = por %p17765_p1, %p17764_p2 }
  0x9b   : > { %p17767_p8 = pnand %p17766_p6, %p17760_p10 }
  0x9d   : > { %17770 = shalt.err (!%p17767_p8)
}
  0x9e   : > { %s17771_s14 = scalar_lea.vmem %s18827_s12, 9216  ;;  %s18485_s13 = smov [#allocation10]  }
  0x9f   : > { %p17772_p5 = scmp.ne.s32.totalorder %s18827_s12, %s17771_s14  ;;  %s17776_s30 = sshll.u32 %s18485_s13, 4  ;;  %s17777_s30 = int_to_ptr.vmem [resolvable:$false] %s17776_s30 }
  0xa0   : > { %s17778_s18 = scalar_lea.vmem %s17777_s30, 18432  ;;  %p17779_p0 = scmp.lt.s32.totalorder %s18827_s12, %s17777_s30 }
  0xa1   : > { %p17774_p7 = pnand %p17772_p5, %p18769_p4  ;;  %p17780_p13 = scmp.lt.s32.totalorder %s17778_s18, %s17771_s14 }
  0xa3   : > { %p17775_p3 = pneg %p17774_p7  ;;  %p17781_p11 = por %p17780_p13, %p17779_p0 }
  0xa5   : > { %p17782_p12 = pnand %p17781_p11, %p17775_p3 }
  0xa7   : > { %17785 = shalt.err (!%p17782_p12)
}
  0xa8   : > { %s21561_s27 = smov 192   ;;  %s21563_s1 = smov 12  }
  0xa9   : > { %15835 = dma.hbm_to_vmem [thread:$0]  (!%p21625_p9), %s18825_s20, 9216, %s18827_s12, %s18763_s23, %s21561_s27, %s21561_s27, %s21563_s1  }
  0xaa   : > { %s18855_s4 = smul.u32 48, %s18472_s6  ;;  %s887_s2 = scalar_lea.vmem [#allocation11], %s18820_s21 }
  0xab   : > { %s895_s16 = sshll.u32 %s887_s2, 4  ;;  %s21627_s30 = sld [smem:[#allocation60_spill]]  ;;  %s18858_s16 = int_to_ptr.vmem [resolvable:$true] %s895_s16 }
  0xac   : > { %s21628_s8 = sld [smem:[#allocation61_spill]] }
  0xb1   : > { %s893_s18 = scalar_lea.hbm %s21627_s30, %s18855_s4  ;;  %s17791_s2 = scalar_lea.hbm %s21627_s30, 96 }
  0xb2   : > { %s18868_s25 = scalar_lea.hbm %s21628_s8, %s18855_s4  ;;  %s17786_s19 = scalar_lea.hbm %s893_s18, 48 }
  0xb3   : > { %p17787_p10 = scmp.ne.s32.totalorder %s893_s18, %s17786_s19  ;;  %p17792_p6 = scmp.lt.u32.totalorder %s893_s18, %s21627_s30 }
  0xb4   : > { %p17793_p8 = scmp.lt.u32.totalorder %s17791_s2, %s17786_s19  ;;  %p17795_p7 = scmp.lt.u32.totalorder %s17786_s19, %s893_s18 }
  0xb5   : > { %p17789_p2 = pnand %p17787_p10, %p18769_p4 }
  0xb6   : > { %p17794_p5 = por %p17793_p8, %p17792_p6 }
  0xb7   : > { %p17790_p1 = pneg %p17789_p2 }
  0xb8   : > { %p17796_p3 = por %p17795_p7, %p17794_p5 }
  0xba   : > { %p17797_p0 = pnand %p17796_p3, %p17790_p1 }
  0xbc   : > { %17800 = shalt.err (!%p17797_p0)
}
  0xbd   : > { %s17801_s22 = scalar_lea.vmem %s18858_s16, 48  ;;  %s18488_s26 = smov [#allocation11]  }
  0xbe   : > { %p17802_p13 = scmp.ne.s32.totalorder %s18858_s16, %s17801_s22  ;;  %s17806_s14 = sshll.u32 %s18488_s26, 4  ;;  %s17807_s14 = int_to_ptr.vmem [resolvable:$false] %s17806_s14 }
  0xbf   : > { %s17808_s27 = scalar_lea.vmem %s17807_s14, 96  ;;  %p17809_p10 = scmp.lt.s32.totalorder %s18858_s16, %s17807_s14 }
  0xc0   : > { %p17804_p11 = pnand %p17802_p13, %p18769_p4  ;;  %p17810_p2 = scmp.lt.s32.totalorder %s17808_s27, %s17801_s22 }
  0xc2   : > { %p17805_p12 = pneg %p17804_p11  ;;  %p17811_p6 = por %p17810_p2, %p17809_p10 }
  0xc4   : > { %p17812_p8 = pnand %p17811_p6, %p17805_p12 }
  0xc6   : > { %17815 = shalt.err (!%p17812_p8)
}
  0xc7   : > { %15838 = dma.hbm_to_vmem [thread:$0]  (!%p21625_p9), %s893_s18, 48, %s18858_s16, %s18763_s23  }
  0xc8   : > { %s906_s19 = scalar_lea.vmem [#allocation12], %s18820_s21  ;;  %s21629_s12 = sld [smem:[#allocation62_spill]] }
  0xc9   : > { %s914_s1 = sshll.u32 %s906_s19, 4  ;;  %s17816_s22 = scalar_lea.hbm %s18868_s25, 48  ;;  %s915_s1 = int_to_ptr.vmem [resolvable:$true] %s914_s1 }
  0xca   : > { %p17817_p1 = scmp.ne.s32.totalorder %s18868_s25, %s17816_s22  ;;  %s17821_s27 = scalar_lea.hbm %s21628_s8, 96 }
  0xcb   : > { %p17822_p3 = scmp.lt.u32.totalorder %s18868_s25, %s21628_s8  ;;  %p17823_p0 = scmp.lt.u32.totalorder %s17821_s27, %s17816_s22 }
  0xcc   : > { %p17819_p5 = pnand %p17817_p1, %p18769_p4  ;;  %p17825_p11 = scmp.lt.u32.totalorder %s17816_s22, %s18868_s25 }
  0xcd   : > { %p17824_p13 = por %p17823_p0, %p17822_p3 }
  0xce   : > { %s18892_s2 = scalar_lea.hbm %s21629_s12, %s18855_s4  ;;  %p17820_p7 = pneg %p17819_p5 }
  0xcf   : > { %p17826_p12 = por %p17825_p11, %p17824_p13 }
  0xd1   : > { %p17827_p10 = pnand %p17826_p12, %p17820_p7 }
  0xd3   : > { %17830 = shalt.err (!%p17827_p10)
}
  0xd4   : > { %s17831_s16 = scalar_lea.vmem %s915_s1, 48  ;;  %s18489_s18 = smov [#allocation12]  }
  0xd5   : > { %p17832_p2 = scmp.ne.s32.totalorder %s915_s1, %s17831_s16  ;;  %s17836_s19 = sshll.u32 %s18489_s18, 4  ;;  %s17837_s19 = int_to_ptr.vmem [resolvable:$false] %s17836_s19 }
  0xd6   : > { %s17838_s13 = scalar_lea.vmem %s17837_s19, 96  ;;  %p17839_p1 = scmp.lt.s32.totalorder %s915_s1, %s17837_s19 }
  0xd7   : > { %p17834_p6 = pnand %p17832_p2, %p18769_p4  ;;  %p17840_p5 = scmp.lt.s32.totalorder %s17838_s13, %s17831_s16 }
  0xd9   : > { %p17835_p8 = pneg %p17834_p6  ;;  %p17841_p9 = por %p17840_p5, %p17839_p1 }
  0xdb   : > { %p17842_p0 = pnand %p17841_p9, %p17835_p8 }
  0xdd   : > { %17845 = shalt.err (!%p17842_p0)
}
  0xde   : > { %p21630_p3 = scmp.ne.s32.totalorder %s21621_s5, 0  ;;  %s925_s17 = scalar_lea.vmem [#allocation13], %s18820_s21 }
  0xdf   : > { %s933_s30 = sshll.u32 %s925_s17, 4  ;;  %s21631_s26 = sld [smem:[#allocation63_spill]]  ;;  %s18919_s30 = int_to_ptr.vmem [resolvable:$true] %s933_s30 }
  0xe0   : > { %15841 = dma.hbm_to_vmem [thread:$0]  (!%p21630_p3), %s18868_s25, 48, %s915_s1, %s18763_s23  }
  0xe1   : > { %s944_s16 = scalar_lea.vmem [#allocation14], %s18744_s28  ;;  %s17846_s19 = scalar_lea.hbm %s18892_s2, 48 }
  0xe2   : > { %s951_s18 = sshll.u32 %s944_s16, 4  ;;  %p17847_p9 = scmp.ne.s32.totalorder %s18892_s2, %s17846_s19  ;;  %s18944_s18 = int_to_ptr.vmem [resolvable:$true] %s951_s18 }
  0xe3   : > { %s17851_s25 = scalar_lea.hbm %s21629_s12, 96  ;;  %p17852_p11 = scmp.lt.u32.totalorder %s18892_s2, %s21629_s12 }
  0xe4   : > { %p17849_p7 = pnand %p17847_p9, %p18769_p4  ;;  %p17853_p12 = scmp.lt.u32.totalorder %s17851_s25, %s17846_s19 }
  0xe5   : > { %s21632_s14 = smov %s21631_s26  ;;  %s18917_s27 = scalar_lea.hbm %s21631_s26, %s18747_s0 }
  0xe6   : > { %p17850_p13 = pneg %p17849_p7  ;;  %p17854_p10 = por %p17853_p12, %p17852_p11 }
  0xe7   : > { %p17855_p2 = scmp.lt.u32.totalorder %s17846_s19, %s18892_s2 }
  0xe9   : > { %p17856_p6 = por %p17855_p2, %p17854_p10 }
  0xeb   : > { %p17857_p8 = pnand %p17856_p6, %p17850_p13 }
  0xed   : > { %17860 = shalt.err (!%p17857_p8)
}
  0xee   : > { %s17861_s20 = scalar_lea.vmem %s18919_s30, 48  ;;  %s18490_s8 = smov [#allocation13]  }
  0xef   : > { %p17862_p1 = scmp.ne.s32.totalorder %s18919_s30, %s17861_s20  ;;  %s17866_s22 = sshll.u32 %s18490_s8, 4  ;;  %s17867_s22 = int_to_ptr.vmem [resolvable:$false] %s17866_s22 }
  0xf0   : > { %s17868_s26 = scalar_lea.vmem %s17867_s22, 96  ;;  %p17869_p9 = scmp.lt.s32.totalorder %s18919_s30, %s17867_s22 }
  0xf1   : > { %p17864_p5 = pnand %p17862_p1, %p18769_p4  ;;  %p17870_p7 = scmp.lt.s32.totalorder %s17868_s26, %s17861_s20 }
  0xf3   : > { %p17865_p0 = pneg %p17864_p5  ;;  %p17871_p11 = por %p17870_p7, %p17869_p9 }
  0xf5   : > { %p17872_p12 = pnand %p17871_p11, %p17865_p0 }
  0xf7   : > { %17875 = shalt.err (!%p17872_p12)
}
  0xf8   : > { %15844 = dma.hbm_to_vmem [thread:$0]  (!%p21630_p3), %s18892_s2, 48, %s18919_s30, %s18763_s23  }
  0xf9   : > { %s17876_s16 = scalar_lea.hbm %s18917_s27, 36864  ;;  %s17881_s25 = scalar_lea.hbm %s21632_s14, 73728 }
  0xfa   : > { %p17877_p13 = scmp.ne.s32.totalorder %s18917_s27, %s17876_s16  ;;  %p17882_p6 = scmp.lt.u32.totalorder %s18917_s27, %s21632_s14 }
  0xfb   : > { %p17883_p8 = scmp.lt.u32.totalorder %s17881_s25, %s17876_s16  ;;  %p17885_p5 = scmp.lt.u32.totalorder %s17876_s16, %s18917_s27 }
  0xfc   : > { %p17879_p10 = pnand %p17877_p13, %p18769_p4 }
  0xfd   : > { %p17884_p1 = por %p17883_p8, %p17882_p6 }
  0xfe   : > { %p17880_p2 = pneg %p17879_p10 }
  0xff   : > { %p17886_p0 = por %p17885_p5, %p17884_p1 }
 0x101   : > { %p17887_p9 = pnand %p17886_p0, %p17880_p2 }
 0x103   : > { %17890 = shalt.err (!%p17887_p9)
}
 0x104   : > { %s17891_s2 = scalar_lea.vmem %s18944_s18, 36864  ;;  %s18491_s30 = smov [#allocation14]  }
 0x105   : > { %p17892_p7 = scmp.ne.s32.totalorder %s18944_s18, %s17891_s2  ;;  %s17896_s20 = sshll.u32 %s18491_s30, 4  ;;  %s17897_s20 = int_to_ptr.vmem [resolvable:$false] %s17896_s20 }
 0x106   : > { %s17898_s8 = scalar_lea.vmem %s17897_s20, 73728  ;;  %p17899_p13 = scmp.lt.s32.totalorder %s18944_s18, %s17897_s20 }
 0x107   : > { %p17894_p11 = pnand %p17892_p7, %p18769_p4  ;;  %p17900_p10 = scmp.lt.s32.totalorder %s17898_s8, %s17891_s2 }
 0x109   : > { %p17895_p12 = pneg %p17894_p11  ;;  %p17901_p6 = por %p17900_p10, %p17899_p13 }
 0x10b   : > { %p17902_p8 = pnand %p17901_p6, %p17895_p12 }
 0x10d   : > { %17905 = shalt.err (!%p17902_p8)
}
 0x10e   : > { %s21633_s22 = smov 48   ;;  %s21634_s26 = smov 768  }
 0x10f   : > { %15847 = dma.hbm_to_vmem [thread:$0]  (!%p21630_p3), %s18917_s27, 36864, %s18944_s18, %s18763_s23, %s21634_s26, %s21634_s26, %s21633_s22  }
 0x110   : > { %s21635_s16 = smul.u32 192, %s18472_s6  ;;  %s21636_s9 = sld [smem:[#allocation64_spill]] }
 0x111   : > { %s21637_s1 = smul.u32 12, %s18738_s24 }
 0x113   : > { %s965_s17 = scalar_lea.vmem [#allocation15], %s21637_s1 }
 0x114   : > { %s973_s2 = sshll.u32 %s965_s17, 4  ;;  %s974_s2 = int_to_ptr.vmem [resolvable:$true] %s973_s2 }
 0x116   : > { %s18976_s25 = scalar_lea.hbm %s21636_s9, %s21635_s16  ;;  %s17911_s20 = scalar_lea.hbm %s21636_s9, 384 }
 0x117   : > { %s17906_s30 = scalar_lea.hbm %s18976_s25, 192  ;;  %p17912_p0 = scmp.lt.u32.totalorder %s18976_s25, %s21636_s9 }
 0x118   : > { %p17907_p2 = scmp.ne.s32.totalorder %s18976_s25, %s17906_s30  ;;  %p17913_p9 = scmp.lt.u32.totalorder %s17911_s20, %s17906_s30 }
 0x119   : > { %p17915_p11 = scmp.lt.u32.totalorder %s17906_s30, %s18976_s25 }
 0x11a   : > { %p17909_p1 = pnand %p17907_p2, %p18769_p4  ;;  %p17914_p7 = por %p17913_p9, %p17912_p0 }
 0x11c   : > { %p17910_p5 = pneg %p17909_p1  ;;  %p17916_p12 = por %p17915_p11, %p17914_p7 }
 0x11e   : > { %p17917_p13 = pnand %p17916_p12, %p17910_p5 }
 0x120   : > { %17920 = shalt.err (!%p17917_p13)
}
 0x121   : > { %s17921_s24 = scalar_lea.vmem %s974_s2, 192  ;;  %s18492_s26 = smov [#allocation15]  }
 0x122   : > { %p17922_p10 = scmp.ne.s32.totalorder %s974_s2, %s17921_s24  ;;  %s17926_s16 = sshll.u32 %s18492_s26, 4  ;;  %s17927_s16 = int_to_ptr.vmem [resolvable:$false] %s17926_s16 }
 0x123   : > { %s17928_s19 = scalar_lea.vmem %s17927_s16, 384  ;;  %p17929_p2 = scmp.lt.s32.totalorder %s974_s2, %s17927_s16 }
 0x124   : > { %p17924_p6 = pnand %p17922_p10, %p18769_p4  ;;  %p17930_p1 = scmp.lt.s32.totalorder %s17928_s19, %s17921_s24 }
 0x126   : > { %p17925_p8 = pneg %p17924_p6  ;;  %p17931_p3 = por %p17930_p1, %p17929_p2 }
 0x128   : > { %p17932_p0 = pnand %p17931_p3, %p17925_p8 }
 0x12a   : > { %17935 = shalt.err (!%p17932_p0)
}
 0x12b   : > { %p21638_p9 = scmp.ne.s32.totalorder %s21621_s5, 0  ;;  %s21639_s10 = sld [smem:[#allocation65_spill]] }
 0x12c   : > { %s984_s30 = scalar_lea.vmem [#allocation16], %s18744_s28 }
 0x12d   : > { %15850 = dma.hbm_to_vmem [thread:$0]  (!%p21638_p9), %s18976_s25, 192, %s974_s2, %s18763_s23  }
 0x12e   : > { %s991_s27 = sshll.u32 %s984_s30, 4  ;;  %s19005_s27 = int_to_ptr.vmem [resolvable:$true] %s991_s27 }
 0x131   : > { %s19002_s17 = scalar_lea.hbm %s21639_s10, %s18747_s0  ;;  %s17941_s2 = scalar_lea.hbm %s21639_s10, 73728 }
 0x132   : > { %s17936_s18 = scalar_lea.hbm %s19002_s17, 36864  ;;  %p17942_p11 = scmp.lt.u32.totalorder %s19002_s17, %s21639_s10 }
 0x133   : > { %p17937_p3 = scmp.ne.s32.totalorder %s19002_s17, %s17936_s18  ;;  %p17943_p12 = scmp.lt.u32.totalorder %s17941_s2, %s17936_s18 }
 0x134   : > { %p17945_p10 = scmp.lt.u32.totalorder %s17936_s18, %s19002_s17 }
 0x135   : > { %p17939_p5 = pnand %p17937_p3, %p18769_p4  ;;  %p17944_p13 = por %p17943_p12, %p17942_p11 }
 0x137   : > { %p17940_p7 = pneg %p17939_p5  ;;  %p17946_p6 = por %p17945_p10, %p17944_p13 }
 0x139   : > { %p17947_p8 = pnand %p17946_p6, %p17940_p7 }
 0x13b   : > { %17950 = shalt.err (!%p17947_p8)
}
 0x13c   : > { %s17951_s28 = scalar_lea.vmem %s19005_s27, 36864  ;;  %s18493_s22 = smov [#allocation16]  }
 0x13d   : > { %p17952_p2 = scmp.ne.s32.totalorder %s19005_s27, %s17951_s28  ;;  %s17956_s24 = sshll.u32 %s18493_s22, 4  ;;  %s17957_s24 = int_to_ptr.vmem [resolvable:$false] %s17956_s24 }
 0x13e   : > { %s17958_s26 = scalar_lea.vmem %s17957_s24, 73728  ;;  %p17959_p3 = scmp.lt.s32.totalorder %s19005_s27, %s17957_s24 }
 0x13f   : > { %p17954_p1 = pnand %p17952_p2, %p18769_p4  ;;  %p17960_p5 = scmp.lt.s32.totalorder %s17958_s26, %s17951_s28 }
 0x141   : > { %p17955_p0 = pneg %p17954_p1  ;;  %p17961_p11 = por %p17960_p5, %p17959_p3 }
 0x143   : > { %p17962_p12 = pnand %p17961_p11, %p17955_p0 }
 0x145   : > { %17965 = shalt.err (!%p17962_p12)
}
 0x146   : > { %s21640_s16 = smov 12   ;;  %s21641_s19 = smov 192  }
 0x147   : > { %15853 = dma.hbm_to_vmem [thread:$0]  (!%p21638_p9), %s19002_s17, 36864, %s19005_s27, %s18763_s23, %s21641_s19, %s21641_s19, %s21640_s16  }
 0x148   : > { %s21642_s11 = sld [smem:[#allocation66_spill]]  ;;  %s1005_s18 = scalar_lea.vmem [#allocation17], %s18820_s21 }
 0x149   : > { %s1013_s20 = sshll.u32 %s1005_s18, 4  ;;  %s1014_s20 = int_to_ptr.vmem [resolvable:$true] %s1013_s20 }
 0x14e   : > { %s19036_s30 = scalar_lea.hbm %s21642_s11, %s18855_s4  ;;  %s17971_s17 = scalar_lea.hbm %s21642_s11, 96 }
 0x14f   : > { %s17966_s25 = scalar_lea.hbm %s19036_s30, 48  ;;  %p17972_p6 = scmp.lt.u32.totalorder %s19036_s30, %s21642_s11 }
 0x150   : > { %p17967_p7 = scmp.ne.s32.totalorder %s19036_s30, %s17966_s25  ;;  %p17973_p8 = scmp.lt.u32.totalorder %s17971_s17, %s17966_s25 }
 0x151   : > { %p17975_p1 = scmp.lt.u32.totalorder %s17966_s25, %s19036_s30 }
 0x152   : > { %p17969_p13 = pnand %p17967_p7, %p18769_p4  ;;  %p17974_p2 = por %p17973_p8, %p17972_p6 }
 0x154   : > { %p17970_p10 = pneg %p17969_p13  ;;  %p17976_p0 = por %p17975_p1, %p17974_p2 }
 0x156   : > { %p17977_p3 = pnand %p17976_p0, %p17970_p10 }
 0x158   : > { %17980 = shalt.err (!%p17977_p3)
}
 0x159   : > { %s17981_s28 = scalar_lea.vmem %s1014_s20, 48  ;;  %s18494_s22 = smov [#allocation17]  }
 0x15a   : > { %p17982_p5 = scmp.ne.s32.totalorder %s1014_s20, %s17981_s28  ;;  %s17986_s24 = sshll.u32 %s18494_s22, 4  ;;  %s17987_s24 = int_to_ptr.vmem [resolvable:$false] %s17986_s24 }
 0x15b   : > { %s17988_s26 = scalar_lea.vmem %s17987_s24, 96  ;;  %p17989_p7 = scmp.lt.s32.totalorder %s1014_s20, %s17987_s24 }
 0x15c   : > { %p17984_p11 = pnand %p17982_p5, %p18769_p4  ;;  %p17990_p13 = scmp.lt.s32.totalorder %s17988_s26, %s17981_s28 }
 0x15e   : > { %p17985_p12 = pneg %p17984_p11  ;;  %p17991_p9 = por %p17990_p13, %p17989_p7 }
 0x160   : > { %p17992_p6 = pnand %p17991_p9, %p17985_p12 }
 0x162   : > { %17995 = shalt.err (!%p17992_p6)
}
 0x163   : > { %p21643_p8 = scmp.ne.s32.totalorder %s21621_s5, 0  ;;  %s18495_s13 = smov [#allocation6]  }
 0x164   : > { %s690_s1 = sshll.u32 %s18495_s13, 4  ;;  %s21644_s2 = sld [smem:[#allocation56_spill]]  ;;  %s691_s1 = int_to_ptr.vmem [resolvable:$true] %s690_s1 }
 0x165   : > { %15856 = dma.hbm_to_vmem [thread:$0]  (!%p21643_p8), %s19036_s30, 48, %s1014_s20, %s18763_s23  }
 0x166   : > { %p21646_p2 = scmp.ne.s32.totalorder %s21615_s7, 0 }
 0x16a   : > { %s21645_s8 = smov %s21644_s2  ;;  %s17996_s17 = scalar_lea.hbm %s21644_s2, 256 }
 0x16b   : > { %p17997_p10 = scmp.ne.s32.totalorder %s21645_s8, %s17996_s17  ;;  %p18003_p0 = scmp.lt.u32.totalorder %s17996_s17, %s21645_s8 }
 0x16d   : > { %p17999_p9 = pnand %p17997_p10, %p21646_p2 }
 0x16f   : > { %p18000_p1 = pneg %p17999_p9 }
 0x171   : > { %p18005_p3 = pnand %p18003_p0, %p18000_p1 }
 0x173   : > { %18008 = shalt.err (!%p18005_p3)
}
 0x174   : > { %s18009_s30 = scalar_lea.vmem %s691_s1, 256  ;;  %p18017_p7 = scmp.lt.s32.totalorder %s691_s1, %s691_s1 }
 0x175   : > { %p18010_p5 = scmp.ne.s32.totalorder %s691_s1, %s18009_s30  ;;  %p18018_p13 = scmp.lt.s32.totalorder %s18009_s30, %s18009_s30 }
 0x177   : > { %p18012_p11 = pnand %p18010_p5, %p21646_p2  ;;  %p18019_p6 = por %p18018_p13, %p18017_p7 }
 0x179   : > { %p18013_p12 = pneg %p18012_p11 }
 0x17b   : > { %p18020_p8 = pnand %p18019_p6, %p18013_p12 }
 0x17d   : > { %18023 = shalt.err (!%p18020_p8)
}
 0x17e   : > { %s21573_s20 = smov 128   ;;  %s21574_s24 = smov 8  }
 0x17f   : > { %p21647_p10 = scmp.ne.s32.totalorder %s21613_s3, 0  ;;  %s18498_s18 = smov [#allocation21]  }
 0x180   : > { %s715_s25 = sshll.u32 %s18498_s18, 4  ;;  %s18499_s2 = smov [#allocation24]   ;;  %s716_s25 = int_to_ptr.vmem [resolvable:$true] %s715_s25 }
 0x181   : > { %15795 = dma.hbm_to_vmem [thread:$0]  (!%p21647_p10), %s21645_s8, 256, %s691_s1, [#allocation7], %s21573_s20, %s21573_s20, %s21574_s24  }
 0x182   : > { %s739_s17 = sshll.u32 %s18499_s2, 4  ;;  %s18024_s28 = scalar_lea.hbm %s21504_s15, 48  ;;  %s19078_s17 = int_to_ptr.vmem [resolvable:$true] %s739_s17 }
 0x183   : > { %p18025_p8 = scmp.ne.s32.totalorder %s21504_s15, %s18024_s28  ;;  %p18031_p0 = scmp.lt.u32.totalorder %s18024_s28, %s21504_s15 }
 0x185   : > { %p18027_p9 = pnand %p18025_p8, %p21646_p2 }
 0x187   : > { %p18028_p1 = pneg %p18027_p9 }
 0x189   : > { %p18033_p3 = pnand %p18031_p0, %p18028_p1 }
 0x18b   : > { %18036 = shalt.err (!%p18033_p3)
}
 0x18c   : > { %s18037_s13 = scalar_lea.vmem %s716_s25, 48  ;;  %s18044_s18 = scalar_lea.vmem %s716_s25, 64 }
 0x18d   : > { %p18038_p5 = scmp.ne.s32.totalorder %s716_s25, %s18037_s13  ;;  %p18045_p7 = scmp.lt.s32.totalorder %s716_s25, %s716_s25 }
 0x18e   : > { %p18046_p13 = scmp.lt.s32.totalorder %s18044_s18, %s18037_s13 }
 0x18f   : > { %p18040_p11 = pnand %p18038_p5, %p21646_p2 }
 0x190   : > { %p18047_p6 = por %p18046_p13, %p18045_p7 }
 0x191   : > { %p18041_p12 = pneg %p18040_p11 }
 0x193   : > { %p18048_p4 = pnand %p18047_p6, %p18041_p12 }
 0x195   : > { %18051 = shalt.err (!%p18048_p4)
}
 0x196   : > { %15801 = dma.hbm_to_vmem [thread:$0]  (!%p21647_p10), %s21504_s15, 48, %s716_s25, [#allocation22]  }
 0x197   : > { %s21648_s22 = sld [smem:[#allocation71_spill]] }
 0x19d   : > { %s18052_s30 = scalar_lea.hbm %s21648_s22, 48 }
 0x19e   : > { %p18053_p8 = scmp.ne.s32.totalorder %s21648_s22, %s18052_s30  ;;  %p18059_p4 = scmp.lt.u32.totalorder %s18052_s30, %s21648_s22 }
 0x1a0   : > { %p18055_p9 = pnand %p18053_p8, %p21646_p2 }
 0x1a2   : > { %p18056_p1 = pneg %p18055_p9 }
 0x1a4   : > { %p18061_p0 = pnand %p18059_p4, %p18056_p1 }
 0x1a6   : > { %18064 = shalt.err (!%p18061_p0)
}
 0x1a7   : > { %s18065_s25 = scalar_lea.vmem %s19078_s17, 48  ;;  %s18072_s2 = scalar_lea.vmem %s19078_s17, 64 }
 0x1a8   : > { %p18066_p3 = scmp.ne.s32.totalorder %s19078_s17, %s18065_s25  ;;  %p18073_p12 = scmp.lt.s32.totalorder %s19078_s17, %s19078_s17 }
 0x1a9   : > { %p18074_p7 = scmp.lt.s32.totalorder %s18072_s2, %s18065_s25 }
 0x1aa   : > { %p18068_p5 = pnand %p18066_p3, %p21646_p2 }
 0x1ab   : > { %p18075_p13 = por %p18074_p7, %p18073_p12 }
 0x1ac   : > { %p18069_p11 = pneg %p18068_p5 }
 0x1ae   : > { %p18076_p6 = pnand %p18075_p13, %p18069_p11 }
 0x1b0   : > { %18079 = shalt.err (!%p18076_p6)
}
 0x1b1   : > { %15807 = dma.hbm_to_vmem [thread:$0]  (!%p21647_p10), %s21648_s22, 48, %s19078_s17, [#allocation25]  }
 0x1b2   : > { %s18500_s28 = smov [#allocation27]   ;;  %s18501_s26 = smov [#allocation30]  }
 0x1b3   : > { %s763_s30 = sshll.u32 %s18500_s28, 4  ;;  %s787_s1 = sshll.u32 %s18501_s26, 4  ;;  %s764_s30 = int_to_ptr.vmem [resolvable:$true] %s763_s30  ;;  %s19122_s1 = int_to_ptr.vmem [resolvable:$true] %s787_s1 }
 0x1b4   : > { %s21649_s25 = sld [smem:[#allocation73_spill]] }
 0x1ba   : > { %s18080_s2 = scalar_lea.hbm %s21649_s25, 32 }
 0x1bb   : > { %p18081_p8 = scmp.ne.s32.totalorder %s21649_s25, %s18080_s2  ;;  %p18087_p4 = scmp.lt.u32.totalorder %s18080_s2, %s21649_s25 }
 0x1bd   : > { %p18083_p9 = pnand %p18081_p8, %p21646_p2 }
 0x1bf   : > { %p18084_p1 = pneg %p18083_p9 }
 0x1c1   : > { %p18089_p0 = pnand %p18087_p4, %p18084_p1 }
 0x1c3   : > { %18092 = shalt.err (!%p18089_p0)
}
 0x1c4   : > { %s18093_s0 = scalar_lea.vmem %s764_s30, 32  ;;  %p18101_p12 = scmp.lt.s32.totalorder %s764_s30, %s764_s30 }
 0x1c5   : > { %p18094_p3 = scmp.ne.s32.totalorder %s764_s30, %s18093_s0  ;;  %p18102_p7 = scmp.lt.s32.totalorder %s18093_s0, %s18093_s0 }
 0x1c7   : > { %p18096_p5 = pnand %p18094_p3, %p21646_p2  ;;  %p18103_p13 = por %p18102_p7, %p18101_p12 }
 0x1c9   : > { %p18097_p11 = pneg %p18096_p5 }
 0x1cb   : > { %p18104_p6 = pnand %p18103_p13, %p18097_p11 }
 0x1cd   : > { %18107 = shalt.err (!%p18104_p6)
}
 0x1ce   : > { %15813 = dma.hbm_to_vmem [thread:$0]  (!%p21647_p10), %s21649_s25, 32, %s764_s30, [#allocation28]  }
 0x1cf   : > { %s21650_s13 = sld [smem:[#allocation75_spill]] }
 0x1d5   : > { %s18108_s18 = scalar_lea.hbm %s21650_s13, 16 }
 0x1d6   : > { %p18109_p8 = scmp.ne.s32.totalorder %s21650_s13, %s18108_s18  ;;  %p18115_p4 = scmp.lt.u32.totalorder %s18108_s18, %s21650_s13 }
 0x1d8   : > { %p18111_p9 = pnand %p18109_p8, %p21646_p2 }
 0x1da   : > { %p18112_p1 = pneg %p18111_p9 }
 0x1dc   : > { %p18117_p0 = pnand %p18115_p4, %p18112_p1 }
 0x1de   : > { %18120 = shalt.err (!%p18117_p0)
}
 0x1df   : > { %s18121_s30 = scalar_lea.vmem %s19122_s1, 16  ;;  %s18128_s20 = scalar_lea.vmem %s19122_s1, 32 }
 0x1e0   : > { %p18122_p3 = scmp.ne.s32.totalorder %s19122_s1, %s18121_s30  ;;  %p18129_p12 = scmp.lt.s32.totalorder %s19122_s1, %s19122_s1 }
 0x1e1   : > { %p18130_p7 = scmp.lt.s32.totalorder %s18128_s20, %s18121_s30 }
 0x1e2   : > { %p18124_p5 = pnand %p18122_p3, %p21646_p2 }
 0x1e3   : > { %p18131_p13 = por %p18130_p7, %p18129_p12 }
 0x1e4   : > { %p18125_p11 = pneg %p18124_p5 }
 0x1e6   : > { %p18132_p6 = pnand %p18131_p13, %p18125_p11 }
 0x1e8   : > { %18135 = shalt.err (!%p18132_p6)
}
 0x1e9   : > { %15819 = dma.hbm_to_vmem [thread:$0]  (!%p21647_p10), %s21650_s13, 16, %s19122_s1, [#allocation31]  }
 0x1ea   : > { %s21651_s2 = sld [smem:[#allocation67_spill]]  ;;  %s1024_s0 = scalar_lea.vmem [#allocation18], %s18820_s21 }
 0x1eb   : > { %s1032_s30 = sshll.u32 %s1024_s0, 4  ;;  %s18502_s20 = smov [#allocation20]   ;;  %s19173_s30 = int_to_ptr.vmem [resolvable:$true] %s1032_s30 }
 0x1ec   : > { %s704_s8 = sshll.u32 %s18502_s20, 4  ;;  %p21653_p9 = scmp.ne.s32.totalorder %s21623_s29, 0  ;;  %s705_s8 = int_to_ptr.vmem [resolvable:$true] %s704_s8 }
 0x1f0   : > { %s21652_s17 = smov %s21651_s2  ;;  %s19170_s27 = scalar_lea.hbm %s21651_s2, %s18855_s4 }
 0x1f1   : > { %s18136_s24 = scalar_lea.hbm %s19170_s27, 48  ;;  %s18141_s26 = scalar_lea.hbm %s21652_s17, 96 }
 0x1f2   : > { %p18137_p8 = scmp.ne.s32.totalorder %s19170_s27, %s18136_s24  ;;  %p18142_p0 = scmp.lt.u32.totalorder %s19170_s27, %s21652_s17 }
 0x1f3   : > { %p18143_p3 = scmp.lt.u32.totalorder %s18141_s26, %s18136_s24  ;;  %p18145_p11 = scmp.lt.u32.totalorder %s18136_s24, %s19170_s27 }
 0x1f4   : > { %p18139_p1 = pnand %p18137_p8, %p21653_p9 }
 0x1f5   : > { %p18144_p5 = por %p18143_p3, %p18142_p0 }
 0x1f6   : > { %p18140_p4 = pneg %p18139_p1 }
 0x1f7   : > { %p18146_p12 = por %p18145_p11, %p18144_p5 }
 0x1f9   : > { %p18147_p7 = pnand %p18146_p12, %p18140_p4 }
 0x1fb   : > { %18150 = shalt.err (!%p18147_p7)
}
 0x1fc   : > { %s18151_s0 = scalar_lea.vmem %s19173_s30, 48  ;;  %s18503_s20 = smov [#allocation18]  }
 0x1fd   : > { %p18152_p13 = scmp.ne.s32.totalorder %s19173_s30, %s18151_s0  ;;  %s18156_s1 = sshll.u32 %s18503_s20, 4  ;;  %s18157_s1 = int_to_ptr.vmem [resolvable:$false] %s18156_s1 }
 0x1fe   : > { %s18158_s28 = scalar_lea.vmem %s18157_s1, 96  ;;  %p18159_p1 = scmp.lt.s32.totalorder %s19173_s30, %s18157_s1 }
 0x1ff   : > { %p18154_p6 = pnand %p18152_p13, %p21653_p9  ;;  %p18160_p10 = scmp.lt.s32.totalorder %s18158_s28, %s18151_s0 }
 0x201   : > { %p18155_p8 = pneg %p18154_p6  ;;  %p18161_p0 = por %p18160_p10, %p18159_p1 }
 0x203   : > { %p18162_p3 = pnand %p18161_p0, %p18155_p8 }
 0x205   : > { %18165 = shalt.err (!%p18162_p3)
}
 0x206   : > { %p21654_p4 = scmp.ne.s32.totalorder %s21621_s5, 0  ;;  %s21655_s18 = sld [smem:[#allocation69_spill]] }
 0x208   : > { %15859 = dma.hbm_to_vmem [thread:$0]  (!%p21654_p4), %s19170_s27, 48, %s19173_s30, %s18763_s23  }
 0x20c   : > { %s18166_s2 = scalar_lea.hbm %s21655_s18, 48 }
 0x20d   : > { %p18167_p5 = scmp.ne.s32.totalorder %s21655_s18, %s18166_s2  ;;  %p18173_p12 = scmp.lt.u32.totalorder %s18166_s2, %s21655_s18 }
 0x20f   : > { %p18169_p10 = pnand %p18167_p5, %p21646_p2 }
 0x211   : > { %p18170_p11 = pneg %p18169_p10 }
 0x213   : > { %p18175_p7 = pnand %p18173_p12, %p18170_p11 }
 0x215   : > { %18178 = shalt.err (!%p18175_p7)
}
 0x216   : > { %s18179_s28 = scalar_lea.vmem %s705_s8, 48  ;;  %s18186_s27 = scalar_lea.vmem %s705_s8, 64 }
 0x217   : > { %p18180_p13 = scmp.ne.s32.totalorder %s705_s8, %s18179_s28  ;;  %p18187_p1 = scmp.lt.s32.totalorder %s705_s8, %s705_s8 }
 0x218   : > { %p18188_p0 = scmp.lt.s32.totalorder %s18186_s27, %s18179_s28 }
 0x219   : > { %p18182_p6 = pnand %p18180_p13, %p21646_p2 }
 0x21a   : > { %p18189_p3 = por %p18188_p0, %p18187_p1 }
 0x21b   : > { %p18183_p8 = pneg %p18182_p6 }
 0x21d   : > { %p18190_p4 = pnand %p18189_p3, %p18183_p8 }
 0x21f   : > { %18193 = shalt.err (!%p18190_p4)
}
 0x220   : > { %p21656_p5 = scmp.ne.s32.totalorder %s21613_s3, 0  ;;  %s18504_s24 = smov [#allocation23]  }
 0x221   : > { %s725_s26 = sshll.u32 %s18504_s24, 4  ;;  %s18505_s2 = smov [#allocation26]   ;;  %s726_s26 = int_to_ptr.vmem [resolvable:$true] %s725_s26 }
 0x222   : > { %15798 = dma.hbm_to_vmem [thread:$0]  (!%p21656_p5), %s21655_s18, 48, %s705_s8, [#allocation7]  }
 0x223   : > { %s749_s20 = sshll.u32 %s18505_s2, 4  ;;  %s21657_s10 = sld [smem:[#allocation70_spill]]  ;;  %s750_s20 = int_to_ptr.vmem [resolvable:$true] %s749_s20 }
 0x229   : > { %s18194_s11 = scalar_lea.hbm %s21657_s10, 9216 }
 0x22a   : > { %p18195_p4 = scmp.ne.s32.totalorder %s21657_s10, %s18194_s11  ;;  %p18201_p12 = scmp.lt.u32.totalorder %s18194_s11, %s21657_s10 }
 0x22c   : > { %p18197_p10 = pnand %p18195_p4, %p21646_p2 }
 0x22e   : > { %p18198_p11 = pneg %p18197_p10 }
 0x230   : > { %p18203_p7 = pnand %p18201_p12, %p18198_p11 }
 0x232   : > { %18206 = shalt.err (!%p18203_p7)
}
 0x233   : > { %s18207_s8 = scalar_lea.vmem %s726_s26, 9216  ;;  %p18215_p1 = scmp.lt.s32.totalorder %s726_s26, %s726_s26 }
 0x234   : > { %p18208_p13 = scmp.ne.s32.totalorder %s726_s26, %s18207_s8  ;;  %p18216_p0 = scmp.lt.s32.totalorder %s18207_s8, %s18207_s8 }
 0x236   : > { %p18210_p6 = pnand %p18208_p13, %p21646_p2  ;;  %p18217_p3 = por %p18216_p0, %p18215_p1 }
 0x238   : > { %p18211_p8 = pneg %p18210_p6 }
 0x23a   : > { %p18218_p9 = pnand %p18217_p3, %p18211_p8 }
 0x23c   : > { %18221 = shalt.err (!%p18218_p9)
}
 0x23d   : > { %15804 = dma.hbm_to_vmem [thread:$0]  (!%p21656_p5), %s21657_s10, 9216, %s726_s26, [#allocation22], %s21641_s19, %s21641_s19, %s21640_s16  }
 0x23e   : > { %s21658_s2 = sld [smem:[#allocation72_spill]] }
 0x244   : > { %s21659_s0 = smov %s21658_s2  ;;  %s18222_s1 = scalar_lea.hbm %s21658_s2, 6144 }
 0x245   : > { %p18223_p4 = scmp.ne.s32.totalorder %s21659_s0, %s18222_s1  ;;  %p18229_p11 = scmp.lt.u32.totalorder %s18222_s1, %s21659_s0 }
 0x247   : > { %p18225_p9 = pnand %p18223_p4, %p21646_p2 }
 0x249   : > { %p18226_p10 = pneg %p18225_p9 }
 0x24b   : > { %p18231_p12 = pnand %p18229_p11, %p18226_p10 }
 0x24d   : > { %18234 = shalt.err (!%p18231_p12)
}
 0x24e   : > { %s18235_s12 = scalar_lea.vmem %s750_s20, 6144  ;;  %p18243_p8 = scmp.lt.s32.totalorder %s750_s20, %s750_s20 }
 0x24f   : > { %p18236_p7 = scmp.ne.s32.totalorder %s750_s20, %s18235_s12  ;;  %p18244_p1 = scmp.lt.s32.totalorder %s18235_s12, %s18235_s12 }
 0x251   : > { %p18238_p13 = pnand %p18236_p7, %p21646_p2  ;;  %p18245_p0 = por %p18244_p1, %p18243_p8 }
 0x253   : > { %p18239_p6 = pneg %p18238_p13 }
 0x255   : > { %p18246_p3 = pnand %p18245_p0, %p18239_p6 }
 0x257   : > { %18249 = shalt.err (!%p18246_p3)
}
 0x258   : > { %s21660_s16 = smov 8   ;;  %s21661_s19 = smov 128  }
 0x259   : > { %15810 = dma.hbm_to_vmem [thread:$0]  (!%p21656_p5), %s21659_s0, 6144, %s750_s20, [#allocation25], %s21661_s19, %s21661_s19, %s21660_s16  }
 0x25a   : > { %s18506_s30 = smov [#allocation29]   ;;  %s21662_s28 = sld [smem:[#allocation74_spill]] }
 0x25b   : > { %s773_s24 = sshll.u32 %s18506_s30, 4  ;;  %s774_s24 = int_to_ptr.vmem [resolvable:$true] %s773_s24 }
 0x260   : > { %s21663_s9 = smov %s21662_s28  ;;  %s18250_s27 = scalar_lea.hbm %s21662_s28, 2048 }
 0x261   : > { %p18251_p4 = scmp.ne.s32.totalorder %s21663_s9, %s18250_s27  ;;  %p18257_p11 = scmp.lt.u32.totalorder %s18250_s27, %s21663_s9 }
 0x263   : > { %p18253_p9 = pnand %p18251_p4, %p21646_p2 }
 0x265   : > { %p18254_p10 = pneg %p18253_p9 }
 0x267   : > { %p18259_p12 = pnand %p18257_p11, %p18254_p10 }
 0x269   : > { %18262 = shalt.err (!%p18259_p12)
}
 0x26a   : > { %s18263_s20 = scalar_lea.vmem %s774_s24, 2048  ;;  %p18271_p8 = scmp.lt.s32.totalorder %s774_s24, %s774_s24 }
 0x26b   : > { %p18264_p7 = scmp.ne.s32.totalorder %s774_s24, %s18263_s20  ;;  %p18272_p1 = scmp.lt.s32.totalorder %s18263_s20, %s18263_s20 }
 0x26d   : > { %p18266_p13 = pnand %p18264_p7, %p21646_p2  ;;  %p18273_p0 = por %p18272_p1, %p18271_p8 }
 0x26f   : > { %p18267_p6 = pneg %p18266_p13 }
 0x271   : > { %p18274_p3 = pnand %p18273_p0, %p18267_p6 }
 0x273   : > { %18277 = shalt.err (!%p18274_p3)
}
 0x274   : > { %s18507_s16 = smov 64   ;;  %s18508_s19 = smov 4  }
 0x275   : > { %15816 = dma.hbm_to_vmem [thread:$0]  (!%p21656_p5), %s21663_s9, 2048, %s774_s24, [#allocation28], %s18507_s16, %s18507_s16, %s18508_s19  }
 0x276   : > { %s18509_s26 = smov [#allocation32]   ;;  %s18510_s30 = smov [#allocation33]  }
 0x277   : > { %s797_s11 = sshll.u32 %s18509_s26, 4  ;;  %s811_s2 = sshll.u32 %s18510_s30, 4  ;;  %s798_s11 = int_to_ptr.vmem [resolvable:$true] %s797_s11  ;;  %s19275_s2 = int_to_ptr.vmem [resolvable:$true] %s811_s2 }
 0x278   : > { %s21664_s27 = sld [smem:[#allocation76_spill]] }
 0x27e   : > { %s21665_s8 = smov %s21664_s27  ;;  %s18278_s12 = scalar_lea.hbm %s21664_s27, 1024 }
 0x27f   : > { %p18279_p4 = scmp.ne.s32.totalorder %s21665_s8, %s18278_s12  ;;  %p18285_p11 = scmp.lt.u32.totalorder %s18278_s12, %s21665_s8 }
 0x281   : > { %p18281_p9 = pnand %p18279_p4, %p21646_p2 }
 0x283   : > { %p18282_p10 = pneg %p18281_p9 }
 0x285   : > { %p18287_p12 = pnand %p18285_p11, %p18282_p10 }
 0x287   : > { %18290 = shalt.err (!%p18287_p12)
}
 0x288   : > { %s18291_s13 = scalar_lea.vmem %s798_s11, 1024  ;;  %p18299_p8 = scmp.lt.s32.totalorder %s798_s11, %s798_s11 }
 0x289   : > { %p18292_p7 = scmp.ne.s32.totalorder %s798_s11, %s18291_s13  ;;  %p18300_p1 = scmp.lt.s32.totalorder %s18291_s13, %s18291_s13 }
 0x28b   : > { %p18294_p13 = pnand %p18292_p7, %p21646_p2  ;;  %p18301_p0 = por %p18300_p1, %p18299_p8 }
 0x28d   : > { %p18295_p6 = pneg %p18294_p13 }
 0x28f   : > { %p18302_p3 = pnand %p18301_p0, %p18295_p6 }
 0x291   : > { %18305 = shalt.err (!%p18302_p3)
}
 0x292   : > { %15822 = dma.hbm_to_vmem [thread:$0]  (!%p21656_p5), %s21665_s8, 1024, %s798_s11, [#allocation31], %s18507_s16, %s18507_s16, %s18508_s19  }
 0x293   : > { %s21666_s28 = sld [smem:[#allocation77_spill]] }
 0x299   : > { %s21667_s12 = smov %s21666_s28  ;;  %s18306_s27 = scalar_lea.hbm %s21666_s28, 16 }
 0x29a   : > { %p18307_p4 = scmp.ne.s32.totalorder %s21667_s12, %s18306_s27  ;;  %p18313_p11 = scmp.lt.u32.totalorder %s18306_s27, %s21667_s12 }
 0x29c   : > { %p18309_p9 = pnand %p18307_p4, %p21646_p2 }
 0x29e   : > { %p18310_p10 = pneg %p18309_p9 }
 0x2a0   : > { %p18315_p12 = pnand %p18313_p11, %p18310_p10 }
 0x2a2   : > { %18318 = shalt.err (!%p18315_p12)
}
 0x2a3   : > { %s18319_s16 = scalar_lea.vmem %s19275_s2, 16  ;;  %s18326_s19 = scalar_lea.vmem %s19275_s2, 32 }
 0x2a4   : > { %p18320_p7 = scmp.ne.s32.totalorder %s19275_s2, %s18319_s16  ;;  %p18327_p8 = scmp.lt.s32.totalorder %s19275_s2, %s19275_s2 }
 0x2a5   : > { %p18328_p1 = scmp.lt.s32.totalorder %s18326_s19, %s18319_s16 }
 0x2a6   : > { %p18322_p13 = pnand %p18320_p7, %p21646_p2 }
 0x2a7   : > { %p18329_p0 = por %p18328_p1, %p18327_p8 }
 0x2a8   : > { %p18323_p6 = pneg %p18322_p13 }
 0x2aa   : > { %p18330_p3 = pnand %p18329_p0, %p18323_p6 }
 0x2ac   : > { %18333 = shalt.err (!%p18330_p3)
}
 0x2ad   : > { %15825 = dma.hbm_to_vmem [thread:$0]  (!%p21656_p5), %s21667_s12, 16, %s19275_s2, [#allocation34]  }
 0x2ae   : > { %s21668_s30 = sld [smem:[#allocation68_spill]]  ;;  %s1043_s28 = scalar_lea.vmem [#allocation19], %s18820_s21 }
 0x2af   : > { %s1051_s27 = sshll.u32 %s1043_s28, 4  ;;  %p21669_p4 = scmp.ne.s32.totalorder %s21623_s29, 0  ;;  %s1052_s27 = int_to_ptr.vmem [resolvable:$true] %s1051_s27 }
 0x2b4   : > { %s19323_s1 = scalar_lea.hbm %s21668_s30, %s18855_s4  ;;  %s18339_s2 = scalar_lea.hbm %s21668_s30, 96 }
 0x2b5   : > { %s18334_s3 = scalar_lea.hbm %s19323_s1, 48  ;;  %p18340_p5 = scmp.lt.u32.totalorder %s19323_s1, %s21668_s30 }
 0x2b6   : > { %p18335_p2 = scmp.ne.s32.totalorder %s19323_s1, %s18334_s3  ;;  %p18341_p11 = scmp.lt.u32.totalorder %s18339_s2, %s18334_s3 }
 0x2b7   : > { %p18343_p7 = scmp.lt.u32.totalorder %s18334_s3, %s19323_s1 }
 0x2b8   : > { %p18337_p9 = pnand %p18335_p2, %p21669_p4  ;;  %p18342_p12 = por %p18341_p11, %p18340_p5 }
 0x2ba   : > { %p18338_p10 = pneg %p18337_p9  ;;  %p18344_p13 = por %p18343_p7, %p18342_p12 }
 0x2bc   : > { %p18345_p6 = pnand %p18344_p13, %p18338_p10 }
 0x2be   : > { %18348 = shalt.err (!%p18345_p6)
}
 0x2bf   : > { %s18349_s21 = scalar_lea.vmem %s1052_s27, 48  ;;  %s18511_s4 = smov [#allocation19]  }
 0x2c0   : > { %p18350_p8 = scmp.ne.s32.totalorder %s1052_s27, %s18349_s21  ;;  %s18354_s16 = sshll.u32 %s18511_s4, 4  ;;  %s18355_s16 = int_to_ptr.vmem [resolvable:$false] %s18354_s16 }
 0x2c1   : > { %s18356_s19 = scalar_lea.vmem %s18355_s16, 96  ;;  %p18357_p3 = scmp.lt.s32.totalorder %s1052_s27, %s18355_s16 }
 0x2c2   : > { %p18352_p1 = pnand %p18350_p8, %p21669_p4  ;;  %p18358_p2 = scmp.lt.s32.totalorder %s18356_s19, %s18349_s21 }
 0x2c4   : > { %p18353_p0 = pneg %p18352_p1  ;;  %p18359_p9 = por %p18358_p2, %p18357_p3 }
 0x2c6   : > { %p18360_p5 = pnand %p18359_p9, %p18353_p0 }
 0x2c8   : > { %18363 = shalt.err (!%p18360_p5)
}
 0x2c9   : > { %p21670_p11 = scmp.ne.s32.totalorder %s21621_s5, 0  ;;  %s21671_s11 = sld [smem:[#allocation51_spill]] }
 0x2cb   : > { %15862 = dma.hbm_to_vmem [thread:$0]  (!%p21670_p11), %s19323_s1, 48, %s1052_s27, %s18763_s23  }
 0x2cf   : > { %p21672_p10 = scmp.ne.s32.totalorder %s21671_s11, 0 }
 0x2d0   : > { %s21673_s29 = sld [smem:[#allocation50_spill]] (!%p21672_p10) }
 0x2d1   : > { %1060 = sbr.rel (%p21672_p10) target bundleno = 5380 (0x1504), region = 116 }
 0x2d6   : > { %p21674_p4 = scmp.eq.s32.totalorder (!%p21672_p10), %s21673_s29, 0 }
 0x2d8   : > { %18415 = dma.done.wait (%p21674_p4), [#allocation4], 768   ;;  %p21675_p12 = pmov %p21674_p4 }
 0x2d9   : > { %p21676_p7 = pmov %p21674_p4 }
 0x2da   : > { %18417 = vsyncadd (%p21675_p12), [#allocation4], 4294966528 }
 0x2db   : > { %18419 = dma.done.wait (%p21676_p7), [#allocation7], 256   ;;  %p21677_p13 = pmov %p21674_p4 }
 0x2dc   : > { %s21678_s5 = sld [smem:[#allocation46_spill]]  ;;  %s1070_s7 = sand.u32 1, %s21673_s29  }
 0x2dd   : > { %18421 = vsyncadd (%p21677_p13), [#allocation7], 4294967040  ;;  %s21679_s0 = sld [smem:[#allocation53_spill]]  ;;  %s1071_s1 = scalar_lea.sflag [#allocation4], %s1070_s7 }
 0x2e2   : > { %s1072_s23 = sand.u32 1, %s21678_s5  }
 0x2e3   : > { %s15709_s26 = smul.u32 2304, %s1072_s23  ;;  %p21680_p6 = scmp.ne.s32.totalorder %s21679_s0, 0 }
 0x2e5   : > { %s19356_s28 = scalar_lea.vmem [#allocation8], %s15709_s26 }
 0x2e6   : > { %18423 = dma.done.wait (%p21680_p6), %s1071_s1, 120480  }
 0x2e7   : > { %18425 = vsyncadd (%p21680_p6), %s1071_s1, 4294846816  ;;  %s15710_s27 = smul.u32 12, %s1072_s23  ;;  %s19371_s4 = scalar_lea.vmem [#allocation14], %s15709_s26 }
 0x2e8   : > { %s15711_s3 = smul.u32 576, %s1072_s23  ;;  %s19375_s19 = scalar_lea.vmem [#allocation16], %s15709_s26 }
 0x2e9   : > { %s19362_s20 = smul.u32 3, %s1072_s23  ;;  %s19364_s10 = scalar_lea.vmem [#allocation9], %s15710_s27 }
 0x2ea   : > { %s19366_s2 = scalar_lea.vmem [#allocation10], %s15711_s3  ;;  %s19373_s16 = scalar_lea.vmem [#allocation15], %s15710_s27 }
 0x2eb   : > { %s1101_s24 = scalar_lea.vmem [#allocation11], %s19362_s20  ;;  %s1110_s13 = scalar_lea.vmem [#allocation12], %s19362_s20 }
 0x2ec   : > { %s1119_s21 = scalar_lea.vmem [#allocation13], %s19362_s20  ;;  %s1155_s11 = scalar_lea.vmem [#allocation17], %s19362_s20 }
 0x2ed   : > { %s1164_s5 = scalar_lea.vmem [#allocation18], %s19362_s20  ;;  %s1173_s0 = scalar_lea.vmem [#allocation19], %s19362_s20 }
 0x2ee   : > { %p21681_p8 = pmov %p21674_p4 }
 0x2ef   : > { %p21682_p1 = pmov %p21674_p4 }
 0x2f0   : > { %18427 = dma.done.wait (%p21681_p8), [#allocation7], 48  }
 0x2f1   : > { %18429 = vsyncadd (%p21682_p1), [#allocation7], 4294967248  ;;  %p21683_p0 = pmov %p21682_p1 }
 0x2f3   : > { %18431 = dma.done.wait (%p21683_p0), [#allocation22], 9264   ;;  %p21684_p3 = pmov %p21683_p0 }
 0x2f4   : > { %p21685_p2 = pmov %p21683_p0 }
 0x2f5   : > { %18433 = vsyncadd (%p21684_p3), [#allocation22], 4294958032 }
 0x2f6   : > { %18435 = dma.done.wait (%p21685_p2), [#allocation25], 6192   ;;  %p21686_p9 = pmov %p21683_p0 }
 0x2f7   : > { %p21687_p5 = pmov %p21683_p0 }
 0x2f8   : > { %18437 = vsyncadd (%p21686_p9), [#allocation25], 4294961104 }
 0x2f9   : > { %18439 = dma.done.wait (%p21687_p5), [#allocation28], 2080   ;;  %p21688_p11 = pmov %p21683_p0 }
 0x2fa   : > { %p21689_p10 = pmov %p21683_p0 }
 0x2fb   : > { %18441 = vsyncadd (%p21688_p11), [#allocation28], 4294965216 }
 0x2fc   : > { %18443 = dma.done.wait (%p21689_p10), [#allocation31], 1040   ;;  %p21690_p4 = pmov %p21683_p0 }
 0x2fd   : > { %p21691_p12 = pmov %p21683_p0 }
 0x2fe   : > { %18445 = vsyncadd (%p21690_p4), [#allocation31], 4294966256 }
 0x2ff   : > { %18447 = dma.done.wait (%p21691_p12), [#allocation34], 16   ;;  %p21692_p7 = pmov %p21683_p0 }
 0x300   : > { %s21693_s7 = sld [smem:[#allocation48_spill]] }
 0x301   : > { %18449 = vsyncadd (%p21692_p7), [#allocation34], 4294967280 }
 0x306   : > { %p13815_p13 = scmp.ne.s32.totalorder %s21693_s7, 0 }
 0x307   : > { %v1333_v0 = vld [vmem:[#allocation3] sm:$0xff] (!%p13815_p13)  ;;  %v1334_v1 = vld [vmem:[#allocation3 + $0x8] sm:$0xff] (!%p13815_p13)  ;;  %v1335_v2 = vld [vmem:[#allocation3 + $0x10] sm:$0xff] (!%p13815_p13)  ;;  %v1385_v32 = vlaneseq (!%p13815_p13) }
 0x308   : > { %1332 = sbr.rel (%p13815_p13) target bundleno = 1101 (0x44d), region = 216  ;;  %v1341_v3 = vadd.f32 (!%p13815_p13), %v1334_v1, %v1333_v0  ;;  %v1336_v4 = vld [vmem:[#allocation3 + $0x18] sm:$0xff] (!%p13815_p13)  ;;  %v1337_v5 = vld [vmem:[#allocation3 + $0x20] sm:$0xff] (!%p13815_p13)  ;;  %v1338_v6 = vld [vmem:[#allocation3 + $0x28] sm:$0xff] (!%p13815_p13) }
 0x309   : > { %v1345_v7 = vadd.f32 (!%p13815_p13), %v1337_v5, %v1336_v4  ;;  %v1386_v36 = vshrl.u32 (!%p13815_p13), %v1385_v32, 7  ;;  %v1339_v41 = vld [vmem:[#allocation20] sm:$0x7] (!%p13815_p13)  ;;  %v1340_v42 = vld [vmem:[#allocation21] sm:$0x7] (!%p13815_p13) }
 0x30a   : > { %v1342_v8 = vadd.f32 (!%p13815_p13), %v1341_v3, %v1335_v2 }
 0x30b   : > { %v1346_v9 = vadd.f32 (!%p13815_p13), %v1345_v7, %v1338_v6  ;;  %v1387_v38 = vsub.s32 (!%p13815_p13), 0, %v1386_v36  ;;  %v1391_v39 = vsub.s32 (!%p13815_p13), 1, %v1386_v36  ;;  %v1395_v40 = vsub.s32 (!%p13815_p13), 2, %v1386_v36 }
 0x30c   : > { %1343 = vadd.xlane.f32.xlu0 (!%p13815_p13), %v1342_v8 }
 0x30d   : > { %v1388_v43 = vrot.slane (!%p13815_p13), %v1339_v41, %v1387_v38  ;;  %v1392_v44 = vrot.slane (!%p13815_p13), %v1339_v41, %v1391_v39  ;;  %v1396_v45 = vrot.slane (!%p13815_p13), %v1339_v41, %v1395_v40  ;;  %v1410_v47 = vrot.slane (!%p13815_p13), %v1340_v42, %v1387_v38 }
 0x30e   : > { %v1414_v48 = vrot.slane (!%p13815_p13), %v1340_v42, %v1391_v39  ;;  %v1418_v49 = vrot.slane (!%p13815_p13), %v1340_v42, %v1395_v40 }
 0x310   : > { %1347 = vadd.xlane.f32.xlu0 %v1346_v9 }
 0x399   : > { %v1344_v10 = vpop.xlane.xlu0 %1343 }
 0x39a   : > { %v1350_v11 = vmul.f32 0.0026041667, %v1344_v10 }
 0x39c   : > { %v1352_v12 = vsub.f32 %v1333_v0, %v1350_v11  ;;  %v1353_v13 = vsub.f32 %v1334_v1, %v1350_v11  ;;  %v1354_v14 = vsub.f32 %v1335_v2, %v1350_v11 }
 0x39d   : > { %v1348_v15 = vpop.xlane.xlu0 %1347 }
 0x39e   : > { %v1351_v16 = vmul.f32 0.0026041667, %v1348_v15  ;;  %v1358_v17 = vmul.f32 %v1352_v12, %v1352_v12  ;;  %v1359_v18 = vmul.f32 %v1353_v13, %v1353_v13  ;;  %v1360_v19 = vmul.f32 %v1354_v14, %v1354_v14 }
 0x3a0   : > { %v1355_v20 = vsub.f32 %v1336_v4, %v1351_v16  ;;  %v1356_v21 = vsub.f32 %v1337_v5, %v1351_v16  ;;  %v1357_v22 = vsub.f32 %v1338_v6, %v1351_v16  ;;  %v1364_v23 = vadd.f32 %v1359_v18, %v1358_v17 }
 0x3a2   : > { %v1365_v24 = vadd.f32 %v1364_v23, %v1360_v19  ;;  %v1361_v25 = vmul.f32 %v1355_v20, %v1355_v20  ;;  %v1362_v26 = vmul.f32 %v1356_v21, %v1356_v21  ;;  %v1363_v27 = vmul.f32 %v1357_v22, %v1357_v22 }
 0x3a4   : > { %1366 = vadd.xlane.f32.xlu1 %v1365_v24  ;;  %v1368_v28 = vadd.f32 %v1362_v26, %v1361_v25 }
 0x3a6   : > { %v1369_v29 = vadd.f32 %v1368_v28, %v1363_v27 }
 0x3a8   : > { %1370 = vadd.xlane.f32.xlu1 %v1369_v29 }
 0x431   : > { %v1367_v30 = vpop.xlane.xlu1 %1366 }
 0x432   : > { %v1372_v31 = vmul.f32 0.0026041667, %v1367_v30 }
 0x434   : > { %v1374_v33 = vadd.f32 1e-12, %v1372_v31 }
 0x435   : > { %v1371_v34 = vpop.xlane.xlu1 %1370 }
 0x436   : > { %15969 = vrsqrt.f32 %v1374_v33  ;;  %v1373_v35 = vmul.f32 0.0026041667, %v1371_v34 }
 0x438   : > { %v1375_v37 = vadd.f32 1e-12, %v1373_v35 }
 0x43a   : > { %15971 = vrsqrt.f32 %v1375_v37 }
 0x440   : > { %v15970_v46 = vpop.eup %15969 }
 0x441   : > { %v1378_v50 = vmul.f32 %v15970_v46, %v1352_v12  ;;  %v1379_v51 = vmul.f32 %v15970_v46, %v1353_v13  ;;  %v1380_v52 = vmul.f32 %v15970_v46, %v1354_v14 }
 0x443   : > { %v1400_v53 = vmul.f32 %v1388_v43, %v1378_v50  ;;  %v1401_v54 = vmul.f32 %v1392_v44, %v1379_v51  ;;  %v1402_v55 = vmul.f32 %v1396_v45, %v1380_v52 }
 0x444   : > { %v15972_v56 = vpop.eup %15971 }
 0x445   : > { %v1422_v57 = vadd.f32 %v1410_v47, %v1400_v53  ;;  %v1423_v58 = vadd.f32 %v1414_v48, %v1401_v54  ;;  %v1424_v59 = vadd.f32 %v1418_v49, %v1402_v55  ;;  %v1381_v60 = vmul.f32 %v15972_v56, %v1355_v20 }
 0x446   : > { %v1382_v61 = vmul.f32 %v15972_v56, %v1356_v21  ;;  %v1383_v62 = vmul.f32 %v15972_v56, %v1357_v22 }
 0x447   : > { %1428 = vst [vmem:[#allocation2] sm:$0xff] %v1422_v57  ;;  %1429 = vst [vmem:[#allocation2 + $0x8] sm:$0xff] %v1423_v58  ;;  %v1403_v63 = vmul.f32 %v1388_v43, %v1381_v60 }
 0x448   : > { %1430 = vst [vmem:[#allocation2 + $0x10] sm:$0xff] %v1424_v59  ;;  %v1404_v0 = vmul.f32 %v1392_v44, %v1382_v61  ;;  %v1405_v1 = vmul.f32 %v1396_v45, %v1383_v62 }
 0x449   : > { %v1425_v2 = vadd.f32 %v1410_v47, %v1403_v63 }
 0x44a   : > { %v1426_v3 = vadd.f32 %v1414_v48, %v1404_v0  ;;  %v1427_v4 = vadd.f32 %v1418_v49, %v1405_v1 }
 0x44b   : > { %1431 = vst [vmem:[#allocation2 + $0x18] sm:$0xff] %v1425_v2 }
 0x44c   : > { %1432 = vst [vmem:[#allocation2 + $0x20] sm:$0xff] %v1426_v3  ;;  %1433 = vst [vmem:[#allocation2 + $0x28] sm:$0xff] %v1427_v4 }
 0x44d PF: > { %v15973_v5 = vld [vmem:[%s19356_s28 + $0x4] ss:$48 sps:$4 sm:$0xff]   ;;  %v15975_v6 = vld [vmem:[%s19356_s28] ss:$48 sps:$4 sm:$0xff]   ;;  %v18512_v0 = vmov 0   ;;  %vm18514_vm0 = vmmov 0  }
 0x44e   : > { %3237 = vmatprep.subr.bf16.mxu1 %v15973_v5  ;;  %v15976_v7 = vld [vmem:[%s19356_s28 + $0x64] ss:$48 sps:$4 sm:$0xff]   ;;  %v15978_v8 = vld [vmem:[%s19356_s28 + $0x60] ss:$48 sps:$4 sm:$0xff]   ;;  %v1435_v18 = vld [vmem:[#allocation2 + $0x8] sm:$0xff]  ;;  %s18515_s29 = smov 96  }
 0x44f   : > { %3238 = vmatpush1.bf16.msra.mxu1 %v15975_v6  ;;  %v15979_v9 = vld [vmem:[%s19356_s28 + $0xc4] ss:$48 sps:$4 sm:$0xff]   ;;  %v15981_v10 = vld [vmem:[%s19356_s28 + $0xc0] ss:$48 sps:$4 sm:$0xff]   ;;  %vm3768_vm1 = vcmask 261120   ;;  %s18516_s23 = smov 64  }
 0x450   : > { %3239 = vmatprep.subr.bf16.mxu1 %v15976_v7  ;;  %v15982_v11 = vld [vmem:[%s19356_s28 + $0x124] ss:$48 sps:$4 sm:$0xff]   ;;  %v15984_v12 = vld [vmem:[%s19356_s28 + $0x120] ss:$48 sps:$4 sm:$0xff]   ;;  %vm4366_vm2 = vcmask 130048   ;;  %s21694_s26 = sld [smem:[#allocation48_spill]] }
 0x451   : > { %v15985_v13 = vld [vmem:[%s19356_s28 + $0x184] ss:$48 sps:$4 sm:$0xff]   ;;  %v15987_v14 = vld [vmem:[%s19356_s28 + $0x180] ss:$48 sps:$4 sm:$0xff]  }
 0x452   : > { %v15988_v15 = vld [vmem:[%s19356_s28 + $0x1e4] ss:$48 sps:$4 sm:$0xff]   ;;  %v15990_v16 = vld [vmem:[%s19356_s28 + $0x1e0] ss:$48 sps:$4 sm:$0xff]   ;;  %v1437_v54 = vld [vmem:[#allocation2 + $0x18] sm:$0xff] }
 0x453   : > { %3240 = vmatpush1.bf16.msra.mxu1 %v15978_v8  ;;  %v15991_v17 = vld [vmem:[%s19356_s28 + $0x244] ss:$48 sps:$4 sm:$0xff]   ;;  %v15993_v21 = vld [vmem:[%s19356_s28 + $0x240] ss:$48 sps:$4 sm:$0xff]  }
 0x454   : > { %3241 = vmatprep.subr.bf16.mxu1 %v15979_v9  ;;  %v1438_v19 = vld [vmem:[#allocation2 + $0x20] sm:$0xff] }
 0x455   : > { %v19418_v20 = vpack.c.bf16 %v1438_v19, %v1435_v18  ;;  %v15994_v22 = vld [vmem:[%s19356_s28 + $0x2a4] ss:$48 sps:$4 sm:$0xff]   ;;  %v15996_v23 = vld [vmem:[%s19356_s28 + $0x2a0] ss:$48 sps:$4 sm:$0xff]  }
 0x456   : > { %v15997_v24 = vld [vmem:[%s19356_s28 + $0x304] ss:$48 sps:$4 sm:$0xff]   ;;  %v15999_v25 = vld [vmem:[%s19356_s28 + $0x300] ss:$48 sps:$4 sm:$0xff]   ;;  %p14800_p6 = scmp.ne.s32.totalorder %s21694_s26, 1 }
 0x457   : > { %3242 = vmatpush1.bf16.msra.mxu1 %v15981_v10  ;;  %3269 = vmatprep.mubr.bf16.mxu1 %v19418_v20  ;;  %v16000_v26 = vld [vmem:[%s19356_s28 + $0x364] ss:$48 sps:$4 sm:$0xff]   ;;  %v16002_v27 = vld [vmem:[%s19356_s28 + $0x360] ss:$48 sps:$4 sm:$0xff]   ;;  %vm12020_vm3 = vcmask (!%p14800_p6), 1040384   ;;  %vm18518_vm4 = vmmov (!%p14800_p6), 0  }
 0x458   : > { %3243 = vmatprep.subr.bf16.mxu1 %v15982_v11  ;;  %3441 = vmatprep.mubr.bf16.mxu0 %v19418_v20  ;;  %v16003_v28 = vld [vmem:[%s19356_s28 + $0x3c4] ss:$48 sps:$4 sm:$0xff]   ;;  %v16005_v29 = vld [vmem:[%s19356_s28 + $0x3c0] ss:$48 sps:$4 sm:$0xff]  }
 0x459   : > { %v16054_v30 = vld [vmem:[%s19356_s28 + $0x14] ss:$48 sps:$4 sm:$0xff]   ;;  %v16056_v31 = vld [vmem:[%s19356_s28 + $0x10] ss:$48 sps:$4 sm:$0xff]  }
 0x45a   : > { %v16006_v32 = vld [vmem:[%s19356_s28 + $0x424] ss:$48 sps:$4 sm:$0xff]   ;;  %3409 = vmatprep.subr.bf16.mxu0 %v16054_v30  ;;  %v16062_v34 = vld [vmem:[%s19356_s28 + $0x70] ss:$48 sps:$4 sm:$0xff]  }
 0x45b   : > { %3244 = vmatpush1.bf16.msra.mxu1 %v15984_v12  ;;  %3410 = vmatpush1.bf16.msra.mxu0 %v16056_v31  ;;  %v16060_v33 = vld [vmem:[%s19356_s28 + $0x74] ss:$48 sps:$4 sm:$0xff]   ;;  %v16008_v35 = vld [vmem:[%s19356_s28 + $0x420] ss:$48 sps:$4 sm:$0xff]  }
 0x45c   : > { %3245 = vmatprep.subr.bf16.mxu1 %v15985_v13  ;;  %3411 = vmatprep.subr.bf16.mxu0 %v16060_v33  ;;  %v16009_v36 = vld [vmem:[%s19356_s28 + $0x484] ss:$48 sps:$4 sm:$0xff]   ;;  %v16068_v38 = vld [vmem:[%s19356_s28 + $0xd0] ss:$48 sps:$4 sm:$0xff]   ;;  %v16050_v33 = vld [vmem:[%s19356_s28 + $0x6c] ss:$48 sps:$4 sm:$0xff]  }
 0x45d   : > { %v16066_v37 = vld [vmem:[%s19356_s28 + $0xd4] ss:$48 sps:$4 sm:$0xff]   ;;  %v16011_v40 = vld [vmem:[%s19356_s28 + $0x480] ss:$48 sps:$4 sm:$0xff]  }
 0x45e   : > { %v16072_v39 = vld [vmem:[%s19356_s28 + $0x134] ss:$48 sps:$4 sm:$0xff]   ;;  %v16074_v42 = vld [vmem:[%s19356_s28 + $0x130] ss:$48 sps:$4 sm:$0xff]  }
 0x45f   : > { %3246 = vmatpush1.bf16.msra.mxu1 %v15987_v14  ;;  %3412 = vmatpush1.bf16.msra.mxu0 %v16062_v34  ;;  %v16012_v41 = vld [vmem:[%s19356_s28 + $0x4e4] ss:$48 sps:$4 sm:$0xff]   ;;  %v16014_v44 = vld [vmem:[%s19356_s28 + $0x4e0] ss:$48 sps:$4 sm:$0xff]  }
 0x460   : > { %3247 = vmatprep.subr.bf16.mxu1 %v15988_v15  ;;  %3413 = vmatprep.subr.bf16.mxu0 %v16066_v37  ;;  %v16078_v43 = vld [vmem:[%s19356_s28 + $0x194] ss:$48 sps:$4 sm:$0xff]   ;;  %v16080_v46 = vld [vmem:[%s19356_s28 + $0x190] ss:$48 sps:$4 sm:$0xff]   ;;  %v16053_v37 = vld [vmem:[%s19356_s28 + $0xcc] ss:$48 sps:$4 sm:$0xff]  }
 0x461   : > { %v16015_v45 = vld [vmem:[%s19356_s28 + $0x544] ss:$48 sps:$4 sm:$0xff]   ;;  %v16017_v48 = vld [vmem:[%s19356_s28 + $0x540] ss:$48 sps:$4 sm:$0xff]  }
 0x462   : > { %v16084_v47 = vld [vmem:[%s19356_s28 + $0x1f4] ss:$48 sps:$4 sm:$0xff]   ;;  %v16020_v50 = vld [vmem:[%s19356_s28 + $0x5a0] ss:$48 sps:$4 sm:$0xff]  }
 0x463   : > { %3248 = vmatpush1.bf16.msra.mxu1 %v15990_v16  ;;  %3414 = vmatpush1.bf16.msra.mxu0 %v16068_v38  ;;  %v16018_v49 = vld [vmem:[%s19356_s28 + $0x5a4] ss:$48 sps:$4 sm:$0xff]   ;;  %v16086_v52 = vld [vmem:[%s19356_s28 + $0x1f0] ss:$48 sps:$4 sm:$0xff]  }
 0x464   : > { %3249 = vmatprep.subr.bf16.mxu1 %v15991_v17  ;;  %3415 = vmatprep.subr.bf16.mxu0 %v16072_v39  ;;  %v1434_v51 = vld [vmem:[#allocation2] sm:$0xff] }
 0x465   : > { %v16090_v53 = vld [vmem:[%s19356_s28 + $0x254] ss:$48 sps:$4 sm:$0xff]   ;;  %v16092_v56 = vld [vmem:[%s19356_s28 + $0x250] ss:$48 sps:$4 sm:$0xff]   ;;  %v19456_v57 = vpack.c.bf16 %v1437_v54, %v1434_v51 }
 0x466   : > { %v16023_v55 = vld [vmem:[%s19356_s28 + $0x604] ss:$48 sps:$4 sm:$0xff]   ;;  %v16021_v59 = vld [vmem:[%s19356_s28 + $0x600] ss:$48 sps:$4 sm:$0xff]  }
 0x467   : > { %3250 = vmatpush1.bf16.msra.mxu1 %v15993_v21  ;;  %3416 = vmatpush1.bf16.msra.mxu0 %v16074_v42  ;;  %v16096_v58 = vld [vmem:[%s19356_s28 + $0x2b4] ss:$48 sps:$4 sm:$0xff]   ;;  %v16098_v61 = vld [vmem:[%s19356_s28 + $0x2b0] ss:$48 sps:$4 sm:$0xff]  }
 0x468   : > { %3251 = vmatprep.subr.bf16.mxu1 %v15994_v22  ;;  %3417 = vmatprep.subr.bf16.mxu0 %v16078_v43  ;;  %v16026_v60 = vld [vmem:[%s19356_s28 + $0x664] ss:$48 sps:$4 sm:$0xff]   ;;  %v16024_v63 = vld [vmem:[%s19356_s28 + $0x660] ss:$48 sps:$4 sm:$0xff]  }
 0x469   : > { %v16102_v62 = vld [vmem:[%s19356_s28 + $0x314] ss:$48 sps:$4 sm:$0xff]   ;;  %v16104_v2 = vld [vmem:[%s19356_s28 + $0x310] ss:$48 sps:$4 sm:$0xff]  }
 0x46a   : > { %v16029_v1 = vld [vmem:[%s19356_s28 + $0x6c4] ss:$48 sps:$4 sm:$0xff]   ;;  %v16027_v4 = vld [vmem:[%s19356_s28 + $0x6c0] ss:$48 sps:$4 sm:$0xff]  }
 0x46b   : > { %3252 = vmatpush1.bf16.msra.mxu1 %v15996_v23  ;;  %3418 = vmatpush1.bf16.msra.mxu0 %v16080_v46  ;;  %v16108_v3 = vld [vmem:[%s19356_s28 + $0x374] ss:$48 sps:$4 sm:$0xff]   ;;  %v16110_v6 = vld [vmem:[%s19356_s28 + $0x370] ss:$48 sps:$4 sm:$0xff]  }
 0x46c   : > { %3253 = vmatprep.subr.bf16.mxu1 %v15997_v24  ;;  %3419 = vmatprep.subr.bf16.mxu0 %v16084_v47  ;;  %v16032_v5 = vld [vmem:[%s19356_s28 + $0x724] ss:$48 sps:$4 sm:$0xff]   ;;  %v16030_v8 = vld [vmem:[%s19356_s28 + $0x720] ss:$48 sps:$4 sm:$0xff]  }
 0x46d   : > { %v16114_v7 = vld [vmem:[%s19356_s28 + $0x3d4] ss:$48 sps:$4 sm:$0xff]   ;;  %v16116_v10 = vld [vmem:[%s19356_s28 + $0x3d0] ss:$48 sps:$4 sm:$0xff]  }
 0x46e   : > { %v16035_v9 = vld [vmem:[%s19356_s28 + $0x784] ss:$48 sps:$4 sm:$0xff]   ;;  %v16033_v12 = vld [vmem:[%s19356_s28 + $0x780] ss:$48 sps:$4 sm:$0xff]  }
 0x46f   : > { %3254 = vmatpush1.bf16.msra.mxu1 %v15999_v25  ;;  %3420 = vmatpush1.bf16.msra.mxu0 %v16086_v52  ;;  %v16120_v11 = vld [vmem:[%s19356_s28 + $0x434] ss:$48 sps:$4 sm:$0xff]   ;;  %v16122_v14 = vld [vmem:[%s19356_s28 + $0x430] ss:$48 sps:$4 sm:$0xff]   ;;  %v16069_v52 = vld [vmem:[%s19356_s28 + $0x1e8] ss:$48 sps:$4 sm:$0xff]  }
 0x470   : > { %3255 = vmatprep.subr.bf16.mxu1 %v16000_v26  ;;  %3421 = vmatprep.subr.bf16.mxu0 %v16090_v53  ;;  %v16038_v13 = vld [vmem:[%s19356_s28 + $0x7e4] ss:$48 sps:$4 sm:$0xff]   ;;  %v16036_v16 = vld [vmem:[%s19356_s28 + $0x7e0] ss:$48 sps:$4 sm:$0xff]   ;;  %v16077_v53 = vld [vmem:[%s19356_s28 + $0x24c] ss:$48 sps:$4 sm:$0xff]  }
 0x471   : > { %v16126_v15 = vld [vmem:[%s19356_s28 + $0x494] ss:$48 sps:$4 sm:$0xff]   ;;  %v16128_v18 = vld [vmem:[%s19356_s28 + $0x490] ss:$48 sps:$4 sm:$0xff]  }
 0x472   : > { %v16041_v17 = vld [vmem:[%s19356_s28 + $0x844] ss:$48 sps:$4 sm:$0xff]   ;;  %v16039_v21 = vld [vmem:[%s19356_s28 + $0x840] ss:$48 sps:$4 sm:$0xff]  }
 0x473   : > { %3256 = vmatpush1.bf16.msra.mxu1 %v16002_v27  ;;  %3422 = vmatpush1.bf16.msra.mxu0 %v16092_v56  ;;  %v16132_v19 = vld [vmem:[%s19356_s28 + $0x4f4] ss:$48 sps:$4 sm:$0xff]   ;;  %v16042_v23 = vld [vmem:[%s19356_s28 + $0x8a0] ss:$48 sps:$4 sm:$0xff]   ;;  %v1439_v27 = vld [vmem:[#allocation2 + $0x28] sm:$0xff] }
 0x474   : > { %3257 = vmatprep.subr.bf16.mxu1 %v16003_v28  ;;  %3423 = vmatprep.subr.bf16.mxu0 %v16096_v58  ;;  %v16044_v22 = vld [vmem:[%s19356_s28 + $0x8a4] ss:$48 sps:$4 sm:$0xff]   ;;  %v16134_v25 = vld [vmem:[%s19356_s28 + $0x4f0] ss:$48 sps:$4 sm:$0xff]   ;;  %v16047_v28 = vld [vmem:[%s19356_s28 + $0xc] ss:$48 sps:$4 sm:$0xff]  }
 0x475   : > { %v1436_v24 = vld [vmem:[#allocation2 + $0x10] sm:$0xff]  ;;  %v16075_v56 = vld [vmem:[%s19356_s28 + $0x248] ss:$48 sps:$4 sm:$0xff]   ;;  %v16083_v58 = vld [vmem:[%s19356_s28 + $0x2ac] ss:$48 sps:$4 sm:$0xff]  }
 0x476   : > { %v16138_v26 = vld [vmem:[%s19356_s28 + $0x554] ss:$48 sps:$4 sm:$0xff]   ;;  %v19492_v30 = vpack.c.bf16 %v1439_v27, %v1436_v24  ;;  %v16146_v34 = vld [vmem:[%s19356_s28 + $0x5b0] ss:$48 sps:$4 sm:$0xff]   ;;  %v16125_v24 = vld [vmem:[%s19356_s28 + $0x54c] ss:$48 sps:$4 sm:$0xff]  }
 0x477   : > { %3258 = vmatpush1.bf16.msra.mxu1 %v16005_v29  ;;  %3424 = vmatpush1.bf16.msra.mxu0 %v16098_v61  ;;  %v16140_v29 = vld [vmem:[%s19356_s28 + $0x550] ss:$48 sps:$4 sm:$0xff]   ;;  %v16144_v31 = vld [vmem:[%s19356_s28 + $0x5b4] ss:$48 sps:$4 sm:$0xff]   ;;  %v16081_v61 = vld [vmem:[%s19356_s28 + $0x2a8] ss:$48 sps:$4 sm:$0xff]  }
 0x478   : > { %3259 = vmatprep.subr.bf16.mxu1 %v16006_v32  ;;  %3425 = vmatprep.subr.bf16.mxu0 %v16102_v62  ;;  %v16045_v32 = vld [vmem:[%s19356_s28 + $0x8] ss:$48 sps:$4 sm:$0xff]   ;;  %v16150_v38 = vld [vmem:[%s19356_s28 + $0x610] ss:$48 sps:$4 sm:$0xff]   ;;  %v16158_v39 = vld [vmem:[%s19356_s28 + $0x674] ss:$48 sps:$4 sm:$0xff]  }
 0x479   : > { %v16156_v42 = vld [vmem:[%s19356_s28 + $0x670] ss:$48 sps:$4 sm:$0xff]   ;;  %v16164_v43 = vld [vmem:[%s19356_s28 + $0x6d4] ss:$48 sps:$4 sm:$0xff]   ;;  %v16089_v62 = vld [vmem:[%s19356_s28 + $0x30c] ss:$48 sps:$4 sm:$0xff]  }
 0x47a   : > { %v16162_v46 = vld [vmem:[%s19356_s28 + $0x6d0] ss:$48 sps:$4 sm:$0xff]   ;;  %v16170_v47 = vld [vmem:[%s19356_s28 + $0x734] ss:$48 sps:$4 sm:$0xff]   ;;  %v16123_v27 = vld [vmem:[%s19356_s28 + $0x548] ss:$48 sps:$4 sm:$0xff]  }
 0x47b   : > { %3260 = vmatpush1.bf16.msra.mxu1 %v16008_v35  ;;  %3426 = vmatpush1.bf16.msra.mxu0 %v16104_v2  ;;  %v16152_v35 = vld [vmem:[%s19356_s28 + $0x614] ss:$48 sps:$4 sm:$0xff]   ;;  %v16174_v54 = vld [vmem:[%s19356_s28 + $0x790] ss:$48 sps:$4 sm:$0xff]   ;;  %v16087_v2 = vld [vmem:[%s19356_s28 + $0x308] ss:$48 sps:$4 sm:$0xff]  }
 0x47c   : > { %3261 = vmatprep.subr.bf16.mxu1 %v16009_v36  ;;  %3427 = vmatprep.subr.bf16.mxu0 %v16108_v3  ;;  %v16048_v36 = vld [vmem:[%s19356_s28 + $0x68] ss:$48 sps:$4 sm:$0xff]   ;;  %v16176_v51 = vld [vmem:[%s19356_s28 + $0x794] ss:$48 sps:$4 sm:$0xff]   ;;  %v16095_v3 = vld [vmem:[%s19356_s28 + $0x36c] ss:$48 sps:$4 sm:$0xff]  }
 0x47f   : > { %3262 = vmatpush1.bf16.msra.mxu1 %v16011_v40  ;;  %3428 = vmatpush1.bf16.msra.mxu0 %v16110_v6  ;;  %v16051_v40 = vld [vmem:[%s19356_s28 + $0xc8] ss:$48 sps:$4 sm:$0xff]  }
 0x480   : > { %3263 = vmatprep.subr.bf16.mxu1 %v16012_v41  ;;  %3429 = vmatprep.subr.bf16.mxu0 %v16114_v7  ;;  %v16059_v41 = vld [vmem:[%s19356_s28 + $0x12c] ss:$48 sps:$4 sm:$0xff]   ;;  %v16093_v6 = vld [vmem:[%s19356_s28 + $0x368] ss:$48 sps:$4 sm:$0xff]  }
 0x481   : > { %v16101_v7 = vld [vmem:[%s19356_s28 + $0x3cc] ss:$48 sps:$4 sm:$0xff]  }
 0x483   : > { %3264 = vmatpush1.bf16.msra.mxu1 %v16014_v44  ;;  %3430 = vmatpush1.bf16.msra.mxu0 %v16116_v10  ;;  %v16057_v44 = vld [vmem:[%s19356_s28 + $0x128] ss:$48 sps:$4 sm:$0xff]  }
 0x484   : > { %3265 = vmatprep.subr.bf16.mxu1 %v16015_v45  ;;  %3431 = vmatprep.subr.bf16.mxu0 %v16120_v11  ;;  %v16065_v45 = vld [vmem:[%s19356_s28 + $0x18c] ss:$48 sps:$4 sm:$0xff]   ;;  %v16099_v10 = vld [vmem:[%s19356_s28 + $0x3c8] ss:$48 sps:$4 sm:$0xff]  }
 0x485   : > { %v16107_v11 = vld [vmem:[%s19356_s28 + $0x42c] ss:$48 sps:$4 sm:$0xff]  }
 0x487   : > { %3266 = vmatpush1.bf16.msra.mxu1 %v16017_v48  ;;  %3432 = vmatpush1.bf16.msra.mxu0 %v16122_v14  ;;  %v16063_v48 = vld [vmem:[%s19356_s28 + $0x188] ss:$48 sps:$4 sm:$0xff]  }
 0x488   : > { %3267 = vmatprep.subr.bf16.mxu1 %v16018_v49  ;;  %3433 = vmatprep.subr.bf16.mxu0 %v16126_v15  ;;  %v16071_v49 = vld [vmem:[%s19356_s28 + $0x1ec] ss:$48 sps:$4 sm:$0xff]   ;;  %v16105_v14 = vld [vmem:[%s19356_s28 + $0x428] ss:$48 sps:$4 sm:$0xff]  }
 0x489   : > { %v16113_v15 = vld [vmem:[%s19356_s28 + $0x48c] ss:$48 sps:$4 sm:$0xff]  }
 0x48b   : > { %3268 = vmatpush1.bf16.msra.mxu1 %v16020_v50  ;;  %3434 = vmatpush1.bf16.msra.mxu0 %v16128_v18  ;;  %v16168_v50 = vld [vmem:[%s19356_s28 + $0x730] ss:$48 sps:$4 sm:$0xff]   ;;  %v16111_v18 = vld [vmem:[%s19356_s28 + $0x488] ss:$48 sps:$4 sm:$0xff]  }
 0x48c   : > { %3280 = vmatprep.subr.bf16.mxu1 %v16023_v55  ;;  %3435 = vmatprep.subr.bf16.mxu0 %v16132_v19  ;;  %v16182_v55 = vld [vmem:[%s19356_s28 + $0x7f4] ss:$48 sps:$4 sm:$0xff]   ;;  %v16119_v19 = vld [vmem:[%s19356_s28 + $0x4ec] ss:$48 sps:$4 sm:$0xff]  }
 0x48e   : > { %3270 = vmatmul.mubr.bf16.vlgmr.msra.gmra.mrb[0].mxu1 %v19456_v57 }
 0x48f   : > { %3281 = vmatpush1.bf16.msra.mxu1 %v16021_v59  ;;  %3312 = vmatprep.mubr.bf16.mxu1 %v18512_v0  ;;  %v16180_v59 = vld [vmem:[%s19356_s28 + $0x7f0] ss:$48 sps:$4 sm:$0xff]  }
 0x490   : > { %3282 = vmatprep.subr.bf16.mxu1 %v16026_v60  ;;  %3436 = vmatpush1.bf16.msra.mxu0 %v16134_v25  ;;  %v16185_v60 = vld [vmem:[%s19356_s28 + $0x854] ss:$48 sps:$4 sm:$0xff]   ;;  %v16222_v25 = vld [vmem:[%s19356_s28 + $0x1a0] ss:$48 sps:$4 sm:$0xff]  }
 0x491   : > { %3437 = vmatprep.subr.bf16.mxu0 %v16138_v26  ;;  %v16230_v26 = vld [vmem:[%s19356_s28 + $0x204] ss:$48 sps:$4 sm:$0xff]  }
 0x493   : > { %3283 = vmatpush1.bf16.msra.mxu1 %v16024_v63  ;;  %v16183_v63 = vld [vmem:[%s19356_s28 + $0x850] ss:$48 sps:$4 sm:$0xff]  }
 0x494   : > { %3284 = vmatprep.subr.bf16.mxu1 %v16029_v1  ;;  %3438 = vmatpush1.bf16.msra.mxu0 %v16140_v29  ;;  %v16191_v1 = vld [vmem:[%s19356_s28 + $0x8b4] ss:$48 sps:$4 sm:$0xff]   ;;  %v16228_v29 = vld [vmem:[%s19356_s28 + $0x200] ss:$48 sps:$4 sm:$0xff]  }
 0x495   : > { %3439 = vmatprep.subr.bf16.mxu0 %v16144_v31  ;;  %v16236_v31 = vld [vmem:[%s19356_s28 + $0x264] ss:$48 sps:$4 sm:$0xff]  }
 0x497   : > { %3285 = vmatpush1.bf16.msra.mxu1 %v16027_v4  ;;  %v16189_v4 = vld [vmem:[%s19356_s28 + $0x8b0] ss:$48 sps:$4 sm:$0xff]  }
 0x498   : > { %3286 = vmatprep.subr.bf16.mxu1 %v16032_v5  ;;  %3440 = vmatpush1.bf16.msra.mxu0 %v16146_v34  ;;  %v16200_v5 = vld [vmem:[%s19356_s28 + $0x24] ss:$48 sps:$4 sm:$0xff]   ;;  %v16234_v34 = vld [vmem:[%s19356_s28 + $0x260] ss:$48 sps:$4 sm:$0xff]  }
 0x499   : > { %3452 = vmatprep.subr.bf16.mxu0 %v16152_v35  ;;  %v16242_v35 = vld [vmem:[%s19356_s28 + $0x2c4] ss:$48 sps:$4 sm:$0xff]  }
 0x49b   : > { %3287 = vmatpush1.bf16.msra.mxu1 %v16030_v8  ;;  %3442 = vmatmul.mubr.bf16.vlgmr.msra.gmra.mrb[0].mxu0 %v19456_v57  ;;  %v16198_v8 = vld [vmem:[%s19356_s28 + $0x20] ss:$48 sps:$4 sm:$0xff]  }
 0x49c   : > { %3288 = vmatprep.subr.bf16.mxu1 %v16035_v9  ;;  %3453 = vmatpush1.bf16.msra.mxu0 %v16150_v38  ;;  %v16206_v9 = vld [vmem:[%s19356_s28 + $0x84] ss:$48 sps:$4 sm:$0xff]   ;;  %v16240_v38 = vld [vmem:[%s19356_s28 + $0x2c0] ss:$48 sps:$4 sm:$0xff]  }
 0x49d   : > { %3484 = vmatprep.mubr.bf16.mxu0 %v18512_v0  ;;  %3454 = vmatprep.subr.bf16.mxu0 %v16158_v39  ;;  %v16248_v39 = vld [vmem:[%s19356_s28 + $0x324] ss:$48 sps:$4 sm:$0xff]  }
 0x49f   : > { %3289 = vmatpush1.bf16.msra.mxu1 %v16033_v12  ;;  %v16204_v12 = vld [vmem:[%s19356_s28 + $0x80] ss:$48 sps:$4 sm:$0xff]  }
 0x4a0   : > { %3290 = vmatprep.subr.bf16.mxu1 %v16038_v13  ;;  %3455 = vmatpush1.bf16.msra.mxu0 %v16156_v42  ;;  %v16212_v13 = vld [vmem:[%s19356_s28 + $0xe4] ss:$48 sps:$4 sm:$0xff]   ;;  %v16246_v42 = vld [vmem:[%s19356_s28 + $0x320] ss:$48 sps:$4 sm:$0xff]  }
 0x4a1   : > { %3456 = vmatprep.subr.bf16.mxu0 %v16164_v43  ;;  %v16254_v43 = vld [vmem:[%s19356_s28 + $0x384] ss:$48 sps:$4 sm:$0xff]  }
 0x4a3   : > { %3291 = vmatpush1.bf16.msra.mxu1 %v16036_v16  ;;  %v16210_v16 = vld [vmem:[%s19356_s28 + $0xe0] ss:$48 sps:$4 sm:$0xff]  }
 0x4a4   : > { %3292 = vmatprep.subr.bf16.mxu1 %v16041_v17  ;;  %3457 = vmatpush1.bf16.msra.mxu0 %v16162_v46  ;;  %v16218_v17 = vld [vmem:[%s19356_s28 + $0x144] ss:$48 sps:$4 sm:$0xff]   ;;  %v16252_v46 = vld [vmem:[%s19356_s28 + $0x380] ss:$48 sps:$4 sm:$0xff]  }
 0x4a5   : > { %3458 = vmatprep.subr.bf16.mxu0 %v16170_v47  ;;  %v16260_v47 = vld [vmem:[%s19356_s28 + $0x3e4] ss:$48 sps:$4 sm:$0xff]  }
 0x4a7   : > { %3293 = vmatpush1.bf16.msra.mxu1 %v16039_v21  ;;  %v16216_v21 = vld [vmem:[%s19356_s28 + $0x140] ss:$48 sps:$4 sm:$0xff]  }
 0x4a8   : > { %3294 = vmatprep.subr.bf16.mxu1 %v16044_v22  ;;  %3459 = vmatpush1.bf16.msra.mxu0 %v16168_v50  ;;  %v16224_v22 = vld [vmem:[%s19356_s28 + $0x1a4] ss:$48 sps:$4 sm:$0xff]   ;;  %v16258_v50 = vld [vmem:[%s19356_s28 + $0x3e0] ss:$48 sps:$4 sm:$0xff]  }
 0x4a9   : > { %3460 = vmatprep.subr.bf16.mxu0 %v16176_v51  ;;  %v16266_v51 = vld [vmem:[%s19356_s28 + $0x444] ss:$48 sps:$4 sm:$0xff]  }
 0x4ab   : > { %3295 = vmatpush1.bf16.msra.mxu1 %v16042_v23  ;;  %v16117_v23 = vld [vmem:[%s19356_s28 + $0x4e8] ss:$48 sps:$4 sm:$0xff]  }
 0x4ac   : > { %3323 = vmatprep.subr.bf16.mxu1 %v16047_v28  ;;  %3461 = vmatpush1.bf16.msra.mxu0 %v16174_v54  ;;  %v16131_v28 = vld [vmem:[%s19356_s28 + $0x5ac] ss:$48 sps:$4 sm:$0xff]   ;;  %v16264_v54 = vld [vmem:[%s19356_s28 + $0x440] ss:$48 sps:$4 sm:$0xff]  }
 0x4ad   : > { %3462 = vmatprep.subr.bf16.mxu0 %v16182_v55  ;;  %v16272_v55 = vld [vmem:[%s19356_s28 + $0x4a4] ss:$48 sps:$4 sm:$0xff]  }
 0x4ae   : > { %3313 = vmatmul.mubr.bf16.vlgmr.msra.gmra.mrb[0].mxu1 %v19492_v30 }
 0x4af   : > { %3324 = vmatpush1.bf16.msra.mxu1 %v16045_v32  ;;  %3355 = vmatprep.mubr.bf16.mxu1 %v19418_v20  ;;  %v16129_v32 = vld [vmem:[%s19356_s28 + $0x5a8] ss:$48 sps:$4 sm:$0xff]  }
 0x4b0   : > { %3325 = vmatprep.subr.bf16.mxu1 %v16050_v33  ;;  %3463 = vmatpush1.bf16.msra.mxu0 %v16180_v59  ;;  %v16137_v33 = vld [vmem:[%s19356_s28 + $0x60c] ss:$48 sps:$4 sm:$0xff]   ;;  %v16270_v59 = vld [vmem:[%s19356_s28 + $0x4a0] ss:$48 sps:$4 sm:$0xff]  }
 0x4b1   : > { %3464 = vmatprep.subr.bf16.mxu0 %v16185_v60  ;;  %v16171_v60 = vld [vmem:[%s19356_s28 + $0x848] ss:$48 sps:$4 sm:$0xff]  }
 0x4b3   : > { %3326 = vmatpush1.bf16.msra.mxu1 %v16048_v36  ;;  %v16135_v36 = vld [vmem:[%s19356_s28 + $0x608] ss:$48 sps:$4 sm:$0xff]  }
 0x4b4   : > { %3327 = vmatprep.subr.bf16.mxu1 %v16053_v37  ;;  %3465 = vmatpush1.bf16.msra.mxu0 %v16183_v63  ;;  %v16143_v37 = vld [vmem:[%s19356_s28 + $0x66c] ss:$48 sps:$4 sm:$0xff]   ;;  %v16276_v63 = vld [vmem:[%s19356_s28 + $0x500] ss:$48 sps:$4 sm:$0xff]  }
 0x4b5   : > { %3466 = vmatprep.subr.bf16.mxu0 %v16191_v1  ;;  %v16177_v1 = vld [vmem:[%s19356_s28 + $0x8a8] ss:$48 sps:$4 sm:$0xff]  }
 0x4b7   : > { %3328 = vmatpush1.bf16.msra.mxu1 %v16051_v40  ;;  %v16141_v40 = vld [vmem:[%s19356_s28 + $0x668] ss:$48 sps:$4 sm:$0xff]  }
 0x4b8   : > { %3329 = vmatprep.subr.bf16.mxu1 %v16059_v41  ;;  %3467 = vmatpush1.bf16.msra.mxu0 %v16189_v4  ;;  %v16149_v41 = vld [vmem:[%s19356_s28 + $0x6cc] ss:$48 sps:$4 sm:$0xff]   ;;  %v16282_v4 = vld [vmem:[%s19356_s28 + $0x560] ss:$48 sps:$4 sm:$0xff]  }
 0x4b9   : > { %3581 = vmatprep.subr.bf16.mxu0 %v16200_v5  ;;  %v16290_v5 = vld [vmem:[%s19356_s28 + $0x5c4] ss:$48 sps:$4 sm:$0xff]  }
 0x4bb   : > { %3330 = vmatpush1.bf16.msra.mxu1 %v16057_v44  ;;  %3485 = vmatmul.mubr.bf16.vlgmr.msra.gmra.mrb[0].mxu0 %v19492_v30  ;;  %v16147_v44 = vld [vmem:[%s19356_s28 + $0x6c8] ss:$48 sps:$4 sm:$0xff]  }
 0x4bc   : > { %3331 = vmatprep.subr.bf16.mxu1 %v16065_v45  ;;  %3582 = vmatpush1.bf16.msra.mxu0 %v16198_v8  ;;  %v16155_v45 = vld [vmem:[%s19356_s28 + $0x72c] ss:$48 sps:$4 sm:$0xff]   ;;  %v16288_v8 = vld [vmem:[%s19356_s28 + $0x5c0] ss:$48 sps:$4 sm:$0xff]  }
 0x4bd   : > { %3613 = vmatprep.mubr.bf16.mxu0 %v19418_v20  ;;  %3583 = vmatprep.subr.bf16.mxu0 %v16206_v9  ;;  %v16296_v9 = vld [vmem:[%s19356_s28 + $0x624] ss:$48 sps:$4 sm:$0xff]  }
 0x4bf   : > { %3332 = vmatpush1.bf16.msra.mxu1 %v16063_v48  ;;  %v16153_v48 = vld [vmem:[%s19356_s28 + $0x728] ss:$48 sps:$4 sm:$0xff]  }
 0x4c0   : > { %3333 = vmatprep.subr.bf16.mxu1 %v16071_v49  ;;  %3584 = vmatpush1.bf16.msra.mxu0 %v16204_v12  ;;  %v16161_v49 = vld [vmem:[%s19356_s28 + $0x78c] ss:$48 sps:$4 sm:$0xff]   ;;  %v16294_v12 = vld [vmem:[%s19356_s28 + $0x620] ss:$48 sps:$4 sm:$0xff]  }
 0x4c1   : > { %3585 = vmatprep.subr.bf16.mxu0 %v16212_v13  ;;  %v16302_v13 = vld [vmem:[%s19356_s28 + $0x684] ss:$48 sps:$4 sm:$0xff]  }
 0x4c3   : > { %3334 = vmatpush1.bf16.msra.mxu1 %v16069_v52  ;;  %v16159_v52 = vld [vmem:[%s19356_s28 + $0x788] ss:$48 sps:$4 sm:$0xff]  }
 0x4c4   : > { %3335 = vmatprep.subr.bf16.mxu1 %v16077_v53  ;;  %3586 = vmatpush1.bf16.msra.mxu0 %v16210_v16  ;;  %v16167_v53 = vld [vmem:[%s19356_s28 + $0x7ec] ss:$48 sps:$4 sm:$0xff]   ;;  %v16300_v16 = vld [vmem:[%s19356_s28 + $0x680] ss:$48 sps:$4 sm:$0xff]  }
 0x4c5   : > { %3587 = vmatprep.subr.bf16.mxu0 %v16218_v17  ;;  %v16308_v17 = vld [vmem:[%s19356_s28 + $0x6e4] ss:$48 sps:$4 sm:$0xff]  }
 0x4c7   : > { %3336 = vmatpush1.bf16.msra.mxu1 %v16075_v56  ;;  %v16165_v56 = vld [vmem:[%s19356_s28 + $0x7e8] ss:$48 sps:$4 sm:$0xff]  }
 0x4c8   : > { %3337 = vmatprep.subr.bf16.mxu1 %v16083_v58  ;;  %3588 = vmatpush1.bf16.msra.mxu0 %v16216_v21  ;;  %v16173_v58 = vld [vmem:[%s19356_s28 + $0x84c] ss:$48 sps:$4 sm:$0xff]   ;;  %v16306_v21 = vld [vmem:[%s19356_s28 + $0x6e0] ss:$48 sps:$4 sm:$0xff]  }
 0x4c9   : > { %3589 = vmatprep.subr.bf16.mxu0 %v16224_v22  ;;  %v16314_v22 = vld [vmem:[%s19356_s28 + $0x744] ss:$48 sps:$4 sm:$0xff]  }
 0x4cb   : > { %3338 = vmatpush1.bf16.msra.mxu1 %v16081_v61  ;;  %v16278_v61 = vld [vmem:[%s19356_s28 + $0x504] ss:$48 sps:$4 sm:$0xff]  }
 0x4cc   : > { %3339 = vmatprep.subr.bf16.mxu1 %v16089_v62  ;;  %3590 = vmatpush1.bf16.msra.mxu0 %v16222_v25  ;;  %v16179_v62 = vld [vmem:[%s19356_s28 + $0x8ac] ss:$48 sps:$4 sm:$0xff]   ;;  %v16312_v25 = vld [vmem:[%s19356_s28 + $0x740] ss:$48 sps:$4 sm:$0xff]  }
 0x4cd   : > { %3591 = vmatprep.subr.bf16.mxu0 %v16230_v26  ;;  %v16320_v26 = vld [vmem:[%s19356_s28 + $0x7a4] ss:$48 sps:$4 sm:$0xff]  }
 0x4cf   : > { %3340 = vmatpush1.bf16.msra.mxu1 %v16087_v2  ;;  %v16284_v2 = vld [vmem:[%s19356_s28 + $0x564] ss:$48 sps:$4 sm:$0xff]  }
 0x4d0   : > { %3341 = vmatprep.subr.bf16.mxu1 %v16095_v3  ;;  %3592 = vmatpush1.bf16.msra.mxu0 %v16228_v29  ;;  %v16188_v3 = vld [vmem:[%s19356_s28 + $0x1c] ss:$48 sps:$4 sm:$0xff]   ;;  %v16318_v29 = vld [vmem:[%s19356_s28 + $0x7a0] ss:$48 sps:$4 sm:$0xff]  }
 0x4d1   : > { %3593 = vmatprep.subr.bf16.mxu0 %v16236_v31  ;;  %v16326_v31 = vld [vmem:[%s19356_s28 + $0x804] ss:$48 sps:$4 sm:$0xff]  }
 0x4d3   : > { %3342 = vmatpush1.bf16.msra.mxu1 %v16093_v6  ;;  %v16186_v6 = vld [vmem:[%s19356_s28 + $0x18] ss:$48 sps:$4 sm:$0xff]  }
 0x4d4   : > { %3343 = vmatprep.subr.bf16.mxu1 %v16101_v7  ;;  %3594 = vmatpush1.bf16.msra.mxu0 %v16234_v34  ;;  %v16194_v7 = vld [vmem:[%s19356_s28 + $0x7c] ss:$48 sps:$4 sm:$0xff]   ;;  %v16324_v34 = vld [vmem:[%s19356_s28 + $0x800] ss:$48 sps:$4 sm:$0xff]  }
 0x4d5   : > { %3595 = vmatprep.subr.bf16.mxu0 %v16242_v35  ;;  %v16329_v35 = vld [vmem:[%s19356_s28 + $0x864] ss:$48 sps:$4 sm:$0xff]  }
 0x4d7   : > { %3344 = vmatpush1.bf16.msra.mxu1 %v16099_v10  ;;  %v16192_v10 = vld [vmem:[%s19356_s28 + $0x78] ss:$48 sps:$4 sm:$0xff]  }
 0x4d8   : > { %3345 = vmatprep.subr.bf16.mxu1 %v16107_v11  ;;  %3596 = vmatpush1.bf16.msra.mxu0 %v16240_v38  ;;  %v16197_v11 = vld [vmem:[%s19356_s28 + $0xdc] ss:$48 sps:$4 sm:$0xff]   ;;  %v16327_v38 = vld [vmem:[%s19356_s28 + $0x860] ss:$48 sps:$4 sm:$0xff]  }
 0x4d9   : > { %3597 = vmatprep.subr.bf16.mxu0 %v16248_v39  ;;  %v16335_v39 = vld [vmem:[%s19356_s28 + $0x8c4] ss:$48 sps:$4 sm:$0xff]  }
 0x4db   : > { %3346 = vmatpush1.bf16.msra.mxu1 %v16105_v14  ;;  %v16195_v14 = vld [vmem:[%s19356_s28 + $0xd8] ss:$48 sps:$4 sm:$0xff]  }
 0x4dc   : > { %3347 = vmatprep.subr.bf16.mxu1 %v16113_v15  ;;  %3598 = vmatpush1.bf16.msra.mxu0 %v16246_v42  ;;  %v16203_v15 = vld [vmem:[%s19356_s28 + $0x13c] ss:$48 sps:$4 sm:$0xff]   ;;  %v16333_v42 = vld [vmem:[%s19356_s28 + $0x8c0] ss:$48 sps:$4 sm:$0xff]  }
 0x4dd   : > { %3599 = vmatprep.subr.bf16.mxu0 %v16254_v43  ;;  %v16237_v43 = vld [vmem:[%s19356_s28 + $0x378] ss:$48 sps:$4 sm:$0xff]  }
 0x4df   : > { %3348 = vmatpush1.bf16.msra.mxu1 %v16111_v18  ;;  %v16201_v18 = vld [vmem:[%s19356_s28 + $0x138] ss:$48 sps:$4 sm:$0xff]  }
 0x4e0   : > { %3349 = vmatprep.subr.bf16.mxu1 %v16119_v19  ;;  %3600 = vmatpush1.bf16.msra.mxu0 %v16252_v46  ;;  %v16209_v19 = vld [vmem:[%s19356_s28 + $0x19c] ss:$48 sps:$4 sm:$0xff]  }
 0x4e1   : > { %3601 = vmatprep.subr.bf16.mxu0 %v16260_v47  ;;  %v16251_v46 = vld [vmem:[%s19356_s28 + $0x43c] ss:$48 sps:$4 sm:$0xff]   ;;  %v16249_v47 = vld [vmem:[%s19356_s28 + $0x438] ss:$48 sps:$4 sm:$0xff]  }
 0x4e3   : > { %3350 = vmatpush1.bf16.msra.mxu1 %v16117_v23  ;;  %v16207_v23 = vld [vmem:[%s19356_s28 + $0x198] ss:$48 sps:$4 sm:$0xff]  }
 0x4e4   : > { %3351 = vmatprep.subr.bf16.mxu1 %v16125_v24  ;;  %3602 = vmatpush1.bf16.msra.mxu0 %v16258_v50  ;;  %v16215_v24 = vld [vmem:[%s19356_s28 + $0x1fc] ss:$48 sps:$4 sm:$0xff]  }
 0x4e5   : > { %3603 = vmatprep.subr.bf16.mxu0 %v16266_v51  ;;  %v16263_v50 = vld [vmem:[%s19356_s28 + $0x4fc] ss:$48 sps:$4 sm:$0xff]   ;;  %v16261_v51 = vld [vmem:[%s19356_s28 + $0x4f8] ss:$48 sps:$4 sm:$0xff]  }
 0x4e7   : > { %3352 = vmatpush1.bf16.msra.mxu1 %v16123_v27  ;;  %v16213_v27 = vld [vmem:[%s19356_s28 + $0x1f8] ss:$48 sps:$4 sm:$0xff]  }
 0x4e8   : > { %3353 = vmatprep.subr.bf16.mxu1 %v16131_v28  ;;  %3604 = vmatpush1.bf16.msra.mxu0 %v16264_v54  ;;  %v16221_v28 = vld [vmem:[%s19356_s28 + $0x25c] ss:$48 sps:$4 sm:$0xff]  }
 0x4e9   : > { %3605 = vmatprep.subr.bf16.mxu0 %v16272_v55  ;;  %v16275_v54 = vld [vmem:[%s19356_s28 + $0x5bc] ss:$48 sps:$4 sm:$0xff]   ;;  %v16273_v55 = vld [vmem:[%s19356_s28 + $0x5b8] ss:$48 sps:$4 sm:$0xff]  }
 0x4eb   : > { %3354 = vmatpush1.bf16.msra.mxu1 %v16129_v32  ;;  %v16219_v32 = vld [vmem:[%s19356_s28 + $0x258] ss:$48 sps:$4 sm:$0xff]  }
 0x4ec   : > { %3366 = vmatprep.subr.bf16.mxu1 %v16137_v33  ;;  %3606 = vmatpush1.bf16.msra.mxu0 %v16270_v59  ;;  %v16227_v33 = vld [vmem:[%s19356_s28 + $0x2bc] ss:$48 sps:$4 sm:$0xff]  }
 0x4ed   : > { %3607 = vmatprep.subr.bf16.mxu0 %v16278_v61  ;;  %v16287_v59 = vld [vmem:[%s19356_s28 + $0x67c] ss:$48 sps:$4 sm:$0xff]  }
 0x4ee   : > { %3356 = vmatmul.mubr.bf16.vlgmr.msra.gmra.mrb[4].mxu1 %v19456_v57  ;;  %v16293_v61 = vld [vmem:[%s19356_s28 + $0x6dc] ss:$48 sps:$4 sm:$0xff]  }
 0x4ef   : > { %3367 = vmatpush1.bf16.msra.mxu1 %v16135_v36  ;;  %3398 = vmatprep.mubr.bf16.mxu1 %v18512_v0  ;;  %v16225_v36 = vld [vmem:[%s19356_s28 + $0x2b8] ss:$48 sps:$4 sm:$0xff]  }
 0x4f0   : > { %3368 = vmatprep.subr.bf16.mxu1 %v16143_v37  ;;  %3608 = vmatpush1.bf16.msra.mxu0 %v16276_v63  ;;  %v16233_v37 = vld [vmem:[%s19356_s28 + $0x31c] ss:$48 sps:$4 sm:$0xff]  }
 0x4f1   : > { %3609 = vmatprep.subr.bf16.mxu0 %v16284_v2  ;;  %v16299_v63 = vld [vmem:[%s19356_s28 + $0x73c] ss:$48 sps:$4 sm:$0xff]  }
 0x4f2   : > { %v16305_v2 = vld [vmem:[%s19356_s28 + $0x79c] ss:$48 sps:$4 sm:$0xff]  }
 0x4f3   : > { %3369 = vmatpush1.bf16.msra.mxu1 %v16141_v40  ;;  %v16231_v40 = vld [vmem:[%s19356_s28 + $0x318] ss:$48 sps:$4 sm:$0xff]  }
 0x4f4   : > { %3370 = vmatprep.subr.bf16.mxu1 %v16149_v41  ;;  %3610 = vmatpush1.bf16.msra.mxu0 %v16282_v4  ;;  %v16239_v41 = vld [vmem:[%s19356_s28 + $0x37c] ss:$48 sps:$4 sm:$0xff]  }
 0x4f5   : > { %3611 = vmatprep.subr.bf16.mxu0 %v16290_v5  ;;  %v16311_v4 = vld [vmem:[%s19356_s28 + $0x7fc] ss:$48 sps:$4 sm:$0xff]   ;;  %v16309_v5 = vld [vmem:[%s19356_s28 + $0x7f8] ss:$48 sps:$4 sm:$0xff]  }
 0x4f7   : > { %3371 = vmatpush1.bf16.msra.mxu1 %v16147_v44  ;;  %v16245_v44 = vld [vmem:[%s19356_s28 + $0x3dc] ss:$48 sps:$4 sm:$0xff]  }
 0x4f8   : > { %3372 = vmatprep.subr.bf16.mxu1 %v16155_v45  ;;  %3612 = vmatpush1.bf16.msra.mxu0 %v16288_v8  ;;  %v16243_v45 = vld [vmem:[%s19356_s28 + $0x3d8] ss:$48 sps:$4 sm:$0xff]   ;;  %v16323_v8 = vld [vmem:[%s19356_s28 + $0x8bc] ss:$48 sps:$4 sm:$0xff]  }
 0x4f9   : > { %3624 = vmatprep.subr.bf16.mxu0 %v16296_v9  ;;  %v16321_v9 = vld [vmem:[%s19356_s28 + $0x8b8] ss:$48 sps:$4 sm:$0xff]  }
 0x4fb   : > { %3373 = vmatpush1.bf16.msra.mxu1 %v16153_v48  ;;  %3614 = vmatmul.mubr.bf16.vlgmr.msra.gmra.mrb[4].mxu0 %v19456_v57  ;;  %v16257_v48 = vld [vmem:[%s19356_s28 + $0x49c] ss:$48 sps:$4 sm:$0xff]  }
 0x4fc   : > { %3374 = vmatprep.subr.bf16.mxu1 %v16161_v49  ;;  %3625 = vmatpush1.bf16.msra.mxu0 %v16294_v12  ;;  %v16255_v49 = vld [vmem:[%s19356_s28 + $0x498] ss:$48 sps:$4 sm:$0xff]   ;;  %v16338_v12 = vld [vmem:[%s19356_s28 + $0x8c] ss:$48 sps:$4 sm:$0xff]  }
 0x4fd   : > { %3656 = vmatprep.mubr.bf16.mxu0 %v18512_v0  ;;  %3626 = vmatprep.subr.bf16.mxu0 %v16302_v13  ;;  %v16336_v13 = vld [vmem:[%s19356_s28 + $0x88] ss:$48 sps:$4 sm:$0xff]  }
 0x4ff   : > { %3375 = vmatpush1.bf16.msra.mxu1 %v16159_v52  ;;  %v16269_v52 = vld [vmem:[%s19356_s28 + $0x55c] ss:$48 sps:$4 sm:$0xff]  }
 0x500   : > { %3376 = vmatprep.subr.bf16.mxu1 %v16167_v53  ;;  %3627 = vmatpush1.bf16.msra.mxu0 %v16300_v16  ;;  %v16267_v53 = vld [vmem:[%s19356_s28 + $0x558] ss:$48 sps:$4 sm:$0xff]   ;;  %v16344_v16 = vld [vmem:[%s19356_s28 + $0x14c] ss:$48 sps:$4 sm:$0xff]  }
 0x501   : > { %3628 = vmatprep.subr.bf16.mxu0 %v16308_v17  ;;  %v1737_v17 = vlaneseq }
 0x503   : > { %3377 = vmatpush1.bf16.msra.mxu1 %v16165_v56  ;;  %v16281_v56 = vld [vmem:[%s19356_s28 + $0x61c] ss:$48 sps:$4 sm:$0xff]  }
 0x504   : > { %3378 = vmatprep.subr.bf16.mxu1 %v16173_v58  ;;  %3629 = vmatpush1.bf16.msra.mxu0 %v16306_v21  ;;  %v16279_v58 = vld [vmem:[%s19356_s28 + $0x618] ss:$48 sps:$4 sm:$0xff]   ;;  %v19681_v21 = vshrl.u32 %v1737_v17, 7  ;;  %v16389_v17 = vld [vmem:[%s19356_s28 + $0x6ec] ss:$48 sps:$4 sm:$0xff]  }
 0x505   : > { %3630 = vmatprep.subr.bf16.mxu0 %v16314_v22  ;;  %v16345_v22 = vld [vmem:[%s19356_s28 + $0x1a8] ss:$48 sps:$4 sm:$0xff]  }
 0x507   : > { %3379 = vmatpush1.bf16.msra.mxu1 %v16171_v60  ;;  %v16285_v60 = vld [vmem:[%s19356_s28 + $0x678] ss:$48 sps:$4 sm:$0xff]  }
 0x508   : > { %3380 = vmatprep.subr.bf16.mxu1 %v16179_v62  ;;  %3631 = vmatpush1.bf16.msra.mxu0 %v16312_v25  ;;  %v16291_v62 = vld [vmem:[%s19356_s28 + $0x6d8] ss:$48 sps:$4 sm:$0xff]   ;;  %v19690_v25 = vsub.s32 0, %v19681_v21 }
 0x509   : > { %3632 = vmatprep.subr.bf16.mxu0 %v16320_v26  ;;  %v19693_v26 = vsub.s32 1, %v19681_v21 }
 0x50b   : > { %3381 = vmatpush1.bf16.msra.mxu1 %v16177_v1  ;;  %v16297_v1 = vld [vmem:[%s19356_s28 + $0x738] ss:$48 sps:$4 sm:$0xff]  }
 0x50c   : > { %3495 = vmatprep.subr.bf16.mxu1 %v16188_v3  ;;  %3633 = vmatpush1.bf16.msra.mxu0 %v16318_v29  ;;  %v16303_v3 = vld [vmem:[%s19356_s28 + $0x798] ss:$48 sps:$4 sm:$0xff]  }
 0x50d   : > { %3634 = vmatprep.subr.bf16.mxu0 %v16326_v31 }
 0x50e   : > { %3399 = vmatmul.mubr.bf16.vlgmr.msra.gmra.mrb[4].mxu1 %v19492_v30 }
 0x50f   : > { %3496 = vmatpush1.bf16.msra.mxu1 %v16186_v6  ;;  %3527 = vmatprep.mubr.bf16.mxu1 %v19418_v20  ;;  %v16317_v6 = vld [vmem:[%s19356_s28 + $0x85c] ss:$48 sps:$4 sm:$0xff]  }
 0x510   : > { %3497 = vmatprep.subr.bf16.mxu1 %v16194_v7  ;;  %3635 = vmatpush1.bf16.msra.mxu0 %v16324_v34  ;;  %v16315_v7 = vld [vmem:[%s19356_s28 + $0x858] ss:$48 sps:$4 sm:$0xff]  }
 0x511   : > { %3636 = vmatprep.subr.bf16.mxu0 %v16329_v35  ;;  %v16356_v35 = vld [vmem:[%s19356_s28 + $0x2cc] ss:$48 sps:$4 sm:$0xff]  }
 0x513   : > { %3498 = vmatpush1.bf16.msra.mxu1 %v16192_v10  ;;  %v16332_v10 = vld [vmem:[%s19356_s28 + $0x2c] ss:$48 sps:$4 sm:$0xff]  }
 0x514   : > { %3499 = vmatprep.subr.bf16.mxu1 %v16197_v11  ;;  %3637 = vmatpush1.bf16.msra.mxu0 %v16327_v38  ;;  %v16330_v11 = vld [vmem:[%s19356_s28 + $0x28] ss:$48 sps:$4 sm:$0xff]  }
 0x515   : > { %3638 = vmatprep.subr.bf16.mxu0 %v16335_v39 }
 0x517   : > { %3500 = vmatpush1.bf16.msra.mxu1 %v16195_v14  ;;  %v16341_v14 = vld [vmem:[%s19356_s28 + $0xec] ss:$48 sps:$4 sm:$0xff]  }
 0x518   : > { %3501 = vmatprep.subr.bf16.mxu1 %v16203_v15  ;;  %3639 = vmatpush1.bf16.msra.mxu0 %v16333_v42  ;;  %v16339_v15 = vld [vmem:[%s19356_s28 + $0xe8] ss:$48 sps:$4 sm:$0xff]  }
 0x519   : > { %v16354_v42 = vld [vmem:[%s19356_s28 + $0x2c8] ss:$48 sps:$4 sm:$0xff]  }
 0x51b   : > { %3502 = vmatpush1.bf16.msra.mxu1 %v16201_v18  ;;  %3657 = vmatmul.mubr.bf16.vlgmr.msra.gmra.mrb[4].mxu0 %v19492_v30  ;;  %v16342_v18 = vld [vmem:[%s19356_s28 + $0x148] ss:$48 sps:$4 sm:$0xff]  }
 0x51c   : > { %3503 = vmatprep.subr.bf16.mxu1 %v16209_v19  ;;  %v16347_v19 = vld [vmem:[%s19356_s28 + $0x1ac] ss:$48 sps:$4 sm:$0xff]  }
 0x51f   : > { %3504 = vmatpush1.bf16.msra.mxu1 %v16207_v23  ;;  %v16350_v23 = vld [vmem:[%s19356_s28 + $0x20c] ss:$48 sps:$4 sm:$0xff]  }
 0x520   : > { %3505 = vmatprep.subr.bf16.mxu1 %v16215_v24  ;;  %v19686_v24 = vld [vmem:[%s19364_s10] sm:$0xff] }
 0x521   : > { %v1740_v29 = vrot.slane %v19686_v24, %v19690_v25 }
 0x523   : > { %3506 = vmatpush1.bf16.msra.mxu1 %v16213_v27  ;;  %v16348_v27 = vld [vmem:[%s19356_s28 + $0x208] ss:$48 sps:$4 sm:$0xff]  }
 0x524   : > { %3507 = vmatprep.subr.bf16.mxu1 %v16221_v28  ;;  %v16353_v28 = vld [vmem:[%s19356_s28 + $0x26c] ss:$48 sps:$4 sm:$0xff]  }
 0x527   : > { %3508 = vmatpush1.bf16.msra.mxu1 %v16219_v32  ;;  %v1744_v32 = vrot.slane %v19686_v24, %v19693_v26 }
 0x528   : > { %3509 = vmatprep.subr.bf16.mxu1 %v16227_v33  ;;  %v16351_v33 = vld [vmem:[%s19356_s28 + $0x268] ss:$48 sps:$4 sm:$0xff]  }
 0x52b   : > { %3510 = vmatpush1.bf16.msra.mxu1 %v16225_v36 }
 0x52c   : > { %3511 = vmatprep.subr.bf16.mxu1 %v16233_v37 }
 0x52f   : > { %3512 = vmatpush1.bf16.msra.mxu1 %v16231_v40 }
 0x530   : > { %3513 = vmatprep.subr.bf16.mxu1 %v16239_v41 }
 0x533   : > { %3514 = vmatpush1.bf16.msra.mxu1 %v16237_v43 }
 0x534   : > { %3515 = vmatprep.subr.bf16.mxu1 %v16245_v44  ;;  %v16359_v44 = vld [vmem:[%s19356_s28 + $0x32c] ss:$48 sps:$4 sm:$0xff]  }
 0x537   : > { %3516 = vmatpush1.bf16.msra.mxu1 %v16243_v45 }
 0x538   : > { %3517 = vmatprep.subr.bf16.mxu1 %v16251_v46  ;;  %v16357_v46 = vld [vmem:[%s19356_s28 + $0x328] ss:$48 sps:$4 sm:$0xff]  }
 0x53b   : > { %3518 = vmatpush1.bf16.msra.mxu1 %v16249_v47  ;;  %v16362_v47 = vld [vmem:[%s19356_s28 + $0x38c] ss:$48 sps:$4 sm:$0xff]  }
 0x53c   : > { %3519 = vmatprep.subr.bf16.mxu1 %v16257_v48  ;;  %v16360_v48 = vld [vmem:[%s19356_s28 + $0x388] ss:$48 sps:$4 sm:$0xff]  }
 0x53f   : > { %3520 = vmatpush1.bf16.msra.mxu1 %v16255_v49  ;;  %v16365_v49 = vld [vmem:[%s19356_s28 + $0x3ec] ss:$48 sps:$4 sm:$0xff]  }
 0x540   : > { %3521 = vmatprep.subr.bf16.mxu1 %v16263_v50  ;;  %v16363_v50 = vld [vmem:[%s19356_s28 + $0x3e8] ss:$48 sps:$4 sm:$0xff]  }
 0x543   : > { %3522 = vmatpush1.bf16.msra.mxu1 %v16261_v51  ;;  %v16368_v51 = vld [vmem:[%s19356_s28 + $0x44c] ss:$48 sps:$4 sm:$0xff]  }
 0x544   : > { %3523 = vmatprep.subr.bf16.mxu1 %v16269_v52  ;;  %v16366_v52 = vld [vmem:[%s19356_s28 + $0x448] ss:$48 sps:$4 sm:$0xff]  }
 0x547   : > { %3524 = vmatpush1.bf16.msra.mxu1 %v16267_v53  ;;  %v16371_v53 = vld [vmem:[%s19356_s28 + $0x4ac] ss:$48 sps:$4 sm:$0xff]  }
 0x548   : > { %3525 = vmatprep.subr.bf16.mxu1 %v16275_v54  ;;  %v16369_v54 = vld [vmem:[%s19356_s28 + $0x4a8] ss:$48 sps:$4 sm:$0xff]  }
 0x54b   : > { %3526 = vmatpush1.bf16.msra.mxu1 %v16273_v55  ;;  %v16374_v55 = vld [vmem:[%s19356_s28 + $0x50c] ss:$48 sps:$4 sm:$0xff]  }
 0x54c   : > { %3538 = vmatprep.subr.bf16.mxu1 %v16281_v56  ;;  %v16372_v56 = vld [vmem:[%s19356_s28 + $0x508] ss:$48 sps:$4 sm:$0xff]  }
 0x54e   : > { %3528 = vmatmul.mubr.bf16.vlgmr.msra.gmra.mrb[8].mxu1 %v19456_v57 }
 0x54f   : > { %3539 = vmatpush1.bf16.msra.mxu1 %v16279_v58  ;;  %3570 = vmatprep.mubr.bf16.mxu1 %v18512_v0  ;;  %v16377_v58 = vld [vmem:[%s19356_s28 + $0x56c] ss:$48 sps:$4 sm:$0xff]  }
 0x550   : > { %3540 = vmatprep.subr.bf16.mxu1 %v16287_v59  ;;  %v1755_v59 = vsub.s32 4, %v19681_v21 }
 0x553   : > { %3541 = vmatpush1.bf16.msra.mxu1 %v16285_v60  ;;  %v16375_v60 = vld [vmem:[%s19356_s28 + $0x568] ss:$48 sps:$4 sm:$0xff]  }
 0x554   : > { %3542 = vmatprep.subr.bf16.mxu1 %v16293_v61  ;;  %v1759_v61 = vsub.s32 5, %v19681_v21 }
 0x557   : > { %3543 = vmatpush1.bf16.msra.mxu1 %v16291_v62  ;;  %v16380_v62 = vld [vmem:[%s19356_s28 + $0x5cc] ss:$48 sps:$4 sm:$0xff]  }
 0x558   : > { %3544 = vmatprep.subr.bf16.mxu1 %v16299_v63  ;;  %v1756_v63 = vrot.slane %v19686_v24, %v1755_v59 }
 0x55b   : > { %3545 = vmatpush1.bf16.msra.mxu1 %v16297_v1  ;;  %v16378_v1 = vld [vmem:[%s19356_s28 + $0x5c8] ss:$48 sps:$4 sm:$0xff]  }
 0x55c   : > { %3546 = vmatprep.subr.bf16.mxu1 %v16305_v2  ;;  %v1760_v2 = vrot.slane %v19686_v24, %v1759_v61 }
 0x55f   : > { %3547 = vmatpush1.bf16.msra.mxu1 %v16303_v3  ;;  %v16383_v3 = vld [vmem:[%s19356_s28 + $0x62c] ss:$48 sps:$4 sm:$0xff]  }
 0x560   : > { %3548 = vmatprep.subr.bf16.mxu1 %v16311_v4 }
 0x563   : > { %3549 = vmatpush1.bf16.msra.mxu1 %v16309_v5 }
 0x564   : > { %3550 = vmatprep.subr.bf16.mxu1 %v16317_v6 }
 0x567   : > { %3551 = vmatpush1.bf16.msra.mxu1 %v16315_v7  ;;  %v16381_v7 = vld [vmem:[%s19356_s28 + $0x628] ss:$48 sps:$4 sm:$0xff]  }
 0x568   : > { %3552 = vmatprep.subr.bf16.mxu1 %v16323_v8 }
 0x56b   : > { %3553 = vmatpush1.bf16.msra.mxu1 %v16321_v9 }
 0x56c   : > { %3667 = vmatprep.subr.bf16.mxu1 %v16332_v10  ;;  %v16386_v10 = vld [vmem:[%s19356_s28 + $0x68c] ss:$48 sps:$4 sm:$0xff]  }
 0x56e   : > { %3571 = vmatmul.mubr.bf16.vlgmr.msra.gmra.mrb[8].mxu1 %v19492_v30 }
 0x56f   : > { %3668 = vmatpush1.bf16.msra.mxu1 %v16330_v11  ;;  %3699 = vmatprep.mubr.bf16.mxu1 %v19418_v20  ;;  %v18513_v20 = vmov 0.0  }
 0x570   : > { %3669 = vmatprep.subr.bf16.mxu1 %v16338_v12  ;;  %15229 = vmatprep.subr.bf16.mxu0 %v18513_v20 }
 0x571   : > { %15231 = vmatprep.mubr.msk.bf16.mxu0 %vm18514_vm0, %v18513_v20 }
 0x573   : > { %3670 = vmatpush1.bf16.msra.mxu1 %v16336_v13 }
 0x574   : > { %3671 = vmatprep.subr.bf16.mxu1 %v16341_v14 }
 0x577   : > { %3672 = vmatpush1.bf16.msra.mxu1 %v16339_v15  ;;  %v16384_v15 = vld [vmem:[%s19356_s28 + $0x688] ss:$48 sps:$4 sm:$0xff]  }
 0x578   : > { %3673 = vmatprep.subr.bf16.mxu1 %v16344_v16 }
 0x57b   : > { %3674 = vmatpush1.bf16.msra.mxu1 %v16342_v18  ;;  %v16387_v18 = vld [vmem:[%s19356_s28 + $0x6e8] ss:$48 sps:$4 sm:$0xff]  }
 0x57c   : > { %3675 = vmatprep.subr.bf16.mxu1 %v16347_v19  ;;  %v16392_v19 = vld [vmem:[%s19356_s28 + $0x74c] ss:$48 sps:$4 sm:$0xff]  }
 0x57f   : > { %3676 = vmatpush1.bf16.msra.mxu1 %v16345_v22  ;;  %v16390_v22 = vld [vmem:[%s19356_s28 + $0x748] ss:$48 sps:$4 sm:$0xff]  }
 0x580   : > { %3677 = vmatprep.subr.bf16.mxu1 %v16350_v23  ;;  %v16395_v23 = vld [vmem:[%s19356_s28 + $0x7ac] ss:$48 sps:$4 sm:$0xff]  }
 0x581   : > { %v3314_v31 = vpop.f32.mrb[0].mxu1 }
 0x582   : > { %v3316_v34 = vpop.f32.mrb[1].mxu1  ;;  %v15509_v37 = vadd.f32 %v3314_v31, %v1740_v29  ;;  %v16399_v31 = vld [vmem:[%s19356_s28 + $0x868] ss:$48 sps:$4 sm:$0xff]  }
 0x583   : > { %v3318_v36 = vpop.f32.mrb[2].mxu1  ;;  %3678 = vmatpush1.bf16.msra.mxu1 %v16348_v27  ;;  %v15510_v40 = vadd.f32 %v3316_v34, %v1744_v32  ;;  %v16398_v27 = vld [vmem:[%s19356_s28 + $0x80c] ss:$48 sps:$4 sm:$0xff]   ;;  %v19767_v34 = vsub.s32 2, %v19681_v21 }
 0x584   : > { %v15511_v38 = vadd.f32 %v3318_v36, %v1740_v29  ;;  %v3320_v39 = vpop.f32.mrb[3].mxu1  ;;  %3679 = vmatprep.subr.bf16.mxu1 %v16353_v28  ;;  %v16396_v28 = vld [vmem:[%s19356_s28 + $0x808] ss:$48 sps:$4 sm:$0xff]   ;;  %v16401_v29 = vld [vmem:[%s19356_s28 + $0x86c] ss:$48 sps:$4 sm:$0xff]  }
 0x585   : > { %v15512_v41 = vadd.f32 %v3320_v39, %v1744_v32  ;;  %v16404_v32 = vld [vmem:[%s19356_s28 + $0x8cc] ss:$48 sps:$4 sm:$0xff]   ;;  %v1748_v36 = vrot.slane %v19686_v24, %v19767_v34 }
 0x586   : > { %v19706_v43 = vpack.c.bf16 %v15511_v38, %v15509_v37 }
 0x587   : > { %v19709_v45 = vpack.c.bf16 %v15512_v41, %v15510_v40  ;;  %3680 = vmatpush1.bf16.msra.mxu1 %v16351_v33  ;;  %v16402_v33 = vld [vmem:[%s19356_s28 + $0x8c8] ss:$48 sps:$4 sm:$0xff]  }
 0x588   : > { %3766 = vrot.lane.b32.xlu0 %v19706_v43, %s18515_s29  ;;  %3681 = vmatprep.subr.bf16.mxu1 %v16356_v35  ;;  %v19770_v35 = vsub.s32 3, %v19681_v21 }
 0x58a   : > { %v1752_v38 = vrot.slane %v19686_v24, %v19770_v35 }
 0x58b   : > { %3682 = vmatpush1.bf16.msra.mxu1 %v16354_v42 }
 0x58c   : > { %3817 = vrot.lane.b32.xlu0 %v19709_v45, %s18515_s29  ;;  %3683 = vmatprep.subr.bf16.mxu1 %v16359_v44 }
 0x58e   : > { %v3486_v4 = vpop.f32.mrb[0].mxu0 }
 0x58f   : > { %3684 = vmatpush1.bf16.msra.mxu1 %v16357_v46  ;;  %v15517_v5 = vadd.f32 %v3486_v4, %v1756_v63  ;;  %v3488_v6 = vpop.f32.mrb[1].mxu0 }
 0x590   : > { %3685 = vmatprep.subr.bf16.mxu1 %v16362_v47  ;;  %v15518_v8 = vadd.f32 %v3488_v6, %v1760_v2  ;;  %v3490_v9 = vpop.f32.mrb[2].mxu0  ;;  %v1767_v6 = vsub.s32 7, %v19681_v21 }
 0x591   : > { %v15519_v11 = vadd.f32 %v3490_v9, %v1756_v63  ;;  %v3492_v12 = vpop.f32.mrb[3].mxu0 }
 0x592   : > { %v15520_v13 = vadd.f32 %v3492_v12, %v1760_v2 }
 0x593   : > { %3686 = vmatpush1.bf16.msra.mxu1 %v16360_v48  ;;  %v19741_v14 = vpack.c.bf16 %v15519_v11, %v15517_v5  ;;  %v1763_v5 = vsub.s32 6, %v19681_v21 }
 0x594   : > { %3687 = vmatprep.subr.bf16.mxu1 %v16365_v49  ;;  %v19744_v16 = vpack.c.bf16 %v15520_v13, %v15518_v8 }
 0x595   : > { %3967 = vrot.lane.b32.xlu0 %v19741_v14, %s18515_s29 }
 0x597   : > { %3688 = vmatpush1.bf16.msra.mxu1 %v16363_v50 }
 0x598   : > { %3689 = vmatprep.subr.bf16.mxu1 %v16368_v51 }
 0x59b   : > { %3690 = vmatpush1.bf16.msra.mxu1 %v16366_v52  ;;  %v19790_v52 = vld [vmem:[%s19364_s10 + $0x8] sm:$0xf] }
 0x59c   : > { %3691 = vmatprep.subr.bf16.mxu1 %v16371_v53  ;;  %v1772_v53 = vrot.slane %v19790_v52, %v19690_v25 }
 0x59f   : > { %3692 = vmatpush1.bf16.msra.mxu1 %v16369_v54  ;;  %v1776_v54 = vrot.slane %v19790_v52, %v19693_v26 }
 0x5a0   : > { %3693 = vmatprep.subr.bf16.mxu1 %v16374_v55 }
 0x5a3   : > { %3694 = vmatpush1.bf16.msra.mxu1 %v16372_v56 }
 0x5a4   : > { %3695 = vmatprep.subr.bf16.mxu1 %v16377_v58 }
 0x5a7   : > { %3696 = vmatpush1.bf16.msra.mxu1 %v16375_v60 }
 0x5a8   : > { %3697 = vmatprep.subr.bf16.mxu1 %v16380_v62 }
 0x5ab   : > { %3698 = vmatpush1.bf16.msra.mxu1 %v16378_v1 }
 0x5ac   : > { %3710 = vmatprep.subr.bf16.mxu1 %v16383_v3 }
 0x5ae   : > { %3700 = vmatmul.mubr.bf16.vlgmr.msra.gmra.mrb[12].mxu1 %v19456_v57  ;;  %v16393_v57 = vld [vmem:[%s19356_s28 + $0x7a8] ss:$48 sps:$4 sm:$0xff]  }
 0x5af   : > { %3711 = vmatpush1.bf16.msra.mxu1 %v16381_v7  ;;  %3742 = vmatprep.mubr.bf16.mxu1 %v18512_v0  ;;  %v17469_v7 = vld [vmem:[%s19364_s10] sm:$0xff] }
 0x5b0   : > { %3712 = vmatprep.subr.bf16.mxu1 %v16386_v10  ;;  %v1764_v8 = vrot.slane %v17469_v7, %v1763_v5  ;;  %v1768_v9 = vrot.slane %v17469_v7, %v1767_v6 }
 0x5b3   : > { %3713 = vmatpush1.bf16.msra.mxu1 %v16384_v15 }
 0x5b4   : > { %3714 = vmatprep.subr.bf16.mxu1 %v16389_v17 }
 0x5b7   : > { %3715 = vmatpush1.bf16.msra.mxu1 %v16387_v18 }
 0x5b8   : > { %3716 = vmatprep.subr.bf16.mxu1 %v16392_v19 }
 0x5bb   : > { %3717 = vmatpush1.bf16.msra.mxu1 %v16390_v22 }
 0x5bc   : > { %3718 = vmatprep.subr.bf16.mxu1 %v16395_v23 }
 0x5bf   : > { %3719 = vmatpush1.bf16.msra.mxu1 %v16393_v57 }
 0x5c0   : > { %3720 = vmatprep.subr.bf16.mxu1 %v16398_v27 }
 0x5c3   : > { %3721 = vmatpush1.bf16.msra.mxu1 %v16396_v28 }
 0x5c4   : > { %3722 = vmatprep.subr.bf16.mxu1 %v16401_v29 }
 0x5c7   : > { %3723 = vmatpush1.bf16.msra.mxu1 %v16399_v31 }
 0x5c8   : > { %3724 = vmatprep.subr.bf16.mxu1 %v16404_v32 }
 0x5cb   : > { %3725 = vmatpush1.bf16.msra.mxu1 %v16402_v33 }
 0x5cc   : > { %15235 = vmatprep.subr.bf16.mxu1 %v18513_v20 }
 0x5ce   : > { %3743 = vmatmul.mubr.bf16.vlgmr.msra.gmra.mrb[12].mxu1 %v19492_v30 }
 0x5cf   : > { %15237 = vmatprep.mubr.msk.bf16.mxu1 %vm18514_vm0, %v18513_v20 }
 0x5e1   : > { %v3400_v37 = vpop.f32.mrb[4].mxu1 }
 0x5e2   : > { %v3402_v39 = vpop.f32.mrb[5].mxu1  ;;  %v15513_v41 = vadd.f32 %v3400_v37, %v1748_v36  ;;  %v1780_v37 = vrot.slane %v19790_v52, %v19767_v34 }
 0x5e3   : > { %v3404_v40 = vpop.f32.mrb[6].mxu1  ;;  %v15514_v44 = vadd.f32 %v3402_v39, %v1752_v38 }
 0x5e4   : > { %v15515_v30 = vadd.f32 %v3404_v40, %v1748_v36  ;;  %v3406_v42 = vpop.f32.mrb[7].mxu1 }
 0x5e5   : > { %v15516_v46 = vadd.f32 %v3406_v42, %v1752_v38  ;;  %v1784_v38 = vrot.slane %v19790_v52, %v19770_v35 }
 0x5e6   : > { %v19776_v47 = vpack.c.bf16 %v15515_v30, %v15513_v41 }
 0x5e7   : > { %v19778_v48 = vpack.c.bf16 %v15516_v46, %v15514_v44 }
 0x5e8   : > { %3867 = vrot.lane.b32.xlu1 %v19776_v47, %s18515_s29 }
 0x5ec   : > { %3917 = vrot.lane.b32.xlu1 %v19778_v48, %s18515_s29 }
 0x5ee   : > { %v3658_v55 = vpop.f32.mrb[4].mxu0 }
 0x5ef   : > { %v15525_v56 = vadd.f32 %v3658_v55, %v1772_v53  ;;  %v3660_v58 = vpop.f32.mrb[5].mxu0 }
 0x5f0   : > { %4017 = vrot.lane.b32.xlu1 %v19744_v16, %s18515_s29  ;;  %v15526_v60 = vadd.f32 %v3660_v58, %v1776_v54  ;;  %v3662_v62 = vpop.f32.mrb[6].mxu0  ;;  %v19898_v58 = vld [vmem:[#allocation6 + $0x8] sm:$0xff] }
 0x5f1   : > { %v15527_v63 = vadd.f32 %v3662_v62, %v1772_v53  ;;  %v3664_v1 = vpop.f32.mrb[7].mxu0 }
 0x5f2   : > { %v15528_v2 = vadd.f32 %v3664_v1, %v1776_v54 }
 0x5f3   : > { %v19805_v3 = vpack.c.bf16 %v15527_v63, %v15525_v56 }
 0x5f4   : > { %v19807_v4 = vpack.c.bf16 %v15528_v2, %v15526_v60 }
 0x5fa   : > { %v3767_v24 = vpop.permute.xlu0 %3766 }
 0x5fb   : > { %v3773_v49 = vsel %vm3768_vm1, %v3767_v24, 0 }
 0x5fc   : > { %15230 = vmatpush3.bf16.xpose.msra.mxu0 %v3773_v49 }
 0x5fd   : > { %15241 = vmatprep.subr.bf16.mxu0 %v18513_v20 }
 0x5fe   : > { %v3818_v50 = vpop.permute.xlu0 %3817 }
 0x5ff   : > { %v3823_v51 = vsel %vm3768_vm1, %v3818_v50, 0 }
 0x600   : > { %15236 = vmatpush3.bf16.xpose.msra.mxu1 %v3823_v51 }
 0x601   : > { %15247 = vmatprep.subr.bf16.mxu1 %v18513_v20 }
 0x603   : > { %15232 = vmatmul.mubr.msk.bf16.vlgmr.msra.gmra.mrb[8].mxu0 %vm3768_vm1, %v19706_v43 }
 0x604   : > { %15243 = vmatprep.mubr.msk.bf16.mxu0 %vm18514_vm0, %v18513_v20 }
 0x607   : > { %15238 = vmatmul.mubr.msk.bf16.vlgmr.msra.gmra.mrb[16].mxu1 %vm3768_vm1, %v19709_v45  ;;  %v3968_v29 = vpop.permute.xlu0 %3967 }
 0x608   : > { %15249 = vmatprep.mubr.msk.bf16.mxu1 %vm18514_vm0, %v18513_v20  ;;  %v3973_v32 = vsel %vm3768_vm1, %v3968_v29, 0 }
 0x641   : > { %v3572_v10 = vpop.f32.mrb[8].mxu1 }
 0x642   : > { %v15521_v11 = vadd.f32 %v3572_v10, %v1764_v8  ;;  %v3574_v12 = vpop.f32.mrb[9].mxu1 }
 0x643   : > { %v15522_v13 = vadd.f32 %v3574_v12, %v1768_v9  ;;  %v3576_v15 = vpop.f32.mrb[10].mxu1 }
 0x644   : > { %v15523_v17 = vadd.f32 %v3576_v15, %v1764_v8  ;;  %v3578_v18 = vpop.f32.mrb[11].mxu1 }
 0x645   : > { %v15524_v19 = vadd.f32 %v3578_v18, %v1768_v9 }
 0x646   : > { %v19816_v22 = vpack.c.bf16 %v15523_v17, %v15521_v11 }
 0x647   : > { %v19818_v23 = vpack.c.bf16 %v15524_v19, %v15522_v13 }
 0x648   : > { %4067 = vrot.lane.b32.xlu0 %v19816_v22, %s18515_s29 }
 0x649   : > { %4117 = vrot.lane.b32.xlu1 %v19818_v23, %s18515_s29 }
 0x64c   : > { %4167 = vrot.lane.b32.xlu0 %v19805_v3, %s18515_s29 }
 0x64d   : > { %4217 = vrot.lane.b32.xlu1 %v19807_v4, %s18515_s29 }
 0x65a   : > { %v3868_v57 = vpop.permute.xlu1 %3867 }
 0x65b   : > { %v3873_v27 = vsel %vm3768_vm1, %v3868_v57, 0 }
 0x65c   : > { %15242 = vmatpush3.bf16.xpose.msra.mxu0 %v3873_v27 }
 0x65d   : > { %15253 = vmatprep.subr.bf16.mxu0 %v18513_v20 }
 0x65e   : > { %v3918_v28 = vpop.permute.xlu1 %3917 }
 0x65f   : > { %v3923_v31 = vsel %vm3768_vm1, %v3918_v28, 0 }
 0x660   : > { %15248 = vmatpush3.bf16.xpose.msra.mxu1 %v3923_v31 }
 0x661   : > { %15259 = vmatprep.subr.bf16.mxu1 %v18513_v20 }
 0x662   : > { %v4018_v33 = vpop.permute.xlu1 %4017 }
 0x663   : > { %15244 = vmatmul.mubr.msk.bf16.vlgmr.msra.gmra.mrb[12].mxu0 %vm3768_vm1, %v19776_v47  ;;  %v4023_v36 = vsel %vm3768_vm1, %v4018_v33, 0 }
 0x664   : > { %15254 = vmatpush3.bf16.xpose.msra.mxu0 %v3973_v32  ;;  %15255 = vmatprep.mubr.msk.bf16.mxu0 %vm18514_vm0, %v18513_v20 }
 0x665   : > { %15265 = vmatprep.subr.bf16.mxu0 %v18513_v20 }
 0x667   : > { %15250 = vmatmul.mubr.msk.bf16.vlgmr.msra.gmra.mrb[20].mxu1 %vm3768_vm1, %v19778_v48 }
 0x668   : > { %15260 = vmatpush3.bf16.xpose.msra.mxu1 %v4023_v36  ;;  %15261 = vmatprep.mubr.msk.bf16.mxu1 %vm18514_vm0, %v18513_v20 }
 0x669   : > { %15271 = vmatprep.subr.bf16.mxu1 %v18513_v20 }
 0x66b   : > { %15256 = vmatmul.mubr.msk.bf16.vlgmr.msra.gmra.mrb[16].mxu0 %vm3768_vm1, %v19741_v14 }
 0x66c   : > { %15267 = vmatprep.mubr.msk.bf16.mxu0 %vm18514_vm0, %v18513_v20 }
 0x66f   : > { %15262 = vmatmul.mubr.msk.bf16.vlgmr.msra.gmra.mrb[24].mxu1 %vm3768_vm1, %v19744_v16 }
 0x670   : > { %15273 = vmatprep.mubr.msk.bf16.mxu1 %vm18514_vm0, %v18513_v20 }
 0x6a1   : > { %v3744_v39 = vpop.f32.mrb[12].mxu1 }
 0x6a2   : > { %v15529_v40 = vadd.f32 %v3744_v39, %v1780_v37  ;;  %v3746_v41 = vpop.f32.mrb[13].mxu1 }
 0x6a3   : > { %v15530_v30 = vadd.f32 %v3746_v41, %v1784_v38  ;;  %v3748_v42 = vpop.f32.mrb[14].mxu1 }
 0x6a4   : > { %v15531_v44 = vadd.f32 %v3748_v42, %v1780_v37  ;;  %v3750_v46 = vpop.f32.mrb[15].mxu1 }
 0x6a5   : > { %v15532_v24 = vadd.f32 %v3750_v46, %v1784_v38 }
 0x6a6   : > { %v19856_v49 = vpack.c.bf16 %v15531_v44, %v15529_v40 }
 0x6a7   : > { %v19858_v50 = vpack.c.bf16 %v15532_v24, %v15530_v30 }
 0x6a8   : > { %4267 = vrot.lane.b32.xlu0 %v19856_v49, %s18515_s29 }
 0x6a9   : > { %4317 = vrot.lane.b32.xlu1 %v19858_v50, %s18515_s29 }
 0x6ac   : > { %4737 = vrot.lane.b32.xlu0 %v19776_v47, %s18516_s23 }
 0x6ad   : > { %4643 = vrot.lane.b32.xlu1 %v19706_v43, %s18516_s23 }
 0x6b1   : > { %4690 = vrot.lane.b32.xlu1 %v19709_v45, %s18516_s23 }
 0x6b5   : > { %4784 = vrot.lane.b32.xlu1 %v19778_v48, %s18516_s23  ;;  %v19896_v48 = vld [vmem:[#allocation6] sm:$0xff] }
 0x6ba   : > { %v4068_v51 = vpop.permute.xlu0 %4067 }
 0x6bb   : > { %v4073_v52 = vsel %vm3768_vm1, %v4068_v51, 0  ;;  %v4118_v53 = vpop.permute.xlu1 %4117 }
 0x6bc   : > { %v4123_v54 = vsel %vm3768_vm1, %v4118_v53, 0  ;;  %15266 = vmatpush3.bf16.xpose.msra.mxu0 %v4073_v52 }
 0x6bd   : > { %15272 = vmatpush3.bf16.xpose.msra.mxu1 %v4123_v54  ;;  %15277 = vmatprep.subr.bf16.mxu0 %v18513_v20 }
 0x6be   : > { %v4168_v47 = vpop.permute.xlu0 %4167  ;;  %15283 = vmatprep.subr.bf16.mxu1 %v18513_v20 }
 0x6bf   : > { %v4218_v43 = vpop.permute.xlu1 %4217  ;;  %v4173_v55 = vsel %vm3768_vm1, %v4168_v47, 0 }
 0x6c0   : > { %v4223_v45 = vsel %vm3768_vm1, %v4218_v43, 0 }
 0x6c3   : > { %15268 = vmatmul.mubr.msk.bf16.vlgmr.msra.gmra.mrb[20].mxu0 %vm3768_vm1, %v19816_v22 }
 0x6c4   : > { %15274 = vmatmul.mubr.msk.bf16.vlgmr.msra.gmra.mrb[28].mxu1 %vm3768_vm1, %v19818_v23  ;;  %15278 = vmatpush3.bf16.xpose.msra.mxu0 %v4173_v55 }
 0x6c5   : > { %15284 = vmatpush3.bf16.xpose.msra.mxu1 %v4223_v45  ;;  %15279 = vmatprep.mubr.msk.bf16.mxu0 %vm18514_vm0, %v18513_v20 }
 0x6c6   : > { %15285 = vmatprep.mubr.msk.bf16.mxu1 %vm18514_vm0, %v18513_v20  ;;  %15289 = vmatprep.subr.bf16.mxu0 %v18513_v20 }
 0x6c7   : > { %15295 = vmatprep.subr.bf16.mxu1 %v18513_v20 }
 0x6cb   : > { %15280 = vmatmul.mubr.msk.bf16.vlgmr.msra.gmra.mrb[24].mxu0 %vm3768_vm1, %v19805_v3 }
 0x6cc   : > { %15286 = vmatmul.mubr.msk.bf16.vlgmr.msra.gmra.mrb[32].mxu1 %vm3768_vm1, %v19807_v4  ;;  %15291 = vmatprep.mubr.msk.bf16.mxu0 %vm18514_vm0, %v18513_v20 }
 0x6cd   : > { %15297 = vmatprep.mubr.msk.bf16.mxu1 %vm18514_vm0, %v18513_v20 }
 0x6d6   : > { %v3809_v56 = vpop.f32.mrb[8].mxu0 }
 0x6d7   : > { %v19901_v60 = vadd.f32 %v3809_v56, %v19896_v48  ;;  %v15233_v62 = vpop.f32.mrb[9].mxu0 }
 0x6d8   : > { %v3812_v63 = vpop.f32.mrb[10].mxu0 }
 0x6d9   : > { %v19904_v1 = vadd.f32 %v3812_v63, %v19898_v58  ;;  %v15234_v2 = vpop.f32.mrb[11].mxu0  ;;  %v4367_v7 = vsel %vm4366_vm2, %v19901_v60, -inf }
 0x6da   : > { %4368 = vmax.xlane.f32.xlu0 %v4367_v7  ;;  %v3859_v8 = vpop.f32.mrb[16].mxu1 }
 0x6db   : > { %v19909_v9 = vadd.f32 %v3859_v8, %v19896_v48  ;;  %v15239_v10 = vpop.f32.mrb[17].mxu1  ;;  %v4370_v11 = vsel %vm4366_vm2, %v19904_v1, -inf }
 0x6dc   : > { %4371 = vmax.xlane.f32.xlu1 %v4370_v11  ;;  %v3862_v12 = vpop.f32.mrb[18].mxu1 }
 0x6dd   : > { %v19914_v13 = vadd.f32 %v3862_v12, %v19898_v58  ;;  %v15240_v15 = vpop.f32.mrb[19].mxu1  ;;  %v4373_v17 = vsel %vm4366_vm2, %v19909_v9, -inf }
 0x6de   : > { %4374 = vmax.xlane.f32.xlu0 %v4373_v17 }
 0x6df   : > { %v4376_v18 = vsel %vm4366_vm2, %v19914_v13, -inf }
 0x6e2   : > { %4377 = vmax.xlane.f32.xlu0 %v4376_v18 }
 0x71a   : > { %v4268_v19 = vpop.permute.xlu0 %4267 }
 0x71b   : > { %v4273_v57 = vsel %vm3768_vm1, %v4268_v19, 0  ;;  %v4318_v27 = vpop.permute.xlu1 %4317 }
 0x71c   : > { %v4323_v28 = vsel %vm3768_vm1, %v4318_v27, 0  ;;  %15290 = vmatpush3.bf16.xpose.msra.mxu0 %v4273_v57 }
 0x71d   : > { %15296 = vmatpush3.bf16.xpose.msra.mxu1 %v4323_v28  ;;  %15301 = vmatprep.subr.bf16.mxu0 %v18513_v20 }
 0x71e   : > { %15307 = vmatprep.subr.bf16.mxu1 %v18513_v20  ;;  %v19953_v62 = vpop.permute.xlu0 %4737 }
 0x71f   : > { %v4644_v29 = vpop.permute.xlu1 %4643 }
 0x723   : > { %v4691_v31 = vpop.permute.xlu1 %4690  ;;  %15292 = vmatmul.mubr.msk.bf16.vlgmr.msra.gmra.mrb[28].mxu0 %vm3768_vm1, %v19856_v49 }
 0x724   : > { %15298 = vmatmul.mubr.msk.bf16.vlgmr.msra.gmra.mrb[36].mxu1 %vm3768_vm1, %v19858_v50  ;;  %15302 = vmatpush3.bf16.msra.mxu0 %v4644_v29 }
 0x725   : > { %15308 = vmatpush3.bf16.msra.mxu1 %v4691_v31  ;;  %15303 = vmatprep.mubr.msk.bf16.mxu0 %vm18514_vm0, %v18513_v20 }
 0x726   : > { %15313 = vmatprep.subr.bf16.mxu0 %v18513_v20  ;;  %15309 = vmatprep.mubr.msk.bf16.mxu1 %vm18514_vm0, %v18513_v20 }
 0x727   : > { %15319 = vmatprep.subr.bf16.mxu1 %v18513_v20  ;;  %v19955_v63 = vpop.permute.xlu1 %4784 }
 0x736   : > { %v3909_v32 = vpop.f32.mrb[12].mxu0 }
 0x737   : > { %v19935_v33 = vadd.f32 %v3909_v32, %v19896_v48  ;;  %v15245_v36 = vpop.f32.mrb[13].mxu0 }
 0x738   : > { %v3912_v37 = vpop.f32.mrb[14].mxu0 }
 0x739   : > { %v19938_v38 = vadd.f32 %v3912_v37, %v19898_v58  ;;  %v15246_v39 = vpop.f32.mrb[15].mxu0  ;;  %v4379_v40 = vsel %vm4366_vm2, %v19935_v33, -inf }
 0x73a   : > { %4380 = vmax.xlane.f32.xlu1 %v4379_v40  ;;  %v3959_v41 = vpop.f32.mrb[20].mxu1 }
 0x73b   : > { %v19943_v30 = vadd.f32 %v3959_v41, %v19896_v48  ;;  %v15251_v42 = vpop.f32.mrb[21].mxu1  ;;  %v4382_v44 = vsel %vm4366_vm2, %v19938_v38, -inf }
 0x73c   : > { %4383 = vmax.xlane.f32.xlu0 %v4382_v44  ;;  %v3962_v46 = vpop.f32.mrb[22].mxu1 }
 0x73d   : > { %v15252_v24 = vpop.f32.mrb[23].mxu1  ;;  %v4385_v51 = vsel %vm4366_vm2, %v19943_v30, -inf  ;;  %v19960_v15 = vadd.f32 %v3962_v46, %v19898_v58 }
 0x73e   : > { %4386 = vmax.xlane.f32.xlu1 %v4385_v51  ;;  %v4009_v52 = vpop.f32.mrb[16].mxu0 }
 0x73f   : > { %v15257_v53 = vpop.f32.mrb[17].mxu0 }
 0x740   : > { %v4012_v54 = vpop.f32.mrb[18].mxu0 }
 0x741   : > { %v15258_v47 = vpop.f32.mrb[19].mxu0 }
 0x742   : > { %v4059_v43 = vpop.f32.mrb[24].mxu1 }
 0x743   : > { %v15263_v55 = vpop.f32.mrb[25].mxu1  ;;  %v19973_v27 = vadd.f32 %v4059_v43, %v19896_v48 }
 0x744   : > { %v4062_v45 = vpop.f32.mrb[26].mxu1 }
 0x745   : > { %v15264_v56 = vpop.f32.mrb[27].mxu1  ;;  %v19978_v29 = vadd.f32 %v4062_v45, %v19898_v58  ;;  %v4397_v31 = vsel %vm4366_vm2, %v19973_v27, -inf }
 0x747   : > { %v4400_v36 = vsel %vm4366_vm2, %v19978_v29, -inf }
 0x74f   : > { %4878 = vrot.lane.b32.xlu1 %v19744_v16, %s18516_s23 }
 0x752   : > { %4831 = vrot.lane.b32.xlu0 %v19741_v14, %s18516_s23  ;;  %v19964_v14 = vadd.f32 %v4009_v52, %v19896_v48 }
 0x754   : > { %v4391_v28 = vsel %vm4366_vm2, %v19964_v14, -inf }
 0x767   : > { %v4369_v2 = vpop.xlane.xlu0 %4368 }
 0x768   : > { %v4439_v7 = vsub.f32 %v19901_v60, %v4369_v2  ;;  %v19967_v60 = vadd.f32 %v4012_v54, %v19898_v58 }
 0x769   : > { %v4372_v8 = vpop.xlane.xlu1 %4371 }
 0x76a   : > { %v4463_v10 = vmul.f32 1.442695, %v4439_v7  ;;  %v4440_v11 = vsub.f32 %v19904_v1, %v4372_v8  ;;  %v4388_v1 = vsel %vm4366_vm2, %v19960_v15, -inf }
 0x76b   : > { %v4375_v12 = vpop.xlane.xlu0 %4374 }
 0x76c   : > { %v4465_v17 = vmul.f32 1.442695, %v4440_v11  ;;  %v4441_v16 = vsub.f32 %v19909_v9, %v4375_v12  ;;  %17317 = vpow2.f32 %v4463_v10 }
 0x76e   : > { %v4467_v18 = vmul.f32 1.442695, %v4441_v16  ;;  %17319 = vpow2.f32 %v4465_v17 }
 0x76f   : > { %v4378_v19 = vpop.xlane.xlu0 %4377 }
 0x770   : > { %v4442_v57 = vsub.f32 %v19914_v13, %v4378_v19  ;;  %17321 = vpow2.f32 %v4467_v18  ;;  %v4394_v13 = vsel %vm4366_vm2, %v19967_v60, -inf }
 0x771   : > { %4389 = vmax.xlane.f32.xlu0 %v4388_v1 }
 0x772   : > { %v4469_v9 = vmul.f32 1.442695, %v4442_v57 }
 0x773   : > { %4392 = vmax.xlane.f32.xlu1 %v4391_v28 }
 0x774   : > { %17323 = vpow2.f32 %v4469_v9 }
 0x775   : > { %4395 = vmax.xlane.f32.xlu0 %v4394_v13 }
 0x776   : > { %v19984_v32 = vpop.eup %17317 }
 0x777   : > { %4398 = vmax.xlane.f32.xlu1 %v4397_v31  ;;  %v4511_v39 = vsel %vm4366_vm2, %v19984_v32, 0.0 }
 0x778   : > { %v19988_v37 = vpop.eup %17319 }
 0x779   : > { %4401 = vmax.xlane.f32.xlu0 %v4400_v36  ;;  %v4514_v41 = vsel %vm4366_vm2, %v19988_v37, 0.0 }
 0x77a   : > { %v19992_v40 = vpop.eup %17321 }
 0x77b   : > { %4512 = vadd.xlane.f32.xlu1 %v4511_v39  ;;  %v4517_v44 = vsel %vm4366_vm2, %v19992_v40, 0.0 }
 0x77d   : > { %4515 = vadd.xlane.f32.xlu0 %v4514_v41 }
 0x77e   : > { %v19996_v42 = vpop.eup %17323 }
 0x77f   : > { %4518 = vadd.xlane.f32.xlu1 %v4517_v44  ;;  %v4520_v46 = vsel %vm4366_vm2, %v19996_v42, 0.0 }
 0x781   : > { %4521 = vadd.xlane.f32.xlu0 %v4520_v46 }
 0x796   : > { %v4109_v24 = vpop.f32.mrb[20].mxu0 }
 0x797   : > { %v20003_v51 = vadd.f32 %v4109_v24, %v19896_v48  ;;  %v15269_v52 = vpop.f32.mrb[21].mxu0  ;;  %v4159_v53 = vpop.f32.mrb[28].mxu1 }
 0x798   : > { %v4112_v54 = vpop.f32.mrb[22].mxu0  ;;  %v15275_v47 = vpop.f32.mrb[29].mxu1  ;;  %v20006_v43 = vadd.f32 %v4159_v53, %v19896_v48 }
 0x799   : > { %v20009_v55 = vadd.f32 %v4112_v54, %v19898_v58  ;;  %v15270_v45 = vpop.f32.mrb[23].mxu0  ;;  %v4162_v56 = vpop.f32.mrb[30].mxu1  ;;  %v4403_v2 = vsel %vm4366_vm2, %v20003_v51, -inf }
 0x79a   : > { %v15276_v7 = vpop.f32.mrb[31].mxu1  ;;  %4404 = vmax.xlane.f32.xlu1 %v4403_v2  ;;  %v20014_v8 = vadd.f32 %v4162_v56, %v19898_v58  ;;  %v4409_v11 = vsel %vm4366_vm2, %v20006_v43, -inf }
 0x79b   : > { %v4406_v10 = vsel %vm4366_vm2, %v20009_v55, -inf }
 0x79c   : > { %4407 = vmax.xlane.f32.xlu0 %v4406_v10  ;;  %v4412_v19 = vsel %vm4366_vm2, %v20014_v8, -inf }
 0x79e   : > { %v4209_v12 = vpop.f32.mrb[24].mxu0  ;;  %4410 = vmax.xlane.f32.xlu1 %v4409_v11 }
 0x79f   : > { %v20021_v17 = vadd.f32 %v4209_v12, %v19896_v48  ;;  %v15281_v16 = vpop.f32.mrb[25].mxu0  ;;  %v4259_v18 = vpop.f32.mrb[32].mxu1 }
 0x7a0   : > { %v4212_v57 = vpop.f32.mrb[26].mxu0  ;;  %v15287_v1 = vpop.f32.mrb[33].mxu1  ;;  %4413 = vmax.xlane.f32.xlu0 %v4412_v19  ;;  %v20026_v9 = vadd.f32 %v4259_v18, %v19896_v48 }
 0x7a1   : > { %v20029_v28 = vadd.f32 %v4212_v57, %v19898_v58  ;;  %v15282_v13 = vpop.f32.mrb[27].mxu0  ;;  %v4262_v31 = vpop.f32.mrb[34].mxu1  ;;  %v4415_v36 = vsel %vm4366_vm2, %v20021_v17, -inf }
 0x7a2   : > { %v15288_v39 = vpop.f32.mrb[35].mxu1  ;;  %4416 = vmax.xlane.f32.xlu1 %v4415_v36  ;;  %v20034_v41 = vadd.f32 %v4262_v31, %v19898_v58  ;;  %v4421_v46 = vsel %vm4366_vm2, %v20026_v9, -inf }
 0x7a3   : > { %v4418_v44 = vsel %vm4366_vm2, %v20029_v28, -inf }
 0x7a4   : > { %4419 = vmax.xlane.f32.xlu0 %v4418_v44  ;;  %v4424_v24 = vsel %vm4366_vm2, %v20034_v41, -inf }
 0x7a6   : > { %4422 = vmax.xlane.f32.xlu1 %v4421_v46 }
 0x7a8   : > { %4425 = vmax.xlane.f32.xlu0 %v4424_v24 }
 0x7c7   : > { %v4381_v52 = vpop.xlane.xlu1 %4380 }
 0x7c8   : > { %v4443_v53 = vsub.f32 %v19935_v33, %v4381_v52 }
 0x7c9   : > { %v4384_v54 = vpop.xlane.xlu0 %4383 }
 0x7ca   : > { %v4471_v47 = vmul.f32 1.442695, %v4443_v53  ;;  %v4444_v45 = vsub.f32 %v19938_v38, %v4384_v54 }
 0x7cb   : > { %v4387_v56 = vpop.xlane.xlu1 %4386 }
 0x7cc   : > { %17325 = vpow2.f32 %v4471_v47  ;;  %v4445_v2 = vsub.f32 %v19943_v30, %v4387_v56  ;;  %v4473_v7 = vmul.f32 1.442695, %v4444_v45 }
 0x7cd   : > { %v20061_v39 = vpop.permute.xlu0 %4831 }
 0x7ce   : > { %v4475_v10 = vmul.f32 1.442695, %v4445_v2 }
 0x7cf   : > { %v20063_v46 = vpop.permute.xlu1 %4878 }
 0x7d0   : > { %17327 = vpow2.f32 %v4475_v10 }
 0x7d1   : > { %17329 = vpow2.f32 %v4473_v7 }
 0x7d6   : > { %v20045_v11 = vpop.eup %17325 }
 0x7d7   : > { %v4523_v12 = vsel %vm4366_vm2, %v20045_v11, 0.0 }
 0x7d8   : > { %4524 = vadd.xlane.f32.xlu1 %v4523_v12 }
 0x7da   : > { %v20049_v16 = vpop.eup %17327 }
 0x7db   : > { %v4529_v33 = vsel %vm4366_vm2, %v20049_v16, 0.0  ;;  %v20053_v38 = vpop.eup %17329 }
 0x7dc   : > { %4530 = vadd.xlane.f32.xlu0 %v4529_v33  ;;  %v4526_v30 = vsel %vm4366_vm2, %v20053_v38, 0.0 }
 0x7e0   : > { %4527 = vadd.xlane.f32.xlu0 %v4526_v30 }
 0x7f6   : > { %v4309_v18 = vpop.f32.mrb[28].mxu0 }
 0x7f7   : > { %v15293_v19 = vpop.f32.mrb[29].mxu0  ;;  %v20057_v57 = vpop.f32.mrb[36].mxu1 }
 0x7f8   : > { %v20059_v1 = vpop.f32.mrb[30].mxu0  ;;  %v15299_v13 = vpop.f32.mrb[37].mxu1 }
 0x7f9   : > { %v15294_v31 = vpop.f32.mrb[31].mxu0  ;;  %v4362_v36 = vpop.f32.mrb[38].mxu1 }
 0x7fa   : > { %v15300_v44 = vpop.f32.mrb[39].mxu1 }
 0x7fe   : > { %v4390_v24 = vpop.xlane.xlu0 %4389 }
 0x7ff   : > { %v4446_v52 = vsub.f32 %v19960_v15, %v4390_v24 }
 0x800   : > { %v4393_v53 = vpop.xlane.xlu1 %4392 }
 0x801   : > { %v4477_v54 = vmul.f32 1.442695, %v4446_v52  ;;  %v4447_v47 = vsub.f32 %v19964_v14, %v4393_v53 }
 0x802   : > { %v4396_v45 = vpop.xlane.xlu0 %4395 }
 0x803   : > { %17331 = vpow2.f32 %v4477_v54  ;;  %v4479_v56 = vmul.f32 1.442695, %v4447_v47  ;;  %v4448_v2 = vsub.f32 %v19967_v60, %v4396_v45 }
 0x804   : > { %v4399_v7 = vpop.xlane.xlu1 %4398 }
 0x805   : > { %17333 = vpow2.f32 %v4479_v56  ;;  %v4481_v10 = vmul.f32 1.442695, %v4448_v2  ;;  %v4449_v12 = vsub.f32 %v19973_v27, %v4399_v7 }
 0x806   : > { %v4402_v33 = vpop.xlane.xlu0 %4401 }
 0x807   : > { %v4483_v30 = vmul.f32 1.442695, %v4449_v12  ;;  %v4450_v19 = vsub.f32 %v19978_v29, %v4402_v33  ;;  %17335 = vpow2.f32 %v4481_v10  ;;  %v20089_v10 = vadd.f32 %v4362_v36, %v19898_v58 }
 0x808   : > { %v4513_v15 = vpop.xlane.xlu1 %4512 }
 0x809   : > { %17337 = vpow2.f32 %v4483_v30  ;;  %v4485_v13 = vmul.f32 1.442695, %v4450_v19 }
 0x80a   : > { %17339 = vrcp.f32 %v4513_v15  ;;  %v4516_v14 = vpop.xlane.xlu0 %4515  ;;  %v20094_v15 = vadd.f32 %v4309_v18, %v19896_v48 }
 0x80b   : > { %17341 = vpow2.f32 %v4485_v13 }
 0x80c   : > { %17343 = vrcp.f32 %v4516_v14  ;;  %v4519_v31 = vpop.xlane.xlu1 %4518 }
 0x80d   : > { %v20070_v44 = vpop.eup %17331  ;;  %17345 = vrcp.f32 %v4519_v31 }
 0x80e   : > { %v4522_v60 = vpop.xlane.xlu0 %4521  ;;  %v4532_v27 = vsel %vm4366_vm2, %v20070_v44, 0.0 }
 0x80f   : > { %v20074_v24 = vpop.eup %17333  ;;  %17347 = vrcp.f32 %v4522_v60  ;;  %4533 = vadd.xlane.f32.xlu0 %v4532_v27 }
 0x810   : > { %v4535_v52 = vsel %vm4366_vm2, %v20074_v24, 0.0 }
 0x811   : > { %v20076_v29 = vpop.eup %17335 }
 0x812   : > { %v4538_v31 = vsel %vm4366_vm2, %v20076_v29, 0.0 }
 0x813   : > { %v20080_v53 = vpop.eup %17337  ;;  %4536 = vadd.xlane.f32.xlu0 %v4535_v52 }
 0x814   : > { %v17340_v54 = vpop.eup %17339  ;;  %v4541_v56 = vsel %vm4366_vm2, %v20080_v53, 0.0 }
 0x815   : > { %v20082_v47 = vpop.eup %17341  ;;  %v4607_v12 = vmul.f32 %v17340_v54, %v19984_v32  ;;  %v4436_v32 = vsel %vm4366_vm2, %v20089_v10, -inf }
 0x816   : > { %v17344_v45 = vpop.eup %17343  ;;  %v4544_v2 = vsel %vm4366_vm2, %v20082_v47, 0.0 }
 0x817   : > { %v17346_v7 = vpop.eup %17345  ;;  %v4608_v33 = vmul.f32 %v17344_v45, %v19988_v37  ;;  %4542 = vadd.xlane.f32.xlu0 %v4541_v56  ;;  %4545 = vadd.xlane.f32.xlu1 %v4544_v2 }
 0x818   : > { %v4609_v13 = vmul.f32 %v17346_v7, %v19992_v40  ;;  %v20109_v40 = vadd.f32 %v20057_v57, %v19896_v48 }
 0x819   : > { %v17348_v30 = vpop.eup %17347  ;;  %v4631_v19 = vpack.c.bf16 %v4608_v33, %v4607_v12 }
 0x81a   : > { %v4610_v14 = vmul.f32 %v17348_v30, %v19996_v42  ;;  %v4427_v42 = vsel %vm4366_vm2, %v20094_v15, -inf  ;;  %v4433_v48 = vsel %vm4366_vm2, %v20109_v40, -inf }
 0x81b   : > { %15304 = vmatmul.mubr.msk.bf16.vlgmr.msra.gmra.mrb[32].mxu0 %vm4366_vm2, %v4631_v19  ;;  %4539 = vadd.xlane.f32.xlu0 %v4538_v31 }
 0x81c   : > { %15314 = vmatpush3.bf16.msra.mxu0 %v19953_v62  ;;  %4437 = vmax.xlane.f32.xlu1 %v4436_v32  ;;  %v4632_v37 = vpack.c.bf16 %v4610_v14, %v4609_v13  ;;  %v20120_v62 = vadd.f32 %v20059_v1, %v19898_v58 }
 0x81d   : > { %15315 = vmatprep.mubr.msk.bf16.mxu0 %vm18514_vm0, %v18513_v20  ;;  %15325 = vmatprep.subr.bf16.mxu0 %v18513_v20 }
 0x81e   : > { %15310 = vmatmul.mubr.msk.bf16.vlgmr.msra.gmra.mrb[40].mxu1 %vm4366_vm2, %v4632_v37  ;;  %v4430_v18 = vsel %vm4366_vm2, %v20120_v62, -inf }
 0x81f   : > { %15320 = vmatpush3.bf16.msra.mxu1 %v19955_v63  ;;  %4428 = vmax.xlane.f32.xlu0 %v4427_v42 }
 0x820   : > { %15321 = vmatprep.mubr.msk.bf16.mxu1 %vm18514_vm0, %v18513_v20  ;;  %15331 = vmatprep.subr.bf16.mxu1 %v18513_v20 }
 0x823   : > { %4434 = vmax.xlane.f32.xlu0 %v4433_v48 }
 0x827   : > { %4431 = vmax.xlane.f32.xlu0 %v4430_v18  ;;  %v4405_v57 = vpop.xlane.xlu1 %4404 }
 0x828   : > { %v4451_v27 = vsub.f32 %v20003_v51, %v4405_v57 }
 0x829   : > { %v4408_v63 = vpop.xlane.xlu0 %4407 }
 0x82a   : > { %v4487_v1 = vmul.f32 1.442695, %v4451_v27  ;;  %v4452_v51 = vsub.f32 %v20009_v55, %v4408_v63 }
 0x82b   : > { %v4411_v60 = vpop.xlane.xlu1 %4410 }
 0x82c   : > { %17349 = vpow2.f32 %v4487_v1 }
 0x82d   : > { %4972 = vrot.lane.b32.xlu1 %v19818_v23, %s18516_s23  ;;  %v4414_v36 = vpop.xlane.xlu0 %4413  ;;  %v4453_v23 = vsub.f32 %v20006_v43, %v4411_v60 }
 0x82e   : > { %v4454_v52 = vsub.f32 %v20014_v8, %v4414_v36  ;;  %v4489_v8 = vmul.f32 1.442695, %v4452_v51 }
 0x82f   : > { %v4417_v54 = vpop.xlane.xlu1 %4416  ;;  %v4491_v33 = vmul.f32 1.442695, %v4453_v23 }
 0x830   : > { %v4493_v45 = vmul.f32 1.442695, %v4454_v52  ;;  %v4455_v56 = vsub.f32 %v20021_v17, %v4417_v54 }
 0x831   : > { %v4420_v58 = vpop.xlane.xlu0 %4419 }
 0x832   : > { %17351 = vpow2.f32 %v4493_v45  ;;  %v4495_v7 = vmul.f32 1.442695, %v4455_v56  ;;  %v4456_v55 = vsub.f32 %v20029_v28, %v4420_v58 }
 0x834   : > { %17353 = vpow2.f32 %v4495_v7  ;;  %v4497_v32 = vmul.f32 1.442695, %v4456_v55 }
 0x835   : > { %v4426_v2 = vpop.xlane.xlu0 %4425  ;;  %17355 = vpow2.f32 %v4491_v33 }
 0x836   : > { %v4458_v12 = vsub.f32 %v20034_v41, %v4426_v2  ;;  %v20136_v19 = vpop.eup %17349 }
 0x837   : > { %v4547_v43 = vsel %vm4366_vm2, %v20136_v19, 0.0 }
 0x838   : > { %v4501_v30 = vmul.f32 1.442695, %v4458_v12 }
 0x83a   : > { %17357 = vpow2.f32 %v4501_v30 }
 0x83b   : > { %17359 = vpow2.f32 %v4489_v8 }
 0x83c   : > { %v20141_v17 = vpop.eup %17351 }
 0x83d   : > { %4925 = vrot.lane.b32.xlu0 %v19816_v22, %s18516_s23  ;;  %v4423_v22 = vpop.xlane.xlu1 %4422  ;;  %v4556_v14 = vsel %vm4366_vm2, %v20141_v17, 0.0 }
 0x83e   : > { %v4457_v13 = vsub.f32 %v20026_v9, %v4423_v22  ;;  %v20146_v31 = vpop.eup %17353 }
 0x83f   : > { %v20148_v9 = vpop.eup %17355  ;;  %v4559_v37 = vsel %vm4366_vm2, %v20146_v31, 0.0 }
 0x840   : > { %v4499_v41 = vmul.f32 1.442695, %v4457_v13  ;;  %v4553_v28 = vsel %vm4366_vm2, %v20148_v9, 0.0 }
 0x842   : > { %17361 = vpow2.f32 %v4499_v41 }
 0x843   : > { %17363 = vpow2.f32 %v4497_v32 }
 0x844   : > { %v20152_v42 = vpop.eup %17357 }
 0x845   : > { %v20156_v48 = vpop.eup %17359  ;;  %v4568_v18 = vsel %vm4366_vm2, %v20152_v42, 0.0 }
 0x846   : > { %v4550_v63 = vsel %vm4366_vm2, %v20156_v48, 0.0 }
 0x84c   : > { %v20162_v57 = vpop.eup %17361 }
 0x84d   : > { %v4565_v36 = vsel %vm4366_vm2, %v20162_v57, 0.0  ;;  %v20166_v60 = vpop.eup %17363 }
 0x84e   : > { %v4562_v27 = vsel %vm4366_vm2, %v20166_v60, 0.0 }
 0x851   : > { %4548 = vadd.xlane.f32.xlu1 %v4547_v43 }
 0x855   : > { %4557 = vadd.xlane.f32.xlu1 %v4556_v14 }
 0x859   : > { %4560 = vadd.xlane.f32.xlu1 %v4559_v37 }
 0x85c   : > { %4554 = vadd.xlane.f32.xlu0 %v4553_v28 }
 0x85d   : > { %4569 = vadd.xlane.f32.xlu1 %v4568_v18 }
 0x860   : > { %4551 = vadd.xlane.f32.xlu0 %v4550_v63 }
 0x864   : > { %4566 = vadd.xlane.f32.xlu0 %v4565_v36 }
 0x865   : > { %v4525_v58 = vpop.xlane.xlu1 %4524 }
 0x866   : > { %17365 = vrcp.f32 %v4525_v58 }
 0x868   : > { %4563 = vadd.xlane.f32.xlu0 %v4562_v27 }
 0x869   : > { %v4531_v1 = vpop.xlane.xlu0 %4530 }
 0x86d   : > { %v4528_v52 = vpop.xlane.xlu0 %4527 }
 0x86e   : > { %17367 = vrcp.f32 %v4528_v52 }
 0x86f   : > { %17369 = vrcp.f32 %v4531_v1 }
 0x870   : > { %v17366_v54 = vpop.eup %17365 }
 0x871   : > { %v4611_v56 = vmul.f32 %v17366_v54, %v20045_v11 }
 0x878   : > { %v17368_v45 = vpop.eup %17367 }
 0x879   : > { %v4612_v2 = vmul.f32 %v17368_v45, %v20053_v38  ;;  %v17370_v22 = vpop.eup %17369 }
 0x87a   : > { %v4613_v38 = vmul.f32 %v17370_v22, %v20049_v16 }
 0x87b   : > { %v4633_v23 = vpack.c.bf16 %v4612_v2, %v4611_v56 }
 0x87d   : > { %15316 = vmatmul.mubr.msk.bf16.vlgmr.msra.gmra.mrb[36].mxu0 %vm4366_vm2, %v4633_v23 }
 0x87e   : > { %15326 = vmatpush3.bf16.msra.mxu0 %v20061_v39  ;;  %15327 = vmatprep.mubr.msk.bf16.mxu0 %vm18514_vm0, %v18513_v20 }
 0x87f   : > { %15337 = vmatprep.subr.bf16.mxu0 %v18513_v20 }
 0x89c   : > { %v4534_v7 = vpop.xlane.xlu0 %4533 }
 0x89d   : > { %17371 = vrcp.f32 %v4534_v7 }
 0x8a0   : > { %v4537_v12 = vpop.xlane.xlu0 %4536 }
 0x8a4   : > { %v4546_v51 = vpop.xlane.xlu1 %4545  ;;  %v4543_v33 = vpop.xlane.xlu0 %4542 }
 0x8a5   : > { %17373 = vrcp.f32 %v4546_v51 }
 0x8a6   : > { %17375 = vrcp.f32 %v4543_v33 }
 0x8a7   : > { %v17372_v11 = vpop.eup %17371  ;;  %17377 = vrcp.f32 %v4537_v12 }
 0x8a8   : > { %v4614_v39 = vmul.f32 %v17372_v11, %v20070_v44  ;;  %v4540_v30 = vpop.xlane.xlu0 %4539 }
 0x8a9   : > { %17379 = vrcp.f32 %v4540_v30  ;;  %v4438_v41 = vpop.xlane.xlu1 %4437 }
 0x8aa   : > { %v4634_v8 = vpack.c.bf16 %v4614_v39, %v4613_v38  ;;  %v4462_v54 = vsub.f32 %v20089_v10, %v4438_v41 }
 0x8ac   : > { %15322 = vmatmul.mubr.msk.bf16.vlgmr.msra.gmra.mrb[44].mxu1 %vm4366_vm2, %v4634_v8  ;;  %v4429_v13 = vpop.xlane.xlu0 %4428  ;;  %v4509_v56 = vmul.f32 1.442695, %v4462_v54 }
 0x8ad   : > { %15332 = vmatpush3.bf16.msra.mxu1 %v20063_v46  ;;  %v4459_v43 = vsub.f32 %v20094_v15, %v4429_v13  ;;  %15333 = vmatprep.mubr.msk.bf16.mxu1 %vm18514_vm0, %v18513_v20  ;;  %v4973_v27 = vpop.permute.xlu1 %4972 }
 0x8ae   : > { %15343 = vmatprep.subr.bf16.mxu1 %v18513_v20 }
 0x8af   : > { %v17374_v55 = vpop.eup %17373  ;;  %v4503_v16 = vmul.f32 1.442695, %v4459_v43 }
 0x8b0   : > { %v17376_v14 = vpop.eup %17375  ;;  %v4618_v44 = vmul.f32 %v17374_v55, %v20082_v47  ;;  %v4435_v32 = vpop.xlane.xlu0 %4434 }
 0x8b1   : > { %v17378_v37 = vpop.eup %17377  ;;  %v4617_v28 = vmul.f32 %v17376_v14, %v20080_v53  ;;  %17381 = vpow2.f32 %v4503_v16  ;;  %v4461_v2 = vsub.f32 %v20109_v40, %v4435_v32 }
 0x8b2   : > { %v4615_v15 = vmul.f32 %v17378_v37, %v20074_v24 }
 0x8b3   : > { %v17380_v18 = vpop.eup %17379  ;;  %v4636_v46 = vpack.c.bf16 %v4618_v44, %v4617_v28  ;;  %v4507_v7 = vmul.f32 1.442695, %v4461_v2 }
 0x8b4   : > { %v4616_v63 = vmul.f32 %v17380_v18, %v20076_v29  ;;  %v4432_v36 = vpop.xlane.xlu0 %4431 }
 0x8b5   : > { %15334 = vmatmul.mubr.msk.bf16.vlgmr.msra.gmra.mrb[48].mxu1 %vm4366_vm2, %v4636_v46  ;;  %v4460_v58 = vsub.f32 %v20120_v62, %v4432_v36 }
 0x8b6   : > { %15344 = vmatpush3.bf16.msra.mxu1 %v4973_v27  ;;  %v4635_v1 = vpack.c.bf16 %v4616_v63, %v4615_v15  ;;  %15345 = vmatprep.mubr.msk.bf16.mxu1 %vm18514_vm0, %v18513_v20 }
 0x8b7   : > { %v4505_v47 = vmul.f32 1.442695, %v4460_v58  ;;  %15355 = vmatprep.subr.bf16.mxu1 %v18513_v20 }
 0x8b8   : > { %15328 = vmatmul.mubr.msk.bf16.vlgmr.msra.gmra.mrb[40].mxu0 %vm4366_vm2, %v4635_v1  ;;  %v4926_v53 = vpop.permute.xlu0 %4925 }
 0x8b9   : > { %17383 = vpow2.f32 %v4505_v47  ;;  %15338 = vmatpush3.bf16.msra.mxu0 %v4926_v53  ;;  %15339 = vmatprep.mubr.msk.bf16.mxu0 %vm18514_vm0, %v18513_v20 }
 0x8ba   : > { %15349 = vmatprep.subr.bf16.mxu0 %v18513_v20  ;;  %17385 = vpow2.f32 %v4509_v56 }
 0x8bb   : > { %v20198_v24 = vpop.eup %17381 }
 0x8bc   : > { %v4571_v29 = vsel %vm4366_vm2, %v20198_v24, 0.0 }
 0x8bd   : > { %4572 = vadd.xlane.f32.xlu1 %v4571_v29 }
 0x8c3   : > { %v20202_v62 = vpop.eup %17383 }
 0x8c4   : > { %v4574_v52 = vsel %vm4366_vm2, %v20202_v62, 0.0 }
 0x8c5   : > { %4575 = vadd.xlane.f32.xlu0 %v4574_v52 }
 0x8ce   : > { %5066 = vrot.lane.b32.xlu1 %v19807_v4, %s18516_s23 }
 0x8d2   : > { %5113 = vrot.lane.b32.xlu1 %v19856_v49, %s18516_s23 }
 0x8db   : > { %5019 = vrot.lane.b32.xlu0 %v19805_v3, %s18516_s23  ;;  %v20214_v3 = vpop.eup %17385 }
 0x8dc   : > { %v4580_v16 = vsel %vm4366_vm2, %v20214_v3, 0.0 }
 0x8de   : > { %v4549_v45 = vpop.xlane.xlu1 %4548 }
 0x8e2   : > { %v4558_v23 = vpop.xlane.xlu1 %4557 }
 0x8e3   : > { %17387 = vrcp.f32 %v4558_v23 }
 0x8e9   : > { %v4555_v12 = vpop.xlane.xlu0 %4554 }
 0x8ea   : > { %17389 = vrcp.f32 %v4555_v12  ;;  %v16407_v12 = vld [vmem:[%s19366_s2 + $0x4] ss:$12 sps:$4 sm:$0xff]  }
 0x8eb   : > { %17391 = vpow2.f32 %v4507_v7 }
 0x8ec   : > { %17393 = vrcp.f32 %v4549_v45 }
 0x8ed   : > { %v4552_v4 = vpop.xlane.xlu0 %4551  ;;  %v17388_v40 = vpop.eup %17387 }
 0x8ee   : > { %v4683_v51 = vpop.f32.mrb[32].mxu0  ;;  %17395 = vrcp.f32 %v4552_v4  ;;  %v4622_v55 = vmul.f32 %v17388_v40, %v20141_v17  ;;  %v16408_v40 = vld [vmem:[%s19366_s2 + $0x18] ss:$12 sps:$4 sm:$0xff]  }
 0x8ef   : > { %v15305_v49 = vpop.f32.mrb[33].mxu0 }
 0x8f0   : > { %v4686_v33 = vpop.f32.mrb[34].mxu0 }
 0x8f1   : > { %v20216_v10 = vpack.c.bf16 %v4686_v33, %v4683_v51  ;;  %v15306_v22 = vpop.f32.mrb[35].mxu0  ;;  %v4730_v11 = vpop.f32.mrb[40].mxu1  ;;  %v16405_v33 = vld [vmem:[%s19366_s2] ss:$12 sps:$4 sm:$0xff]  }
 0x8f2   : > { %v15311_v38 = vpop.f32.mrb[41].mxu1 }
 0x8f3   : > { %v4733_v39 = vpop.f32.mrb[42].mxu1  ;;  %v16413_v38 = vld [vmem:[%s19366_s2 + $0x34] ss:$12 sps:$4 sm:$0xff]  }
 0x8f4   : > { %v17390_v30 = vpop.eup %17389  ;;  %v20218_v8 = vpack.c.bf16 %v4733_v39, %v4730_v11  ;;  %v15312_v13 = vpop.f32.mrb[43].mxu1  ;;  %v16410_v11 = vld [vmem:[%s19366_s2 + $0x1c] ss:$12 sps:$4 sm:$0xff]  }
 0x8f5   : > { %v20220_v43 = vpop.eup %17391  ;;  %v4621_v41 = vmul.f32 %v17390_v30, %v20148_v9  ;;  %v4567_v9 = vpop.xlane.xlu0 %4566  ;;  %v16414_v39 = vld [vmem:[%s19366_s2 + $0x48] ss:$12 sps:$4 sm:$0xff]   ;;  %v16419_v30 = vld [vmem:[%s19366_s2 + $0x64] ss:$12 sps:$4 sm:$0xff]   ;;  %v16417_v13 = vld [vmem:[%s19366_s2 + $0x60] ss:$12 sps:$4 sm:$0xff]  }
 0x8f6   : > { %v17394_v14 = vpop.eup %17393  ;;  %4581 = vadd.xlane.f32.xlu1 %v4580_v16  ;;  %v4577_v18 = vsel %vm4366_vm2, %v20220_v43, 0.0  ;;  %17397 = vrcp.f32 %v4567_v9  ;;  %v16425_v16 = vld [vmem:[%s19366_s2 + $0x94] ss:$12 sps:$4 sm:$0xff]  }
 0x8f7   : > { %v4638_v44 = vpack.c.bf16 %v4622_v55, %v4621_v41  ;;  %v4619_v37 = vmul.f32 %v17394_v14, %v20136_v19  ;;  %v4561_v19 = vpop.xlane.xlu1 %4560  ;;  %v16422_v55 = vld [vmem:[%s19366_s2 + $0x7c] ss:$12 sps:$4 sm:$0xff]   ;;  %v16420_v41 = vld [vmem:[%s19366_s2 + $0x78] ss:$12 sps:$4 sm:$0xff]  }
 0x8f8   : > { %v17396_v32 = vpop.eup %17395  ;;  %v16426_v9 = vld [vmem:[%s19366_s2 + $0xa8] ss:$12 sps:$4 sm:$0xff]  }
 0x8f9   : > { %v4620_v28 = vmul.f32 %v17396_v32, %v20156_v48  ;;  %15346 = vmatmul.mubr.msk.bf16.vlgmr.msra.gmra.mrb[52].mxu1 %vm4366_vm2, %v4638_v44  ;;  %v4564_v46 = vpop.xlane.xlu0 %4563  ;;  %v16423_v32 = vld [vmem:[%s19366_s2 + $0x90] ss:$12 sps:$4 sm:$0xff]  }
 0x8fa   : > { %4578 = vadd.xlane.f32.xlu0 %v4577_v18  ;;  %15357 = vmatprep.mubr.msk.bf16.mxu1 %vm18514_vm0, %v18513_v20 }
 0x8fb   : > { %v4637_v17 = vpack.c.bf16 %v4620_v28, %v4619_v37  ;;  %v4570_v48 = vpop.xlane.xlu1 %4569  ;;  %v16428_v28 = vld [vmem:[%s19366_s2 + $0xac] ss:$12 sps:$4 sm:$0xff]  }
 0x8fc   : > { %17399 = vrcp.f32 %v4570_v48  ;;  %v16431_v48 = vld [vmem:[%s19366_s2 + $0xc4] ss:$12 sps:$4 sm:$0xff]  }
 0x8fd   : > { %15340 = vmatmul.mubr.msk.bf16.vlgmr.msra.gmra.mrb[44].mxu0 %vm4366_vm2, %v4637_v17  ;;  %17401 = vrcp.f32 %v4564_v46 }
 0x8fe   : > { %15351 = vmatprep.mubr.msk.bf16.mxu0 %vm18514_vm0, %v18513_v20  ;;  %17403 = vrcp.f32 %v4561_v19 }
 0x900   : > { %v17398_v15 = vpop.eup %17397 }
 0x901   : > { %v4625_v27 = vmul.f32 %v17398_v15, %v20162_v57 }
 0x906   : > { %v17400_v36 = vpop.eup %17399 }
 0x907   : > { %5160 = vrot.lane.b32.xlu1 %v19858_v50, %s18516_s23  ;;  %v4626_v58 = vmul.f32 %v17400_v36, %v20152_v42  ;;  %v17402_v29 = vpop.eup %17401 }
 0x908   : > { %v17404_v42 = vpop.eup %17403  ;;  %v4624_v57 = vmul.f32 %v17402_v29, %v20166_v60 }
 0x909   : > { %v4640_v53 = vpack.c.bf16 %v4626_v58, %v4625_v27  ;;  %v4623_v2 = vmul.f32 %v17404_v42, %v20146_v31 }
 0x90b   : > { %v4639_v7 = vpack.c.bf16 %v4624_v57, %v4623_v2  ;;  %v16432_v57 = vld [vmem:[%s19366_s2 + $0xd8] ss:$12 sps:$4 sm:$0xff]   ;;  %v16439_v2 = vld [vmem:[%s19366_s2 + $0xf4] ss:$12 sps:$4 sm:$0xff]  }
 0x94a   : > { %v4573_v63 = vpop.xlane.xlu1 %4572 }
 0x94b   : > { %17405 = vrcp.f32 %v4573_v63 }
 0x94e   : > { %v5067_v1 = vpop.permute.xlu1 %5066 }
 0x94f   : > { %15356 = vmatpush3.bf16.msra.mxu1 %v5067_v1 }
 0x950   : > { %v4777_v47 = vpop.f32.mrb[36].mxu0  ;;  %15367 = vmatprep.subr.bf16.mxu1 %v18513_v20 }
 0x951   : > { %v15317_v50 = vpop.f32.mrb[37].mxu0 }
 0x952   : > { %v4780_v52 = vpop.f32.mrb[38].mxu0  ;;  %15358 = vmatmul.mubr.msk.bf16.vlgmr.msra.gmra.mrb[56].mxu1 %vm4366_vm2, %v4640_v53  ;;  %v4576_v45 = vpop.xlane.xlu0 %4575  ;;  %v16429_v50 = vld [vmem:[%s19366_s2 + $0xc0] ss:$12 sps:$4 sm:$0xff]  }
 0x953   : > { %v20242_v54 = vpack.c.bf16 %v4780_v52, %v4777_v47  ;;  %v15318_v56 = vpop.f32.mrb[39].mxu0  ;;  %15369 = vmatprep.mubr.msk.bf16.mxu1 %vm18514_vm0, %v18513_v20  ;;  %17407 = vrcp.f32 %v4576_v45  ;;  %v5114_v4 = vpop.permute.xlu1 %5113  ;;  %v16434_v52 = vld [vmem:[%s19366_s2 + $0xdc] ss:$12 sps:$4 sm:$0xff]  }
 0x955   : > { %v17406_v51 = vpop.eup %17405 }
 0x956   : > { %v5020_v23 = vpop.permute.xlu0 %5019  ;;  %v4627_v60 = vmul.f32 %v17406_v51, %v20198_v24  ;;  %v16411_v24 = vld [vmem:[%s19366_s2 + $0x30] ss:$12 sps:$4 sm:$0xff]  }
 0x957   : > { %15350 = vmatpush3.bf16.msra.mxu0 %v5020_v23 }
 0x958   : > { %15361 = vmatprep.subr.bf16.mxu0 %v18513_v20 }
 0x95a   : > { %15352 = vmatmul.mubr.msk.bf16.vlgmr.msra.gmra.mrb[48].mxu0 %vm4366_vm2, %v4639_v7 }
 0x95b   : > { %15362 = vmatpush3.bf16.msra.mxu0 %v5114_v4  ;;  %15363 = vmatprep.mubr.msk.bf16.mxu0 %vm18514_vm0, %v18513_v20  ;;  %v16435_v4 = vld [vmem:[%s19366_s2 + $0x8] ss:$12 sps:$4 sm:$0xff]  }
 0x95c   : > { %5350 = vmatprep.subr.bf16.mxu0 %v16407_v12 }
 0x95d   : > { %v17408_v31 = vpop.eup %17407 }
 0x95e   : > { %v4628_v49 = vmul.f32 %v17408_v31, %v20202_v62  ;;  %v16416_v62 = vld [vmem:[%s19366_s2 + $0x4c] ss:$12 sps:$4 sm:$0xff]  }
 0x95f   : > { %v16436_v31 = vld [vmem:[%s19366_s2 + $0x20] ss:$12 sps:$4 sm:$0xff]  }
 0x960   : > { %v4641_v22 = vpack.c.bf16 %v4628_v49, %v4627_v60  ;;  %v16437_v60 = vld [vmem:[%s19366_s2 + $0xf0] ss:$12 sps:$4 sm:$0xff]   ;;  %v16441_v49 = vld [vmem:[%s19366_s2 + $0x108] ss:$12 sps:$4 sm:$0xff]  }
 0x962   : > { %15364 = vmatmul.mubr.msk.bf16.vlgmr.msra.gmra.mrb[52].mxu0 %vm4366_vm2, %v4641_v22  ;;  %v16444_v22 = vld [vmem:[%s19366_s2 + $0x50] ss:$12 sps:$4 sm:$0xff]  }
 0x963   : > { %5351 = vmatpush1.bf16.msra.mxu0 %v16405_v33  ;;  %5382 = vmatprep.mubr.bf16.mxu0 %v18512_v0  ;;  %v16455_v33 = vld [vmem:[%s19366_s2 + $0x124] ss:$12 sps:$4 sm:$0xff]  }
 0x964   : > { %5352 = vmatprep.subr.bf16.mxu0 %v16410_v11  ;;  %v16445_v11 = vld [vmem:[%s19366_s2 + $0x68] ss:$12 sps:$4 sm:$0xff]  }
 0x967   : > { %5353 = vmatpush1.bf16.msra.mxu0 %v16408_v40  ;;  %v16453_v40 = vld [vmem:[%s19366_s2 + $0x120] ss:$12 sps:$4 sm:$0xff]  }
 0x968   : > { %5469 = vmatprep.subr.bf16.mxu0 %v16413_v38  ;;  %v16459_v38 = vld [vmem:[%s19366_s2 + $0x13c] ss:$12 sps:$4 sm:$0xff]  }
 0x96a   : > { %14134 = vmatmul.mubr.msk.bf16.vlgmr.msra.gmra.mrb[56].mxu0 %vm3768_vm1, %v20216_v10 }
 0x96b   : > { %5470 = vmatpush1.bf16.msra.mxu0 %v16411_v24  ;;  %5501 = vmatprep.mubr.bf16.mxu0 %v18512_v0  ;;  %v16457_v24 = vld [vmem:[%s19366_s2 + $0x138] ss:$12 sps:$4 sm:$0xff]  }
 0x96c   : > { %5471 = vmatprep.subr.bf16.mxu0 %v16416_v62  ;;  %v16464_v62 = vld [vmem:[%s19366_s2 + $0x154] ss:$12 sps:$4 sm:$0xff]  }
 0x96f   : > { %5472 = vmatpush1.bf16.msra.mxu0 %v16414_v39  ;;  %v16447_v39 = vld [vmem:[%s19366_s2 + $0x98] ss:$12 sps:$4 sm:$0xff]  }
 0x970   : > { %5588 = vmatprep.subr.bf16.mxu0 %v16419_v30  ;;  %v16449_v30 = vld [vmem:[%s19366_s2 + $0xc8] ss:$12 sps:$4 sm:$0xff]  }
 0x976   : > { %14142 = vmatmul.mubr.msk.bf16.vlgmr.msra.gmra.mrb[56].mxu0 %vm3768_vm1, %v20218_v8 }
 0x977   : > { %5589 = vmatpush1.bf16.msra.mxu0 %v16417_v13  ;;  %5620 = vmatprep.mubr.bf16.mxu0 %v18512_v0  ;;  %v16450_v13 = vld [vmem:[%s19366_s2 + $0xe0] ss:$12 sps:$4 sm:$0xff]  }
 0x978   : > { %5590 = vmatprep.subr.bf16.mxu0 %v16422_v55  ;;  %v16452_v55 = vld [vmem:[%s19366_s2 + $0x110] ss:$12 sps:$4 sm:$0xff]  }
 0x97b   : > { %5591 = vmatpush1.bf16.msra.mxu0 %v16420_v41  ;;  %v16456_v41 = vld [vmem:[%s19366_s2 + $0x128] ss:$12 sps:$4 sm:$0xff]  }
 0x97c   : > { %5707 = vmatprep.subr.bf16.mxu0 %v16425_v16  ;;  %v16460_v16 = vld [vmem:[%s19366_s2 + $0x140] ss:$12 sps:$4 sm:$0xff]  }
 0x97f   : > { %v4824_v14 = vpop.f32.mrb[44].mxu1 }
 0x980   : > { %v15323_v44 = vpop.f32.mrb[45].mxu1 }
 0x981   : > { %v4827_v37 = vpop.f32.mrb[46].mxu1 }
 0x982   : > { %v20277_v18 = vpack.c.bf16 %v4827_v37, %v4824_v14  ;;  %v15324_v17 = vpop.f32.mrb[47].mxu1  ;;  %14150 = vmatmul.mubr.msk.bf16.vlgmr.msra.gmra.mrb[56].mxu0 %vm3768_vm1, %v20242_v54 }
 0x983   : > { %v4582_v19 = vpop.xlane.xlu1 %4581  ;;  %5708 = vmatpush1.bf16.msra.mxu0 %v16423_v32  ;;  %5739 = vmatprep.mubr.bf16.mxu0 %v18512_v0 }
 0x984   : > { %5709 = vmatprep.subr.bf16.mxu0 %v16428_v28  ;;  %17409 = vrcp.f32 %v4582_v19 }
 0x987   : > { %v5161_v46 = vpop.permute.xlu1 %5160  ;;  %v4579_v15 = vpop.xlane.xlu0 %4578  ;;  %5710 = vmatpush1.bf16.msra.mxu0 %v16426_v9  ;;  %v16461_v9 = vld [vmem:[%s19366_s2 + $0x158] ss:$12 sps:$4 sm:$0xff]  }
 0x988   : > { %v4918_v63 = vpop.f32.mrb[48].mxu1  ;;  %17411 = vrcp.f32 %v4579_v15  ;;  %15368 = vmatpush3.bf16.msra.mxu1 %v5161_v46  ;;  %5826 = vmatprep.subr.bf16.mxu0 %v16431_v48  ;;  %v16462_v48 = vld [vmem:[%s19366_s2 + $0x150] ss:$12 sps:$4 sm:$0xff]  }
 0x989   : > { %v15335_v36 = vpop.f32.mrb[49].mxu1  ;;  %15373 = vmatprep.subr.bf16.mxu1 %v18513_v20 }
 0x98a   : > { %v4921_v27 = vpop.f32.mrb[50].mxu1  ;;  %v16465_v36 = vld [vmem:[%s19366_s2 + $0x170] ss:$12 sps:$4 sm:$0xff]  }
 0x98b   : > { %v20285_v58 = vpack.c.bf16 %v4921_v27, %v4918_v63  ;;  %v15336_v1 = vpop.f32.mrb[51].mxu1  ;;  %v4871_v47 = vpop.f32.mrb[40].mxu0  ;;  %v16468_v63 = vld [vmem:[%s19366_s2 + $0x16c] ss:$12 sps:$4 sm:$0xff]   ;;  %v16466_v27 = vld [vmem:[%s19366_s2 + $0x168] ss:$12 sps:$4 sm:$0xff]  }
 0x98c   : > { %v15329_v53 = vpop.f32.mrb[41].mxu0  ;;  %v16472_v1 = vld [vmem:[%s19366_s2 + $0x188] ss:$12 sps:$4 sm:$0xff]  }
 0x98d   : > { %v4874_v29 = vpop.f32.mrb[42].mxu0  ;;  %v16476_v53 = vld [vmem:[%s19366_s2 + $0x1a0] ss:$12 sps:$4 sm:$0xff]  }
 0x98e   : > { %v20289_v45 = vpack.c.bf16 %v4874_v29, %v4871_v47  ;;  %v15330_v56 = vpop.f32.mrb[43].mxu0  ;;  %14158 = vmatmul.mubr.msk.bf16.vlgmr.msra.gmra.mrb[56].mxu0 %vm3768_vm1, %v20277_v18  ;;  %v17410_v42 = vpop.eup %17409  ;;  %v16469_v47 = vld [vmem:[%s19366_s2 + $0x180] ss:$12 sps:$4 sm:$0xff]   ;;  %v16473_v29 = vld [vmem:[%s19366_s2 + $0x198] ss:$12 sps:$4 sm:$0xff]  }
 0x98f   : > { %5827 = vmatpush1.bf16.msra.mxu0 %v16429_v50  ;;  %5858 = vmatprep.mubr.bf16.mxu0 %v18512_v0  ;;  %v4630_v7 = vmul.f32 %v17410_v42, %v20214_v3  ;;  %v16443_v3 = vld [vmem:[%s19366_s2 + $0x10c] ss:$12 sps:$4 sm:$0xff]   ;;  %v16475_v50 = vld [vmem:[%s19366_s2 + $0x19c] ss:$12 sps:$4 sm:$0xff]  }
 0x990   : > { %5828 = vmatprep.subr.bf16.mxu0 %v16434_v52  ;;  %v16480_v52 = vld [vmem:[%s19366_s2 + $0x1b4] ss:$12 sps:$4 sm:$0xff]  }
 0x992   : > { %v17412_v23 = vpop.eup %17411 }
 0x993   : > { %v4629_v12 = vmul.f32 %v17412_v23, %v20220_v43  ;;  %5829 = vmatpush1.bf16.msra.mxu0 %v16432_v57  ;;  %v16440_v43 = vld [vmem:[%s19366_s2 + $0x38] ss:$12 sps:$4 sm:$0xff]  }
 0x994   : > { %5945 = vmatprep.subr.bf16.mxu0 %v16439_v2 }
 0x995   : > { %v4642_v51 = vpack.c.bf16 %v4630_v7, %v4629_v12 }
 0x997   : > { %15370 = vmatmul.mubr.msk.bf16.vlgmr.msra.gmra.mrb[60].mxu1 %vm4366_vm2, %v4642_v51  ;;  %v16478_v51 = vld [vmem:[%s19366_s2 + $0x1b0] ss:$12 sps:$4 sm:$0xff]  }
 0x998   : > { %15374 = vmatpush3.bf16.msra.mxu1 %v16435_v4  ;;  %15377 = vmatprep.mubr.msk.bf16.mxu1 %vm18514_vm0, %v18513_v20  ;;  %v16477_v4 = vld [vmem:[%s19366_s2 + $0x1b8] ss:$12 sps:$4 sm:$0xff]  }
 0x999   : > { %15375 = vmatprep.subr.bf16.mxu1 %v18513_v20 }
 0x99a   : > { %14166 = vmatmul.mubr.msk.bf16.vlgmr.msra.gmra.mrb[56].mxu0 %vm3768_vm1, %v20289_v45 }
 0x99b   : > { %5946 = vmatpush1.bf16.msra.mxu0 %v16437_v60  ;;  %5977 = vmatprep.mubr.bf16.mxu0 %v18512_v0 }
 0x99c   : > { %15376 = vmatpush3.bf16.msra.mxu1 %v16436_v31  ;;  %5947 = vmatprep.subr.bf16.mxu0 %v16443_v3  ;;  %v16484_v3 = vld [vmem:[%s19366_s2 + $0x1cc] ss:$12 sps:$4 sm:$0xff]  }
 0x99d   : > { %15381 = vmatprep.subr.bf16.mxu1 %v18513_v20 }
 0x99f   : > { %15378 = vmatmul.mubr.msk.bf16.vlgmr.msra.gmra.mrb[64].mxu1 %vm3768_vm1, %v20216_v10  ;;  %5948 = vmatpush1.bf16.msra.mxu0 %v16441_v49  ;;  %v16446_v10 = vld [vmem:[%s19366_s2 + $0x80] ss:$12 sps:$4 sm:$0xff]   ;;  %v16482_v49 = vld [vmem:[%s19366_s2 + $0x1c8] ss:$12 sps:$4 sm:$0xff]  }
 0x9a0   : > { %15382 = vmatpush3.bf16.msra.mxu1 %v16440_v43  ;;  %15385 = vmatprep.mubr.msk.bf16.mxu1 %vm18514_vm0, %v18513_v20  ;;  %v16481_v43 = vld [vmem:[%s19366_s2 + $0x1d0] ss:$12 sps:$4 sm:$0xff]  }
 0x9a1   : > { %15383 = vmatprep.subr.bf16.mxu1 %v18513_v20  ;;  %6064 = vmatprep.subr.bf16.mxu0 %v16455_v33  ;;  %v16489_v33 = vld [vmem:[%s19366_s2 + $0x1e4] ss:$12 sps:$4 sm:$0xff]  }
 0x9a4   : > { %15384 = vmatpush3.bf16.msra.mxu1 %v16444_v22 }
 0x9a5   : > { %15389 = vmatprep.subr.bf16.mxu1 %v18513_v20 }
 0x9a6   : > { %14174 = vmatmul.mubr.msk.bf16.vlgmr.msra.gmra.mrb[56].mxu0 %vm3768_vm1, %v20285_v58 }
 0x9a7   : > { %15386 = vmatmul.mubr.msk.bf16.vlgmr.msra.gmra.mrb[68].mxu1 %vm3768_vm1, %v20218_v8  ;;  %6065 = vmatpush1.bf16.msra.mxu0 %v16453_v40  ;;  %v16448_v8 = vld [vmem:[%s19366_s2 + $0xb0] ss:$12 sps:$4 sm:$0xff]  }
 0x9a8   : > { %15390 = vmatpush3.bf16.msra.mxu1 %v16445_v11  ;;  %15393 = vmatprep.mubr.msk.bf16.mxu1 %vm18514_vm0, %v18513_v20 }
 0x9a9   : > { %15391 = vmatprep.subr.bf16.mxu1 %v18513_v20  ;;  %6066 = vmatprep.subr.bf16.mxu0 %v16459_v38  ;;  %v16485_v38 = vld [vmem:[%s19366_s2 + $0x1e8] ss:$12 sps:$4 sm:$0xff]  }
 0x9aa   : > { %6096 = vmatprep.mubr.bf16.mxu0 %v18512_v0 }
 0x9ab   : > { %6067 = vmatpush1.bf16.msra.mxu0 %v16457_v24 }
 0x9ac   : > { %15392 = vmatpush3.bf16.msra.mxu1 %v16446_v10  ;;  %6183 = vmatprep.subr.bf16.mxu0 %v16464_v62  ;;  %v16486_v62 = vld [vmem:[%s19366_s2 + $0x200] ss:$12 sps:$4 sm:$0xff]  }
 0x9ad   : > { %15397 = vmatprep.subr.bf16.mxu1 %v18513_v20 }
 0x9af   : > { %15394 = vmatmul.mubr.msk.bf16.vlgmr.msra.gmra.mrb[72].mxu1 %vm3768_vm1, %v20242_v54  ;;  %v16451_v54 = vld [vmem:[%s19366_s2 + $0xf8] ss:$12 sps:$4 sm:$0xff]  }
 0x9b0   : > { %15398 = vmatpush3.bf16.msra.mxu1 %v16447_v39  ;;  %15401 = vmatprep.mubr.msk.bf16.mxu1 %vm18514_vm0, %v18513_v20  ;;  %v16487_v39 = vld [vmem:[%s19366_s2 + $0x1e0] ss:$12 sps:$4 sm:$0xff]  }
 0x9b1   : > { %15399 = vmatprep.subr.bf16.mxu1 %v18513_v20 }
 0x9b4   : > { %15400 = vmatpush3.bf16.msra.mxu1 %v16448_v8  ;;  %v16492_v8 = vld [vmem:[%s19366_s2 + $0x1fc] ss:$12 sps:$4 sm:$0xff]  }
 0x9b5   : > { %15405 = vmatprep.subr.bf16.mxu1 %v18513_v20 }
 0x9b7   : > { %15402 = vmatmul.mubr.msk.bf16.vlgmr.msra.gmra.mrb[76].mxu1 %vm3768_vm1, %v20277_v18 }
 0x9b8   : > { %15406 = vmatpush3.bf16.msra.mxu1 %v16449_v30  ;;  %15409 = vmatprep.mubr.msk.bf16.mxu1 %vm18514_vm0, %v18513_v20  ;;  %v16490_v30 = vld [vmem:[%s19366_s2 + $0x1f8] ss:$12 sps:$4 sm:$0xff]  }
 0x9b9   : > { %15407 = vmatprep.subr.bf16.mxu1 %v18513_v20 }
 0x9bc   : > { %15408 = vmatpush3.bf16.msra.mxu1 %v16450_v13  ;;  %v16496_v13 = vld [vmem:[%s19366_s2 + $0x218] ss:$12 sps:$4 sm:$0xff]  }
 0x9bd   : > { %15413 = vmatprep.subr.bf16.mxu1 %v18513_v20 }
 0x9bf   : > { %15410 = vmatmul.mubr.msk.bf16.vlgmr.msra.gmra.mrb[80].mxu1 %vm3768_vm1, %v20289_v45 }
 0x9c0   : > { %15414 = vmatpush3.bf16.msra.mxu1 %v16451_v54  ;;  %15417 = vmatprep.mubr.msk.bf16.mxu1 %vm18514_vm0, %v18513_v20  ;;  %v16495_v54 = vld [vmem:[%s19366_s2 + $0x214] ss:$12 sps:$4 sm:$0xff]  }
 0x9c1   : > { %15415 = vmatprep.subr.bf16.mxu1 %v18513_v20 }
 0x9c4   : > { %15416 = vmatpush3.bf16.msra.mxu1 %v16452_v55  ;;  %v16500_v55 = vld [vmem:[%s19366_s2 + $0x230] ss:$12 sps:$4 sm:$0xff]  }
 0x9c5   : > { %15421 = vmatprep.subr.bf16.mxu1 %v18513_v20 }
 0x9c7   : > { %15418 = vmatmul.mubr.msk.bf16.vlgmr.msra.gmra.mrb[84].mxu1 %vm3768_vm1, %v20285_v58  ;;  %v16471_v58 = vld [vmem:[%s19366_s2 + $0x184] ss:$12 sps:$4 sm:$0xff]  }
 0x9c8   : > { %15422 = vmatpush3.bf16.msra.mxu1 %v16456_v41  ;;  %15425 = vmatprep.mubr.msk.bf16.mxu1 %vm18514_vm0, %v18513_v20  ;;  %v16493_v41 = vld [vmem:[%s19366_s2 + $0x210] ss:$12 sps:$4 sm:$0xff]  }
 0x9c9   : > { %15423 = vmatprep.subr.bf16.mxu1 %v18513_v20 }
 0x9cc   : > { %v5012_v14 = vpop.f32.mrb[52].mxu1  ;;  %15424 = vmatpush3.bf16.msra.mxu1 %v16460_v16  ;;  %v16499_v16 = vld [vmem:[%s19366_s2 + $0x22c] ss:$12 sps:$4 sm:$0xff]  }
 0x9cd   : > { %v15347_v44 = vpop.f32.mrb[53].mxu1  ;;  %15429 = vmatprep.subr.bf16.mxu1 %v18513_v20 }
 0x9ce   : > { %v5015_v32 = vpop.f32.mrb[54].mxu1 }
 0x9cf   : > { %v5214_v37 = vpack.c.bf16 %v5015_v32, %v5012_v14  ;;  %v15348_v28 = vpop.f32.mrb[55].mxu1  ;;  %v16497_v14 = vld [vmem:[%s19366_s2 + $0x228] ss:$12 sps:$4 sm:$0xff]  }
 0x9d0   : > { %v4965_v18 = vpop.f32.mrb[44].mxu0 }
 0x9d1   : > { %v15341_v17 = vpop.f32.mrb[45].mxu0 }
 0x9d2   : > { %v4968_v19 = vpop.f32.mrb[46].mxu0 }
 0x9d3   : > { %v5213_v46 = vpack.c.bf16 %v4968_v19, %v4965_v18  ;;  %v15342_v15 = vpop.f32.mrb[47].mxu0 }
 0x9d5   : > { %14182 = vmatmul.mubr.msk.bf16.vlgmr.msra.gmra.mrb[56].mxu0 %vm3768_vm1, %v5213_v46  ;;  %15426 = vmatmul.mubr.msk.bf16.vlgmr.msra.gmra.mrb[88].mxu1 %vm3768_vm1, %v5213_v46 }
 0x9d6   : > { %15430 = vmatpush3.bf16.msra.mxu1 %v16461_v9  ;;  %6184 = vmatpush1.bf16.msra.mxu0 %v16462_v48 }
 0x9d7   : > { %15431 = vmatprep.subr.bf16.mxu1 %v18513_v20  ;;  %15433 = vmatprep.mubr.msk.bf16.mxu1 %vm18514_vm0, %v18513_v20 }
 0x9d8   : > { %6185 = vmatprep.subr.bf16.mxu0 %v16468_v63  ;;  %6215 = vmatprep.mubr.bf16.mxu0 %v18512_v0 }
 0x9da   : > { %15432 = vmatpush3.bf16.msra.mxu1 %v16465_v36  ;;  %6186 = vmatpush1.bf16.msra.mxu0 %v16466_v27 }
 0x9db   : > { %6302 = vmatprep.subr.bf16.mxu0 %v16471_v58  ;;  %15437 = vmatprep.subr.bf16.mxu1 %v18513_v20 }
 0x9dd   : > { %15434 = vmatmul.mubr.msk.bf16.vlgmr.msra.gmra.mrb[92].mxu1 %vm3768_vm1, %v5214_v37 }
 0x9de   : > { %15438 = vmatpush3.bf16.msra.mxu1 %v16472_v1  ;;  %15441 = vmatprep.mubr.msk.bf16.mxu1 %vm18514_vm0, %v18513_v20 }
 0x9df   : > { %15439 = vmatprep.subr.bf16.mxu1 %v18513_v20 }
 0x9e1   : > { %14190 = vmatmul.mubr.msk.bf16.vlgmr.msra.gmra.mrb[56].mxu0 %vm3768_vm1, %v5214_v37 }
 0x9e2   : > { %6303 = vmatpush1.bf16.msra.mxu0 %v16469_v47  ;;  %15440 = vmatpush3.bf16.msra.mxu1 %v16476_v53 }
 0x9e3   : > { %6304 = vmatprep.subr.bf16.mxu0 %v16475_v50  ;;  %6334 = vmatprep.mubr.bf16.mxu0 %v18512_v0 }
 0x9e4   : > { %15445 = vmatprep.subr.bf16.mxu1 %v18513_v20 }
 0x9e6   : > { %6305 = vmatpush1.bf16.msra.mxu0 %v16473_v29 }
 0x9e7   : > { %6421 = vmatprep.subr.bf16.mxu0 %v16480_v52 }
 0xa25   : > { %v5106_v45 = vpop.f32.mrb[56].mxu1 }
 0xa26   : > { %v15359_v56 = vpop.f32.mrb[57].mxu1 }
 0xa27   : > { %v5109_v42 = vpop.f32.mrb[58].mxu1 }
 0xa28   : > { %v5216_v57 = vpack.c.bf16 %v5109_v42, %v5106_v45  ;;  %v15360_v2 = vpop.f32.mrb[59].mxu1 }
 0xa2d   : > { %v5059_v23 = vpop.f32.mrb[48].mxu0 }
 0xa2e   : > { %v15353_v7 = vpop.f32.mrb[49].mxu0 }
 0xa2f   : > { %v5062_v12 = vpop.f32.mrb[50].mxu0 }
 0xa30   : > { %v5215_v31 = vpack.c.bf16 %v5062_v12, %v5059_v23  ;;  %v15354_v60 = vpop.f32.mrb[51].mxu0 }
 0xa32   : > { %14198 = vmatmul.mubr.msk.bf16.vlgmr.msra.gmra.mrb[56].mxu0 %vm3768_vm1, %v5215_v31  ;;  %15442 = vmatmul.mubr.msk.bf16.vlgmr.msra.gmra.mrb[96].mxu1 %vm3768_vm1, %v5215_v31 }
 0xa33   : > { %15446 = vmatpush3.bf16.msra.mxu1 %v16477_v4  ;;  %6422 = vmatpush1.bf16.msra.mxu0 %v16478_v51 }
 0xa34   : > { %15447 = vmatprep.subr.bf16.mxu1 %v18513_v20  ;;  %15449 = vmatprep.mubr.msk.bf16.mxu1 %vm18514_vm0, %v18513_v20 }
 0xa35   : > { %v5153_v22 = vpop.f32.mrb[52].mxu0  ;;  %6423 = vmatprep.subr.bf16.mxu0 %v16484_v3  ;;  %6453 = vmatprep.mubr.bf16.mxu0 %v18512_v0 }
 0xa36   : > { %v15365_v11 = vpop.f32.mrb[53].mxu0 }
 0xa37   : > { %v5156_v40 = vpop.f32.mrb[54].mxu0  ;;  %15448 = vmatpush3.bf16.msra.mxu1 %v16481_v43  ;;  %6424 = vmatpush1.bf16.msra.mxu0 %v16482_v49 }
 0xa38   : > { %v5217_v10 = vpack.c.bf16 %v5156_v40, %v5153_v22  ;;  %v15366_v24 = vpop.f32.mrb[55].mxu0  ;;  %15453 = vmatprep.subr.bf16.mxu1 %v18513_v20  ;;  %6540 = vmatprep.subr.bf16.mxu0 %v16489_v33 }
 0xa3a   : > { %15450 = vmatmul.mubr.msk.bf16.vlgmr.msra.gmra.mrb[100].mxu1 %vm3768_vm1, %v5216_v57 }
 0xa3b   : > { %15454 = vmatpush3.bf16.msra.mxu1 %v16485_v38  ;;  %15457 = vmatprep.mubr.msk.bf16.mxu1 %vm18514_vm0, %v18513_v20 }
 0xa3c   : > { %15455 = vmatprep.subr.bf16.mxu1 %v18513_v20 }
 0xa3e   : > { %14206 = vmatmul.mubr.msk.bf16.vlgmr.msra.gmra.mrb[56].mxu0 %vm3768_vm1, %v5216_v57 }
 0xa3f   : > { %15456 = vmatpush3.bf16.msra.mxu1 %v16486_v62  ;;  %6541 = vmatpush1.bf16.msra.mxu0 %v16487_v39 }
 0xa40   : > { %6542 = vmatprep.subr.bf16.mxu0 %v16492_v8  ;;  %6572 = vmatprep.mubr.bf16.mxu0 %v18512_v0 }
 0xa41   : > { %15461 = vmatprep.subr.bf16.mxu1 %v18513_v20 }
 0xa42   : > { %15458 = vmatmul.mubr.msk.bf16.vlgmr.msra.gmra.mrb[104].mxu1 %vm3768_vm1, %v5217_v10 }
 0xa43   : > { %6543 = vmatpush1.bf16.msra.mxu0 %v16490_v30  ;;  %15462 = vmatpush3.bf16.msra.mxu1 %v16496_v13 }
 0xa44   : > { %6659 = vmatprep.subr.bf16.mxu0 %v16495_v54  ;;  %15463 = vmatprep.subr.bf16.mxu1 %v18513_v20 }
 0xa45   : > { %15465 = vmatprep.mubr.msk.bf16.mxu1 %vm18514_vm0, %v18513_v20 }
 0xa47   : > { %15464 = vmatpush3.bf16.msra.mxu1 %v16500_v55 }
 0xa4a   : > { %14214 = vmatmul.mubr.msk.bf16.vlgmr.msra.gmra.mrb[56].mxu0 %vm3768_vm1, %v5217_v10 }
 0xa4b   : > { %6660 = vmatpush1.bf16.msra.mxu0 %v16493_v41  ;;  %6691 = vmatprep.mubr.bf16.mxu0 %v18512_v0 }
 0xa4c   : > { %6661 = vmatprep.subr.bf16.mxu0 %v16499_v16 }
 0xa4f   : > { %6662 = vmatpush1.bf16.msra.mxu0 %v16497_v14 }
 0xa6a   : > { %v5200_v44 = vpop.f32.mrb[60].mxu1 }
 0xa6b   : > { %v15371_v32 = vpop.f32.mrb[61].mxu1 }
 0xa6c   : > { %v5203_v37 = vpop.f32.mrb[62].mxu1 }
 0xa6d   : > { %v5218_v28 = vpack.c.bf16 %v5203_v37, %v5200_v44  ;;  %v15372_v18 = vpop.f32.mrb[63].mxu1 }
 0xa6f   : > { %14222 = vmatmul.mubr.msk.bf16.vlgmr.msra.gmra.mrb[56].mxu0 %vm3768_vm1, %v5218_v28  ;;  %15466 = vmatmul.mubr.msk.bf16.vlgmr.msra.gmra.mrb[108].mxu1 %vm3768_vm1, %v5218_v28 }
 0xa72   : > { %v5427_v20 = vpop.f32.mrb[64].mxu1 }
 0xa73   : > { %v15379_v17 = vpop.f32.mrb[65].mxu1 }
 0xa74   : > { %v5430_v19 = vpop.f32.mrb[66].mxu1 }
 0xa75   : > { %v15380_v9 = vpop.f32.mrb[67].mxu1 }
 0xa7a   : > { %v5546_v48 = vpop.f32.mrb[68].mxu1 }
 0xa7b   : > { %v6745_v46 = vadd.f32 %v5546_v48, %v5427_v20  ;;  %v15387_v15 = vpop.f32.mrb[69].mxu1 }
 0xa7c   : > { %v5549_v63 = vpop.f32.mrb[70].mxu1 }
 0xa7d   : > { %v6748_v36 = vadd.f32 %v5549_v63, %v5430_v19  ;;  %v15388_v27 = vpop.f32.mrb[71].mxu1 }
 0xa82   : > { %v5665_v58 = vpop.f32.mrb[72].mxu1 }
 0xa83   : > { %v6751_v1 = vadd.f32 %v6745_v46, %v5665_v58  ;;  %v15395_v47 = vpop.f32.mrb[73].mxu1  ;;  %v6809_v58 = vld [vmem:[%s1101_s24] sm:$0x7] }
 0xa84   : > { %v5668_v53 = vpop.f32.mrb[74].mxu1  ;;  %v6818_v47 = vrot.slane %v6809_v58, %v19693_v26 }
 0xa85   : > { %v6754_v50 = vadd.f32 %v6748_v36, %v5668_v53  ;;  %v15396_v29 = vpop.f32.mrb[75].mxu1  ;;  %v6822_v53 = vrot.slane %v6809_v58, %v19767_v34 }
 0xa8a   : > { %v5784_v52 = vpop.f32.mrb[76].mxu1 }
 0xa8b   : > { %v6757_v45 = vadd.f32 %v6751_v1, %v5784_v52  ;;  %v15403_v56 = vpop.f32.mrb[77].mxu1  ;;  %v6814_v1 = vrot.slane %v6809_v58, %v19690_v25  ;;  %v16525_v58 = vld [vmem:[%s19371_s4 + $0x180] ss:$48 sps:$4 sm:$0xff]  }
 0xa8c   : > { %v5787_v42 = vpop.f32.mrb[78].mxu1 }
 0xa8d   : > { %v6760_v57 = vadd.f32 %v6754_v50, %v5787_v42  ;;  %v15404_v2 = vpop.f32.mrb[79].mxu1 }
 0xa92   : > { %v5903_v23 = vpop.f32.mrb[80].mxu1 }
 0xa93   : > { %v6763_v7 = vadd.f32 %v6757_v45, %v5903_v23  ;;  %v15411_v12 = vpop.f32.mrb[81].mxu1 }
 0xa94   : > { %v5906_v4 = vpop.f32.mrb[82].mxu1 }
 0xa95   : > { %v6766_v51 = vadd.f32 %v6760_v57, %v5906_v4  ;;  %v15412_v31 = vpop.f32.mrb[83].mxu1 }
 0xa9a   : > { %v6022_v60 = vpop.f32.mrb[84].mxu1 }
 0xa9b   : > { %v6769_v3 = vadd.f32 %v6763_v7, %v6022_v60  ;;  %v15419_v43 = vpop.f32.mrb[85].mxu1  ;;  %v17470_v7 = vld [vmem:[#allocation2] sm:$0xff] }
 0xa9c   : > { %v6025_v49 = vpop.f32.mrb[86].mxu1  ;;  %v17471_v43 = vld [vmem:[#allocation2 + $0x8] sm:$0xff] }
 0xa9d   : > { %v6772_v33 = vadd.f32 %v6766_v51, %v6025_v49  ;;  %v15420_v22 = vpop.f32.mrb[87].mxu1 }
 0xa9e   : > { %v17472_v22 = vld [vmem:[#allocation2 + $0x18] sm:$0xff] }
 0xaa8   : > { %v6141_v11 = vpop.f32.mrb[88].mxu1 }
 0xaa9   : > { %v6775_v40 = vadd.f32 %v6769_v3, %v6141_v11  ;;  %v15427_v38 = vpop.f32.mrb[89].mxu1 }
 0xaaa   : > { %v6144_v10 = vpop.f32.mrb[90].mxu1  ;;  %v17473_v38 = vld [vmem:[#allocation2 + $0x10] sm:$0xff] }
 0xaab   : > { %v6778_v24 = vadd.f32 %v6772_v33, %v6144_v10  ;;  %v15428_v62 = vpop.f32.mrb[91].mxu1 }
 0xab0   : > { %v6260_v39 = vpop.f32.mrb[92].mxu1 }
 0xab1   : > { %v6781_v8 = vadd.f32 %v6775_v40, %v6260_v39  ;;  %v15435_v30 = vpop.f32.mrb[93].mxu1 }
 0xab2   : > { %v6263_v13 = vpop.f32.mrb[94].mxu1 }
 0xab3   : > { %v6784_v54 = vadd.f32 %v6778_v24, %v6263_v13  ;;  %v15436_v55 = vpop.f32.mrb[95].mxu1  ;;  %v17474_v24 = vld [vmem:[#allocation2 + $0x20] sm:$0xff] }
 0xb05   : > { %v6379_v41 = vpop.f32.mrb[96].mxu1 }
 0xb06   : > { %v6787_v16 = vadd.f32 %v6781_v8, %v6379_v41  ;;  %v15443_v14 = vpop.f32.mrb[97].mxu1  ;;  %v17475_v8 = vld [vmem:[#allocation2 + $0x28] sm:$0xff] }
 0xb07   : > { %v6382_v44 = vpop.f32.mrb[98].mxu1  ;;  %v16501_v41 = vld [vmem:[%s19371_s4] ss:$48 sps:$4 sm:$0xff]   ;;  %v16504_v14 = vld [vmem:[%s19371_s4 + $0x8] ss:$48 sps:$4 sm:$0xff]  }
 0xb08   : > { %v6790_v32 = vadd.f32 %v6784_v54, %v6382_v44  ;;  %v15444_v37 = vpop.f32.mrb[99].mxu1  ;;  %v16506_v44 = vld [vmem:[%s19371_s4 + $0xc] ss:$48 sps:$4 sm:$0xff]  }
 0xb09   : > { %v16512_v37 = vld [vmem:[%s19371_s4 + $0x6c] ss:$48 sps:$4 sm:$0xff]   ;;  %8808 = vmatprep.subr.bf16.mxu1 %v16506_v44 }
 0xb0a   : > { %8809 = vmatpush1.bf16.msra.mxu1 %v16504_v14 }
 0xb0b   : > { %8810 = vmatprep.subr.bf16.mxu1 %v16512_v37 }
 0xb0d   : > { %v6498_v28 = vpop.f32.mrb[100].mxu1 }
 0xb0e   : > { %v6793_v18 = vadd.f32 %v6787_v16, %v6498_v28  ;;  %v15451_v20 = vpop.f32.mrb[101].mxu1  ;;  %v16503_v16 = vld [vmem:[%s19371_s4 + $0x4] ss:$48 sps:$4 sm:$0xff]   ;;  %v16507_v28 = vld [vmem:[%s19371_s4 + $0x60] ss:$48 sps:$4 sm:$0xff]  }
 0xb0f   : > { %v6501_v17 = vpop.f32.mrb[102].mxu1  ;;  %8722 = vmatprep.subr.bf16.mxu0 %v16503_v16  ;;  %v16515_v20 = vld [vmem:[%s19371_s4 + $0xc4] ss:$48 sps:$4 sm:$0xff]  }
 0xb10   : > { %v6796_v19 = vadd.f32 %v6790_v32, %v6501_v17  ;;  %v15452_v9 = vpop.f32.mrb[103].mxu1  ;;  %v16509_v32 = vld [vmem:[%s19371_s4 + $0x64] ss:$48 sps:$4 sm:$0xff]   ;;  %8723 = vmatpush1.bf16.msra.mxu0 %v16501_v41  ;;  %v16518_v17 = vld [vmem:[%s19371_s4 + $0xcc] ss:$48 sps:$4 sm:$0xff]  }
 0xb11   : > { %8724 = vmatprep.subr.bf16.mxu0 %v16509_v32  ;;  %v16516_v9 = vld [vmem:[%s19371_s4 + $0xc8] ss:$48 sps:$4 sm:$0xff]  }
 0xb14   : > { %8725 = vmatpush1.bf16.msra.mxu0 %v16507_v28 }
 0xb15   : > { %v6617_v48 = vpop.f32.mrb[104].mxu1  ;;  %8726 = vmatprep.subr.bf16.mxu0 %v16515_v20  ;;  %v16561_v20 = vld [vmem:[%s19371_s4 + $0x3c0] ss:$48 sps:$4 sm:$0xff]  }
 0xb16   : > { %v6799_v46 = vadd.f32 %v6793_v18, %v6617_v48  ;;  %v15459_v15 = vpop.f32.mrb[105].mxu1  ;;  %v16510_v18 = vld [vmem:[%s19371_s4 + $0x68] ss:$48 sps:$4 sm:$0xff]   ;;  %v16521_v48 = vld [vmem:[%s19371_s4 + $0x124] ss:$48 sps:$4 sm:$0xff]  }
 0xb17   : > { %v6620_v63 = vpop.f32.mrb[106].mxu1  ;;  %8811 = vmatpush1.bf16.msra.mxu1 %v16510_v18  ;;  %v16519_v15 = vld [vmem:[%s19371_s4 + $0x120] ss:$48 sps:$4 sm:$0xff]   ;;  %v16563_v18 = vld [vmem:[%s19371_s4 + $0x3c4] ss:$48 sps:$4 sm:$0xff]  }
 0xb18   : > { %v6802_v36 = vadd.f32 %v6796_v19, %v6620_v63  ;;  %v15460_v27 = vpop.f32.mrb[107].mxu1  ;;  %v16513_v19 = vld [vmem:[%s19371_s4 + $0xc0] ss:$48 sps:$4 sm:$0xff]   ;;  %8812 = vmatprep.subr.bf16.mxu1 %v16518_v17  ;;  %v16522_v63 = vld [vmem:[%s19371_s4 + $0x128] ss:$48 sps:$4 sm:$0xff]  }
 0xb19   : > { %8727 = vmatpush1.bf16.msra.mxu0 %v16513_v19  ;;  %v16530_v27 = vld [vmem:[%s19371_s4 + $0x18c] ss:$48 sps:$4 sm:$0xff]   ;;  %v16564_v17 = vld [vmem:[%s19371_s4 + $0x3c8] ss:$48 sps:$4 sm:$0xff]   ;;  %v16569_v19 = vld [vmem:[%s19371_s4 + $0x424] ss:$48 sps:$4 sm:$0xff]  }
 0xb1a   : > { %8728 = vmatprep.subr.bf16.mxu0 %v16521_v48  ;;  %v16567_v48 = vld [vmem:[%s19371_s4 + $0x420] ss:$48 sps:$4 sm:$0xff]  }
 0xb1b   : > { %8813 = vmatpush1.bf16.msra.mxu1 %v16516_v9  ;;  %v16572_v9 = vld [vmem:[%s19371_s4 + $0x42c] ss:$48 sps:$4 sm:$0xff]  }
 0xb1d   : > { %8729 = vmatpush1.bf16.msra.mxu0 %v16519_v15  ;;  %v16575_v15 = vld [vmem:[%s19371_s4 + $0x484] ss:$48 sps:$4 sm:$0xff]  }
 0xb42   : > { %v6693_v50 = vpop.f32.mrb[56].mxu0  ;;  %v6736_v29 = vpop.f32.mrb[108].mxu1 }
 0xb43   : > { %v6826_v52 = vadd.f32 %v6814_v1, %v6693_v50  ;;  %v6805_v45 = vadd.f32 %v6799_v46, %v6736_v29  ;;  %v6695_v56 = vpop.f32.mrb[57].mxu0  ;;  %v15467_v42 = vpop.f32.mrb[109].mxu1  ;;  %v16524_v46 = vld [vmem:[%s19371_s4 + $0x12c] ss:$48 sps:$4 sm:$0xff]   ;;  %v16531_v50 = vld [vmem:[%s19371_s4 + $0x1e0] ss:$48 sps:$4 sm:$0xff]  }
 0xb44   : > { %v6827_v57 = vadd.f32 %v6818_v47, %v6695_v56  ;;  %v6697_v2 = vpop.f32.mrb[58].mxu0  ;;  %v6739_v23 = vpop.f32.mrb[110].mxu1  ;;  %8814 = vmatprep.subr.bf16.mxu1 %v16524_v46  ;;  %v16534_v29 = vld [vmem:[%s19371_s4 + $0x1e8] ss:$48 sps:$4 sm:$0xff]   ;;  %v16537_v56 = vld [vmem:[%s19371_s4 + $0x240] ss:$48 sps:$4 sm:$0xff]  }
 0xb45   : > { %v20437_v12 = vadd.f32 %v17470_v7, %v6826_v52  ;;  %v6828_v4 = vadd.f32 %v6822_v53, %v6805_v45  ;;  %v6829_v51 = vadd.f32 %v6814_v1, %v6697_v2  ;;  %v6808_v31 = vadd.f32 %v6802_v36, %v6739_v23  ;;  %v6699_v60 = vpop.f32.mrb[59].mxu0  ;;  %v15468_v3 = vpop.f32.mrb[111].mxu1  ;;  %v16527_v36 = vld [vmem:[%s19371_s4 + $0x184] ss:$48 sps:$4 sm:$0xff]   ;;  %8815 = vmatpush1.bf16.msra.mxu1 %v16522_v63  ;;  %v16528_v1 = vld [vmem:[%s19371_s4 + $0x188] ss:$48 sps:$4 sm:$0xff]  }
 0xb46   : > { %v20439_v49 = vadd.f32 %v17471_v43, %v6827_v57  ;;  %v6830_v33 = vadd.f32 %v6818_v47, %v6699_v60  ;;  %8730 = vmatprep.subr.bf16.mxu0 %v16527_v36  ;;  %v16533_v47 = vld [vmem:[%s19371_s4 + $0x1e4] ss:$48 sps:$4 sm:$0xff]   ;;  %8816 = vmatprep.subr.bf16.mxu1 %v16530_v27  ;;  %v16542_v45 = vld [vmem:[%s19371_s4 + $0x24c] ss:$48 sps:$4 sm:$0xff]   ;;  %v16540_v42 = vld [vmem:[%s19371_s4 + $0x248] ss:$48 sps:$4 sm:$0xff]  }
 0xb47   : > { %v20441_v11 = vadd.f32 %v17472_v22, %v6829_v51  ;;  %v6831_v40 = vadd.f32 %v6822_v53, %v6808_v31  ;;  %v20443_v10 = vadd.f32 %v17473_v38, %v6828_v4  ;;  %v16536_v53 = vld [vmem:[%s19371_s4 + $0x1ec] ss:$48 sps:$4 sm:$0xff]   ;;  %8731 = vmatpush1.bf16.msra.mxu0 %v16525_v58  ;;  %v16539_v52 = vld [vmem:[%s19371_s4 + $0x244] ss:$48 sps:$4 sm:$0xff]   ;;  %v16543_v23 = vld [vmem:[%s19371_s4 + $0x2a0] ss:$48 sps:$4 sm:$0xff]  }
 0xb48   : > { %v20445_v62 = vadd.f32 %v17474_v24, %v6830_v33  ;;  %v6840_v39 = vadd.f32 %v20439_v49, %v20437_v12  ;;  %8732 = vmatprep.subr.bf16.mxu0 %v16533_v47  ;;  %v16545_v57 = vld [vmem:[%s19371_s4 + $0x2a4] ss:$48 sps:$4 sm:$0xff]   ;;  %v16548_v2 = vld [vmem:[%s19371_s4 + $0x2ac] ss:$48 sps:$4 sm:$0xff]   ;;  %v16546_v7 = vld [vmem:[%s19371_s4 + $0x2a8] ss:$48 sps:$4 sm:$0xff]  }
 0xb49   : > { %v20449_v30 = vadd.f32 %v17475_v8, %v6831_v40  ;;  %8817 = vmatpush1.bf16.msra.mxu1 %v16528_v1  ;;  %v16551_v4 = vld [vmem:[%s19371_s4 + $0x304] ss:$48 sps:$4 sm:$0xff]   ;;  %v16554_v51 = vld [vmem:[%s19371_s4 + $0x30c] ss:$48 sps:$4 sm:$0xff]   ;;  %v16549_v31 = vld [vmem:[%s19371_s4 + $0x300] ss:$48 sps:$4 sm:$0xff]  }
 0xb4a   : > { %v6841_v13 = vadd.f32 %v6840_v39, %v20443_v10  ;;  %v6844_v54 = vadd.f32 %v20445_v62, %v20441_v11  ;;  %8818 = vmatprep.subr.bf16.mxu1 %v16536_v53  ;;  %v16552_v60 = vld [vmem:[%s19371_s4 + $0x308] ss:$48 sps:$4 sm:$0xff]   ;;  %v16557_v3 = vld [vmem:[%s19371_s4 + $0x364] ss:$48 sps:$4 sm:$0xff]   ;;  %v16560_v43 = vld [vmem:[%s19371_s4 + $0x36c] ss:$48 sps:$4 sm:$0xff]  }
 0xb4b   : > { %8733 = vmatpush1.bf16.msra.mxu0 %v16531_v50  ;;  %v16555_v33 = vld [vmem:[%s19371_s4 + $0x360] ss:$48 sps:$4 sm:$0xff]   ;;  %v16558_v22 = vld [vmem:[%s19371_s4 + $0x368] ss:$48 sps:$4 sm:$0xff]   ;;  %v16578_v27 = vld [vmem:[%s19371_s4 + $0x48c] ss:$48 sps:$4 sm:$0xff]  }
 0xb4c   : > { %6842 = vadd.xlane.f32.xlu0 %v6841_v13  ;;  %v6845_v55 = vadd.f32 %v6844_v54, %v20449_v30  ;;  %8734 = vmatprep.subr.bf16.mxu0 %v16539_v52  ;;  %v16570_v46 = vld [vmem:[%s19371_s4 + $0x428] ss:$48 sps:$4 sm:$0xff]   ;;  %v16573_v63 = vld [vmem:[%s19371_s4 + $0x480] ss:$48 sps:$4 sm:$0xff]   ;;  %v16581_v58 = vld [vmem:[%s19371_s4 + $0x4e4] ss:$48 sps:$4 sm:$0xff]  }
 0xb4d   : > { %8819 = vmatpush1.bf16.msra.mxu1 %v16534_v29  ;;  %v16576_v36 = vld [vmem:[%s19371_s4 + $0x488] ss:$48 sps:$4 sm:$0xff]   ;;  %v16584_v1 = vld [vmem:[%s19371_s4 + $0x4ec] ss:$48 sps:$4 sm:$0xff]   ;;  %v16579_v47 = vld [vmem:[%s19371_s4 + $0x4e0] ss:$48 sps:$4 sm:$0xff]  }
 0xb4e   : > { %6846 = vadd.xlane.f32.xlu1 %v6845_v55  ;;  %8820 = vmatprep.subr.bf16.mxu1 %v16542_v45  ;;  %v16582_v53 = vld [vmem:[%s19371_s4 + $0x4e8] ss:$48 sps:$4 sm:$0xff]   ;;  %v16587_v50 = vld [vmem:[%s19371_s4 + $0x544] ss:$48 sps:$4 sm:$0xff]   ;;  %v16590_v29 = vld [vmem:[%s19371_s4 + $0x54c] ss:$48 sps:$4 sm:$0xff]  }
 0xb4f   : > { %8735 = vmatpush1.bf16.msra.mxu0 %v16537_v56  ;;  %v16585_v52 = vld [vmem:[%s19371_s4 + $0x540] ss:$48 sps:$4 sm:$0xff]   ;;  %v16588_v45 = vld [vmem:[%s19371_s4 + $0x548] ss:$48 sps:$4 sm:$0xff]   ;;  %v16593_v56 = vld [vmem:[%s19371_s4 + $0x5a4] ss:$48 sps:$4 sm:$0xff]  }
 0xb50   : > { %8736 = vmatprep.subr.bf16.mxu0 %v16545_v57  ;;  %v16591_v57 = vld [vmem:[%s19371_s4 + $0x5a0] ss:$48 sps:$4 sm:$0xff]  }
 0xb51   : > { %8821 = vmatpush1.bf16.msra.mxu1 %v16540_v42  ;;  %v16596_v42 = vld [vmem:[%s19371_s4 + $0x5ac] ss:$48 sps:$4 sm:$0xff]  }
 0xb52   : > { %8822 = vmatprep.subr.bf16.mxu1 %v16548_v2  ;;  %v16594_v2 = vld [vmem:[%s19371_s4 + $0x5a8] ss:$48 sps:$4 sm:$0xff]  }
 0xb53   : > { %8737 = vmatpush1.bf16.msra.mxu0 %v16543_v23  ;;  %v16599_v23 = vld [vmem:[%s19371_s4 + $0x604] ss:$48 sps:$4 sm:$0xff]  }
 0xb54   : > { %8738 = vmatprep.subr.bf16.mxu0 %v16551_v4 }
 0xb55   : > { %8823 = vmatpush1.bf16.msra.mxu1 %v16546_v7  ;;  %v16602_v7 = vld [vmem:[%s19371_s4 + $0x60c] ss:$48 sps:$4 sm:$0xff]  }
 0xb56   : > { %8824 = vmatprep.subr.bf16.mxu1 %v16554_v51 }
 0xb57   : > { %8739 = vmatpush1.bf16.msra.mxu0 %v16549_v31 }
 0xb58   : > { %8740 = vmatprep.subr.bf16.mxu0 %v16557_v3 }
 0xb59   : > { %8825 = vmatpush1.bf16.msra.mxu1 %v16552_v60 }
 0xb5a   : > { %8826 = vmatprep.subr.bf16.mxu1 %v16560_v43 }
 0xb5b   : > { %8741 = vmatpush1.bf16.msra.mxu0 %v16555_v33  ;;  %v20553_v33 = vld [vmem:[%s1110_s13] sm:$0x7] }
 0xb5c   : > { %8742 = vmatprep.subr.bf16.mxu0 %v16563_v18 }
 0xb5d   : > { %8827 = vmatpush1.bf16.msra.mxu1 %v16558_v22 }
 0xb5f   : > { %8743 = vmatpush1.bf16.msra.mxu0 %v16561_v20  ;;  %v16597_v20 = vld [vmem:[%s19371_s4 + $0x600] ss:$48 sps:$4 sm:$0xff]  }
 0xb60   : > { %8744 = vmatprep.subr.bf16.mxu0 %v16569_v19  ;;  %v16605_v19 = vld [vmem:[%s19371_s4 + $0x664] ss:$48 sps:$4 sm:$0xff]  }
 0xb63   : > { %8745 = vmatpush1.bf16.msra.mxu0 %v16567_v48  ;;  %v16603_v48 = vld [vmem:[%s19371_s4 + $0x660] ss:$48 sps:$4 sm:$0xff]  }
 0xb64   : > { %8746 = vmatprep.subr.bf16.mxu0 %v16575_v15  ;;  %v16611_v15 = vld [vmem:[%s19371_s4 + $0x6c4] ss:$48 sps:$4 sm:$0xff]  }
 0xb67   : > { %8747 = vmatpush1.bf16.msra.mxu0 %v16573_v63  ;;  %v16614_v63 = vld [vmem:[%s19371_s4 + $0x6cc] ss:$48 sps:$4 sm:$0xff]  }
 0xb68   : > { %8748 = vmatprep.subr.bf16.mxu0 %v16581_v58  ;;  %v16617_v58 = vld [vmem:[%s19371_s4 + $0x724] ss:$48 sps:$4 sm:$0xff]  }
 0xb6b   : > { %8749 = vmatpush1.bf16.msra.mxu0 %v16579_v47  ;;  %v16615_v47 = vld [vmem:[%s19371_s4 + $0x720] ss:$48 sps:$4 sm:$0xff]  }
 0xb6c   : > { %8750 = vmatprep.subr.bf16.mxu0 %v16587_v50  ;;  %v16623_v50 = vld [vmem:[%s19371_s4 + $0x784] ss:$48 sps:$4 sm:$0xff]  }
 0xb6f   : > { %8751 = vmatpush1.bf16.msra.mxu0 %v16585_v52  ;;  %v16621_v52 = vld [vmem:[%s19371_s4 + $0x780] ss:$48 sps:$4 sm:$0xff]  }
 0xb70   : > { %8752 = vmatprep.subr.bf16.mxu0 %v16593_v56  ;;  %v16629_v56 = vld [vmem:[%s19371_s4 + $0x7e4] ss:$48 sps:$4 sm:$0xff]  }
 0xb73   : > { %8753 = vmatpush1.bf16.msra.mxu0 %v16591_v57  ;;  %v16627_v57 = vld [vmem:[%s19371_s4 + $0x7e0] ss:$48 sps:$4 sm:$0xff]  }
 0xb74   : > { %8765 = vmatprep.subr.bf16.mxu0 %v16599_v23  ;;  %v16635_v23 = vld [vmem:[%s19371_s4 + $0x844] ss:$48 sps:$4 sm:$0xff]  }
 0xbd9   : > { %v6843_v40 = vpop.xlane.xlu0 %6842 }
 0xbda   : > { %v6849_v38 = vmul.f32 0.0026041667, %v6843_v40  ;;  %v20559_v40 = vld [vmem:[%s1119_s21] sm:$0x7] }
 0xbdb   : > { %v6847_v24 = vpop.xlane.xlu1 %6846 }
 0xbdc   : > { %v20496_v39 = vsub.f32 %v20437_v12, %v6849_v38  ;;  %v20499_v8 = vsub.f32 %v20439_v49, %v6849_v38  ;;  %v6850_v13 = vmul.f32 0.0026041667, %v6847_v24  ;;  %v20502_v54 = vsub.f32 %v20443_v10, %v6849_v38 }
 0xbdd   : > { %v6891_v24 = vrot.slane %v20553_v33, %v19693_v26 }
 0xbde   : > { %v20505_v55 = vsub.f32 %v20441_v11, %v6850_v13  ;;  %v20508_v41 = vsub.f32 %v20445_v62, %v6850_v13  ;;  %v6857_v12 = vmul.f32 %v20496_v39, %v20496_v39  ;;  %v6858_v49 = vmul.f32 %v20499_v8, %v20499_v8 }
 0xbdf   : > { %v20519_v11 = vsub.f32 %v20449_v30, %v6850_v13  ;;  %v6859_v62 = vmul.f32 %v20502_v54, %v20502_v54  ;;  %v16566_v30 = vld [vmem:[%s19371_s4 + $0x3cc] ss:$48 sps:$4 sm:$0xff]  }
 0xbe0   : > { %v6860_v10 = vmul.f32 %v20505_v55, %v20505_v55  ;;  %v6861_v16 = vmul.f32 %v20508_v41, %v20508_v41  ;;  %v6863_v14 = vadd.f32 %v6858_v49, %v6857_v12  ;;  %8828 = vmatprep.subr.bf16.mxu1 %v16566_v30  ;;  %v6887_v12 = vrot.slane %v20553_v33, %v19690_v25 }
 0xbe1   : > { %v6862_v37 = vmul.f32 %v20519_v11, %v20519_v11  ;;  %8829 = vmatpush1.bf16.msra.mxu1 %v16564_v17 }
 0xbe2   : > { %v6864_v44 = vadd.f32 %v6863_v14, %v6859_v62  ;;  %v6867_v32 = vadd.f32 %v6861_v16, %v6860_v10  ;;  %8830 = vmatprep.subr.bf16.mxu1 %v16572_v9  ;;  %v6913_v10 = vrot.slane %v20559_v40, %v19693_v26  ;;  %v16608_v9 = vld [vmem:[%s19371_s4 + $0x66c] ss:$48 sps:$4 sm:$0xff]  }
 0xbe4   : > { %6865 = vadd.xlane.f32.xlu0 %v6864_v44  ;;  %v6868_v28 = vadd.f32 %v6867_v32, %v6862_v37 }
 0xbe5   : > { %8831 = vmatpush1.bf16.msra.mxu1 %v16570_v46  ;;  %v16606_v46 = vld [vmem:[%s19371_s4 + $0x668] ss:$48 sps:$4 sm:$0xff]  }
 0xbe6   : > { %8832 = vmatprep.subr.bf16.mxu1 %v16578_v27  ;;  %v16612_v27 = vld [vmem:[%s19371_s4 + $0x6c8] ss:$48 sps:$4 sm:$0xff]  }
 0xbe8   : > { %6869 = vadd.xlane.f32.xlu0 %v6868_v28 }
 0xbe9   : > { %8833 = vmatpush1.bf16.msra.mxu1 %v16576_v36  ;;  %v16609_v36 = vld [vmem:[%s19371_s4 + $0x6c0] ss:$48 sps:$4 sm:$0xff]  }
 0xbea   : > { %8834 = vmatprep.subr.bf16.mxu1 %v16584_v1  ;;  %v16620_v1 = vld [vmem:[%s19371_s4 + $0x72c] ss:$48 sps:$4 sm:$0xff]  }
 0xbed   : > { %8835 = vmatpush1.bf16.msra.mxu1 %v16582_v53  ;;  %v16618_v53 = vld [vmem:[%s19371_s4 + $0x728] ss:$48 sps:$4 sm:$0xff]  }
 0xbee   : > { %8836 = vmatprep.subr.bf16.mxu1 %v16590_v29  ;;  %v16626_v29 = vld [vmem:[%s19371_s4 + $0x78c] ss:$48 sps:$4 sm:$0xff]  }
 0xbf1   : > { %8837 = vmatpush1.bf16.msra.mxu1 %v16588_v45  ;;  %v16624_v45 = vld [vmem:[%s19371_s4 + $0x788] ss:$48 sps:$4 sm:$0xff]  }
 0xbf2   : > { %8838 = vmatprep.subr.bf16.mxu1 %v16596_v42  ;;  %v16632_v42 = vld [vmem:[%s19371_s4 + $0x7ec] ss:$48 sps:$4 sm:$0xff]  }
 0xbf5   : > { %8839 = vmatpush1.bf16.msra.mxu1 %v16594_v2  ;;  %v16630_v2 = vld [vmem:[%s19371_s4 + $0x7e8] ss:$48 sps:$4 sm:$0xff]  }
 0xbf6   : > { %8851 = vmatprep.subr.bf16.mxu1 %v16602_v7  ;;  %v16638_v7 = vld [vmem:[%s19371_s4 + $0x84c] ss:$48 sps:$4 sm:$0xff]  }
 0xc71   : > { %v6866_v4 = vpop.xlane.xlu0 %6865 }
 0xc72   : > { %v6871_v51 = vmul.f32 0.0026041667, %v6866_v4 }
 0xc74   : > { %v6873_v31 = vadd.f32 1e-12, %v6871_v51 }
 0xc75   : > { %v6870_v60 = vpop.xlane.xlu0 %6869 }
 0xc76   : > { %17413 = vrsqrt.f32 %v6873_v31  ;;  %v6872_v3 = vmul.f32 0.0026041667, %v6870_v60  ;;  %v6895_v31 = vrot.slane %v20553_v33, %v19767_v34  ;;  %v16633_v60 = vld [vmem:[%s19371_s4 + $0x840] ss:$48 sps:$4 sm:$0xff]  }
 0xc77   : > { %v16639_v33 = vld [vmem:[%s19371_s4 + $0x8a0] ss:$48 sps:$4 sm:$0xff]  }
 0xc78   : > { %v6874_v43 = vadd.f32 1e-12, %v6872_v3  ;;  %v16636_v3 = vld [vmem:[%s19371_s4 + $0x848] ss:$48 sps:$4 sm:$0xff]  }
 0xc7a   : > { %17415 = vrsqrt.f32 %v6874_v43  ;;  %v16641_v43 = vld [vmem:[%s19371_s4 + $0x8a4] ss:$48 sps:$4 sm:$0xff]  }
 0xc80   : > { %v20555_v22 = vpop.eup %17413 }
 0xc81   : > { %v6878_v38 = vmul.f32 %v20555_v22, %v20499_v8  ;;  %v6877_v13 = vmul.f32 %v20555_v22, %v20496_v39  ;;  %v6909_v8 = vrot.slane %v20559_v40, %v19690_v25  ;;  %v6879_v51 = vmul.f32 %v20555_v22, %v20502_v54  ;;  %v16642_v22 = vld [vmem:[%s19371_s4 + $0x8a8] ss:$48 sps:$4 sm:$0xff]  }
 0xc82   : > { %v6917_v54 = vrot.slane %v20559_v40, %v19767_v34  ;;  %v16645_v40 = vld [vmem:[%s19371_s4 + $0x10] ss:$48 sps:$4 sm:$0xff]  }
 0xc83   : > { %v6900_v62 = vmul.f32 %v6891_v24, %v6878_v38  ;;  %v6899_v14 = vmul.f32 %v6887_v12, %v6877_v13  ;;  %v16644_v38 = vld [vmem:[%s19371_s4 + $0x8ac] ss:$48 sps:$4 sm:$0xff]  }
 0xc84   : > { %v20569_v49 = vpop.eup %17415 }
 0xc85   : > { %v6881_v16 = vmul.f32 %v20569_v49, %v20508_v41  ;;  %v6880_v39 = vmul.f32 %v20569_v49, %v20505_v55  ;;  %v20579_v37 = vadd.f32 %v6913_v10, %v6900_v62  ;;  %v20583_v18 = vadd.f32 %v6909_v8, %v6899_v14  ;;  %v16600_v55 = vld [vmem:[%s19371_s4 + $0x608] ss:$48 sps:$4 sm:$0xff]   ;;  %v16653_v62 = vld [vmem:[%s19371_s4 + $0x74] ss:$48 sps:$4 sm:$0xff]   ;;  %v16651_v14 = vld [vmem:[%s19371_s4 + $0x70] ss:$48 sps:$4 sm:$0xff]  }
 0xc86   : > { %v6882_v4 = vmul.f32 %v20569_v49, %v20519_v11  ;;  %v16650_v49 = vld [vmem:[%s19371_s4 + $0x1c] ss:$48 sps:$4 sm:$0xff]  }
 0xc87   : > { %v6903_v44 = vmul.f32 %v6891_v24, %v6881_v16  ;;  %v6902_v32 = vmul.f32 %v6887_v12, %v6880_v39  ;;  %v6901_v24 = vmul.f32 %v6895_v31, %v6879_v51  ;;  %v16647_v12 = vld [vmem:[%s19371_s4 + $0x14] ss:$48 sps:$4 sm:$0xff]   ;;  %v16648_v16 = vld [vmem:[%s19371_s4 + $0x18] ss:$48 sps:$4 sm:$0xff]   ;;  %v16656_v39 = vld [vmem:[%s19371_s4 + $0x7c] ss:$48 sps:$4 sm:$0xff]  }
 0xc88   : > { %v6904_v11 = vmul.f32 %v6895_v31, %v6882_v4  ;;  %v16698_v4 = vld [vmem:[%s19371_s4 + $0x31c] ss:$48 sps:$4 sm:$0xff]   ;;  %v16693_v51 = vld [vmem:[%s19371_s4 + $0x310] ss:$48 sps:$4 sm:$0xff]   ;;  %v16696_v31 = vld [vmem:[%s19371_s4 + $0x318] ss:$48 sps:$4 sm:$0xff]  }
 0xc89   : > { %v20581_v28 = vadd.f32 %v6913_v10, %v6903_v44  ;;  %v20585_v30 = vadd.f32 %v6909_v8, %v6902_v32  ;;  %v20643_v10 = vadd.f32 %v6917_v54, %v6901_v24  ;;  %v16654_v44 = vld [vmem:[%s19371_s4 + $0x78] ss:$48 sps:$4 sm:$0xff]   ;;  %v16659_v32 = vld [vmem:[%s19371_s4 + $0xd4] ss:$48 sps:$4 sm:$0xff]   ;;  %v16710_v24 = vld [vmem:[%s19371_s4 + $0x3dc] ss:$48 sps:$4 sm:$0xff]  }
 0xc8a   : > { %v20639_v13 = vadd.f32 %v6917_v54, %v6904_v11  ;;  %v16707_v11 = vld [vmem:[%s19371_s4 + $0x3d4] ss:$48 sps:$4 sm:$0xff]   ;;  %v16705_v54 = vld [vmem:[%s19371_s4 + $0x3d0] ss:$48 sps:$4 sm:$0xff]  }
 0xc8b   : > { %v20589_v41 = vpack.c.bf16 %v20581_v28, %v20579_v37  ;;  %v20595_v17 = vpack.c.bf16 %v20585_v30, %v20583_v18 }
 0xc8c   : > { %v20648_v8 = vpack.c.bf16 %v20639_v13, %v20643_v10 }
 0xc8d   : > { %8754 = vmatprep.mubr.bf16.mxu0 %v20589_v41  ;;  %8840 = vmatprep.mubr.bf16.mxu1 %v20589_v41 }
 0xc8e   : > { %8755 = vmatmul.mubr.bf16.vlgmr.msra.gmra.mrb[60].mxu0 %v20595_v17  ;;  %8841 = vmatmul.mubr.bf16.vlgmr.msra.gmra.mrb[112].mxu1 %v20595_v17 }
 0xc8f   : > { %8766 = vmatpush1.bf16.msra.mxu0 %v16597_v20  ;;  %8852 = vmatpush1.bf16.msra.mxu1 %v16600_v55  ;;  %v16662_v20 = vld [vmem:[%s19371_s4 + $0xdc] ss:$48 sps:$4 sm:$0xff]   ;;  %v16657_v55 = vld [vmem:[%s19371_s4 + $0xd0] ss:$48 sps:$4 sm:$0xff]  }
 0xc90   : > { %8767 = vmatprep.subr.bf16.mxu0 %v16605_v19  ;;  %8853 = vmatprep.subr.bf16.mxu1 %v16608_v9  ;;  %v16660_v19 = vld [vmem:[%s19371_s4 + $0xd8] ss:$48 sps:$4 sm:$0xff]   ;;  %v16665_v9 = vld [vmem:[%s19371_s4 + $0x134] ss:$48 sps:$4 sm:$0xff]  }
 0xc91   : > { %8797 = vmatprep.mubr.bf16.mxu0 %v18512_v0  ;;  %8883 = vmatprep.mubr.bf16.mxu1 %v18512_v0 }
 0xc93   : > { %8768 = vmatpush1.bf16.msra.mxu0 %v16603_v48  ;;  %8854 = vmatpush1.bf16.msra.mxu1 %v16606_v46  ;;  %v16668_v48 = vld [vmem:[%s19371_s4 + $0x13c] ss:$48 sps:$4 sm:$0xff]   ;;  %v16663_v46 = vld [vmem:[%s19371_s4 + $0x130] ss:$48 sps:$4 sm:$0xff]  }
 0xc94   : > { %8769 = vmatprep.subr.bf16.mxu0 %v16611_v15  ;;  %8855 = vmatprep.subr.bf16.mxu1 %v16614_v63  ;;  %v16666_v15 = vld [vmem:[%s19371_s4 + $0x138] ss:$48 sps:$4 sm:$0xff]   ;;  %v16671_v63 = vld [vmem:[%s19371_s4 + $0x194] ss:$48 sps:$4 sm:$0xff]  }
 0xc97   : > { %8770 = vmatpush1.bf16.msra.mxu0 %v16609_v36  ;;  %8856 = vmatpush1.bf16.msra.mxu1 %v16612_v27  ;;  %v16674_v36 = vld [vmem:[%s19371_s4 + $0x19c] ss:$48 sps:$4 sm:$0xff]   ;;  %v16669_v27 = vld [vmem:[%s19371_s4 + $0x190] ss:$48 sps:$4 sm:$0xff]  }
 0xc98   : > { %8771 = vmatprep.subr.bf16.mxu0 %v16617_v58  ;;  %8857 = vmatprep.subr.bf16.mxu1 %v16620_v1  ;;  %v16672_v58 = vld [vmem:[%s19371_s4 + $0x198] ss:$48 sps:$4 sm:$0xff]   ;;  %v16677_v1 = vld [vmem:[%s19371_s4 + $0x1f4] ss:$48 sps:$4 sm:$0xff]  }
 0xc9b   : > { %8772 = vmatpush1.bf16.msra.mxu0 %v16615_v47  ;;  %8858 = vmatpush1.bf16.msra.mxu1 %v16618_v53  ;;  %v16680_v47 = vld [vmem:[%s19371_s4 + $0x1fc] ss:$48 sps:$4 sm:$0xff]   ;;  %v16675_v53 = vld [vmem:[%s19371_s4 + $0x1f0] ss:$48 sps:$4 sm:$0xff]  }
 0xc9c   : > { %8773 = vmatprep.subr.bf16.mxu0 %v16623_v50  ;;  %8859 = vmatprep.subr.bf16.mxu1 %v16626_v29  ;;  %v16678_v50 = vld [vmem:[%s19371_s4 + $0x1f8] ss:$48 sps:$4 sm:$0xff]   ;;  %v16683_v29 = vld [vmem:[%s19371_s4 + $0x254] ss:$48 sps:$4 sm:$0xff]  }
 0xc9f   : > { %8774 = vmatpush1.bf16.msra.mxu0 %v16621_v52  ;;  %8860 = vmatpush1.bf16.msra.mxu1 %v16624_v45  ;;  %v16686_v52 = vld [vmem:[%s19371_s4 + $0x25c] ss:$48 sps:$4 sm:$0xff]   ;;  %v16681_v45 = vld [vmem:[%s19371_s4 + $0x250] ss:$48 sps:$4 sm:$0xff]  }
 0xca0   : > { %8775 = vmatprep.subr.bf16.mxu0 %v16629_v56  ;;  %8861 = vmatprep.subr.bf16.mxu1 %v16632_v42  ;;  %v16684_v56 = vld [vmem:[%s19371_s4 + $0x258] ss:$48 sps:$4 sm:$0xff]   ;;  %v16689_v42 = vld [vmem:[%s19371_s4 + $0x2b4] ss:$48 sps:$4 sm:$0xff]  }
 0xca3   : > { %8776 = vmatpush1.bf16.msra.mxu0 %v16627_v57  ;;  %8862 = vmatpush1.bf16.msra.mxu1 %v16630_v2  ;;  %v16692_v57 = vld [vmem:[%s19371_s4 + $0x2bc] ss:$48 sps:$4 sm:$0xff]   ;;  %v16687_v2 = vld [vmem:[%s19371_s4 + $0x2b0] ss:$48 sps:$4 sm:$0xff]  }
 0xca4   : > { %8777 = vmatprep.subr.bf16.mxu0 %v16635_v23  ;;  %8863 = vmatprep.subr.bf16.mxu1 %v16638_v7  ;;  %v16690_v23 = vld [vmem:[%s19371_s4 + $0x2b8] ss:$48 sps:$4 sm:$0xff]   ;;  %v16695_v7 = vld [vmem:[%s19371_s4 + $0x314] ss:$48 sps:$4 sm:$0xff]  }
 0xca7   : > { %8778 = vmatpush1.bf16.msra.mxu0 %v16633_v60  ;;  %8864 = vmatpush1.bf16.msra.mxu1 %v16636_v3  ;;  %v16701_v60 = vld [vmem:[%s19371_s4 + $0x374] ss:$48 sps:$4 sm:$0xff]   ;;  %v16704_v3 = vld [vmem:[%s19371_s4 + $0x37c] ss:$48 sps:$4 sm:$0xff]  }
 0xca8   : > { %8779 = vmatprep.subr.bf16.mxu0 %v16641_v43  ;;  %8865 = vmatprep.subr.bf16.mxu1 %v16644_v38  ;;  %v16699_v43 = vld [vmem:[%s19371_s4 + $0x370] ss:$48 sps:$4 sm:$0xff]   ;;  %v16702_v38 = vld [vmem:[%s19371_s4 + $0x378] ss:$48 sps:$4 sm:$0xff]  }
 0xcab   : > { %8780 = vmatpush1.bf16.msra.mxu0 %v16639_v33  ;;  %8866 = vmatpush1.bf16.msra.mxu1 %v16642_v22  ;;  %v16708_v33 = vld [vmem:[%s19371_s4 + $0x3d8] ss:$48 sps:$4 sm:$0xff]   ;;  %v16713_v22 = vld [vmem:[%s19371_s4 + $0x434] ss:$48 sps:$4 sm:$0xff]  }
 0xcac   : > { %8894 = vmatprep.subr.bf16.mxu0 %v16647_v12  ;;  %8980 = vmatprep.subr.bf16.mxu1 %v16650_v49  ;;  %v16716_v12 = vld [vmem:[%s19371_s4 + $0x43c] ss:$48 sps:$4 sm:$0xff]   ;;  %v16711_v49 = vld [vmem:[%s19371_s4 + $0x430] ss:$48 sps:$4 sm:$0xff]  }
 0xcae   : > { %8798 = vmatmul.mubr.bf16.vlgmr.msra.gmra.mrb[60].mxu0 %v20648_v8  ;;  %8884 = vmatmul.mubr.bf16.vlgmr.msra.gmra.mrb[112].mxu1 %v20648_v8 }
 0xcaf   : > { %8895 = vmatpush1.bf16.msra.mxu0 %v16645_v40  ;;  %8926 = vmatprep.mubr.bf16.mxu0 %v20589_v41  ;;  %v16714_v40 = vld [vmem:[%s19371_s4 + $0x438] ss:$48 sps:$4 sm:$0xff]  }
 0xcb0   : > { %8981 = vmatpush1.bf16.msra.mxu1 %v16648_v16  ;;  %9012 = vmatprep.mubr.bf16.mxu1 %v20589_v41  ;;  %v16719_v16 = vld [vmem:[%s19371_s4 + $0x494] ss:$48 sps:$4 sm:$0xff]  }
 0xcb1   : > { %8896 = vmatprep.subr.bf16.mxu0 %v16653_v62  ;;  %8982 = vmatprep.subr.bf16.mxu1 %v16656_v39  ;;  %v16722_v62 = vld [vmem:[%s19371_s4 + $0x49c] ss:$48 sps:$4 sm:$0xff]   ;;  %v16717_v39 = vld [vmem:[%s19371_s4 + $0x490] ss:$48 sps:$4 sm:$0xff]  }
 0xcb3   : > { %8897 = vmatpush1.bf16.msra.mxu0 %v16651_v14  ;;  %v16720_v14 = vld [vmem:[%s19371_s4 + $0x498] ss:$48 sps:$4 sm:$0xff]  }
 0xcb4   : > { %8983 = vmatpush1.bf16.msra.mxu1 %v16654_v44  ;;  %8898 = vmatprep.subr.bf16.mxu0 %v16659_v32  ;;  %v16725_v44 = vld [vmem:[%s19371_s4 + $0x4f4] ss:$48 sps:$4 sm:$0xff]   ;;  %v16728_v32 = vld [vmem:[%s19371_s4 + $0x4fc] ss:$48 sps:$4 sm:$0xff]  }
 0xcb5   : > { %8984 = vmatprep.subr.bf16.mxu1 %v16662_v20  ;;  %v16723_v20 = vld [vmem:[%s19371_s4 + $0x4f0] ss:$48 sps:$4 sm:$0xff]  }
 0xcb7   : > { %8899 = vmatpush1.bf16.msra.mxu0 %v16657_v55  ;;  %v16726_v55 = vld [vmem:[%s19371_s4 + $0x4f8] ss:$48 sps:$4 sm:$0xff]  }
 0xcb8   : > { %8985 = vmatpush1.bf16.msra.mxu1 %v16660_v19  ;;  %8900 = vmatprep.subr.bf16.mxu0 %v16665_v9  ;;  %v16731_v19 = vld [vmem:[%s19371_s4 + $0x554] ss:$48 sps:$4 sm:$0xff]   ;;  %v16734_v9 = vld [vmem:[%s19371_s4 + $0x55c] ss:$48 sps:$4 sm:$0xff]  }
 0xcb9   : > { %8986 = vmatprep.subr.bf16.mxu1 %v16668_v48  ;;  %v16729_v48 = vld [vmem:[%s19371_s4 + $0x550] ss:$48 sps:$4 sm:$0xff]  }
 0xcbb   : > { %8901 = vmatpush1.bf16.msra.mxu0 %v16663_v46  ;;  %v16732_v46 = vld [vmem:[%s19371_s4 + $0x558] ss:$48 sps:$4 sm:$0xff]  }
 0xcbc   : > { %8987 = vmatpush1.bf16.msra.mxu1 %v16666_v15  ;;  %8902 = vmatprep.subr.bf16.mxu0 %v16671_v63  ;;  %v16737_v15 = vld [vmem:[%s19371_s4 + $0x5b4] ss:$48 sps:$4 sm:$0xff]   ;;  %v16740_v63 = vld [vmem:[%s19371_s4 + $0x5bc] ss:$48 sps:$4 sm:$0xff]  }
 0xcbd   : > { %8988 = vmatprep.subr.bf16.mxu1 %v16674_v36  ;;  %v16735_v36 = vld [vmem:[%s19371_s4 + $0x5b0] ss:$48 sps:$4 sm:$0xff]  }
 0xcbf   : > { %8903 = vmatpush1.bf16.msra.mxu0 %v16669_v27  ;;  %v16738_v27 = vld [vmem:[%s19371_s4 + $0x5b8] ss:$48 sps:$4 sm:$0xff]  }
 0xcc0   : > { %8989 = vmatpush1.bf16.msra.mxu1 %v16672_v58  ;;  %8904 = vmatprep.subr.bf16.mxu0 %v16677_v1  ;;  %v16743_v58 = vld [vmem:[%s19371_s4 + $0x614] ss:$48 sps:$4 sm:$0xff]   ;;  %v16746_v1 = vld [vmem:[%s19371_s4 + $0x61c] ss:$48 sps:$4 sm:$0xff]  }
 0xcc1   : > { %8990 = vmatprep.subr.bf16.mxu1 %v16680_v47  ;;  %v16741_v47 = vld [vmem:[%s19371_s4 + $0x610] ss:$48 sps:$4 sm:$0xff]  }
 0xcc3   : > { %8905 = vmatpush1.bf16.msra.mxu0 %v16675_v53  ;;  %v16744_v53 = vld [vmem:[%s19371_s4 + $0x618] ss:$48 sps:$4 sm:$0xff]  }
 0xcc4   : > { %8991 = vmatpush1.bf16.msra.mxu1 %v16678_v50  ;;  %8906 = vmatprep.subr.bf16.mxu0 %v16683_v29  ;;  %v16749_v50 = vld [vmem:[%s19371_s4 + $0x674] ss:$48 sps:$4 sm:$0xff]   ;;  %v16752_v29 = vld [vmem:[%s19371_s4 + $0x67c] ss:$48 sps:$4 sm:$0xff]  }
 0xcc5   : > { %8992 = vmatprep.subr.bf16.mxu1 %v16686_v52  ;;  %v16747_v52 = vld [vmem:[%s19371_s4 + $0x670] ss:$48 sps:$4 sm:$0xff]  }
 0xcc7   : > { %8907 = vmatpush1.bf16.msra.mxu0 %v16681_v45  ;;  %v16750_v45 = vld [vmem:[%s19371_s4 + $0x678] ss:$48 sps:$4 sm:$0xff]  }
 0xcc8   : > { %8993 = vmatpush1.bf16.msra.mxu1 %v16684_v56  ;;  %8908 = vmatprep.subr.bf16.mxu0 %v16689_v42  ;;  %v16755_v56 = vld [vmem:[%s19371_s4 + $0x6d4] ss:$48 sps:$4 sm:$0xff]   ;;  %v16758_v42 = vld [vmem:[%s19371_s4 + $0x6dc] ss:$48 sps:$4 sm:$0xff]  }
 0xcc9   : > { %8994 = vmatprep.subr.bf16.mxu1 %v16692_v57  ;;  %v16753_v57 = vld [vmem:[%s19371_s4 + $0x6d0] ss:$48 sps:$4 sm:$0xff]  }
 0xccb   : > { %8909 = vmatpush1.bf16.msra.mxu0 %v16687_v2  ;;  %v16756_v2 = vld [vmem:[%s19371_s4 + $0x6d8] ss:$48 sps:$4 sm:$0xff]  }
 0xccc   : > { %8995 = vmatpush1.bf16.msra.mxu1 %v16690_v23  ;;  %8910 = vmatprep.subr.bf16.mxu0 %v16695_v7  ;;  %v16761_v23 = vld [vmem:[%s19371_s4 + $0x734] ss:$48 sps:$4 sm:$0xff]   ;;  %v16764_v7 = vld [vmem:[%s19371_s4 + $0x73c] ss:$48 sps:$4 sm:$0xff]  }
 0xccd   : > { %8996 = vmatprep.subr.bf16.mxu1 %v16698_v4  ;;  %v16759_v4 = vld [vmem:[%s19371_s4 + $0x730] ss:$48 sps:$4 sm:$0xff]  }
 0xccf   : > { %8911 = vmatpush1.bf16.msra.mxu0 %v16693_v51  ;;  %v16762_v51 = vld [vmem:[%s19371_s4 + $0x738] ss:$48 sps:$4 sm:$0xff]  }
 0xcd0   : > { %8997 = vmatpush1.bf16.msra.mxu1 %v16696_v31  ;;  %8912 = vmatprep.subr.bf16.mxu0 %v16701_v60  ;;  %v16767_v31 = vld [vmem:[%s19371_s4 + $0x794] ss:$48 sps:$4 sm:$0xff]   ;;  %v16770_v60 = vld [vmem:[%s19371_s4 + $0x79c] ss:$48 sps:$4 sm:$0xff]  }
 0xcd1   : > { %8998 = vmatprep.subr.bf16.mxu1 %v16704_v3  ;;  %v16765_v3 = vld [vmem:[%s19371_s4 + $0x790] ss:$48 sps:$4 sm:$0xff]  }
 0xcd3   : > { %8913 = vmatpush1.bf16.msra.mxu0 %v16699_v43  ;;  %v16768_v43 = vld [vmem:[%s19371_s4 + $0x798] ss:$48 sps:$4 sm:$0xff]  }
 0xcd4   : > { %8999 = vmatpush1.bf16.msra.mxu1 %v16702_v38  ;;  %8914 = vmatprep.subr.bf16.mxu0 %v16707_v11  ;;  %v16773_v38 = vld [vmem:[%s19371_s4 + $0x7f4] ss:$48 sps:$4 sm:$0xff]   ;;  %v16776_v11 = vld [vmem:[%s19371_s4 + $0x7fc] ss:$48 sps:$4 sm:$0xff]  }
 0xcd5   : > { %9000 = vmatprep.subr.bf16.mxu1 %v16710_v24  ;;  %v16771_v24 = vld [vmem:[%s19371_s4 + $0x7f0] ss:$48 sps:$4 sm:$0xff]  }
 0xcd7   : > { %8915 = vmatpush1.bf16.msra.mxu0 %v16705_v54  ;;  %v16774_v54 = vld [vmem:[%s19371_s4 + $0x7f8] ss:$48 sps:$4 sm:$0xff]  }
 0xcd8   : > { %9001 = vmatpush1.bf16.msra.mxu1 %v16708_v33  ;;  %8916 = vmatprep.subr.bf16.mxu0 %v16713_v22  ;;  %v16779_v33 = vld [vmem:[%s19371_s4 + $0x854] ss:$48 sps:$4 sm:$0xff]   ;;  %v16782_v22 = vld [vmem:[%s19371_s4 + $0x85c] ss:$48 sps:$4 sm:$0xff]  }
 0xcd9   : > { %9002 = vmatprep.subr.bf16.mxu1 %v16716_v12  ;;  %v16777_v12 = vld [vmem:[%s19371_s4 + $0x850] ss:$48 sps:$4 sm:$0xff]  }
 0xcdb   : > { %8917 = vmatpush1.bf16.msra.mxu0 %v16711_v49  ;;  %v16780_v49 = vld [vmem:[%s19371_s4 + $0x858] ss:$48 sps:$4 sm:$0xff]  }
 0xcdc   : > { %9003 = vmatpush1.bf16.msra.mxu1 %v16714_v40  ;;  %8918 = vmatprep.subr.bf16.mxu0 %v16719_v16  ;;  %v16785_v40 = vld [vmem:[%s19371_s4 + $0x8b4] ss:$48 sps:$4 sm:$0xff]   ;;  %v16788_v16 = vld [vmem:[%s19371_s4 + $0x8bc] ss:$48 sps:$4 sm:$0xff]  }
 0xcdd   : > { %9004 = vmatprep.subr.bf16.mxu1 %v16722_v62  ;;  %v16783_v62 = vld [vmem:[%s19371_s4 + $0x8b0] ss:$48 sps:$4 sm:$0xff]  }
 0xcdf   : > { %8919 = vmatpush1.bf16.msra.mxu0 %v16717_v39  ;;  %v16786_v39 = vld [vmem:[%s19371_s4 + $0x8b8] ss:$48 sps:$4 sm:$0xff]  }
 0xce0   : > { %9005 = vmatpush1.bf16.msra.mxu1 %v16720_v14  ;;  %8920 = vmatprep.subr.bf16.mxu0 %v16725_v44  ;;  %v16791_v14 = vld [vmem:[%s19371_s4 + $0x24] ss:$48 sps:$4 sm:$0xff]   ;;  %v16794_v44 = vld [vmem:[%s19371_s4 + $0x2c] ss:$48 sps:$4 sm:$0xff]  }
 0xce1   : > { %9006 = vmatprep.subr.bf16.mxu1 %v16728_v32  ;;  %v16789_v32 = vld [vmem:[%s19371_s4 + $0x20] ss:$48 sps:$4 sm:$0xff]  }
 0xce3   : > { %8921 = vmatpush1.bf16.msra.mxu0 %v16723_v20  ;;  %v16792_v20 = vld [vmem:[%s19371_s4 + $0x28] ss:$48 sps:$4 sm:$0xff]  }
 0xce4   : > { %9007 = vmatpush1.bf16.msra.mxu1 %v16726_v55  ;;  %8922 = vmatprep.subr.bf16.mxu0 %v16731_v19  ;;  %v16797_v55 = vld [vmem:[%s19371_s4 + $0x84] ss:$48 sps:$4 sm:$0xff]   ;;  %v16800_v19 = vld [vmem:[%s19371_s4 + $0x8c] ss:$48 sps:$4 sm:$0xff]  }
 0xce5   : > { %9008 = vmatprep.subr.bf16.mxu1 %v16734_v9  ;;  %v16795_v9 = vld [vmem:[%s19371_s4 + $0x80] ss:$48 sps:$4 sm:$0xff]  }
 0xce7   : > { %8923 = vmatpush1.bf16.msra.mxu0 %v16729_v48  ;;  %v16798_v48 = vld [vmem:[%s19371_s4 + $0x88] ss:$48 sps:$4 sm:$0xff]  }
 0xce8   : > { %9009 = vmatpush1.bf16.msra.mxu1 %v16732_v46  ;;  %8924 = vmatprep.subr.bf16.mxu0 %v16737_v15  ;;  %v16803_v46 = vld [vmem:[%s19371_s4 + $0xe4] ss:$48 sps:$4 sm:$0xff]   ;;  %v16806_v15 = vld [vmem:[%s19371_s4 + $0xec] ss:$48 sps:$4 sm:$0xff]  }
 0xce9   : > { %9010 = vmatprep.subr.bf16.mxu1 %v16740_v63  ;;  %v16801_v63 = vld [vmem:[%s19371_s4 + $0xe0] ss:$48 sps:$4 sm:$0xff]  }
 0xceb   : > { %8925 = vmatpush1.bf16.msra.mxu0 %v16735_v36  ;;  %v16804_v36 = vld [vmem:[%s19371_s4 + $0xe8] ss:$48 sps:$4 sm:$0xff]  }
 0xcec   : > { %9011 = vmatpush1.bf16.msra.mxu1 %v16738_v27  ;;  %8937 = vmatprep.subr.bf16.mxu0 %v16743_v58  ;;  %v16809_v27 = vld [vmem:[%s19371_s4 + $0x144] ss:$48 sps:$4 sm:$0xff]   ;;  %v16812_v58 = vld [vmem:[%s19371_s4 + $0x14c] ss:$48 sps:$4 sm:$0xff]  }
 0xced   : > { %9023 = vmatprep.subr.bf16.mxu1 %v16746_v1  ;;  %v16810_v1 = vld [vmem:[%s19371_s4 + $0x148] ss:$48 sps:$4 sm:$0xff]  }
 0xcee   : > { %8927 = vmatmul.mubr.bf16.vlgmr.msra.gmra.mrb[64].mxu0 %v20595_v17 }
 0xcef   : > { %9013 = vmatmul.mubr.bf16.vlgmr.msra.gmra.mrb[116].mxu1 %v20595_v17  ;;  %8938 = vmatpush1.bf16.msra.mxu0 %v16741_v47  ;;  %v16815_v47 = vld [vmem:[%s19371_s4 + $0x1a4] ss:$48 sps:$4 sm:$0xff]  }
 0xcf0   : > { %9024 = vmatpush1.bf16.msra.mxu1 %v16744_v53  ;;  %8939 = vmatprep.subr.bf16.mxu0 %v16749_v50  ;;  %v16818_v53 = vld [vmem:[%s19371_s4 + $0x1ac] ss:$48 sps:$4 sm:$0xff]   ;;  %v16813_v50 = vld [vmem:[%s19371_s4 + $0x1a0] ss:$48 sps:$4 sm:$0xff]  }
 0xcf1   : > { %9025 = vmatprep.subr.bf16.mxu1 %v16752_v29  ;;  %8969 = vmatprep.mubr.bf16.mxu0 %v18512_v0  ;;  %v16816_v29 = vld [vmem:[%s19371_s4 + $0x1a8] ss:$48 sps:$4 sm:$0xff]  }
 0xcf2   : > { %9055 = vmatprep.mubr.bf16.mxu1 %v18512_v0 }
 0xcf3   : > { %8940 = vmatpush1.bf16.msra.mxu0 %v16747_v52  ;;  %v16821_v52 = vld [vmem:[%s19371_s4 + $0x204] ss:$48 sps:$4 sm:$0xff]  }
 0xcf4   : > { %9026 = vmatpush1.bf16.msra.mxu1 %v16750_v45  ;;  %8941 = vmatprep.subr.bf16.mxu0 %v16755_v56  ;;  %v16824_v45 = vld [vmem:[%s19371_s4 + $0x20c] ss:$48 sps:$4 sm:$0xff]   ;;  %v16819_v56 = vld [vmem:[%s19371_s4 + $0x200] ss:$48 sps:$4 sm:$0xff]  }
 0xcf5   : > { %9027 = vmatprep.subr.bf16.mxu1 %v16758_v42  ;;  %v16822_v42 = vld [vmem:[%s19371_s4 + $0x208] ss:$48 sps:$4 sm:$0xff]  }
 0xcf7   : > { %8942 = vmatpush1.bf16.msra.mxu0 %v16753_v57  ;;  %v16827_v57 = vld [vmem:[%s19371_s4 + $0x264] ss:$48 sps:$4 sm:$0xff]  }
 0xcf8   : > { %9028 = vmatpush1.bf16.msra.mxu1 %v16756_v2  ;;  %8943 = vmatprep.subr.bf16.mxu0 %v16761_v23  ;;  %v16830_v2 = vld [vmem:[%s19371_s4 + $0x26c] ss:$48 sps:$4 sm:$0xff]   ;;  %v16825_v23 = vld [vmem:[%s19371_s4 + $0x260] ss:$48 sps:$4 sm:$0xff]  }
 0xcf9   : > { %9029 = vmatprep.subr.bf16.mxu1 %v16764_v7  ;;  %v16828_v7 = vld [vmem:[%s19371_s4 + $0x268] ss:$48 sps:$4 sm:$0xff]  }
 0xcfb   : > { %8944 = vmatpush1.bf16.msra.mxu0 %v16759_v4  ;;  %v16833_v4 = vld [vmem:[%s19371_s4 + $0x2c4] ss:$48 sps:$4 sm:$0xff]  }
 0xcfc   : > { %9030 = vmatpush1.bf16.msra.mxu1 %v16762_v51  ;;  %8945 = vmatprep.subr.bf16.mxu0 %v16767_v31  ;;  %v16836_v51 = vld [vmem:[%s19371_s4 + $0x2cc] ss:$48 sps:$4 sm:$0xff]   ;;  %v16831_v31 = vld [vmem:[%s19371_s4 + $0x2c0] ss:$48 sps:$4 sm:$0xff]  }
 0xcfd   : > { %9031 = vmatprep.subr.bf16.mxu1 %v16770_v60  ;;  %v16834_v60 = vld [vmem:[%s19371_s4 + $0x2c8] ss:$48 sps:$4 sm:$0xff]  }
 0xcff   : > { %8946 = vmatpush1.bf16.msra.mxu0 %v16765_v3  ;;  %v16839_v3 = vld [vmem:[%s19371_s4 + $0x324] ss:$48 sps:$4 sm:$0xff]  }
 0xd00   : > { %9032 = vmatpush1.bf16.msra.mxu1 %v16768_v43  ;;  %8947 = vmatprep.subr.bf16.mxu0 %v16773_v38  ;;  %v16842_v43 = vld [vmem:[%s19371_s4 + $0x32c] ss:$48 sps:$4 sm:$0xff]   ;;  %v16837_v38 = vld [vmem:[%s19371_s4 + $0x320] ss:$48 sps:$4 sm:$0xff]  }
 0xd01   : > { %9033 = vmatprep.subr.bf16.mxu1 %v16776_v11  ;;  %v16840_v11 = vld [vmem:[%s19371_s4 + $0x328] ss:$48 sps:$4 sm:$0xff]  }
 0xd03   : > { %8948 = vmatpush1.bf16.msra.mxu0 %v16771_v24  ;;  %v16845_v24 = vld [vmem:[%s19371_s4 + $0x384] ss:$48 sps:$4 sm:$0xff]  }
 0xd04   : > { %9034 = vmatpush1.bf16.msra.mxu1 %v16774_v54  ;;  %8949 = vmatprep.subr.bf16.mxu0 %v16779_v33  ;;  %v16848_v54 = vld [vmem:[%s19371_s4 + $0x38c] ss:$48 sps:$4 sm:$0xff]   ;;  %v16843_v33 = vld [vmem:[%s19371_s4 + $0x380] ss:$48 sps:$4 sm:$0xff]  }
 0xd05   : > { %9035 = vmatprep.subr.bf16.mxu1 %v16782_v22  ;;  %v16846_v22 = vld [vmem:[%s19371_s4 + $0x388] ss:$48 sps:$4 sm:$0xff]  }
 0xd07   : > { %8950 = vmatpush1.bf16.msra.mxu0 %v16777_v12  ;;  %v16851_v12 = vld [vmem:[%s19371_s4 + $0x3e4] ss:$48 sps:$4 sm:$0xff]  }
 0xd08   : > { %9036 = vmatpush1.bf16.msra.mxu1 %v16780_v49  ;;  %8951 = vmatprep.subr.bf16.mxu0 %v16785_v40  ;;  %v16854_v49 = vld [vmem:[%s19371_s4 + $0x3ec] ss:$48 sps:$4 sm:$0xff]   ;;  %v16849_v40 = vld [vmem:[%s19371_s4 + $0x3e0] ss:$48 sps:$4 sm:$0xff]  }
 0xd09   : > { %9037 = vmatprep.subr.bf16.mxu1 %v16788_v16  ;;  %v16852_v16 = vld [vmem:[%s19371_s4 + $0x3e8] ss:$48 sps:$4 sm:$0xff]  }
 0xd0b   : > { %8952 = vmatpush1.bf16.msra.mxu0 %v16783_v62  ;;  %v16857_v62 = vld [vmem:[%s19371_s4 + $0x444] ss:$48 sps:$4 sm:$0xff]  }
 0xd0c   : > { %9038 = vmatpush1.bf16.msra.mxu1 %v16786_v39  ;;  %9066 = vmatprep.subr.bf16.mxu0 %v16791_v14  ;;  %v16860_v39 = vld [vmem:[%s19371_s4 + $0x44c] ss:$48 sps:$4 sm:$0xff]   ;;  %v16855_v14 = vld [vmem:[%s19371_s4 + $0x440] ss:$48 sps:$4 sm:$0xff]  }
 0xd0d   : > { %9152 = vmatprep.subr.bf16.mxu1 %v16794_v44  ;;  %v16858_v44 = vld [vmem:[%s19371_s4 + $0x448] ss:$48 sps:$4 sm:$0xff]  }
 0xd0e   : > { %8970 = vmatmul.mubr.bf16.vlgmr.msra.gmra.mrb[64].mxu0 %v20648_v8 }
 0xd0f   : > { %9056 = vmatmul.mubr.bf16.vlgmr.msra.gmra.mrb[116].mxu1 %v20648_v8  ;;  %9067 = vmatpush1.bf16.msra.mxu0 %v16789_v32  ;;  %v16863_v32 = vld [vmem:[%s19371_s4 + $0x4a4] ss:$48 sps:$4 sm:$0xff]  }
 0xd10   : > { %9098 = vmatprep.mubr.bf16.mxu0 %v20589_v41  ;;  %9153 = vmatpush1.bf16.msra.mxu1 %v16792_v20  ;;  %v16866_v20 = vld [vmem:[%s19371_s4 + $0x4ac] ss:$48 sps:$4 sm:$0xff]  }
 0xd11   : > { %9184 = vmatprep.mubr.bf16.mxu1 %v20589_v41  ;;  %9068 = vmatprep.subr.bf16.mxu0 %v16797_v55  ;;  %v16807_v41 = vld [vmem:[%s19371_s4 + $0x140] ss:$48 sps:$4 sm:$0xff]  }
 0xd12   : > { %9154 = vmatprep.subr.bf16.mxu1 %v16800_v19  ;;  %v16861_v55 = vld [vmem:[%s19371_s4 + $0x4a0] ss:$48 sps:$4 sm:$0xff]   ;;  %v16864_v19 = vld [vmem:[%s19371_s4 + $0x4a8] ss:$48 sps:$4 sm:$0xff]  }
 0xd13   : > { %9069 = vmatpush1.bf16.msra.mxu0 %v16795_v9  ;;  %v16869_v9 = vld [vmem:[%s19371_s4 + $0x504] ss:$48 sps:$4 sm:$0xff]  }
 0xd14   : > { %9155 = vmatpush1.bf16.msra.mxu1 %v16798_v48  ;;  %9070 = vmatprep.subr.bf16.mxu0 %v16803_v46  ;;  %v16872_v48 = vld [vmem:[%s19371_s4 + $0x50c] ss:$48 sps:$4 sm:$0xff]   ;;  %v16867_v46 = vld [vmem:[%s19371_s4 + $0x500] ss:$48 sps:$4 sm:$0xff]  }
 0xd15   : > { %9156 = vmatprep.subr.bf16.mxu1 %v16806_v15  ;;  %v16870_v15 = vld [vmem:[%s19371_s4 + $0x508] ss:$48 sps:$4 sm:$0xff]  }
 0xd17   : > { %9071 = vmatpush1.bf16.msra.mxu0 %v16801_v63  ;;  %v16875_v63 = vld [vmem:[%s19371_s4 + $0x564] ss:$48 sps:$4 sm:$0xff]  }
 0xd18   : > { %9157 = vmatpush1.bf16.msra.mxu1 %v16804_v36  ;;  %9072 = vmatprep.subr.bf16.mxu0 %v16809_v27  ;;  %v16878_v36 = vld [vmem:[%s19371_s4 + $0x56c] ss:$48 sps:$4 sm:$0xff]   ;;  %v16873_v27 = vld [vmem:[%s19371_s4 + $0x560] ss:$48 sps:$4 sm:$0xff]  }
 0xd19   : > { %9158 = vmatprep.subr.bf16.mxu1 %v16812_v58  ;;  %v16876_v58 = vld [vmem:[%s19371_s4 + $0x568] ss:$48 sps:$4 sm:$0xff]  }
 0xd1b   : > { %9073 = vmatpush1.bf16.msra.mxu0 %v16807_v41  ;;  %v16881_v41 = vld [vmem:[%s19371_s4 + $0x5c4] ss:$48 sps:$4 sm:$0xff]  }
 0xd1c   : > { %9159 = vmatpush1.bf16.msra.mxu1 %v16810_v1  ;;  %9074 = vmatprep.subr.bf16.mxu0 %v16815_v47  ;;  %v16884_v1 = vld [vmem:[%s19371_s4 + $0x5cc] ss:$48 sps:$4 sm:$0xff]   ;;  %v16879_v47 = vld [vmem:[%s19371_s4 + $0x5c0] ss:$48 sps:$4 sm:$0xff]  }
 0xd1d   : > { %9160 = vmatprep.subr.bf16.mxu1 %v16818_v53  ;;  %v16882_v53 = vld [vmem:[%s19371_s4 + $0x5c8] ss:$48 sps:$4 sm:$0xff]  }
 0xd1f   : > { %9075 = vmatpush1.bf16.msra.mxu0 %v16813_v50  ;;  %v16887_v50 = vld [vmem:[%s19371_s4 + $0x624] ss:$48 sps:$4 sm:$0xff]  }
 0xd20   : > { %9161 = vmatpush1.bf16.msra.mxu1 %v16816_v29  ;;  %9076 = vmatprep.subr.bf16.mxu0 %v16821_v52  ;;  %v16890_v29 = vld [vmem:[%s19371_s4 + $0x62c] ss:$48 sps:$4 sm:$0xff]   ;;  %v16885_v52 = vld [vmem:[%s19371_s4 + $0x620] ss:$48 sps:$4 sm:$0xff]  }
 0xd21   : > { %9162 = vmatprep.subr.bf16.mxu1 %v16824_v45  ;;  %v16888_v45 = vld [vmem:[%s19371_s4 + $0x628] ss:$48 sps:$4 sm:$0xff]  }
 0xd23   : > { %9077 = vmatpush1.bf16.msra.mxu0 %v16819_v56  ;;  %v16893_v56 = vld [vmem:[%s19371_s4 + $0x684] ss:$48 sps:$4 sm:$0xff]  }
 0xd24   : > { %9163 = vmatpush1.bf16.msra.mxu1 %v16822_v42  ;;  %9078 = vmatprep.subr.bf16.mxu0 %v16827_v57  ;;  %v16896_v42 = vld [vmem:[%s19371_s4 + $0x68c] ss:$48 sps:$4 sm:$0xff]   ;;  %v16891_v57 = vld [vmem:[%s19371_s4 + $0x680] ss:$48 sps:$4 sm:$0xff]  }
 0xd25   : > { %9164 = vmatprep.subr.bf16.mxu1 %v16830_v2  ;;  %v16894_v2 = vld [vmem:[%s19371_s4 + $0x688] ss:$48 sps:$4 sm:$0xff]  }
 0xd27   : > { %9079 = vmatpush1.bf16.msra.mxu0 %v16825_v23  ;;  %v16899_v23 = vld [vmem:[%s19371_s4 + $0x6e4] ss:$48 sps:$4 sm:$0xff]  }
 0xd28   : > { %9165 = vmatpush1.bf16.msra.mxu1 %v16828_v7  ;;  %9080 = vmatprep.subr.bf16.mxu0 %v16833_v4  ;;  %v16902_v7 = vld [vmem:[%s19371_s4 + $0x6ec] ss:$48 sps:$4 sm:$0xff]   ;;  %v16900_v4 = vld [vmem:[%s19371_s4 + $0x6e8] ss:$48 sps:$4 sm:$0xff]  }
 0xd29   : > { %9166 = vmatprep.subr.bf16.mxu1 %v16836_v51  ;;  %v16905_v51 = vld [vmem:[%s19371_s4 + $0x744] ss:$48 sps:$4 sm:$0xff]  }
 0xd2b   : > { %9081 = vmatpush1.bf16.msra.mxu0 %v16831_v31  ;;  %v16908_v31 = vld [vmem:[%s19371_s4 + $0x74c] ss:$48 sps:$4 sm:$0xff]  }
 0xd2c   : > { %9167 = vmatpush1.bf16.msra.mxu1 %v16834_v60  ;;  %9082 = vmatprep.subr.bf16.mxu0 %v16839_v3  ;;  %v16903_v60 = vld [vmem:[%s19371_s4 + $0x740] ss:$48 sps:$4 sm:$0xff]   ;;  %v16906_v3 = vld [vmem:[%s19371_s4 + $0x748] ss:$48 sps:$4 sm:$0xff]  }
 0xd2d   : > { %9168 = vmatprep.subr.bf16.mxu1 %v16842_v43  ;;  %v16914_v43 = vld [vmem:[%s19371_s4 + $0x7ac] ss:$48 sps:$4 sm:$0xff]  }
 0xd2f   : > { %9083 = vmatpush1.bf16.msra.mxu0 %v16837_v38  ;;  %v16909_v38 = vld [vmem:[%s19371_s4 + $0x7a0] ss:$48 sps:$4 sm:$0xff]  }
 0xd30   : > { %9169 = vmatpush1.bf16.msra.mxu1 %v16840_v11  ;;  %9084 = vmatprep.subr.bf16.mxu0 %v16845_v24  ;;  %v16912_v11 = vld [vmem:[%s19371_s4 + $0x7a8] ss:$48 sps:$4 sm:$0xff]   ;;  %v16917_v24 = vld [vmem:[%s19371_s4 + $0x804] ss:$48 sps:$4 sm:$0xff]  }
 0xd31   : > { %9170 = vmatprep.subr.bf16.mxu1 %v16848_v54  ;;  %v16920_v54 = vld [vmem:[%s19371_s4 + $0x80c] ss:$48 sps:$4 sm:$0xff]  }
 0xd33   : > { %9085 = vmatpush1.bf16.msra.mxu0 %v16843_v33  ;;  %v16915_v33 = vld [vmem:[%s19371_s4 + $0x800] ss:$48 sps:$4 sm:$0xff]  }
 0xd34   : > { %9171 = vmatpush1.bf16.msra.mxu1 %v16846_v22  ;;  %9086 = vmatprep.subr.bf16.mxu0 %v16851_v12  ;;  %v16918_v22 = vld [vmem:[%s19371_s4 + $0x808] ss:$48 sps:$4 sm:$0xff]   ;;  %v16923_v12 = vld [vmem:[%s19371_s4 + $0x864] ss:$48 sps:$4 sm:$0xff]  }
 0xd35   : > { %9172 = vmatprep.subr.bf16.mxu1 %v16854_v49  ;;  %v16926_v49 = vld [vmem:[%s19371_s4 + $0x86c] ss:$48 sps:$4 sm:$0xff]  }
 0xd37   : > { %9087 = vmatpush1.bf16.msra.mxu0 %v16849_v40  ;;  %v16921_v40 = vld [vmem:[%s19371_s4 + $0x860] ss:$48 sps:$4 sm:$0xff]  }
 0xd38   : > { %9173 = vmatpush1.bf16.msra.mxu1 %v16852_v16  ;;  %9088 = vmatprep.subr.bf16.mxu0 %v16857_v62  ;;  %v16924_v16 = vld [vmem:[%s19371_s4 + $0x868] ss:$48 sps:$4 sm:$0xff]   ;;  %v16929_v62 = vld [vmem:[%s19371_s4 + $0x8c4] ss:$48 sps:$4 sm:$0xff]  }
 0xd39   : > { %9174 = vmatprep.subr.bf16.mxu1 %v16860_v39  ;;  %v16932_v39 = vld [vmem:[%s19371_s4 + $0x8cc] ss:$48 sps:$4 sm:$0xff]  }
 0xd3b   : > { %9089 = vmatpush1.bf16.msra.mxu0 %v16855_v14  ;;  %v16927_v14 = vld [vmem:[%s19371_s4 + $0x8c0] ss:$48 sps:$4 sm:$0xff]  }
 0xd3c   : > { %9175 = vmatpush1.bf16.msra.mxu1 %v16858_v44  ;;  %9090 = vmatprep.subr.bf16.mxu0 %v16863_v32  ;;  %v16930_v44 = vld [vmem:[%s19371_s4 + $0x8c8] ss:$48 sps:$4 sm:$0xff]  }
 0xd3d   : > { %9176 = vmatprep.subr.bf16.mxu1 %v16866_v20  ;;  %v16935_v32 = vld [vmem:[%s19375_s19 + $0x4] ss:$12 sps:$4 sm:$0xff]   ;;  %v16951_v20 = vld [vmem:[%s19375_s19 + $0xc8] ss:$12 sps:$4 sm:$0xff]  }
 0xd3f   : > { %9091 = vmatpush1.bf16.msra.mxu0 %v16861_v55  ;;  %v16933_v55 = vld [vmem:[%s19375_s19] ss:$12 sps:$4 sm:$0xff]  }
 0xd40   : > { %9177 = vmatpush1.bf16.msra.mxu1 %v16864_v19  ;;  %9092 = vmatprep.subr.bf16.mxu0 %v16869_v9  ;;  %v16938_v19 = vld [vmem:[%s19375_s19 + $0x1c] ss:$12 sps:$4 sm:$0xff]  }
 0xd41   : > { %9178 = vmatprep.subr.bf16.mxu1 %v16872_v48  ;;  %v16952_v9 = vld [vmem:[%s19375_s19 + $0x8] ss:$12 sps:$4 sm:$0xff]   ;;  %v16956_v48 = vld [vmem:[%s19375_s19 + $0xe0] ss:$12 sps:$4 sm:$0xff]  }
 0xd43   : > { %9093 = vmatpush1.bf16.msra.mxu0 %v16867_v46  ;;  %v16936_v46 = vld [vmem:[%s19375_s19 + $0x18] ss:$12 sps:$4 sm:$0xff]  }
 0xd44   : > { %9179 = vmatpush1.bf16.msra.mxu1 %v16870_v15  ;;  %9094 = vmatprep.subr.bf16.mxu0 %v16875_v63  ;;  %v16941_v15 = vld [vmem:[%s19375_s19 + $0x34] ss:$12 sps:$4 sm:$0xff]  }
 0xd45   : > { %9180 = vmatprep.subr.bf16.mxu1 %v16878_v36  ;;  %v16957_v63 = vld [vmem:[%s19375_s19 + $0x20] ss:$12 sps:$4 sm:$0xff]   ;;  %v16961_v36 = vld [vmem:[%s19375_s19 + $0xf8] ss:$12 sps:$4 sm:$0xff]  }
 0xd47   : > { %9095 = vmatpush1.bf16.msra.mxu0 %v16873_v27  ;;  %v16939_v27 = vld [vmem:[%s19375_s19 + $0x30] ss:$12 sps:$4 sm:$0xff]  }
 0xd48   : > { %9181 = vmatpush1.bf16.msra.mxu1 %v16876_v58  ;;  %9096 = vmatprep.subr.bf16.mxu0 %v16881_v41  ;;  %v16944_v58 = vld [vmem:[%s19375_s19 + $0x4c] ss:$12 sps:$4 sm:$0xff]   ;;  %v16966_v41 = vld [vmem:[%s19375_s19 + $0x110] ss:$12 sps:$4 sm:$0xff]  }
 0xd49   : > { %9182 = vmatprep.subr.bf16.mxu1 %v16884_v1  ;;  %v16942_v1 = vld [vmem:[%s19375_s19 + $0x48] ss:$12 sps:$4 sm:$0xff]  }
 0xd4b   : > { %9097 = vmatpush1.bf16.msra.mxu0 %v16879_v47  ;;  %v16947_v47 = vld [vmem:[%s19375_s19 + $0x64] ss:$12 sps:$4 sm:$0xff]  }
 0xd4c   : > { %9183 = vmatpush1.bf16.msra.mxu1 %v16882_v53  ;;  %9109 = vmatprep.subr.bf16.mxu0 %v16887_v50  ;;  %v16967_v53 = vld [vmem:[%s19375_s19 + $0x50] ss:$12 sps:$4 sm:$0xff]   ;;  %v16971_v50 = vld [vmem:[%s19375_s19 + $0x128] ss:$12 sps:$4 sm:$0xff]  }
 0xd4d   : > { %9195 = vmatprep.subr.bf16.mxu1 %v16890_v29  ;;  %v16945_v29 = vld [vmem:[%s19375_s19 + $0x60] ss:$12 sps:$4 sm:$0xff]  }
 0xd4e   : > { %9099 = vmatmul.mubr.bf16.vlgmr.msra.gmra.mrb[68].mxu0 %v20595_v17 }
 0xd4f   : > { %9185 = vmatmul.mubr.bf16.vlgmr.msra.gmra.mrb[120].mxu1 %v20595_v17  ;;  %9110 = vmatpush1.bf16.msra.mxu0 %v16885_v52  ;;  %v16897_v17 = vld [vmem:[%s19371_s4 + $0x6e0] ss:$48 sps:$4 sm:$0xff]  }
 0xd50   : > { %9196 = vmatpush1.bf16.msra.mxu1 %v16888_v45  ;;  %9111 = vmatprep.subr.bf16.mxu0 %v16893_v56  ;;  %v20877_v52 = vld [vmem:[%s19373_s16] sm:$0xff] }
 0xd51   : > { %9197 = vmatprep.subr.bf16.mxu1 %v16896_v42  ;;  %9141 = vmatprep.mubr.bf16.mxu0 %v18512_v0  ;;  %v16950_v45 = vld [vmem:[%s19375_s19 + $0x7c] ss:$12 sps:$4 sm:$0xff]   ;;  %v16976_v42 = vld [vmem:[%s19375_s19 + $0x140] ss:$12 sps:$4 sm:$0xff]  }
 0xd52   : > { %9227 = vmatprep.mubr.bf16.mxu1 %v18512_v0  ;;  %v16911_v0 = vld [vmem:[%s19371_s4 + $0x7a4] ss:$48 sps:$4 sm:$0xff]   ;;  %v16972_v56 = vld [vmem:[%s19375_s19 + $0x68] ss:$12 sps:$4 sm:$0xff]  }
 0xd53   : > { %9112 = vmatpush1.bf16.msra.mxu0 %v16891_v57  ;;  %v7225_v57 = vrot.slane %v20877_v52, %v19690_v25 }
 0xd54   : > { %9198 = vmatpush1.bf16.msra.mxu1 %v16894_v2  ;;  %9113 = vmatprep.subr.bf16.mxu0 %v16899_v23  ;;  %v7233_v2 = vrot.slane %v20877_v52, %v19767_v34  ;;  %v7229_v23 = vrot.slane %v20877_v52, %v19693_v26 }
 0xd55   : > { %9199 = vmatprep.subr.bf16.mxu1 %v16902_v7  ;;  %v7237_v7 = vrot.slane %v20877_v52, %v19770_v35 }
 0xd57   : > { %9114 = vmatpush1.bf16.msra.mxu0 %v16897_v17  ;;  %v16948_v17 = vld [vmem:[%s19375_s19 + $0x78] ss:$12 sps:$4 sm:$0xff]  }
 0xd58   : > { %9200 = vmatpush1.bf16.msra.mxu1 %v16900_v4  ;;  %9115 = vmatprep.subr.bf16.mxu0 %v16905_v51  ;;  %v16955_v4 = vld [vmem:[%s19375_s19 + $0x94] ss:$12 sps:$4 sm:$0xff]  }
 0xd59   : > { %9201 = vmatprep.subr.bf16.mxu1 %v16908_v31 }
 0xd5b   : > { %9116 = vmatpush1.bf16.msra.mxu0 %v16903_v60  ;;  %v16977_v60 = vld [vmem:[%s19375_s19 + $0x80] ss:$12 sps:$4 sm:$0xff]  }
 0xd5c   : > { %9202 = vmatpush1.bf16.msra.mxu1 %v16906_v3  ;;  %9117 = vmatprep.subr.bf16.mxu0 %v16911_v0 }
 0xd5d   : > { %9203 = vmatprep.subr.bf16.mxu1 %v16914_v43 }
 0xd5f   : > { %9118 = vmatpush1.bf16.msra.mxu0 %v16909_v38 }
 0xd60   : > { %9204 = vmatpush1.bf16.msra.mxu1 %v16912_v11  ;;  %9119 = vmatprep.subr.bf16.mxu0 %v16917_v24  ;;  %v16981_v11 = vld [vmem:[%s19375_s19 + $0x158] ss:$12 sps:$4 sm:$0xff]  }
 0xd61   : > { %9205 = vmatprep.subr.bf16.mxu1 %v16920_v54 }
 0xd63   : > { %9120 = vmatpush1.bf16.msra.mxu0 %v16915_v33 }
 0xd64   : > { %9206 = vmatpush1.bf16.msra.mxu1 %v16918_v22  ;;  %9121 = vmatprep.subr.bf16.mxu0 %v16923_v12  ;;  %v16953_v12 = vld [vmem:[%s19375_s19 + $0x90] ss:$12 sps:$4 sm:$0xff]  }
 0xd65   : > { %9207 = vmatprep.subr.bf16.mxu1 %v16926_v49 }
 0xd67   : > { %9122 = vmatpush1.bf16.msra.mxu0 %v16921_v40 }
 0xd68   : > { %9208 = vmatpush1.bf16.msra.mxu1 %v16924_v16  ;;  %9123 = vmatprep.subr.bf16.mxu0 %v16929_v62 }
 0xd69   : > { %9209 = vmatprep.subr.bf16.mxu1 %v16932_v39 }
 0xd6b   : > { %9124 = vmatpush1.bf16.msra.mxu0 %v16927_v14 }
 0xd6c   : > { %9210 = vmatpush1.bf16.msra.mxu1 %v16930_v44  ;;  %11403 = vmatprep.subr.bf16.mxu0 %v16935_v32  ;;  %v16960_v44 = vld [vmem:[%s19375_s19 + $0xac] ss:$12 sps:$4 sm:$0xff]  }
 0xd6d   : > { %15035 = vmatprep.subr.bf16.mxu1 %v16951_v20 }
 0xd6e   : > { %9142 = vmatmul.mubr.bf16.vlgmr.msra.gmra.mrb[68].mxu0 %v20648_v8 }
 0xd6f   : > { %9228 = vmatmul.mubr.bf16.vlgmr.msra.gmra.mrb[120].mxu1 %v20648_v8  ;;  %11404 = vmatpush1.bf16.msra.mxu0 %v16933_v55  ;;  %v16962_v8 = vld [vmem:[%s19375_s19 + $0x38] ss:$12 sps:$4 sm:$0xff]  }
 0xd70   : > { %11405 = vmatprep.subr.bf16.mxu0 %v16938_v19  ;;  %15036 = vmatpush3.bf16.msra.mxu1 %v16952_v9  ;;  %v16982_v9 = vld [vmem:[%s19375_s19 + $0x98] ss:$12 sps:$4 sm:$0xff]  }
 0xd71   : > { %15037 = vmatprep.subr.bf16.mxu1 %v16956_v48 }
 0xd73   : > { %11406 = vmatpush1.bf16.msra.mxu0 %v16936_v46 }
 0xd74   : > { %11407 = vmatprep.subr.bf16.mxu0 %v16941_v15  ;;  %15038 = vmatpush3.bf16.msra.mxu1 %v16957_v63 }
 0xd75   : > { %15039 = vmatprep.subr.bf16.mxu1 %v16961_v36  ;;  %v16986_v36 = vld [vmem:[%s19375_s19 + $0x170] ss:$12 sps:$4 sm:$0xff]  }
 0xd77   : > { %11408 = vmatpush1.bf16.msra.mxu0 %v16939_v27 }
 0xd78   : > { %11409 = vmatprep.subr.bf16.mxu0 %v16944_v58  ;;  %15040 = vmatpush3.bf16.msra.mxu1 %v16962_v8 }
 0xd79   : > { %15041 = vmatprep.subr.bf16.mxu1 %v16966_v41 }
 0xd7b   : > { %11410 = vmatpush1.bf16.msra.mxu0 %v16942_v1  ;;  %v16958_v1 = vld [vmem:[%s19375_s19 + $0xa8] ss:$12 sps:$4 sm:$0xff]  }
 0xd7c   : > { %11411 = vmatprep.subr.bf16.mxu0 %v16947_v47  ;;  %15042 = vmatpush3.bf16.msra.mxu1 %v16967_v53 }
 0xd7d   : > { %15043 = vmatprep.subr.bf16.mxu1 %v16971_v50 }
 0xd7f   : > { %11412 = vmatpush1.bf16.msra.mxu0 %v16945_v29 }
 0xd80   : > { %11413 = vmatprep.subr.bf16.mxu0 %v16950_v45  ;;  %15044 = vmatpush3.bf16.msra.mxu1 %v16972_v56  ;;  %v16965_v45 = vld [vmem:[%s19375_s19 + $0xc4] ss:$12 sps:$4 sm:$0xff]  }
 0xd81   : > { %v8799_v51 = vpop.f32.mrb[60].mxu0  ;;  %v8885_v31 = vpop.f32.mrb[112].mxu1  ;;  %15045 = vmatprep.subr.bf16.mxu1 %v16976_v42 }
 0xd82   : > { %v20893_v3 = vadd.f32 %v8799_v51, %v7225_v57  ;;  %v20895_v0 = vadd.f32 %v8885_v31, %v7233_v2  ;;  %v8801_v43 = vpop.f32.mrb[61].mxu0  ;;  %v8887_v38 = vpop.f32.mrb[113].mxu1  ;;  %v16991_v31 = vld [vmem:[%s19375_s19 + $0x248] ss:$12 sps:$4 sm:$0xff]  }
 0xd83   : > { %v20898_v24 = vadd.f32 %v8801_v43, %v7229_v23  ;;  %v20900_v54 = vadd.f32 %v8887_v38, %v7237_v7  ;;  %v8803_v33 = vpop.f32.mrb[62].mxu0  ;;  %v8889_v22 = vpop.f32.mrb[114].mxu1  ;;  %11414 = vmatpush1.bf16.msra.mxu0 %v16948_v17 }
 0xd84   : > { %v9238_v49 = vmul.f32 %v20893_v3, %v20893_v3  ;;  %v9240_v40 = vmul.f32 %v20895_v0, %v20895_v0  ;;  %v20907_v16 = vadd.f32 %v8803_v33, %v7225_v57  ;;  %v20909_v62 = vadd.f32 %v8889_v22, %v7233_v2  ;;  %v8805_v39 = vpop.f32.mrb[63].mxu0  ;;  %v8891_v14 = vpop.f32.mrb[115].mxu1  ;;  %11415 = vmatprep.subr.bf16.mxu0 %v16955_v4  ;;  %v16963_v33 = vld [vmem:[%s19375_s19 + $0xc0] ss:$12 sps:$4 sm:$0xff]  }
 0xd85   : > { %v9239_v32 = vmul.f32 %v20898_v24, %v20898_v24  ;;  %v9241_v20 = vmul.f32 %v20900_v54, %v20900_v54  ;;  %v20916_v55 = vadd.f32 %v8805_v39, %v7229_v23  ;;  %v20918_v19 = vadd.f32 %v8891_v14, %v7237_v7  ;;  %15046 = vmatpush3.bf16.msra.mxu1 %v16977_v60  ;;  %v16987_v23 = vld [vmem:[%s19375_s19 + $0xb0] ss:$12 sps:$4 sm:$0xff]  }
 0xd86   : > { %v9262_v48 = vmul.f32 %v20893_v3, %v9238_v49  ;;  %v9264_v46 = vmul.f32 %v20895_v0, %v9240_v40  ;;  %v9250_v15 = vmul.f32 %v20907_v16, %v20907_v16  ;;  %v9252_v63 = vmul.f32 %v20909_v62, %v20909_v62  ;;  %15047 = vmatprep.subr.bf16.mxu1 %v16981_v11  ;;  %v16970_v39 = vld [vmem:[%s19375_s19 + $0xdc] ss:$12 sps:$4 sm:$0xff]  }
 0xd87   : > { %v9263_v27 = vmul.f32 %v20898_v24, %v9239_v32  ;;  %v9265_v58 = vmul.f32 %v20900_v54, %v9241_v20  ;;  %v9251_v8 = vmul.f32 %v20916_v55, %v20916_v55  ;;  %v9253_v41 = vmul.f32 %v20918_v19, %v20918_v19  ;;  %11416 = vmatpush1.bf16.msra.mxu0 %v16953_v12 }
 0xd88   : > { %v9286_v47 = vmul.f32 0.044715, %v9262_v48  ;;  %v9288_v53 = vmul.f32 0.044715, %v9264_v46  ;;  %v9274_v50 = vmul.f32 %v20907_v16, %v9250_v15  ;;  %v9276_v29 = vmul.f32 %v20909_v62, %v9252_v63  ;;  %11417 = vmatprep.subr.bf16.mxu0 %v16960_v44  ;;  %v16968_v46 = vld [vmem:[%s19375_s19 + $0xd8] ss:$12 sps:$4 sm:$0xff]  }
 0xd89   : > { %v9287_v56 = vmul.f32 0.044715, %v9263_v27  ;;  %v9289_v42 = vmul.f32 0.044715, %v9265_v58  ;;  %v9275_v57 = vmul.f32 %v20916_v55, %v9251_v8  ;;  %v9277_v2 = vmul.f32 %v20918_v19, %v9253_v41  ;;  %15048 = vmatpush3.bf16.msra.mxu1 %v16982_v9  ;;  %v16975_v63 = vld [vmem:[%s19375_s19 + $0xf4] ss:$12 sps:$4 sm:$0xff]  }
 0xd8a   : > { %v9310_v7 = vadd.f32 %v20893_v3, %v9286_v47  ;;  %v9312_v17 = vadd.f32 %v20895_v0, %v9288_v53  ;;  %v9298_v4 = vmul.f32 0.044715, %v9274_v50  ;;  %v9300_v51 = vmul.f32 0.044715, %v9276_v29  ;;  %15049 = vmatprep.subr.bf16.mxu1 %v16986_v36  ;;  %v16973_v27 = vld [vmem:[%s19375_s19 + $0xf0] ss:$12 sps:$4 sm:$0xff]  }
 0xd8b   : > { %v9311_v60 = vadd.f32 %v20898_v24, %v9287_v56  ;;  %v9313_v43 = vadd.f32 %v20900_v54, %v9289_v42  ;;  %v9299_v38 = vmul.f32 0.044715, %v9275_v57  ;;  %v9301_v11 = vmul.f32 0.044715, %v9277_v2  ;;  %11418 = vmatpush1.bf16.msra.mxu0 %v16958_v1  ;;  %v16980_v58 = vld [vmem:[%s19375_s19 + $0x10c] ss:$12 sps:$4 sm:$0xff]  }
 0xd8c   : > { %v9334_v22 = vmul.f32 0.7978846, %v9310_v7  ;;  %v9336_v12 = vmul.f32 0.7978846, %v9312_v17  ;;  %v9322_v49 = vadd.f32 %v20907_v16, %v9298_v4  ;;  %v9324_v40 = vadd.f32 %v20909_v62, %v9300_v51  ;;  %11419 = vmatprep.subr.bf16.mxu0 %v16965_v45  ;;  %v16978_v8 = vld [vmem:[%s19375_s19 + $0x108] ss:$12 sps:$4 sm:$0xff]  }
 0xd8d   : > { %v9335_v14 = vmul.f32 0.7978846, %v9311_v60  ;;  %v9337_v44 = vmul.f32 0.7978846, %v9313_v43  ;;  %v9323_v32 = vadd.f32 %v20916_v55, %v9299_v38  ;;  %v9325_v20 = vadd.f32 %v20918_v19, %v9301_v11  ;;  %15050 = vmatpush3.bf16.msra.mxu1 %v16987_v23  ;;  %v16985_v1 = vld [vmem:[%s19375_s19 + $0x124] ss:$12 sps:$4 sm:$0xff]  }
 0xd8e   : > { %17417 = vtanh.f32 %v9334_v22  ;;  %v9346_v9 = vmul.f32 0.7978846, %v9322_v49  ;;  %15057 = vmatprep.subr.bf16.mxu1 %v16991_v31  ;;  %v9348_v48 = vmul.f32 0.7978846, %v9324_v40  ;;  %v16983_v56 = vld [vmem:[%s19375_s19 + $0x120] ss:$12 sps:$4 sm:$0xff]  }
 0xd8f   : > { %17419 = vtanh.f32 %v9336_v12  ;;  %11420 = vmatpush1.bf16.msra.mxu0 %v16963_v33  ;;  %v9347_v15 = vmul.f32 0.7978846, %v9323_v32  ;;  %v9349_v36 = vmul.f32 0.7978846, %v9325_v20  ;;  %v16990_v2 = vld [vmem:[%s19375_s19 + $0x13c] ss:$12 sps:$4 sm:$0xff]  }
 0xd90   : > { %17421 = vtanh.f32 %v9335_v14  ;;  %11421 = vmatprep.subr.bf16.mxu0 %v16970_v39  ;;  %v16988_v11 = vld [vmem:[%s19375_s19 + $0x138] ss:$12 sps:$4 sm:$0xff]   ;;  %v16995_v49 = vld [vmem:[%s19375_s19 + $0x154] ss:$12 sps:$4 sm:$0xff]  }
 0xd91   : > { %17423 = vtanh.f32 %v9337_v44 }
 0xd92   : > { %17425 = vtanh.f32 %v9346_v9 }
 0xd93   : > { %17427 = vtanh.f32 %v9348_v48  ;;  %11422 = vmatpush1.bf16.msra.mxu0 %v16968_v46 }
 0xd94   : > { %17429 = vtanh.f32 %v9347_v15  ;;  %11423 = vmatprep.subr.bf16.mxu0 %v16975_v63 }
 0xd95   : > { %17431 = vtanh.f32 %v9349_v36  ;;  %v16993_v36 = vld [vmem:[%s19375_s19 + $0x150] ss:$12 sps:$4 sm:$0xff]  }
 0xd97   : > { %11424 = vmatpush1.bf16.msra.mxu0 %v16973_v27 }
 0xd98   : > { %v17418_v41 = vpop.eup %17417  ;;  %11425 = vmatprep.subr.bf16.mxu0 %v16980_v58 }
 0xd99   : > { %v17420_v47 = vpop.eup %17419  ;;  %v9382_v53 = vadd.f32 1.0, %v17418_v41  ;;  %v17001_v41 = vld [vmem:[%s19375_s19 + $0x278] ss:$12 sps:$4 sm:$0xff]  }
 0xd9a   : > { %v17422_v50 = vpop.eup %17421  ;;  %v9384_v29 = vadd.f32 1.0, %v17420_v47  ;;  %v17002_v47 = vld [vmem:[%s19375_s19 + $0x1b8] ss:$12 sps:$4 sm:$0xff]  }
 0xd9b   : > { %v17424_v45 = vpop.eup %17423  ;;  %11426 = vmatpush1.bf16.msra.mxu0 %v16978_v8  ;;  %v9383_v42 = vadd.f32 1.0, %v17422_v50  ;;  %v9406_v17 = vmul.f32 0.5, %v9382_v53  ;;  %v17000_v8 = vld [vmem:[%s19375_s19 + $0x16c] ss:$12 sps:$4 sm:$0xff]   ;;  %v17010_v53 = vld [vmem:[%s19375_s19 + $0x19c] ss:$12 sps:$4 sm:$0xff]  }
 0xd9c   : > { %v17426_v57 = vpop.eup %17425  ;;  %11427 = vmatprep.subr.bf16.mxu0 %v16985_v1  ;;  %v9385_v23 = vadd.f32 1.0, %v17424_v45  ;;  %v9408_v31 = vmul.f32 0.5, %v9384_v29  ;;  %v17003_v1 = vld [vmem:[%s19375_s19 + $0x180] ss:$12 sps:$4 sm:$0xff]   ;;  %v17006_v50 = vld [vmem:[%s19375_s19 + $0x290] ss:$12 sps:$4 sm:$0xff]  }
 0xd9d   : > { %v17428_v7 = vpop.eup %17427  ;;  %v9394_v4 = vadd.f32 1.0, %v17426_v57  ;;  %v9407_v22 = vmul.f32 0.5, %v9383_v42  ;;  %v9430_v14 = vmul.f32 %v20893_v3, %v9406_v17  ;;  %v17008_v29 = vld [vmem:[%s19375_s19 + $0x198] ss:$12 sps:$4 sm:$0xff]   ;;  %v17007_v45 = vld [vmem:[%s19375_s19 + $0x1d0] ss:$12 sps:$4 sm:$0xff]  }
 0xd9e   : > { %v17430_v51 = vpop.eup %17429  ;;  %v9396_v60 = vadd.f32 1.0, %v17428_v7  ;;  %v9409_v39 = vmul.f32 0.5, %v9385_v23  ;;  %v9432_v20 = vmul.f32 %v20895_v0, %v9408_v31  ;;  %v17011_v42 = vld [vmem:[%s19375_s19 + $0x2a8] ss:$12 sps:$4 sm:$0xff]   ;;  %v17013_v57 = vld [vmem:[%s19375_s19 + $0x1b0] ss:$12 sps:$4 sm:$0xff]  }
 0xd9f   : > { %v17432_v43 = vpop.eup %17431  ;;  %v9418_v38 = vmul.f32 0.5, %v9394_v4  ;;  %11428 = vmatpush1.bf16.msra.mxu0 %v16983_v56  ;;  %v9395_v33 = vadd.f32 1.0, %v17430_v51  ;;  %v9431_v46 = vmul.f32 %v20898_v24, %v9407_v22  ;;  %v16996_v24 = vld [vmem:[%s19375_s19 + $0x260] ss:$12 sps:$4 sm:$0xff]   ;;  %v17018_v17 = vld [vmem:[%s19375_s19 + $0x1c8] ss:$12 sps:$4 sm:$0xff]  }
 0xda0   : > { %v9420_v12 = vmul.f32 0.5, %v9396_v60  ;;  %11429 = vmatprep.subr.bf16.mxu0 %v16990_v2  ;;  %v9397_v40 = vadd.f32 1.0, %v17432_v43  ;;  %v9433_v3 = vmul.f32 %v20900_v54, %v9409_v39  ;;  %v16998_v54 = vld [vmem:[%s19375_s19 + $0x168] ss:$12 sps:$4 sm:$0xff]   ;;  %v17020_v23 = vld [vmem:[%s19375_s19 + $0x1cc] ss:$12 sps:$4 sm:$0xff]  }
 0xda1   : > { %v9442_v44 = vmul.f32 %v20907_v16, %v9418_v38  ;;  %v9419_v32 = vmul.f32 0.5, %v9395_v33  ;;  %v17015_v56 = vld [vmem:[%s19375_s19 + $0x1b4] ss:$12 sps:$4 sm:$0xff]   ;;  %v17025_v51 = vld [vmem:[%s19375_s19 + $0x1e4] ss:$12 sps:$4 sm:$0xff]  }
 0xda2   : > { %v9444_v9 = vmul.f32 %v20909_v62, %v9420_v12  ;;  %v9421_v48 = vmul.f32 0.5, %v9397_v40  ;;  %v16992_v62 = vld [vmem:[%s19375_s19 + $0x188] ss:$12 sps:$4 sm:$0xff]   ;;  %v17016_v7 = vld [vmem:[%s19375_s19 + $0x2c0] ss:$12 sps:$4 sm:$0xff]  }
 0xda3   : > { %11430 = vmatpush1.bf16.msra.mxu0 %v16988_v11  ;;  %v9443_v15 = vmul.f32 %v20916_v55, %v9419_v32  ;;  %v9838_v63 = vpack.c.bf16 %v9442_v44, %v9430_v14  ;;  %v16997_v55 = vld [vmem:[%s19375_s19 + $0x1a0] ss:$12 sps:$4 sm:$0xff]   ;;  %v17012_v2 = vld [vmem:[%s19375_s19 + $0x1e8] ss:$12 sps:$4 sm:$0xff]   ;;  %v17021_v31 = vld [vmem:[%s19375_s19 + $0x2d8] ss:$12 sps:$4 sm:$0xff]  }
 0xda4   : > { %11431 = vmatprep.subr.bf16.mxu0 %v16995_v49  ;;  %v9445_v16 = vmul.f32 %v20918_v19, %v9421_v48  ;;  %v20971_v0 = vpack.c.bf16 %v9444_v9, %v9432_v20  ;;  %v17005_v19 = vld [vmem:[%s19375_s19 + $0x184] ss:$12 sps:$4 sm:$0xff]   ;;  %v17017_v4 = vld [vmem:[%s19375_s19 + $0x200] ss:$12 sps:$4 sm:$0xff]   ;;  %v17030_v38 = vld [vmem:[%s19375_s19 + $0x1fc] ss:$12 sps:$4 sm:$0xff]  }
 0xda5   : > { %v9839_v27 = vpack.c.bf16 %v9443_v15, %v9431_v46  ;;  %v17023_v60 = vld [vmem:[%s19375_s19 + $0x1e0] ss:$12 sps:$4 sm:$0xff]   ;;  %v17022_v43 = vld [vmem:[%s19375_s19 + $0x218] ss:$12 sps:$4 sm:$0xff]   ;;  %v17026_v11 = vld [vmem:[%s19375_s19 + $0x2f0] ss:$12 sps:$4 sm:$0xff]  }
 0xda6   : > { %v9841_v58 = vpack.c.bf16 %v9445_v16, %v9433_v3  ;;  %v17028_v33 = vld [vmem:[%s19375_s19 + $0x1f8] ss:$12 sps:$4 sm:$0xff]   ;;  %v17027_v22 = vld [vmem:[%s19375_s19 + $0x230] ss:$12 sps:$4 sm:$0xff]   ;;  %v17033_v12 = vld [vmem:[%s19375_s19 + $0x214] ss:$12 sps:$4 sm:$0xff]  }
 0xda7   : > { %11435 = vmatprep.mubr.bf16.mxu0 %v9839_v27  ;;  %11693 = vmatprep.mubr.bf16.mxu1 %v9839_v27  ;;  %v17055_v49 = vld [vmem:[%s19375_s19 + $0x3c8] ss:$12 sps:$4 sm:$0xff]   ;;  %v17031_v40 = vld [vmem:[%s19375_s19 + $0x210] ss:$12 sps:$4 sm:$0xff]   ;;  %v17036_v39 = vld [vmem:[%s19375_s19 + $0x22c] ss:$12 sps:$4 sm:$0xff]  }
 0xda8   : > { %11694 = vmatmul.mubr.bf16.vlgmr.msra.gmra.mrb[124].mxu1 %v9838_v63  ;;  %11432 = vmatpush1.bf16.msra.mxu0 %v16993_v36  ;;  %v17056_v14 = vld [vmem:[%s19375_s19 + $0x308] ss:$12 sps:$4 sm:$0xff]   ;;  %v17060_v44 = vld [vmem:[%s19375_s19 + $0x3e0] ss:$12 sps:$4 sm:$0xff]   ;;  %v17039_v20 = vld [vmem:[%s19375_s19 + $0x244] ss:$12 sps:$4 sm:$0xff]  }
 0xda9   : > { %15058 = vmatpush3.bf16.msra.mxu1 %v16992_v62  ;;  %11734 = vmatprep.mubr.bf16.mxu1 %v9841_v58  ;;  %v17034_v32 = vld [vmem:[%s19375_s19 + $0x228] ss:$12 sps:$4 sm:$0xff]   ;;  %v17061_v9 = vld [vmem:[%s19375_s19 + $0x320] ss:$12 sps:$4 sm:$0xff]   ;;  %v17065_v48 = vld [vmem:[%s19375_s19 + $0x3f8] ss:$12 sps:$4 sm:$0xff]  }
 0xdaa   : > { %15059 = vmatprep.subr.bf16.mxu1 %v16996_v24  ;;  %11433 = vmatprep.subr.bf16.mxu0 %v17000_v8  ;;  %v17037_v46 = vld [vmem:[%s19375_s19 + $0x240] ss:$12 sps:$4 sm:$0xff]   ;;  %v17042_v15 = vld [vmem:[%s19375_s19 + $0x25c] ss:$12 sps:$4 sm:$0xff]   ;;  %v17040_v3 = vld [vmem:[%s19375_s19 + $0x258] ss:$12 sps:$4 sm:$0xff]  }
 0xdab   : > { %v17070_v36 = vld [vmem:[%s19375_s19 + $0x410] ss:$12 sps:$4 sm:$0xff]   ;;  %v17045_v16 = vld [vmem:[%s19375_s19 + $0x274] ss:$12 sps:$4 sm:$0xff]   ;;  %v17048_v24 = vld [vmem:[%s19375_s19 + $0x28c] ss:$12 sps:$4 sm:$0xff]  }
 0xdac   : > { %11434 = vmatpush1.bf16.msra.mxu0 %v16998_v54  ;;  %v17071_v27 = vld [vmem:[%s19375_s19 + $0x350] ss:$12 sps:$4 sm:$0xff]   ;;  %v17075_v62 = vld [vmem:[%s19375_s19 + $0x428] ss:$12 sps:$4 sm:$0xff]   ;;  %v17080_v54 = vld [vmem:[%s19375_s19 + $0x440] ss:$12 sps:$4 sm:$0xff]  }
 0xdad   : > { %15060 = vmatpush3.bf16.msra.mxu1 %v16997_v55  ;;  %11446 = vmatprep.subr.bf16.mxu0 %v17005_v19  ;;  %v17076_v8 = vld [vmem:[%s19375_s19 + $0x368] ss:$12 sps:$4 sm:$0xff]   ;;  %v17051_v19 = vld [vmem:[%s19375_s19 + $0x2a4] ss:$12 sps:$4 sm:$0xff]  }
 0xdae   : > { %15061 = vmatprep.subr.bf16.mxu1 %v17001_v41  ;;  %v17046_v55 = vld [vmem:[%s19375_s19 + $0x288] ss:$12 sps:$4 sm:$0xff]   ;;  %v17081_v41 = vld [vmem:[%s19375_s19 + $0x380] ss:$12 sps:$4 sm:$0xff]  }
 0xdaf   : > { %11436 = vmatmul.mubr.bf16.vlgmr.msra.gmra.mrb[72].mxu0 %v9838_v63  ;;  %v17066_v63 = vld [vmem:[%s19375_s19 + $0x338] ss:$12 sps:$4 sm:$0xff]  }
 0xdb0   : > { %11447 = vmatpush1.bf16.msra.mxu0 %v17003_v1  ;;  %11478 = vmatprep.mubr.bf16.mxu0 %v9841_v58  ;;  %v17043_v58 = vld [vmem:[%s19375_s19 + $0x270] ss:$12 sps:$4 sm:$0xff]   ;;  %v17085_v1 = vld [vmem:[%s19375_s19 + $0x458] ss:$12 sps:$4 sm:$0xff]  }
 0xdb1   : > { %15062 = vmatpush3.bf16.msra.mxu1 %v17002_v47  ;;  %11448 = vmatprep.subr.bf16.mxu0 %v17010_v53  ;;  %v17049_v47 = vld [vmem:[%s19375_s19 + $0x2a0] ss:$12 sps:$4 sm:$0xff]   ;;  %v17054_v53 = vld [vmem:[%s19375_s19 + $0x2bc] ss:$12 sps:$4 sm:$0xff]  }
 0xdb2   : > { %15063 = vmatprep.subr.bf16.mxu1 %v17006_v50  ;;  %v17086_v50 = vld [vmem:[%s19375_s19 + $0x398] ss:$12 sps:$4 sm:$0xff]  }
 0xdb4   : > { %11449 = vmatpush1.bf16.msra.mxu0 %v17008_v29  ;;  %v7241_v29 = vrot.slane %v20877_v52, %v1755_v59  ;;  %v17059_v59 = vld [vmem:[%s19375_s19 + $0x2d4] ss:$12 sps:$4 sm:$0xff]  }
 0xdb5   : > { %15064 = vmatpush3.bf16.msra.mxu1 %v17007_v45  ;;  %11450 = vmatprep.subr.bf16.mxu0 %v17015_v56  ;;  %v17090_v45 = vld [vmem:[%s19375_s19 + $0x470] ss:$12 sps:$4 sm:$0xff]   ;;  %v7249_v56 = vrot.slane %v20877_v52, %v1763_v5 }
 0xdb6   : > { %15065 = vmatprep.subr.bf16.mxu1 %v17011_v42  ;;  %v7245_v42 = vrot.slane %v20877_v52, %v1759_v61 }
 0xdb8   : > { %11451 = vmatpush1.bf16.msra.mxu0 %v17013_v57  ;;  %v7253_v57 = vrot.slane %v20877_v52, %v1767_v6  ;;  %v17095_v6 = vld [vmem:[%s19375_s19 + $0x548] ss:$12 sps:$4 sm:$0xff]  }
 0xdb9   : > { %15066 = vmatpush3.bf16.msra.mxu1 %v17012_v2  ;;  %11452 = vmatprep.subr.bf16.mxu0 %v17020_v23  ;;  %v17052_v2 = vld [vmem:[%s19375_s19 + $0x2b8] ss:$12 sps:$4 sm:$0xff]  }
 0xdba   : > { %15067 = vmatprep.subr.bf16.mxu1 %v17016_v7 }
 0xdbc   : > { %11453 = vmatpush1.bf16.msra.mxu0 %v17018_v17 }
 0xdbd   : > { %15068 = vmatpush3.bf16.msra.mxu1 %v17017_v4  ;;  %11454 = vmatprep.subr.bf16.mxu0 %v17025_v51  ;;  %v17091_v4 = vld [vmem:[%s19375_s19 + $0x3b0] ss:$12 sps:$4 sm:$0xff]  }
 0xdbe   : > { %15069 = vmatprep.subr.bf16.mxu1 %v17021_v31 }
 0xdc0   : > { %11455 = vmatpush1.bf16.msra.mxu0 %v17023_v60 }
 0xdc1   : > { %15070 = vmatpush3.bf16.msra.mxu1 %v17022_v43  ;;  %11456 = vmatprep.subr.bf16.mxu0 %v17030_v38 }
 0xdc2   : > { %15071 = vmatprep.subr.bf16.mxu1 %v17026_v11 }
 0xdc4   : > { %11457 = vmatpush1.bf16.msra.mxu0 %v17028_v33  ;;  %v17057_v33 = vld [vmem:[%s19375_s19 + $0x2d0] ss:$12 sps:$4 sm:$0xff]  }
 0xdc5   : > { %15072 = vmatpush3.bf16.msra.mxu1 %v17027_v22  ;;  %11458 = vmatprep.subr.bf16.mxu0 %v17033_v12 }
 0xdc6   : > { %15079 = vmatprep.subr.bf16.mxu1 %v17055_v49 }
 0xdc8   : > { %11735 = vmatmul.mubr.bf16.vlgmr.msra.gmra.mrb[128].mxu1 %v20971_v0  ;;  %11459 = vmatpush1.bf16.msra.mxu0 %v17031_v40 }
 0xdc9   : > { %11460 = vmatprep.subr.bf16.mxu0 %v17036_v39  ;;  %15080 = vmatpush3.bf16.msra.mxu1 %v17056_v14  ;;  %v17064_v14 = vld [vmem:[%s19375_s19 + $0x2ec] ss:$12 sps:$4 sm:$0xff]  }
 0xdca   : > { %15081 = vmatprep.subr.bf16.mxu1 %v17060_v44 }
 0xdcc   : > { %11461 = vmatpush1.bf16.msra.mxu0 %v17034_v32 }
 0xdcd   : > { %11462 = vmatprep.subr.bf16.mxu0 %v17039_v20  ;;  %15082 = vmatpush3.bf16.msra.mxu1 %v17061_v9 }
 0xdce   : > { %15083 = vmatprep.subr.bf16.mxu1 %v17065_v48 }
 0xdd0   : > { %11463 = vmatpush1.bf16.msra.mxu0 %v17037_v46 }
 0xdd1   : > { %11464 = vmatprep.subr.bf16.mxu0 %v17042_v15  ;;  %15084 = vmatpush3.bf16.msra.mxu1 %v17066_v63 }
 0xdd2   : > { %15085 = vmatprep.subr.bf16.mxu1 %v17070_v36 }
 0xdd4   : > { %11465 = vmatpush1.bf16.msra.mxu0 %v17040_v3 }
 0xdd5   : > { %11466 = vmatprep.subr.bf16.mxu0 %v17045_v16  ;;  %15086 = vmatpush3.bf16.msra.mxu1 %v17071_v27 }
 0xdd6   : > { %15087 = vmatprep.subr.bf16.mxu1 %v17075_v62  ;;  %v17062_v62 = vld [vmem:[%s19375_s19 + $0x2e8] ss:$12 sps:$4 sm:$0xff]  }
 0xdd8   : > { %11467 = vmatpush1.bf16.msra.mxu0 %v17043_v58 }
 0xdd9   : > { %11468 = vmatprep.subr.bf16.mxu0 %v17048_v24  ;;  %15088 = vmatpush3.bf16.msra.mxu1 %v17076_v8 }
 0xdda   : > { %15089 = vmatprep.subr.bf16.mxu1 %v17080_v54 }
 0xddc   : > { %11469 = vmatpush1.bf16.msra.mxu0 %v17046_v55  ;;  %v17069_v55 = vld [vmem:[%s19375_s19 + $0x304] ss:$12 sps:$4 sm:$0xff]  }
 0xddd   : > { %11470 = vmatprep.subr.bf16.mxu0 %v17051_v19  ;;  %15090 = vmatpush3.bf16.msra.mxu1 %v17081_v41 }
 0xdde   : > { %15091 = vmatprep.subr.bf16.mxu1 %v17085_v1 }
 0xde0   : > { %11471 = vmatpush1.bf16.msra.mxu0 %v17049_v47 }
 0xde1   : > { %v8971_v23 = vpop.f32.mrb[64].mxu0  ;;  %11472 = vmatprep.subr.bf16.mxu0 %v17054_v53  ;;  %15092 = vmatpush3.bf16.msra.mxu1 %v17086_v50 }
 0xde2   : > { %v21047_v7 = vadd.f32 %v8971_v23, %v7241_v29  ;;  %v9057_v17 = vpop.f32.mrb[116].mxu1  ;;  %v8973_v5 = vpop.f32.mrb[65].mxu0  ;;  %15093 = vmatprep.subr.bf16.mxu1 %v17090_v45  ;;  %v17067_v23 = vld [vmem:[%s19375_s19 + $0x300] ss:$12 sps:$4 sm:$0xff]  }
 0xde3   : > { %v21050_v51 = vadd.f32 %v9057_v17, %v7249_v56  ;;  %v21052_v61 = vadd.f32 %v8973_v5, %v7245_v42  ;;  %v9059_v21 = vpop.f32.mrb[117].mxu1  ;;  %v8975_v31 = vpop.f32.mrb[66].mxu0 }
 0xde4   : > { %v9242_v52 = vmul.f32 %v21047_v7, %v21047_v7  ;;  %v21057_v60 = vadd.f32 %v9059_v21, %v7253_v57  ;;  %v21059_v43 = vadd.f32 %v8975_v31, %v7241_v29  ;;  %v9061_v38 = vpop.f32.mrb[118].mxu1  ;;  %11473 = vmatpush1.bf16.msra.mxu0 %v17052_v2  ;;  %v8977_v11 = vpop.f32.mrb[67].mxu0  ;;  %v17074_v21 = vld [vmem:[%s19375_s19 + $0x31c] ss:$12 sps:$4 sm:$0xff]  }
 0xde5   : > { %v9244_v22 = vmul.f32 %v21050_v51, %v21050_v51  ;;  %v9243_v12 = vmul.f32 %v21052_v61, %v21052_v61  ;;  %v21066_v49 = vadd.f32 %v9061_v38, %v7249_v56  ;;  %v21068_v40 = vadd.f32 %v8977_v11, %v7245_v42  ;;  %v9063_v39 = vpop.f32.mrb[119].mxu1  ;;  %11474 = vmatprep.subr.bf16.mxu0 %v17059_v59 }
 0xde6   : > { %v9266_v44 = vmul.f32 %v21047_v7, %v9242_v52  ;;  %v9245_v32 = vmul.f32 %v21057_v60, %v21057_v60  ;;  %v9254_v20 = vmul.f32 %v21059_v43, %v21059_v43  ;;  %v21076_v9 = vadd.f32 %v9063_v39, %v7253_v57  ;;  %15094 = vmatpush3.bf16.msra.mxu1 %v17091_v4  ;;  %v17077_v39 = vld [vmem:[%s19375_s19 + $0x330] ss:$12 sps:$4 sm:$0xff]  }
 0xde7   : > { %v9268_v48 = vmul.f32 %v21050_v51, %v9244_v22  ;;  %v9267_v46 = vmul.f32 %v21052_v61, %v9243_v12  ;;  %v9256_v15 = vmul.f32 %v21066_v49, %v21066_v49  ;;  %v9255_v63 = vmul.f32 %v21068_v40, %v21068_v40  ;;  %15101 = vmatprep.subr.bf16.mxu1 %v17095_v6  ;;  %v17079_v12 = vld [vmem:[%s19375_s19 + $0x334] ss:$12 sps:$4 sm:$0xff]  }
 0xde8   : > { %v9290_v36 = vmul.f32 0.044715, %v9266_v44  ;;  %v9269_v3 = vmul.f32 %v21057_v60, %v9245_v32  ;;  %v9278_v16 = vmul.f32 %v21059_v43, %v9254_v20  ;;  %v9257_v27 = vmul.f32 %v21076_v9, %v21076_v9  ;;  %11475 = vmatpush1.bf16.msra.mxu0 %v17057_v33  ;;  %v17072_v33 = vld [vmem:[%s19375_s19 + $0x318] ss:$12 sps:$4 sm:$0xff]   ;;  %v17082_v44 = vld [vmem:[%s19375_s19 + $0x348] ss:$12 sps:$4 sm:$0xff]  }
 0xde9   : > { %v9292_v58 = vmul.f32 0.044715, %v9268_v48  ;;  %v9291_v24 = vmul.f32 0.044715, %v9267_v46  ;;  %v9280_v8 = vmul.f32 %v21066_v49, %v9256_v15  ;;  %v9279_v54 = vmul.f32 %v21068_v40, %v9255_v63  ;;  %11476 = vmatprep.subr.bf16.mxu0 %v17064_v14  ;;  %v17089_v48 = vld [vmem:[%s19375_s19 + $0x364] ss:$12 sps:$4 sm:$0xff]  }
 0xdea   : > { %v9314_v19 = vadd.f32 %v21047_v7, %v9290_v36  ;;  %v9293_v41 = vmul.f32 0.044715, %v9269_v3  ;;  %v9302_v1 = vmul.f32 0.044715, %v9278_v16  ;;  %v9281_v47 = vmul.f32 %v21076_v9, %v9257_v27  ;;  %v17087_v16 = vld [vmem:[%s19375_s19 + $0x360] ss:$12 sps:$4 sm:$0xff]  }
 0xdeb   : > { %v9316_v53 = vadd.f32 %v21050_v51, %v9292_v58  ;;  %v9315_v50 = vadd.f32 %v21052_v61, %v9291_v24  ;;  %v9304_v29 = vmul.f32 0.044715, %v9280_v8  ;;  %v9303_v45 = vmul.f32 0.044715, %v9279_v54  ;;  %v17094_v8 = vld [vmem:[%s19375_s19 + $0x37c] ss:$12 sps:$4 sm:$0xff]  }
 0xdec   : > { %v9338_v56 = vmul.f32 0.7978846, %v9314_v19  ;;  %v9317_v42 = vadd.f32 %v21057_v60, %v9293_v41  ;;  %v9326_v57 = vadd.f32 %v21059_v43, %v9302_v1  ;;  %v9305_v2 = vmul.f32 0.044715, %v9281_v47  ;;  %11477 = vmatpush1.bf16.msra.mxu0 %v17062_v62 }
 0xded   : > { %v9340_v59 = vmul.f32 0.7978846, %v9316_v53  ;;  %v9339_v17 = vmul.f32 0.7978846, %v9315_v50  ;;  %v9328_v5 = vadd.f32 %v21066_v49, %v9304_v29  ;;  %v9327_v4 = vadd.f32 %v21068_v40, %v9303_v45  ;;  %11489 = vmatprep.subr.bf16.mxu0 %v17069_v55  ;;  %v17092_v29 = vld [vmem:[%s19375_s19 + $0x378] ss:$12 sps:$4 sm:$0xff]  }
 0xdee   : > { %17433 = vtanh.f32 %v9338_v56  ;;  %v9341_v31 = vmul.f32 0.7978846, %v9317_v42  ;;  %v9350_v6 = vmul.f32 0.7978846, %v9326_v57  ;;  %v9329_v52 = vadd.f32 %v21076_v9, %v9305_v2 }
 0xdef   : > { %17435 = vtanh.f32 %v9340_v59  ;;  %v9352_v38 = vmul.f32 0.7978846, %v9328_v5  ;;  %11479 = vmatmul.mubr.bf16.vlgmr.msra.gmra.mrb[72].mxu0 %v20971_v0  ;;  %v9351_v11 = vmul.f32 0.7978846, %v9327_v4  ;;  %v17084_v0 = vld [vmem:[%s19375_s19 + $0x34c] ss:$12 sps:$4 sm:$0xff]  }
 0xdf0   : > { %17437 = vtanh.f32 %v9339_v17  ;;  %11490 = vmatpush1.bf16.msra.mxu0 %v17067_v23  ;;  %v9353_v22 = vmul.f32 0.7978846, %v9329_v52  ;;  %v17099_v23 = vld [vmem:[%s19375_s19 + $0x394] ss:$12 sps:$4 sm:$0xff]  }
 0xdf1   : > { %17439 = vtanh.f32 %v9341_v31  ;;  %11491 = vmatprep.subr.bf16.mxu0 %v17074_v21 }
 0xdf2   : > { %17441 = vtanh.f32 %v9350_v6 }
 0xdf3   : > { %17443 = vtanh.f32 %v9352_v38  ;;  %v17104_v38 = vld [vmem:[%s19375_s19 + $0x3ac] ss:$12 sps:$4 sm:$0xff]  }
 0xdf4   : > { %17445 = vtanh.f32 %v9351_v11  ;;  %11492 = vmatpush1.bf16.msra.mxu0 %v17072_v33  ;;  %v17109_v11 = vld [vmem:[%s19375_s19 + $0x3c4] ss:$12 sps:$4 sm:$0xff]  }
 0xdf5   : > { %17447 = vtanh.f32 %v9353_v22  ;;  %11493 = vmatprep.subr.bf16.mxu0 %v17079_v12  ;;  %v17105_v33 = vld [vmem:[%s19375_s19 + $0x578] ss:$12 sps:$4 sm:$0xff]   ;;  %v17107_v22 = vld [vmem:[%s19375_s19 + $0x3c0] ss:$12 sps:$4 sm:$0xff]  }
 0xdf6   : > { %v17106_v12 = vld [vmem:[%s19375_s19 + $0x4b8] ss:$12 sps:$4 sm:$0xff]  }
 0xdf8   : > { %v17434_v14 = vpop.eup %17433  ;;  %11494 = vmatpush1.bf16.msra.mxu0 %v17077_v39  ;;  %v17114_v39 = vld [vmem:[%s19375_s19 + $0x3dc] ss:$12 sps:$4 sm:$0xff]  }
 0xdf9   : > { %v17436_v32 = vpop.eup %17435  ;;  %v9386_v20 = vadd.f32 1.0, %v17434_v14  ;;  %11495 = vmatprep.subr.bf16.mxu0 %v17084_v0  ;;  %v17110_v0 = vld [vmem:[%s19375_s19 + $0x590] ss:$12 sps:$4 sm:$0xff]   ;;  %v17112_v14 = vld [vmem:[%s19375_s19 + $0x3d8] ss:$12 sps:$4 sm:$0xff]  }
 0xdfa   : > { %v17438_v46 = vpop.eup %17437  ;;  %v9388_v15 = vadd.f32 1.0, %v17436_v32  ;;  %v17119_v32 = vld [vmem:[%s19375_s19 + $0x3f4] ss:$12 sps:$4 sm:$0xff]  }
 0xdfb   : > { %v17440_v63 = vpop.eup %17439  ;;  %v9387_v36 = vadd.f32 1.0, %v17438_v46  ;;  %v9410_v58 = vmul.f32 0.5, %v9386_v20  ;;  %v17115_v20 = vld [vmem:[%s19375_s19 + $0x5a8] ss:$12 sps:$4 sm:$0xff]  }
 0xdfc   : > { %v17442_v3 = vpop.eup %17441  ;;  %11496 = vmatpush1.bf16.msra.mxu0 %v17082_v44  ;;  %v9389_v27 = vadd.f32 1.0, %v17440_v63  ;;  %v9412_v55 = vmul.f32 0.5, %v9388_v15  ;;  %v17111_v44 = vld [vmem:[%s19375_s19 + $0x4d0] ss:$12 sps:$4 sm:$0xff]   ;;  %v17116_v46 = vld [vmem:[%s19375_s19 + $0x4e8] ss:$12 sps:$4 sm:$0xff]  }
 0xdfd   : > { %v17444_v62 = vpop.eup %17443  ;;  %v9398_v24 = vadd.f32 1.0, %v17442_v3  ;;  %11497 = vmatprep.subr.bf16.mxu0 %v17089_v48  ;;  %v9411_v53 = vmul.f32 0.5, %v9387_v36  ;;  %v9434_v42 = vmul.f32 %v21047_v7, %v9410_v58  ;;  %v17097_v7 = vld [vmem:[%s19375_s19 + $0x390] ss:$12 sps:$4 sm:$0xff]   ;;  %v17124_v15 = vld [vmem:[%s19375_s19 + $0x40c] ss:$12 sps:$4 sm:$0xff]  }
 0xdfe   : > { %v17446_v54 = vpop.eup %17445  ;;  %v9400_v19 = vadd.f32 1.0, %v17444_v62  ;;  %v9413_v56 = vmul.f32 0.5, %v9389_v27  ;;  %v9436_v59 = vmul.f32 %v21050_v51, %v9412_v55  ;;  %v17117_v48 = vld [vmem:[%s19375_s19 + $0x3f0] ss:$12 sps:$4 sm:$0xff]   ;;  %v17120_v63 = vld [vmem:[%s19375_s19 + $0x5c0] ss:$12 sps:$4 sm:$0xff]  }
 0xdff   : > { %v17448_v41 = vpop.eup %17447  ;;  %v9422_v1 = vmul.f32 0.5, %v9398_v24  ;;  %v9399_v47 = vadd.f32 1.0, %v17446_v54  ;;  %v9435_v4 = vmul.f32 %v21052_v61, %v9411_v53  ;;  %v17122_v36 = vld [vmem:[%s19375_s19 + $0x408] ss:$12 sps:$4 sm:$0xff]   ;;  %v17121_v3 = vld [vmem:[%s19375_s19 + $0x500] ss:$12 sps:$4 sm:$0xff]  }
 0xe00   : > { %v9424_v50 = vmul.f32 0.5, %v9400_v19  ;;  %11498 = vmatpush1.bf16.msra.mxu0 %v17087_v16  ;;  %v9401_v45 = vadd.f32 1.0, %v17448_v41  ;;  %v17129_v16 = vld [vmem:[%s19375_s19 + $0x424] ss:$12 sps:$4 sm:$0xff]   ;;  %v17127_v62 = vld [vmem:[%s19375_s19 + $0x420] ss:$12 sps:$4 sm:$0xff]  }
 0xe01   : > { %v9446_v57 = vmul.f32 %v21059_v43, %v9422_v1  ;;  %11499 = vmatprep.subr.bf16.mxu0 %v17094_v8  ;;  %v9423_v2 = vmul.f32 0.5, %v9399_v47  ;;  %v9437_v43 = vmul.f32 %v21057_v60, %v9413_v56  ;;  %v17102_v60 = vld [vmem:[%s19375_s19 + $0x3a8] ss:$12 sps:$4 sm:$0xff]   ;;  %v17125_v27 = vld [vmem:[%s19375_s19 + $0x5d8] ss:$12 sps:$4 sm:$0xff]  }
 0xe02   : > { %v9448_v17 = vmul.f32 %v21066_v49, %v9424_v50  ;;  %v9425_v5 = vmul.f32 0.5, %v9401_v45  ;;  %v17096_v49 = vld [vmem:[%s19375_s19 + $0x488] ss:$12 sps:$4 sm:$0xff]   ;;  %v17126_v58 = vld [vmem:[%s19375_s19 + $0x518] ss:$12 sps:$4 sm:$0xff]  }
 0xe03   : > { %v9447_v21 = vmul.f32 %v21068_v40, %v9423_v2  ;;  %v21120_v31 = vpack.c.bf16 %v9446_v57, %v9434_v42  ;;  %v17100_v40 = vld [vmem:[%s19375_s19 + $0x560] ss:$12 sps:$4 sm:$0xff]   ;;  %v17134_v24 = vld [vmem:[%s19375_s19 + $0x43c] ss:$12 sps:$4 sm:$0xff]   ;;  %v17132_v54 = vld [vmem:[%s19375_s19 + $0x438] ss:$12 sps:$4 sm:$0xff]  }
 0xe04   : > { %11500 = vmatpush1.bf16.msra.mxu0 %v17092_v29  ;;  %v9449_v6 = vmul.f32 %v21076_v9, %v9425_v5  ;;  %v21125_v51 = vpack.c.bf16 %v9448_v17, %v9436_v59  ;;  %v17101_v9 = vld [vmem:[%s19375_s19 + $0x4a0] ss:$12 sps:$4 sm:$0xff]   ;;  %v17130_v8 = vld [vmem:[%s19375_s19 + $0x5f0] ss:$12 sps:$4 sm:$0xff]   ;;  %v17159_v41 = vld [vmem:[%s19375_s19 + $0x6c8] ss:$12 sps:$4 sm:$0xff]  }
 0xe05   : > { %v9843_v52 = vpack.c.bf16 %v9447_v21, %v9435_v4  ;;  %11501 = vmatprep.subr.bf16.mxu0 %v17099_v23  ;;  %v17131_v55 = vld [vmem:[%s19375_s19 + $0x530] ss:$12 sps:$4 sm:$0xff]   ;;  %v17137_v19 = vld [vmem:[%s19375_s19 + $0x454] ss:$12 sps:$4 sm:$0xff]   ;;  %v17140_v47 = vld [vmem:[%s19375_s19 + $0x46c] ss:$12 sps:$4 sm:$0xff]  }
 0xe06   : > { %v21128_v61 = vpack.c.bf16 %v9449_v6, %v9437_v43  ;;  %v17135_v1 = vld [vmem:[%s19375_s19 + $0x450] ss:$12 sps:$4 sm:$0xff]   ;;  %v17160_v53 = vld [vmem:[%s19375_s19 + $0x608] ss:$12 sps:$4 sm:$0xff]   ;;  %v17164_v50 = vld [vmem:[%s19375_s19 + $0x6e0] ss:$12 sps:$4 sm:$0xff]  }
 0xe07   : > { %11521 = vmatprep.mubr.bf16.mxu0 %v9843_v52  ;;  %11775 = vmatprep.mubr.bf16.mxu1 %v9843_v52  ;;  %v17138_v29 = vld [vmem:[%s19375_s19 + $0x468] ss:$12 sps:$4 sm:$0xff]   ;;  %v17143_v45 = vld [vmem:[%s19375_s19 + $0x484] ss:$12 sps:$4 sm:$0xff]   ;;  %v17165_v56 = vld [vmem:[%s19375_s19 + $0x620] ss:$12 sps:$4 sm:$0xff]  }
 0xe08   : > { %11776 = vmatmul.mubr.bf16.vlgmr.msra.gmra.mrb[132].mxu1 %v21120_v31  ;;  %11502 = vmatpush1.bf16.msra.mxu0 %v17097_v7  ;;  %v17169_v42 = vld [vmem:[%s19375_s19 + $0x6f8] ss:$12 sps:$4 sm:$0xff]   ;;  %v17141_v57 = vld [vmem:[%s19375_s19 + $0x480] ss:$12 sps:$4 sm:$0xff]   ;;  %v17146_v2 = vld [vmem:[%s19375_s19 + $0x49c] ss:$12 sps:$4 sm:$0xff]  }
 0xe09   : > { %15102 = vmatpush3.bf16.msra.mxu1 %v17096_v49  ;;  %11816 = vmatprep.mubr.bf16.mxu1 %v21128_v61  ;;  %v17170_v23 = vld [vmem:[%s19375_s19 + $0x638] ss:$12 sps:$4 sm:$0xff]   ;;  %v17174_v59 = vld [vmem:[%s19375_s19 + $0x710] ss:$12 sps:$4 sm:$0xff]   ;;  %v17149_v5 = vld [vmem:[%s19375_s19 + $0x4b4] ss:$12 sps:$4 sm:$0xff]  }
 0xe0a   : > { %15103 = vmatprep.subr.bf16.mxu1 %v17100_v40  ;;  %11503 = vmatprep.subr.bf16.mxu0 %v17104_v38  ;;  %v17144_v17 = vld [vmem:[%s19375_s19 + $0x498] ss:$12 sps:$4 sm:$0xff]   ;;  %v17175_v4 = vld [vmem:[%s19375_s19 + $0x650] ss:$12 sps:$4 sm:$0xff]   ;;  %v17179_v21 = vld [vmem:[%s19375_s19 + $0x728] ss:$12 sps:$4 sm:$0xff]  }
 0xe0b   : > { %v17147_v7 = vld [vmem:[%s19375_s19 + $0x4b0] ss:$12 sps:$4 sm:$0xff]   ;;  %v17180_v43 = vld [vmem:[%s19375_s19 + $0x668] ss:$12 sps:$4 sm:$0xff]   ;;  %v17184_v6 = vld [vmem:[%s19375_s19 + $0x740] ss:$12 sps:$4 sm:$0xff]  }
 0xe0c   : > { %11504 = vmatpush1.bf16.msra.mxu0 %v17102_v60  ;;  %v17150_v52 = vld [vmem:[%s19375_s19 + $0x4c8] ss:$12 sps:$4 sm:$0xff]   ;;  %v17155_v49 = vld [vmem:[%s19375_s19 + $0x4e4] ss:$12 sps:$4 sm:$0xff]   ;;  %v17153_v60 = vld [vmem:[%s19375_s19 + $0x4e0] ss:$12 sps:$4 sm:$0xff]  }
 0xe0d   : > { %15104 = vmatpush3.bf16.msra.mxu1 %v17101_v9  ;;  %11505 = vmatprep.subr.bf16.mxu0 %v17109_v11  ;;  %v17189_v40 = vld [vmem:[%s19375_s19 + $0x758] ss:$12 sps:$4 sm:$0xff]   ;;  %v7219_v38 = vld [vmem:[%s19373_s16 + $0x8] sm:$0xf] }
 0xe0e   : > { %15105 = vmatprep.subr.bf16.mxu1 %v17105_v33  ;;  %v17158_v9 = vld [vmem:[%s19375_s19 + $0x4fc] ss:$12 sps:$4 sm:$0xff]   ;;  %v17190_v11 = vld [vmem:[%s19375_s19 + $0x698] ss:$12 sps:$4 sm:$0xff]   ;;  %v7257_v33 = vrot.slane %v7219_v38, %v19690_v25 }
 0xe10   : > { %11506 = vmatpush1.bf16.msra.mxu0 %v17107_v22  ;;  %v17194_v22 = vld [vmem:[%s19375_s19 + $0x770] ss:$12 sps:$4 sm:$0xff]  }
 0xe11   : > { %15106 = vmatpush3.bf16.msra.mxu1 %v17106_v12  ;;  %11507 = vmatprep.subr.bf16.mxu0 %v17114_v39  ;;  %v7265_v12 = vrot.slane %v7219_v38, %v19767_v34  ;;  %v7261_v39 = vrot.slane %v7219_v38, %v19693_v26 }
 0xe12   : > { %15107 = vmatprep.subr.bf16.mxu1 %v17110_v0  ;;  %v7269_v0 = vrot.slane %v7219_v38, %v19770_v35  ;;  %v17199_v35 = vld [vmem:[%s19375_s19 + $0x848] ss:$12 sps:$4 sm:$0xff]  }
 0xe14   : > { %11508 = vmatpush1.bf16.msra.mxu0 %v17112_v14  ;;  %v17156_v14 = vld [vmem:[%s19375_s19 + $0x4f8] ss:$12 sps:$4 sm:$0xff]  }
 0xe15   : > { %15108 = vmatpush3.bf16.msra.mxu1 %v17111_v44  ;;  %11509 = vmatprep.subr.bf16.mxu0 %v17119_v32  ;;  %v17163_v32 = vld [vmem:[%s19375_s19 + $0x514] ss:$12 sps:$4 sm:$0xff]  }
 0xe16   : > { %15109 = vmatprep.subr.bf16.mxu1 %v17115_v20 }
 0xe18   : > { %11510 = vmatpush1.bf16.msra.mxu0 %v17117_v48 }
 0xe19   : > { %15110 = vmatpush3.bf16.msra.mxu1 %v17116_v46  ;;  %11511 = vmatprep.subr.bf16.mxu0 %v17124_v15  ;;  %v17195_v15 = vld [vmem:[%s19375_s19 + $0x6b0] ss:$12 sps:$4 sm:$0xff]  }
 0xe1a   : > { %15111 = vmatprep.subr.bf16.mxu1 %v17120_v63 }
 0xe1c   : > { %11512 = vmatpush1.bf16.msra.mxu0 %v17122_v36 }
 0xe1d   : > { %15112 = vmatpush3.bf16.msra.mxu1 %v17121_v3  ;;  %11513 = vmatprep.subr.bf16.mxu0 %v17129_v16 }
 0xe1e   : > { %15113 = vmatprep.subr.bf16.mxu1 %v17125_v27 }
 0xe20   : > { %11514 = vmatpush1.bf16.msra.mxu0 %v17127_v62 }
 0xe21   : > { %15114 = vmatpush3.bf16.msra.mxu1 %v17126_v58  ;;  %11515 = vmatprep.subr.bf16.mxu0 %v17134_v24 }
 0xe22   : > { %15115 = vmatprep.subr.bf16.mxu1 %v17130_v8 }
 0xe24   : > { %11516 = vmatpush1.bf16.msra.mxu0 %v17132_v54  ;;  %v17161_v54 = vld [vmem:[%s19375_s19 + $0x510] ss:$12 sps:$4 sm:$0xff]  }
 0xe25   : > { %15116 = vmatpush3.bf16.msra.mxu1 %v17131_v55  ;;  %11517 = vmatprep.subr.bf16.mxu0 %v17137_v19 }
 0xe26   : > { %15123 = vmatprep.subr.bf16.mxu1 %v17159_v41 }
 0xe28   : > { %11817 = vmatmul.mubr.bf16.vlgmr.msra.gmra.mrb[136].mxu1 %v21125_v51  ;;  %11518 = vmatpush1.bf16.msra.mxu0 %v17135_v1 }
 0xe29   : > { %11519 = vmatprep.subr.bf16.mxu0 %v17140_v47  ;;  %15124 = vmatpush3.bf16.msra.mxu1 %v17160_v53  ;;  %v17168_v53 = vld [vmem:[%s19375_s19 + $0x52c] ss:$12 sps:$4 sm:$0xff]  }
 0xe2a   : > { %15125 = vmatprep.subr.bf16.mxu1 %v17164_v50 }
 0xe2c   : > { %11520 = vmatpush1.bf16.msra.mxu0 %v17138_v29 }
 0xe2d   : > { %11532 = vmatprep.subr.bf16.mxu0 %v17143_v45  ;;  %15126 = vmatpush3.bf16.msra.mxu1 %v17165_v56 }
 0xe2e   : > { %15127 = vmatprep.subr.bf16.mxu1 %v17169_v42 }
 0xe2f   : > { %11522 = vmatmul.mubr.bf16.vlgmr.msra.gmra.mrb[72].mxu0 %v21120_v31  ;;  %v17152_v31 = vld [vmem:[%s19375_s19 + $0x4cc] ss:$12 sps:$4 sm:$0xff]  }
 0xe30   : > { %11533 = vmatpush1.bf16.msra.mxu0 %v17141_v57  ;;  %11564 = vmatprep.mubr.bf16.mxu0 %v21128_v61  ;;  %v17185_v61 = vld [vmem:[%s19375_s19 + $0x680] ss:$12 sps:$4 sm:$0xff]  }
 0xe31   : > { %11534 = vmatprep.subr.bf16.mxu0 %v17146_v2  ;;  %15128 = vmatpush3.bf16.msra.mxu1 %v17170_v23 }
 0xe32   : > { %15129 = vmatprep.subr.bf16.mxu1 %v17174_v59 }
 0xe34   : > { %11535 = vmatpush1.bf16.msra.mxu0 %v17144_v17 }
 0xe35   : > { %11536 = vmatprep.subr.bf16.mxu0 %v17149_v5  ;;  %15130 = vmatpush3.bf16.msra.mxu1 %v17175_v4 }
 0xe36   : > { %15131 = vmatprep.subr.bf16.mxu1 %v17179_v21  ;;  %v17166_v21 = vld [vmem:[%s19375_s19 + $0x528] ss:$12 sps:$4 sm:$0xff]  }
 0xe38   : > { %11537 = vmatpush1.bf16.msra.mxu0 %v17147_v7 }
 0xe39   : > { %11538 = vmatprep.subr.bf16.mxu0 %v17152_v31  ;;  %15132 = vmatpush3.bf16.msra.mxu1 %v17180_v43 }
 0xe3a   : > { %15133 = vmatprep.subr.bf16.mxu1 %v17184_v6 }
 0xe3c   : > { %11539 = vmatpush1.bf16.msra.mxu0 %v17150_v52  ;;  %v17173_v52 = vld [vmem:[%s19375_s19 + $0x544] ss:$12 sps:$4 sm:$0xff]  }
 0xe3d   : > { %11540 = vmatprep.subr.bf16.mxu0 %v17155_v49  ;;  %15134 = vmatpush3.bf16.msra.mxu1 %v17185_v61 }
 0xe3e   : > { %15135 = vmatprep.subr.bf16.mxu1 %v17189_v40 }
 0xe40   : > { %11541 = vmatpush1.bf16.msra.mxu0 %v17153_v60 }
 0xe41   : > { %v9143_v44 = vpop.f32.mrb[68].mxu0  ;;  %11542 = vmatprep.subr.bf16.mxu0 %v17158_v9  ;;  %15136 = vmatpush3.bf16.msra.mxu1 %v17190_v11 }
 0xe42   : > { %v21200_v20 = vadd.f32 %v9143_v44, %v7257_v33  ;;  %v9229_v48 = vpop.f32.mrb[120].mxu1  ;;  %v9145_v46 = vpop.f32.mrb[69].mxu0  ;;  %15137 = vmatprep.subr.bf16.mxu1 %v17194_v22 }
 0xe43   : > { %v21203_v63 = vadd.f32 %v9229_v48, %v7265_v12  ;;  %v21205_v36 = vadd.f32 %v9145_v46, %v7261_v39  ;;  %v9231_v3 = vpop.f32.mrb[121].mxu1  ;;  %v9147_v16 = vpop.f32.mrb[70].mxu0 }
 0xe44   : > { %v9246_v27 = vmul.f32 %v21200_v20, %v21200_v20  ;;  %v21210_v62 = vadd.f32 %v9231_v3, %v7269_v0  ;;  %v21212_v58 = vadd.f32 %v9147_v16, %v7257_v33  ;;  %v9233_v24 = vpop.f32.mrb[122].mxu1  ;;  %11543 = vmatpush1.bf16.msra.mxu0 %v17156_v14  ;;  %v9149_v8 = vpop.f32.mrb[71].mxu0  ;;  %v17171_v14 = vld [vmem:[%s19375_s19 + $0x540] ss:$12 sps:$4 sm:$0xff]  }
 0xe45   : > { %v9248_v55 = vmul.f32 %v21203_v63, %v21203_v63  ;;  %v9247_v19 = vmul.f32 %v21205_v36, %v21205_v36  ;;  %v21219_v41 = vadd.f32 %v9233_v24, %v7265_v12  ;;  %v21221_v1 = vadd.f32 %v9149_v8, %v7261_v39  ;;  %v9235_v47 = vpop.f32.mrb[123].mxu1  ;;  %11544 = vmatprep.subr.bf16.mxu0 %v17163_v32  ;;  %v17176_v8 = vld [vmem:[%s19375_s19 + $0x558] ss:$12 sps:$4 sm:$0xff]  }
 0xe46   : > { %v9270_v50 = vmul.f32 %v21200_v20, %v9246_v27  ;;  %v9249_v29 = vmul.f32 %v21210_v62, %v21210_v62  ;;  %v9258_v45 = vmul.f32 %v21212_v58, %v21212_v58  ;;  %v21229_v56 = vadd.f32 %v9235_v47, %v7269_v0  ;;  %15138 = vmatpush3.bf16.msra.mxu1 %v17195_v15  ;;  %v17178_v15 = vld [vmem:[%s19375_s19 + $0x55c] ss:$12 sps:$4 sm:$0xff]   ;;  %v17188_v47 = vld [vmem:[%s19375_s19 + $0x58c] ss:$12 sps:$4 sm:$0xff]  }
 0xe47   : > { %v9272_v42 = vmul.f32 %v21203_v63, %v9248_v55  ;;  %v9271_v57 = vmul.f32 %v21205_v36, %v9247_v19  ;;  %v9260_v2 = vmul.f32 %v21219_v41, %v21219_v41  ;;  %v9259_v23 = vmul.f32 %v21221_v1, %v21221_v1  ;;  %15145 = vmatprep.subr.bf16.mxu1 %v17199_v35  ;;  %v17183_v55 = vld [vmem:[%s19375_s19 + $0x574] ss:$12 sps:$4 sm:$0xff]   ;;  %v17181_v19 = vld [vmem:[%s19375_s19 + $0x570] ss:$12 sps:$4 sm:$0xff]  }
 0xe48   : > { %v9294_v59 = vmul.f32 0.044715, %v9270_v50  ;;  %v9273_v17 = vmul.f32 %v21210_v62, %v9249_v29  ;;  %v9282_v5 = vmul.f32 %v21212_v58, %v9258_v45  ;;  %v9261_v4 = vmul.f32 %v21229_v56, %v21229_v56  ;;  %11545 = vmatpush1.bf16.msra.mxu0 %v17161_v54  ;;  %v17186_v50 = vld [vmem:[%s19375_s19 + $0x588] ss:$12 sps:$4 sm:$0xff]  }
 0xe49   : > { %v9296_v7 = vmul.f32 0.044715, %v9272_v42  ;;  %v9295_v31 = vmul.f32 0.044715, %v9271_v57  ;;  %v9284_v43 = vmul.f32 %v21219_v41, %v9260_v2  ;;  %v9283_v6 = vmul.f32 %v21221_v1, %v9259_v23  ;;  %11546 = vmatprep.subr.bf16.mxu0 %v17168_v53  ;;  %v17193_v42 = vld [vmem:[%s19375_s19 + $0x5a4] ss:$12 sps:$4 sm:$0xff]  }
 0xe4a   : > { %v9318_v49 = vadd.f32 %v21200_v20, %v9294_v59  ;;  %v9297_v61 = vmul.f32 0.044715, %v9273_v17  ;;  %v9306_v40 = vmul.f32 0.044715, %v9282_v5  ;;  %v9285_v38 = vmul.f32 %v21229_v56, %v9261_v4  ;;  %v17191_v5 = vld [vmem:[%s19375_s19 + $0x5a0] ss:$12 sps:$4 sm:$0xff]  }
 0xe4b   : > { %v9320_v60 = vadd.f32 %v21203_v63, %v9296_v7  ;;  %v9319_v9 = vadd.f32 %v21205_v36, %v9295_v31  ;;  %v9308_v11 = vmul.f32 0.044715, %v9284_v43  ;;  %v9307_v33 = vmul.f32 0.044715, %v9283_v6  ;;  %v17198_v43 = vld [vmem:[%s19375_s19 + $0x5bc] ss:$12 sps:$4 sm:$0xff]  }
 0xe4c   : > { %v9342_v22 = vmul.f32 0.7978846, %v9318_v49  ;;  %v9321_v12 = vadd.f32 %v21210_v62, %v9297_v61  ;;  %v9330_v39 = vadd.f32 %v21212_v58, %v9306_v40  ;;  %v9309_v0 = vmul.f32 0.044715, %v9285_v38  ;;  %11547 = vmatpush1.bf16.msra.mxu0 %v17166_v21 }
 0xe4d   : > { %v9344_v44 = vmul.f32 0.7978846, %v9320_v60  ;;  %v9343_v32 = vmul.f32 0.7978846, %v9319_v9  ;;  %v9332_v48 = vadd.f32 %v21219_v41, %v9308_v11  ;;  %v9331_v46 = vadd.f32 %v21221_v1, %v9307_v33  ;;  %11548 = vmatprep.subr.bf16.mxu0 %v17173_v52  ;;  %v17196_v11 = vld [vmem:[%s19375_s19 + $0x5b8] ss:$12 sps:$4 sm:$0xff]  }
 0xe4e   : > { %17449 = vtanh.f32 %v9342_v22  ;;  %v9345_v3 = vmul.f32 0.7978846, %v9321_v12  ;;  %v9354_v16 = vmul.f32 0.7978846, %v9330_v39  ;;  %v9333_v35 = vadd.f32 %v21229_v56, %v9309_v0 }
 0xe4f   : > { %17451 = vtanh.f32 %v9344_v44  ;;  %v9356_v27 = vmul.f32 0.7978846, %v9332_v48  ;;  %v9355_v24 = vmul.f32 0.7978846, %v9331_v46 }
 0xe50   : > { %17453 = vtanh.f32 %v9343_v32  ;;  %11549 = vmatpush1.bf16.msra.mxu0 %v17171_v14  ;;  %v9357_v54 = vmul.f32 0.7978846, %v9333_v35  ;;  %v17203_v14 = vld [vmem:[%s19375_s19 + $0x5d4] ss:$12 sps:$4 sm:$0xff]  }
 0xe51   : > { %17455 = vtanh.f32 %v9345_v3  ;;  %11550 = vmatprep.subr.bf16.mxu0 %v17178_v15 }
 0xe52   : > { %17457 = vtanh.f32 %v9354_v16 }
 0xe53   : > { %17459 = vtanh.f32 %v9356_v27  ;;  %v17208_v27 = vld [vmem:[%s19375_s19 + $0x5ec] ss:$12 sps:$4 sm:$0xff]  }
 0xe54   : > { %17461 = vtanh.f32 %v9355_v24  ;;  %11551 = vmatpush1.bf16.msra.mxu0 %v17176_v8  ;;  %v17213_v24 = vld [vmem:[%s19375_s19 + $0x604] ss:$12 sps:$4 sm:$0xff]  }
 0xe55   : > { %17463 = vtanh.f32 %v9357_v54  ;;  %11552 = vmatprep.subr.bf16.mxu0 %v17183_v55  ;;  %v17209_v8 = vld [vmem:[%s19375_s19 + $0x878] ss:$12 sps:$4 sm:$0xff]   ;;  %v17211_v54 = vld [vmem:[%s19375_s19 + $0x600] ss:$12 sps:$4 sm:$0xff]  }
 0xe56   : > { %v17210_v55 = vld [vmem:[%s19375_s19 + $0x7b8] ss:$12 sps:$4 sm:$0xff]  }
 0xe58   : > { %v17450_v53 = vpop.eup %17449  ;;  %11553 = vmatpush1.bf16.msra.mxu0 %v17181_v19  ;;  %v17218_v19 = vld [vmem:[%s19375_s19 + $0x61c] ss:$12 sps:$4 sm:$0xff]  }
 0xe59   : > { %v17452_v29 = vpop.eup %17451  ;;  %v9390_v45 = vadd.f32 1.0, %v17450_v53  ;;  %11554 = vmatprep.subr.bf16.mxu0 %v17188_v47  ;;  %v17214_v47 = vld [vmem:[%s19375_s19 + $0x890] ss:$12 sps:$4 sm:$0xff]   ;;  %v17216_v53 = vld [vmem:[%s19375_s19 + $0x618] ss:$12 sps:$4 sm:$0xff]  }
 0xe5a   : > { %v17454_v57 = vpop.eup %17453  ;;  %v9392_v2 = vadd.f32 1.0, %v17452_v29  ;;  %v17223_v29 = vld [vmem:[%s19375_s19 + $0x634] ss:$12 sps:$4 sm:$0xff]  }
 0xe5b   : > { %v17456_v23 = vpop.eup %17455  ;;  %v9391_v59 = vadd.f32 1.0, %v17454_v57  ;;  %v9414_v7 = vmul.f32 0.5, %v9390_v45  ;;  %v17219_v45 = vld [vmem:[%s19375_s19 + $0x8a8] ss:$12 sps:$4 sm:$0xff]  }
 0xe5c   : > { %v17458_v17 = vpop.eup %17457  ;;  %11555 = vmatpush1.bf16.msra.mxu0 %v17186_v50  ;;  %v9393_v4 = vadd.f32 1.0, %v17456_v23  ;;  %v9416_v52 = vmul.f32 0.5, %v9392_v2  ;;  %v17215_v50 = vld [vmem:[%s19375_s19 + $0x7d0] ss:$12 sps:$4 sm:$0xff]   ;;  %v17220_v57 = vld [vmem:[%s19375_s19 + $0x7e8] ss:$12 sps:$4 sm:$0xff]  }
 0xe5d   : > { %v17460_v21 = vpop.eup %17459  ;;  %v9402_v31 = vadd.f32 1.0, %v17458_v17  ;;  %11556 = vmatprep.subr.bf16.mxu0 %v17193_v42  ;;  %v9415_v60 = vmul.f32 0.5, %v9391_v59  ;;  %v9438_v12 = vmul.f32 %v21200_v20, %v9414_v7  ;;  %v17201_v20 = vld [vmem:[%s19375_s19 + $0x5d0] ss:$12 sps:$4 sm:$0xff]   ;;  %v17224_v2 = vld [vmem:[%s19375_s19 + $0x8c0] ss:$12 sps:$4 sm:$0xff]  }
 0xe5e   : > { %v17462_v6 = vpop.eup %17461  ;;  %v9404_v49 = vadd.f32 1.0, %v17460_v21  ;;  %v9417_v22 = vmul.f32 0.5, %v9393_v4  ;;  %v9440_v44 = vmul.f32 %v21203_v63, %v9416_v52  ;;  %v17221_v42 = vld [vmem:[%s19375_s19 + $0x630] ss:$12 sps:$4 sm:$0xff]   ;;  %v17226_v23 = vld [vmem:[%s19375_s19 + $0x648] ss:$12 sps:$4 sm:$0xff]  }
 0xe5f   : > { %v17464_v61 = vpop.eup %17463  ;;  %v9426_v40 = vmul.f32 0.5, %v9402_v31  ;;  %v9403_v38 = vadd.f32 1.0, %v17462_v6  ;;  %v9439_v46 = vmul.f32 %v21205_v36, %v9415_v60  ;;  %v17225_v59 = vld [vmem:[%s19375_s19 + $0x800] ss:$12 sps:$4 sm:$0xff]   ;;  %v17233_v17 = vld [vmem:[%s19375_s19 + $0x664] ss:$12 sps:$4 sm:$0xff]  }
 0xe60   : > { %v9428_v9 = vmul.f32 0.5, %v9404_v49  ;;  %11557 = vmatpush1.bf16.msra.mxu0 %v17191_v5  ;;  %v9405_v33 = vadd.f32 1.0, %v17464_v61  ;;  %v17229_v5 = vld [vmem:[%s19375_s19 + $0x8d8] ss:$12 sps:$4 sm:$0xff]   ;;  %v17231_v7 = vld [vmem:[%s19375_s19 + $0x660] ss:$12 sps:$4 sm:$0xff]  }
 0xe61   : > { %v9450_v39 = vmul.f32 %v21212_v58, %v9426_v40  ;;  %11558 = vmatprep.subr.bf16.mxu0 %v17198_v43  ;;  %v9427_v0 = vmul.f32 0.5, %v9403_v38  ;;  %v9441_v58 = vmul.f32 %v21210_v62, %v9417_v22  ;;  %v17206_v62 = vld [vmem:[%s19375_s19 + $0x5e8] ss:$12 sps:$4 sm:$0xff]   ;;  %v17230_v6 = vld [vmem:[%s19375_s19 + $0x818] ss:$12 sps:$4 sm:$0xff]  }
 0xe62   : > { %v9452_v32 = vmul.f32 %v21219_v41, %v9428_v9  ;;  %v9429_v48 = vmul.f32 0.5, %v9405_v33  ;;  %v17200_v41 = vld [vmem:[%s19375_s19 + $0x788] ss:$12 sps:$4 sm:$0xff]   ;;  %v17234_v61 = vld [vmem:[%s19375_s19 + $0x8f0] ss:$12 sps:$4 sm:$0xff]  }
 0xe63   : > { %v9451_v15 = vmul.f32 %v21221_v1, %v9427_v0  ;;  %v21272_v3 = vpack.c.bf16 %v9450_v39, %v9438_v12  ;;  %v17204_v1 = vld [vmem:[%s19375_s19 + $0x860] ss:$12 sps:$4 sm:$0xff]   ;;  %v17238_v52 = vld [vmem:[%s19375_s19 + $0x67c] ss:$12 sps:$4 sm:$0xff]   ;;  %v17236_v38 = vld [vmem:[%s19375_s19 + $0x678] ss:$12 sps:$4 sm:$0xff]  }
 0xe64   : > { %11559 = vmatpush1.bf16.msra.mxu0 %v17196_v11  ;;  %v9453_v16 = vmul.f32 %v21229_v56, %v9429_v48  ;;  %v21277_v63 = vpack.c.bf16 %v9452_v32, %v9440_v44  ;;  %v17205_v56 = vld [vmem:[%s19375_s19 + $0x7a0] ss:$12 sps:$4 sm:$0xff]   ;;  %v17235_v60 = vld [vmem:[%s19375_s19 + $0x830] ss:$12 sps:$4 sm:$0xff]   ;;  %v17242_v22 = vld [vmem:[%s19375_s19 + $0x6a8] ss:$12 sps:$4 sm:$0xff]  }
 0xe65   : > { %v9847_v35 = vpack.c.bf16 %v9451_v15, %v9439_v46  ;;  %11560 = vmatprep.subr.bf16.mxu0 %v17203_v14  ;;  %v17241_v9 = vld [vmem:[%s19375_s19 + $0x694] ss:$12 sps:$4 sm:$0xff]   ;;  %v17239_v11 = vld [vmem:[%s19375_s19 + $0x690] ss:$12 sps:$4 sm:$0xff]   ;;  %v17244_v33 = vld [vmem:[%s19375_s19 + $0x6ac] ss:$12 sps:$4 sm:$0xff]  }
 0xe66   : > { %v21280_v36 = vpack.c.bf16 %v9453_v16, %v9441_v58  ;;  %v17247_v12 = vld [vmem:[%s19375_s19 + $0x6c4] ss:$12 sps:$4 sm:$0xff]   ;;  %v17245_v39 = vld [vmem:[%s19375_s19 + $0x6c0] ss:$12 sps:$4 sm:$0xff]   ;;  %v17250_v0 = vld [vmem:[%s19375_s19 + $0x6dc] ss:$12 sps:$4 sm:$0xff]  }
 0xe67   : > { %11857 = vmatprep.mubr.bf16.mxu1 %v9847_v35  ;;  %v17248_v14 = vld [vmem:[%s19375_s19 + $0x6d8] ss:$12 sps:$4 sm:$0xff]   ;;  %v17253_v44 = vld [vmem:[%s19375_s19 + $0x6f4] ss:$12 sps:$4 sm:$0xff]   ;;  %v17251_v32 = vld [vmem:[%s19375_s19 + $0x6f0] ss:$12 sps:$4 sm:$0xff]  }
 0xe68   : > { %11858 = vmatmul.mubr.bf16.vlgmr.msra.gmra.mrb[140].mxu1 %v21272_v3  ;;  %11561 = vmatpush1.bf16.msra.mxu0 %v17201_v20  ;;  %v17256_v48 = vld [vmem:[%s19375_s19 + $0x70c] ss:$12 sps:$4 sm:$0xff]   ;;  %v21327_v46 = vld [vmem:[%s1155_s11] sm:$0x7]  ;;  %v17254_v15 = vld [vmem:[%s19375_s19 + $0x708] ss:$12 sps:$4 sm:$0xff]  }
 0xe69   : > { %15146 = vmatpush3.bf16.msra.mxu1 %v17200_v41  ;;  %11898 = vmatprep.mubr.bf16.mxu1 %v21280_v36  ;;  %v9863_v20 = vrot.slane %v21327_v46, %v19767_v34  ;;  %v17259_v58 = vld [vmem:[%s19375_s19 + $0x724] ss:$12 sps:$4 sm:$0xff]   ;;  %v17257_v41 = vld [vmem:[%s19375_s19 + $0x720] ss:$12 sps:$4 sm:$0xff]  }
 0xe6a   : > { %15147 = vmatprep.subr.bf16.mxu1 %v17204_v1  ;;  %11562 = vmatprep.subr.bf16.mxu0 %v17208_v27 }
 0xe6c   : > { %11563 = vmatpush1.bf16.msra.mxu0 %v17206_v62 }
 0xe6d   : > { %15148 = vmatpush3.bf16.msra.mxu1 %v17205_v56  ;;  %11575 = vmatprep.subr.bf16.mxu0 %v17213_v24  ;;  %v17262_v56 = vld [vmem:[%s19375_s19 + $0x73c] ss:$12 sps:$4 sm:$0xff]  }
 0xe6e   : > { %15149 = vmatprep.subr.bf16.mxu1 %v17209_v8 }
 0xe6f   : > { %11565 = vmatmul.mubr.bf16.vlgmr.msra.gmra.mrb[72].mxu0 %v21125_v51  ;;  %v17228_v51 = vld [vmem:[%s19375_s19 + $0x64c] ss:$12 sps:$4 sm:$0xff]  }
 0xe70   : > { %11576 = vmatpush1.bf16.msra.mxu0 %v17211_v54  ;;  %11607 = vmatprep.mubr.bf16.mxu0 %v9847_v35 }
 0xe71   : > { %15150 = vmatpush3.bf16.msra.mxu1 %v17210_v55  ;;  %11577 = vmatprep.subr.bf16.mxu0 %v17218_v19  ;;  %v17260_v19 = vld [vmem:[%s19375_s19 + $0x738] ss:$12 sps:$4 sm:$0xff]  }
 0xe72   : > { %15151 = vmatprep.subr.bf16.mxu1 %v17214_v47 }
 0xe74   : > { %11578 = vmatpush1.bf16.msra.mxu0 %v17216_v53  ;;  %v17265_v53 = vld [vmem:[%s19375_s19 + $0x754] ss:$12 sps:$4 sm:$0xff]  }
 0xe75   : > { %15152 = vmatpush3.bf16.msra.mxu1 %v17215_v50  ;;  %11579 = vmatprep.subr.bf16.mxu0 %v17223_v29  ;;  %v17263_v50 = vld [vmem:[%s19375_s19 + $0x750] ss:$12 sps:$4 sm:$0xff]   ;;  %v17268_v29 = vld [vmem:[%s19375_s19 + $0x76c] ss:$12 sps:$4 sm:$0xff]  }
 0xe76   : > { %15153 = vmatprep.subr.bf16.mxu1 %v17219_v45  ;;  %v17266_v45 = vld [vmem:[%s19375_s19 + $0x768] ss:$12 sps:$4 sm:$0xff]  }
 0xe78   : > { %11580 = vmatpush1.bf16.msra.mxu0 %v17221_v42  ;;  %v17271_v42 = vld [vmem:[%s19375_s19 + $0x784] ss:$12 sps:$4 sm:$0xff]  }
 0xe79   : > { %15154 = vmatpush3.bf16.msra.mxu1 %v17220_v57  ;;  %11581 = vmatprep.subr.bf16.mxu0 %v17228_v51  ;;  %v17269_v57 = vld [vmem:[%s19375_s19 + $0x780] ss:$12 sps:$4 sm:$0xff]   ;;  %v17274_v51 = vld [vmem:[%s19375_s19 + $0x79c] ss:$12 sps:$4 sm:$0xff]  }
 0xe7a   : > { %15155 = vmatprep.subr.bf16.mxu1 %v17224_v2  ;;  %v17272_v2 = vld [vmem:[%s19375_s19 + $0x798] ss:$12 sps:$4 sm:$0xff]  }
 0xe7b   : > { %v15051_v4 = vpop.f32.mrb[124].mxu1 }
 0xe7c   : > { %v15052_v21 = vpop.f32.mrb[125].mxu1  ;;  %11582 = vmatpush1.bf16.msra.mxu0 %v17226_v23  ;;  %v17277_v23 = vld [vmem:[%s19375_s19 + $0x7b4] ss:$12 sps:$4 sm:$0xff]  }
 0xe7d   : > { %v15053_v31 = vadd.f32 %v15052_v21, %v15051_v4  ;;  %15156 = vmatpush3.bf16.msra.mxu1 %v17225_v59  ;;  %v15054_v43 = vpop.f32.mrb[126].mxu1  ;;  %11583 = vmatprep.subr.bf16.mxu0 %v17233_v17  ;;  %v17275_v59 = vld [vmem:[%s19375_s19 + $0x7b0] ss:$12 sps:$4 sm:$0xff]   ;;  %v17280_v17 = vld [vmem:[%s19375_s19 + $0x7cc] ss:$12 sps:$4 sm:$0xff]  }
 0xe7e   : > { %v15055_v49 = vpop.f32.mrb[127].mxu1  ;;  %15157 = vmatprep.subr.bf16.mxu1 %v17229_v5  ;;  %v17278_v5 = vld [vmem:[%s19375_s19 + $0x7c8] ss:$12 sps:$4 sm:$0xff]   ;;  %v17281_v4 = vld [vmem:[%s19375_s19 + $0x7e0] ss:$12 sps:$4 sm:$0xff]  }
 0xe7f   : > { %v15056_v40 = vadd.f32 %v15055_v49, %v15054_v43  ;;  %v11696_v1 = vadd.f32 %v15053_v31, %v9863_v20  ;;  %v17284_v21 = vld [vmem:[%s19375_s19 + $0x7f8] ss:$12 sps:$4 sm:$0xff]   ;;  %v17287_v31 = vld [vmem:[%s19375_s19 + $0x810] ss:$12 sps:$4 sm:$0xff]   ;;  %v17293_v49 = vld [vmem:[%s19375_s19 + $0x840] ss:$12 sps:$4 sm:$0xff]  }
 0xe80   : > { %11584 = vmatpush1.bf16.msra.mxu0 %v17231_v7  ;;  %v17289_v7 = vld [vmem:[%s19375_s19 + $0x814] ss:$12 sps:$4 sm:$0xff]   ;;  %v17292_v43 = vld [vmem:[%s19375_s19 + $0x82c] ss:$12 sps:$4 sm:$0xff]  }
 0xe81   : > { %15158 = vmatpush3.bf16.msra.mxu1 %v17230_v6  ;;  %11585 = vmatprep.subr.bf16.mxu0 %v17238_v52  ;;  %v11699_v8 = vadd.f32 %v15056_v40, %v9863_v20  ;;  %v17290_v6 = vld [vmem:[%s19375_s19 + $0x828] ss:$12 sps:$4 sm:$0xff]   ;;  %v17295_v52 = vld [vmem:[%s19375_s19 + $0x844] ss:$12 sps:$4 sm:$0xff]  }
 0xe82   : > { %15159 = vmatprep.subr.bf16.mxu1 %v17234_v61  ;;  %v17298_v61 = vld [vmem:[%s19375_s19 + $0x85c] ss:$12 sps:$4 sm:$0xff]   ;;  %v17296_v40 = vld [vmem:[%s19375_s19 + $0x858] ss:$12 sps:$4 sm:$0xff]  }
 0xe83   : > { %v17308_v20 = vld [vmem:[%s19375_s19 + $0x8b8] ss:$12 sps:$4 sm:$0xff]  }
 0xe84   : > { %11586 = vmatpush1.bf16.msra.mxu0 %v17236_v38  ;;  %v17301_v38 = vld [vmem:[%s19375_s19 + $0x874] ss:$12 sps:$4 sm:$0xff]  }
 0xe85   : > { %15160 = vmatpush3.bf16.msra.mxu1 %v17235_v60  ;;  %11587 = vmatprep.subr.bf16.mxu0 %v17241_v9  ;;  %v17299_v60 = vld [vmem:[%s19375_s19 + $0x870] ss:$12 sps:$4 sm:$0xff]   ;;  %v17304_v9 = vld [vmem:[%s19375_s19 + $0x88c] ss:$12 sps:$4 sm:$0xff]  }
 0xe88   : > { %11899 = vmatmul.mubr.bf16.vlgmr.msra.gmra.mrb[144].mxu1 %v21277_v63  ;;  %11588 = vmatpush1.bf16.msra.mxu0 %v17239_v11  ;;  %v17302_v11 = vld [vmem:[%s19375_s19 + $0x888] ss:$12 sps:$4 sm:$0xff]  }
 0xe89   : > { %11589 = vmatprep.subr.bf16.mxu0 %v17244_v33  ;;  %v17307_v33 = vld [vmem:[%s19375_s19 + $0x8a4] ss:$12 sps:$4 sm:$0xff]  }
 0xe8c   : > { %11590 = vmatpush1.bf16.msra.mxu0 %v17242_v22 }
 0xe8d   : > { %11591 = vmatprep.subr.bf16.mxu0 %v17247_v12 }
 0xe90   : > { %11592 = vmatpush1.bf16.msra.mxu0 %v17245_v39  ;;  %v17305_v39 = vld [vmem:[%s19375_s19 + $0x8a0] ss:$12 sps:$4 sm:$0xff]  }
 0xe91   : > { %11593 = vmatprep.subr.bf16.mxu0 %v17250_v0 }
 0xe94   : > { %11594 = vmatpush1.bf16.msra.mxu0 %v17248_v14 }
 0xe95   : > { %11595 = vmatprep.subr.bf16.mxu0 %v17253_v44  ;;  %v17310_v44 = vld [vmem:[%s19375_s19 + $0x8bc] ss:$12 sps:$4 sm:$0xff]  }
 0xe98   : > { %11596 = vmatpush1.bf16.msra.mxu0 %v17251_v32 }
 0xe99   : > { %11597 = vmatprep.subr.bf16.mxu0 %v17256_v48 }
 0xe9b   : > { %v15073_v16 = vpop.f32.mrb[128].mxu1 }
 0xe9c   : > { %v15074_v35 = vpop.f32.mrb[129].mxu1  ;;  %11598 = vmatpush1.bf16.msra.mxu0 %v17254_v15 }
 0xe9d   : > { %v15075_v27 = vadd.f32 %v15074_v35, %v15073_v16  ;;  %v15076_v62 = vpop.f32.mrb[130].mxu1  ;;  %11599 = vmatprep.subr.bf16.mxu0 %v17259_v58  ;;  %v17313_v16 = vld [vmem:[%s19375_s19 + $0x8d4] ss:$12 sps:$4 sm:$0xff]   ;;  %v17311_v35 = vld [vmem:[%s19375_s19 + $0x8d0] ss:$12 sps:$4 sm:$0xff]  }
 0xe9e   : > { %v15077_v24 = vpop.f32.mrb[131].mxu1 }
 0xe9f   : > { %v21335_v54 = vadd.f32 %v15075_v27, %v11696_v1  ;;  %v15078_v55 = vadd.f32 %v15077_v24, %v15076_v62  ;;  %v17314_v1 = vld [vmem:[%s19375_s19 + $0x8e8] ss:$12 sps:$4 sm:$0xff]  }
 0xea0   : > { %11600 = vmatpush1.bf16.msra.mxu0 %v17257_v41  ;;  %v17316_v41 = vld [vmem:[%s19375_s19 + $0x8ec] ss:$12 sps:$4 sm:$0xff]  }
 0xea1   : > { %v21338_v47 = vadd.f32 %v15078_v55, %v11699_v8  ;;  %11601 = vmatprep.subr.bf16.mxu0 %v17262_v56 }
 0xea4   : > { %11602 = vmatpush1.bf16.msra.mxu0 %v17260_v19 }
 0xea5   : > { %11603 = vmatprep.subr.bf16.mxu0 %v17265_v53 }
 0xea8   : > { %11604 = vmatpush1.bf16.msra.mxu0 %v17263_v50 }
 0xea9   : > { %11605 = vmatprep.subr.bf16.mxu0 %v17268_v29 }
 0xeac   : > { %11606 = vmatpush1.bf16.msra.mxu0 %v17266_v45 }
 0xead   : > { %11618 = vmatprep.subr.bf16.mxu0 %v17271_v42 }
 0xeaf   : > { %11608 = vmatmul.mubr.bf16.vlgmr.msra.gmra.mrb[72].mxu0 %v21272_v3  ;;  %v17283_v3 = vld [vmem:[%s19375_s19 + $0x7e4] ss:$12 sps:$4 sm:$0xff]  }
 0xeb0   : > { %11619 = vmatpush1.bf16.msra.mxu0 %v17269_v57  ;;  %11650 = vmatprep.mubr.bf16.mxu0 %v21280_v36  ;;  %v17286_v36 = vld [vmem:[%s19375_s19 + $0x7fc] ss:$12 sps:$4 sm:$0xff]  }
 0xeb1   : > { %11620 = vmatprep.subr.bf16.mxu0 %v17274_v51 }
 0xeb4   : > { %11621 = vmatpush1.bf16.msra.mxu0 %v17272_v2 }
 0xeb5   : > { %11622 = vmatprep.subr.bf16.mxu0 %v17277_v23 }
 0xeb8   : > { %11623 = vmatpush1.bf16.msra.mxu0 %v17275_v59 }
 0xeb9   : > { %11624 = vmatprep.subr.bf16.mxu0 %v17280_v17 }
 0xebc   : > { %11625 = vmatpush1.bf16.msra.mxu0 %v17278_v5 }
 0xebd   : > { %11626 = vmatprep.subr.bf16.mxu0 %v17283_v3 }
 0xec0   : > { %11627 = vmatpush1.bf16.msra.mxu0 %v17281_v4 }
 0xec1   : > { %11628 = vmatprep.subr.bf16.mxu0 %v17286_v36  ;;  %v9855_v36 = vrot.slane %v21327_v46, %v19690_v25 }
 0xec4   : > { %11629 = vmatpush1.bf16.msra.mxu0 %v17284_v21  ;;  %v9859_v21 = vrot.slane %v21327_v46, %v19693_v26 }
 0xec5   : > { %11630 = vmatprep.subr.bf16.mxu0 %v17289_v7 }
 0xec8   : > { %11631 = vmatpush1.bf16.msra.mxu0 %v17287_v31 }
 0xec9   : > { %11632 = vmatprep.subr.bf16.mxu0 %v17292_v43 }
 0xecc   : > { %11633 = vmatpush1.bf16.msra.mxu0 %v17290_v6 }
 0xecd   : > { %11634 = vmatprep.subr.bf16.mxu0 %v17295_v52 }
 0xed0   : > { %11635 = vmatpush1.bf16.msra.mxu0 %v17293_v49 }
 0xed1   : > { %11636 = vmatprep.subr.bf16.mxu0 %v17298_v61 }
 0xed4   : > { %11637 = vmatpush1.bf16.msra.mxu0 %v17296_v40 }
 0xed5   : > { %11638 = vmatprep.subr.bf16.mxu0 %v17301_v38 }
 0xed8   : > { %11639 = vmatpush1.bf16.msra.mxu0 %v17299_v60 }
 0xed9   : > { %11640 = vmatprep.subr.bf16.mxu0 %v17304_v9 }
 0xedb   : > { %v15095_v22 = vpop.f32.mrb[132].mxu1 }
 0xedc   : > { %v15096_v12 = vpop.f32.mrb[133].mxu1  ;;  %11641 = vmatpush1.bf16.msra.mxu0 %v17302_v11 }
 0xedd   : > { %v15097_v0 = vadd.f32 %v15096_v12, %v15095_v22  ;;  %v15098_v14 = vpop.f32.mrb[134].mxu1  ;;  %11642 = vmatprep.subr.bf16.mxu0 %v17307_v33 }
 0xede   : > { %v15099_v32 = vpop.f32.mrb[135].mxu1 }
 0xedf   : > { %v11778_v48 = vadd.f32 %v15097_v0, %v21335_v54  ;;  %v15100_v15 = vadd.f32 %v15099_v32, %v15098_v14 }
 0xee0   : > { %11643 = vmatpush1.bf16.msra.mxu0 %v17305_v39 }
 0xee1   : > { %v11781_v58 = vadd.f32 %v15100_v15, %v21338_v47  ;;  %11644 = vmatprep.subr.bf16.mxu0 %v17310_v44 }
 0xee4   : > { %11645 = vmatpush1.bf16.msra.mxu0 %v17308_v20 }
 0xee5   : > { %11646 = vmatprep.subr.bf16.mxu0 %v17313_v16 }
 0xee8   : > { %11647 = vmatpush1.bf16.msra.mxu0 %v17311_v35 }
 0xee9   : > { %11648 = vmatprep.subr.bf16.mxu0 %v17316_v41 }
 0xeec   : > { %11649 = vmatpush1.bf16.msra.mxu0 %v17314_v1 }
 0xeef   : > { %11651 = vmatmul.mubr.bf16.vlgmr.msra.gmra.mrb[72].mxu0 %v21277_v63 }
 0xefb   : > { %v15117_v27 = vpop.f32.mrb[136].mxu1 }
 0xefc   : > { %v15118_v62 = vpop.f32.mrb[137].mxu1 }
 0xefd   : > { %v15119_v56 = vadd.f32 %v15118_v62, %v15117_v27  ;;  %v15120_v24 = vpop.f32.mrb[138].mxu1 }
 0xefe   : > { %v15121_v8 = vpop.f32.mrb[139].mxu1 }
 0xeff   : > { %v11819_v54 = vadd.f32 %v15119_v56, %v11778_v48  ;;  %v15122_v55 = vadd.f32 %v15121_v8, %v15120_v24 }
 0xf01   : > { %v11822_v19 = vadd.f32 %v15122_v55, %v11781_v58 }
 0xf3b   : > { %v15139_v47 = vpop.f32.mrb[140].mxu1 }
 0xf3c   : > { %v15140_v53 = vpop.f32.mrb[141].mxu1 }
 0xf3d   : > { %v15141_v50 = vadd.f32 %v15140_v53, %v15139_v47  ;;  %v15142_v29 = vpop.f32.mrb[142].mxu1  ;;  %v11913_v53 = vld [vmem:[%s1164_s5] sm:$0x7] }
 0xf3e   : > { %v15143_v45 = vpop.f32.mrb[143].mxu1 }
 0xf3f   : > { %v11860_v42 = vadd.f32 %v15141_v50, %v11819_v54  ;;  %v15144_v57 = vadd.f32 %v15143_v45, %v15142_v29  ;;  %v11914_v50 = vld [vmem:[%s1173_s0] sm:$0x7]  ;;  %v11961_v29 = vrot.slane %v11913_v53, %v19690_v25  ;;  %v11965_v45 = vrot.slane %v11913_v53, %v19693_v26 }
 0xf41   : > { %v11863_v51 = vadd.f32 %v15144_v57, %v11822_v19 }
 0xf5b   : > { %v15161_v2 = vpop.f32.mrb[144].mxu1 }
 0xf5c   : > { %v15162_v23 = vpop.f32.mrb[145].mxu1 }
 0xf5d   : > { %v15163_v59 = vadd.f32 %v15162_v23, %v15161_v2  ;;  %v15164_v63 = vpop.f32.mrb[146].mxu1  ;;  %v11987_v2 = vrot.slane %v11914_v50, %v19693_v26  ;;  %v11991_v23 = vrot.slane %v11914_v50, %v19767_v34 }
 0xf5e   : > { %v15165_v17 = vpop.f32.mrb[147].mxu1 }
 0xf5f   : > { %v11901_v5 = vadd.f32 %v15163_v59, %v11860_v42  ;;  %v15166_v3 = vadd.f32 %v15165_v17, %v15164_v63  ;;  %v11969_v42 = vrot.slane %v11913_v53, %v19767_v34  ;;  %v17532_v53 = vld [vmem:[#allocation23 + $0x80] ss:$12 sps:$4 sm:$0xff] (!%p14800_p6)  }
 0xf61   : > { %v11904_v4 = vadd.f32 %v15166_v3, %v11863_v51  ;;  %v11909_v33 = vadd.f32 %v11901_v5, %v20643_v10  ;;  %v11983_v51 = vrot.slane %v11914_v50, %v19690_v25  ;;  %v17536_v50 = vld [vmem:[#allocation23 + $0x158] ss:$12 sps:$4 sm:$0xff] (!%p14800_p6)  }
 0xf63   : > { %v11912_v39 = vadd.f32 %v11904_v4, %v20639_v13 }
 0xfc2   : > { %v11652_v7 = vpop.f32.mrb[72].mxu0 }
 0xfc3   : > { %v15557_v31 = vadd.f32 %v11652_v7, %v9855_v36  ;;  %v11654_v43 = vpop.f32.mrb[73].mxu0 }
 0xfc4   : > { %v15558_v6 = vadd.f32 %v11654_v43, %v9859_v21  ;;  %v11656_v52 = vpop.f32.mrb[74].mxu0 }
 0xfc5   : > { %v11907_v49 = vadd.f32 %v15557_v31, %v20583_v18  ;;  %v15559_v61 = vadd.f32 %v11656_v52, %v9855_v36  ;;  %v11658_v40 = vpop.f32.mrb[75].mxu0 }
 0xfc6   : > { %v11908_v38 = vadd.f32 %v15558_v6, %v20579_v37  ;;  %v15560_v60 = vadd.f32 %v11658_v40, %v9859_v21 }
 0xfc7   : > { %v11910_v9 = vadd.f32 %v15559_v61, %v20585_v30 }
 0xfc8   : > { %v11911_v11 = vadd.f32 %v15560_v60, %v20581_v28  ;;  %v11915_v22 = vadd.f32 %v11908_v38, %v11907_v49 }
 0xfca   : > { %v11916_v46 = vadd.f32 %v11915_v22, %v11909_v33  ;;  %v11919_v12 = vadd.f32 %v11911_v11, %v11910_v9  ;;  %v17478_v22 = vld [vmem:[#allocation23] ss:$12 sps:$4 sm:$0xff] (!%p14800_p6)  }
 0xfcc   : > { %11917 = vadd.xlane.f32.xlu0 %v11916_v46  ;;  %v11920_v0 = vadd.f32 %v11919_v12, %v11912_v39  ;;  %v17479_v46 = vld [vmem:[#allocation23 + $0x1c] ss:$12 sps:$4 sm:$0xff] (!%p14800_p6)  }
 0xfd0   : > { %11921 = vadd.xlane.f32.xlu0 %v11920_v0 }
0x1059   : > { %v11918_v18 = vpop.xlane.xlu0 %11917 }
0x105a   : > { %v11923_v14 = vmul.f32 0.0026041667, %v11918_v18  ;;  %v17482_v18 = vld [vmem:[#allocation23 + $0x34] ss:$12 sps:$4 sm:$0xff] (!%p14800_p6)  }
0x105c   : > { %v11925_v44 = vsub.f32 %v11907_v49, %v11923_v14  ;;  %v11926_v32 = vsub.f32 %v11908_v38, %v11923_v14  ;;  %v11927_v37 = vsub.f32 %v11909_v33, %v11923_v14  ;;  %v17484_v14 = vld [vmem:[#allocation23 + $0x30] ss:$12 sps:$4 sm:$0xff] (!%p14800_p6)  }
0x105d   : > { %v11922_v48 = vpop.xlane.xlu0 %11921 }
0x105e   : > { %v11924_v15 = vmul.f32 0.0026041667, %v11922_v48  ;;  %v11931_v30 = vmul.f32 %v11925_v44, %v11925_v44  ;;  %v11932_v20 = vmul.f32 %v11926_v32, %v11926_v32  ;;  %v11933_v28 = vmul.f32 %v11927_v37, %v11927_v37  ;;  %v17490_v48 = vld [vmem:[#allocation23 + $0x60] ss:$12 sps:$4 sm:$0xff] (!%p14800_p6)  }
0x1060   : > { %v11928_v58 = vsub.f32 %v11910_v9, %v11924_v15  ;;  %v11929_v10 = vsub.f32 %v11911_v11, %v11924_v15  ;;  %v11930_v16 = vsub.f32 %v11912_v39, %v11924_v15  ;;  %v11937_v35 = vadd.f32 %v11932_v20, %v11931_v30  ;;  %v17476_v11 = vld [vmem:[#allocation23 + $0x4] ss:$12 sps:$4 sm:$0xff] (!%p14800_p6)   ;;  %v17506_v15 = vld [vmem:[#allocation23 + $0xc8] ss:$12 sps:$4 sm:$0xff] (!%p14800_p6)  }
0x1061   : > { %12524 = vmatprep.subr.bf16.mxu0 (!%p14800_p6), %v17476_v11  ;;  %v17481_v39 = vld [vmem:[#allocation23 + $0x18] ss:$12 sps:$4 sm:$0xff] (!%p14800_p6)   ;;  %v17507_v30 = vld [vmem:[#allocation23 + $0x8] ss:$12 sps:$4 sm:$0xff] (!%p14800_p6)   ;;  %15167 = vmatprep.subr.bf16.mxu1 (!%p14800_p6), %v17506_v15  ;;  %v17571_v15 = vld [vmem:[#allocation23 + $0x230] ss:$12 sps:$4 sm:$0xff] (!%p14800_p6)  }
0x1062   : > { %v11938_v41 = vadd.f32 %v11937_v35, %v11933_v28  ;;  %v11934_v1 = vmul.f32 %v11928_v58, %v11928_v58  ;;  %v11935_v13 = vmul.f32 %v11929_v10, %v11929_v10  ;;  %v11936_v27 = vmul.f32 %v11930_v16, %v11930_v16  ;;  %12525 = vmatpush1.bf16.msra.mxu0 (!%p14800_p6), %v17478_v22  ;;  %v17491_v20 = vld [vmem:[#allocation23 + $0x7c] ss:$12 sps:$4 sm:$0xff] (!%p14800_p6)   ;;  %v17511_v28 = vld [vmem:[#allocation23 + $0xe0] ss:$12 sps:$4 sm:$0xff] (!%p14800_p6)   ;;  %v17516_v35 = vld [vmem:[#allocation23 + $0xf8] ss:$12 sps:$4 sm:$0xff] (!%p14800_p6)  }
0x1063   : > { %12526 = vmatprep.subr.bf16.mxu0 (!%p14800_p6), %v17479_v46  ;;  %15168 = vmatpush3.bf16.msra.mxu1 (!%p14800_p6), %v17507_v30  ;;  %v17540_v11 = vld [vmem:[#allocation23 + $0x184] ss:$12 sps:$4 sm:$0xff] (!%p14800_p6)   ;;  %v17538_v22 = vld [vmem:[#allocation23 + $0x180] ss:$12 sps:$4 sm:$0xff] (!%p14800_p6)   ;;  %v17545_v46 = vld [vmem:[#allocation23 + $0x19c] ss:$12 sps:$4 sm:$0xff] (!%p14800_p6)  }
0x1064   : > { %11939 = vadd.xlane.f32.xlu0 %v11938_v41  ;;  %v11941_v62 = vadd.f32 %v11935_v13, %v11934_v1  ;;  %15169 = vmatprep.subr.bf16.mxu1 (!%p14800_p6), %v17511_v28  ;;  %v17517_v41 = vld [vmem:[#allocation23 + $0x38] ss:$12 sps:$4 sm:$0xff] (!%p14800_p6)   ;;  %v17496_v1 = vld [vmem:[#allocation23 + $0x90] ss:$12 sps:$4 sm:$0xff] (!%p14800_p6)  }
0x1065   : > { %v17497_v13 = vld [vmem:[#allocation23 + $0xac] ss:$12 sps:$4 sm:$0xff] (!%p14800_p6)   ;;  %v17557_v30 = vld [vmem:[#allocation23 + $0x1e4] ss:$12 sps:$4 sm:$0xff] (!%p14800_p6)  }
0x1066   : > { %v11942_v56 = vadd.f32 %v11941_v62, %v11936_v27  ;;  %12527 = vmatpush1.bf16.msra.mxu0 (!%p14800_p6), %v17481_v39  ;;  %v17521_v27 = vld [vmem:[#allocation23 + $0x110] ss:$12 sps:$4 sm:$0xff] (!%p14800_p6)   ;;  %v17543_v39 = vld [vmem:[#allocation23 + $0x198] ss:$12 sps:$4 sm:$0xff] (!%p14800_p6)  }
0x1067   : > { %12528 = vmatprep.subr.bf16.mxu0 (!%p14800_p6), %v17482_v18  ;;  %v17522_v62 = vld [vmem:[#allocation23 + $0x50] ss:$12 sps:$4 sm:$0xff] (!%p14800_p6)   ;;  %v17549_v18 = vld [vmem:[#allocation23 + $0x1b4] ss:$12 sps:$4 sm:$0xff] (!%p14800_p6)  }
0x1068   : > { %11943 = vadd.xlane.f32.xlu0 %v11942_v56  ;;  %v17499_v56 = vld [vmem:[#allocation23 + $0xa8] ss:$12 sps:$4 sm:$0xff] (!%p14800_p6)  }
0x106a   : > { %12529 = vmatpush1.bf16.msra.mxu0 (!%p14800_p6), %v17484_v14  ;;  %v17570_v14 = vld [vmem:[#allocation23 + $0x218] ss:$12 sps:$4 sm:$0xff] (!%p14800_p6)  }
0x10f1   : > { %v11940_v24 = vpop.xlane.xlu0 %11939 }
0x10f2   : > { %v11945_v8 = vmul.f32 0.0026041667, %v11940_v24  ;;  %v17526_v24 = vld [vmem:[#allocation23 + $0x128] ss:$12 sps:$4 sm:$0xff] (!%p14800_p6)  }
0x10f4   : > { %v11947_v54 = vadd.f32 1e-12, %v11945_v8  ;;  %v17500_v8 = vld [vmem:[#allocation23 + $0xc4] ss:$12 sps:$4 sm:$0xff] (!%p14800_p6)  }
0x10f5   : > { %v11944_v55 = vpop.xlane.xlu0 %11943 }
0x10f6   : > { %17465 = vrsqrt.f32 %v11947_v54  ;;  %v11946_v19 = vmul.f32 0.0026041667, %v11944_v55  ;;  %v17527_v54 = vld [vmem:[#allocation23 + $0x68] ss:$12 sps:$4 sm:$0xff] (!%p14800_p6)   ;;  %v17531_v55 = vld [vmem:[#allocation23 + $0x140] ss:$12 sps:$4 sm:$0xff] (!%p14800_p6)  }
0x10f8   : > { %v11948_v47 = vadd.f32 1e-12, %v11946_v19  ;;  %v17502_v19 = vld [vmem:[#allocation23 + $0xc0] ss:$12 sps:$4 sm:$0xff] (!%p14800_p6)  }
0x10fa   : > { %17467 = vrsqrt.f32 %v11948_v47  ;;  %v17503_v47 = vld [vmem:[#allocation23 + $0xdc] ss:$12 sps:$4 sm:$0xff] (!%p14800_p6)  }
0x1100   : > { %v17466_v57 = vpop.eup %17465 }
0x1101   : > { %v11951_v59 = vmul.f32 %v17466_v57, %v11925_v44  ;;  %v11952_v63 = vmul.f32 %v17466_v57, %v11926_v32  ;;  %v11953_v17 = vmul.f32 %v17466_v57, %v11927_v37  ;;  %v17485_v44 = vld [vmem:[#allocation23 + $0x4c] ss:$12 sps:$4 sm:$0xff] (!%p14800_p6)   ;;  %v17487_v32 = vld [vmem:[#allocation23 + $0x48] ss:$12 sps:$4 sm:$0xff] (!%p14800_p6)   ;;  %v17488_v37 = vld [vmem:[#allocation23 + $0x64] ss:$12 sps:$4 sm:$0xff] (!%p14800_p6)  }
0x1102   : > { %12530 = vmatprep.subr.bf16.mxu0 (!%p14800_p6), %v17485_v44  ;;  %v17541_v57 = vld [vmem:[#allocation23 + $0x170] ss:$12 sps:$4 sm:$0xff] (!%p14800_p6)  }
0x1103   : > { %v11973_v5 = vmul.f32 %v11961_v29, %v11951_v59  ;;  %v11974_v3 = vmul.f32 %v11965_v45, %v11952_v63  ;;  %v11975_v4 = vmul.f32 %v11969_v42, %v11953_v17  ;;  %12531 = vmatpush1.bf16.msra.mxu0 (!%p14800_p6), %v17487_v32  ;;  %v17542_v59 = vld [vmem:[#allocation23 + $0xb0] ss:$12 sps:$4 sm:$0xff] (!%p14800_p6)   ;;  %v17515_v63 = vld [vmem:[#allocation23 + $0x108] ss:$12 sps:$4 sm:$0xff] (!%p14800_p6)  }
0x1104   : > { %v17468_v36 = vpop.eup %17467  ;;  %12532 = vmatprep.subr.bf16.mxu0 (!%p14800_p6), %v17488_v37  ;;  %v17547_v32 = vld [vmem:[#allocation23 + $0x1b0] ss:$12 sps:$4 sm:$0xff] (!%p14800_p6)   ;;  %v17553_v37 = vld [vmem:[#allocation23 + $0x1cc] ss:$12 sps:$4 sm:$0xff] (!%p14800_p6)  }
0x1105   : > { %v21401_v21 = vadd.f32 %v11983_v51, %v11973_v5  ;;  %v11996_v7 = vadd.f32 %v11987_v2, %v11974_v3  ;;  %v21403_v31 = vadd.f32 %v11991_v23, %v11975_v4  ;;  %v11954_v43 = vmul.f32 %v17468_v36, %v11928_v58  ;;  %v17512_v58 = vld [vmem:[#allocation23 + $0x20] ss:$12 sps:$4 sm:$0xff] (!%p14800_p6)   ;;  %v17518_v5 = vld [vmem:[#allocation23 + $0x124] ss:$12 sps:$4 sm:$0xff] (!%p14800_p6)   ;;  %v17546_v3 = vld [vmem:[#allocation23 + $0x188] ss:$12 sps:$4 sm:$0xff] (!%p14800_p6)  }
0x1106   : > { %v11955_v6 = vmul.f32 %v17468_v36, %v11929_v10  ;;  %v11956_v52 = vmul.f32 %v17468_v36, %v11930_v16  ;;  %12010 = sbr.rel (%p14800_p6) target bundleno = 5346 (0x14e2), region = 220  ;;  %v17493_v10 = vld [vmem:[#allocation23 + $0x78] ss:$12 sps:$4 sm:$0xff] (!%p14800_p6)   ;;  %v17494_v16 = vld [vmem:[#allocation23 + $0x94] ss:$12 sps:$4 sm:$0xff] (!%p14800_p6)   ;;  %15170 = vmatpush3.bf16.msra.mxu1 (!%p14800_p6), %v17512_v58  ;;  %v18517_v36 = vmov (!%p14800_p6), 0.0  }
0x1107   : > { %12001 = vst [vmem:[#allocation2] sm:$0xff] %v21401_v21  ;;  %12002 = vst [vmem:[#allocation2 + $0x8] sm:$0xff] %v11996_v7  ;;  %v11976_v49 = vmul.f32 %v11961_v29, %v11954_v43  ;;  %12533 = vmatpush1.bf16.msra.mxu0 (!%p14800_p6), %v17490_v48  ;;  %15171 = vmatprep.subr.bf16.mxu1 (!%p14800_p6), %v17516_v35  ;;  %v17505_v29 = vld [vmem:[#allocation23 + $0xd8] ss:$12 sps:$4 sm:$0xff] (!%p14800_p6)   ;;  %v17523_v43 = vld [vmem:[#allocation23 + $0x13c] ss:$12 sps:$4 sm:$0xff] (!%p14800_p6)  }
0x1108   : > { %12003 = vst [vmem:[#allocation2 + $0x10] sm:$0xff] %v21403_v31  ;;  %v11977_v61 = vmul.f32 %v11965_v45, %v11955_v6  ;;  %v11978_v40 = vmul.f32 %v11969_v42, %v11956_v52  ;;  %12534 = vmatprep.subr.bf16.mxu0 (!%p14800_p6), %v17491_v20  ;;  %v17508_v45 = vld [vmem:[#allocation23 + $0xf4] ss:$12 sps:$4 sm:$0xff] (!%p14800_p6)   ;;  %v17537_v42 = vld [vmem:[#allocation23 + $0x98] ss:$12 sps:$4 sm:$0xff] (!%p14800_p6)  }
0x1109   : > { %v21407_v38 = vadd.f32 %v11983_v51, %v11976_v49  ;;  %v17510_v51 = vld [vmem:[#allocation23 + $0xf0] ss:$12 sps:$4 sm:$0xff] (!%p14800_p6)   ;;  %v17550_v6 = vld [vmem:[#allocation23 + $0x1a0] ss:$12 sps:$4 sm:$0xff] (!%p14800_p6)   ;;  %v17554_v49 = vld [vmem:[#allocation23 + $0x1b8] ss:$12 sps:$4 sm:$0xff] (!%p14800_p6)  }
0x110a   : > { %v11999_v60 = vadd.f32 %v11987_v2, %v11977_v61  ;;  %v21409_v9 = vadd.f32 %v11991_v23, %v11978_v40  ;;  %15172 = vmatpush3.bf16.msra.mxu1 (!%p14800_p6), %v17517_v41  ;;  %v17513_v23 = vld [vmem:[#allocation23 + $0x10c] ss:$12 sps:$4 sm:$0xff] (!%p14800_p6)   ;;  %v17528_v52 = vld [vmem:[#allocation23 + $0x154] ss:$12 sps:$4 sm:$0xff] (!%p14800_p6)   ;;  %v17530_v61 = vld [vmem:[#allocation23 + $0x150] ss:$12 sps:$4 sm:$0xff] (!%p14800_p6)  }
0x110b   : > { %12004 = vst [vmem:[#allocation2 + $0x18] sm:$0xff] %v21407_v38  ;;  %12535 = vmatpush1.bf16.msra.mxu0 (!%p14800_p6), %v17493_v10  ;;  %15173 = vmatprep.subr.bf16.mxu1 (!%p14800_p6), %v17521_v27  ;;  %v12014_v2 = vrot.slane (!%p14800_p6), %v21407_v38, 7  ;;  %v17533_v40 = vld [vmem:[#allocation23 + $0x16c] ss:$12 sps:$4 sm:$0xff] (!%p14800_p6)   ;;  %v17558_v38 = vld [vmem:[#allocation23 + $0x1d0] ss:$12 sps:$4 sm:$0xff] (!%p14800_p6)  }
0x110c   : > { %12005 = vst [vmem:[#allocation2 + $0x20] sm:$0xff] %v11999_v60  ;;  %12006 = vst [vmem:[#allocation2 + $0x28] sm:$0xff] %v21409_v9  ;;  %v12015_v33 = vrot.slane (!%p14800_p6), %v11999_v60, 7  ;;  %12536 = vmatprep.subr.bf16.mxu0 (!%p14800_p6), %v17494_v16  ;;  %v17535_v60 = vld [vmem:[#allocation23 + $0x168] ss:$12 sps:$4 sm:$0xff] (!%p14800_p6)   ;;  %v12016_v44 = vrot.slane (!%p14800_p6), %v21409_v9, 7 }
0x110d   : > { %v12021_v17 = vsel %vm12020_vm3, %v21401_v21, %v12014_v2  ;;  %v17525_v21 = vld [vmem:[#allocation23 + $0x138] ss:$12 sps:$4 sm:$0xff]   ;;  %v17551_v48 = vld [vmem:[#allocation23 + $0x1c8] ss:$12 sps:$4 sm:$0xff]   ;;  %v17555_v16 = vld [vmem:[#allocation23 + $0x1e0] ss:$12 sps:$4 sm:$0xff]  }
0x110e   : > { %v12022_v12 = vsel %vm12020_vm3, %v11996_v7, %v12015_v33  ;;  %15174 = vmatpush3.bf16.msra.mxu1 %v17522_v62  ;;  %v12120_v4 = vpack.c.bf16 %v12021_v17, %v12021_v17  ;;  %v17520_v7 = vld [vmem:[#allocation23 + $0x120] ss:$12 sps:$4 sm:$0xff]   ;;  %v17562_v33 = vld [vmem:[#allocation23 + $0x1e8] ss:$12 sps:$4 sm:$0xff]   ;;  %v12023_v28 = vsel %vm12020_vm3, %v21403_v31, %v12016_v44 }
0x110f   : > { %v12121_v0 = vpack.c.bf16 %v12022_v12, %v12022_v12  ;;  %12537 = vmatpush1.bf16.msra.mxu0 %v17496_v1  ;;  %15175 = vmatprep.subr.bf16.mxu1 %v17526_v24  ;;  %v17566_v12 = vld [vmem:[#allocation23 + $0x200] ss:$12 sps:$4 sm:$0xff]   ;;  %v17574_v20 = vld [vmem:[#allocation26 + $0x4] ss:$8 sps:$4 sm:$0xff]   ;;  %v12122_v9 = vpack.c.bf16 %v12023_v28, %v12023_v28  ;;  %v17575_v41 = vld [vmem:[#allocation26 + $0x10] ss:$8 sps:$4 sm:$0xff]  }
0x1110   : > { %12538 = vmatprep.subr.bf16.mxu0 %v17497_v13  ;;  %v17572_v58 = vld [vmem:[#allocation26] ss:$8 sps:$4 sm:$0xff]   ;;  %v17577_v10 = vld [vmem:[#allocation26 + $0x14] ss:$8 sps:$4 sm:$0xff]   ;;  %v17561_v35 = vld [vmem:[#allocation23 + $0x1fc] ss:$12 sps:$4 sm:$0xff]  }
0x1111   : > { %12556 = vmatprep.mubr.bf16.mxu0 %v12121_v0  ;;  %12638 = vmatprep.mubr.bf16.mxu1 %v12121_v0  ;;  %v18519_v0 = vmov 0   ;;  %v17580_v1 = vld [vmem:[#allocation26 + $0x24] ss:$8 sps:$4 sm:$0xff]   ;;  %v17559_v13 = vld [vmem:[#allocation23 + $0x1f8] ss:$12 sps:$4 sm:$0xff]  }
0x1112   : > { %15176 = vmatpush3.bf16.msra.mxu1 %v17527_v54  ;;  %v17565_v27 = vld [vmem:[#allocation23 + $0x214] ss:$12 sps:$4 sm:$0xff]   ;;  %v17578_v31 = vld [vmem:[#allocation26 + $0x20] ss:$8 sps:$4 sm:$0xff]   ;;  %v17586_v54 = vld [vmem:[#allocation26 + $0x44] ss:$8 sps:$4 sm:$0xff]  }
0x1113   : > { %12539 = vmatpush1.bf16.msra.mxu0 %v17499_v56  ;;  %15177 = vmatprep.subr.bf16.mxu1 %v17531_v55  ;;  %v17583_v62 = vld [vmem:[#allocation26 + $0x34] ss:$8 sps:$4 sm:$0xff]   ;;  %v17563_v56 = vld [vmem:[#allocation23 + $0x210] ss:$12 sps:$4 sm:$0xff]   ;;  %v17567_v55 = vld [vmem:[#allocation23 + $0x228] ss:$12 sps:$4 sm:$0xff]  }
0x1114   : > { %12540 = vmatprep.subr.bf16.mxu0 %v17500_v8  ;;  %v17569_v24 = vld [vmem:[#allocation23 + $0x22c] ss:$12 sps:$4 sm:$0xff]   ;;  %v17581_v8 = vld [vmem:[#allocation26 + $0x30] ss:$8 sps:$4 sm:$0xff]  }
0x1115   : > { %v17601_v2 = vld [vmem:[#allocation26 + $0x94] ss:$8 sps:$4 sm:$0xff]   ;;  %v17655_v44 = vld [vmem:[#allocation29 + $0x28] sm:$0xff]  }
0x1116   : > { %15178 = vmatpush3.bf16.msra.mxu1 %v17532_v53  ;;  %v17587_v53 = vld [vmem:[#allocation26 + $0x50] ss:$8 sps:$4 sm:$0xff]   ;;  %v17607_v17 = vld [vmem:[#allocation26 + $0xb4] ss:$8 sps:$4 sm:$0xff]  }
0x1117   : > { %12541 = vmatpush1.bf16.msra.mxu0 %v17502_v19  ;;  %15179 = vmatprep.subr.bf16.mxu1 %v17536_v50  ;;  %v17584_v19 = vld [vmem:[#allocation26 + $0x40] ss:$8 sps:$4 sm:$0xff]   ;;  %v17592_v50 = vld [vmem:[#allocation26 + $0x64] ss:$8 sps:$4 sm:$0xff]  }
0x1118   : > { %12542 = vmatprep.subr.bf16.mxu0 %v17503_v47  ;;  %v17589_v47 = vld [vmem:[#allocation26 + $0x54] ss:$8 sps:$4 sm:$0xff]  }
0x111a   : > { %15180 = vmatpush3.bf16.msra.mxu1 %v17537_v42  ;;  %v17593_v42 = vld [vmem:[#allocation26 + $0x70] ss:$8 sps:$4 sm:$0xff]  }
0x111b   : > { %12543 = vmatpush1.bf16.msra.mxu0 %v17505_v29  ;;  %15181 = vmatprep.subr.bf16.mxu1 %v17541_v57  ;;  %v17590_v29 = vld [vmem:[#allocation26 + $0x60] ss:$8 sps:$4 sm:$0xff]   ;;  %v17598_v57 = vld [vmem:[#allocation26 + $0x84] ss:$8 sps:$4 sm:$0xff]  }
0x111c   : > { %12544 = vmatprep.subr.bf16.mxu0 %v17508_v45  ;;  %v17595_v45 = vld [vmem:[#allocation26 + $0x74] ss:$8 sps:$4 sm:$0xff]  }
0x111e   : > { %15182 = vmatpush3.bf16.msra.mxu1 %v17542_v59  ;;  %v17604_v59 = vld [vmem:[#allocation26 + $0xa4] ss:$8 sps:$4 sm:$0xff]  }
0x111f   : > { %12545 = vmatpush1.bf16.msra.mxu0 %v17510_v51  ;;  %15469 = vmatprep.subr.bf16.mxu1 %v18517_v36  ;;  %v17596_v51 = vld [vmem:[#allocation26 + $0x80] ss:$8 sps:$4 sm:$0xff]  }
0x1120   : > { %12546 = vmatprep.subr.bf16.mxu0 %v17513_v23  ;;  %v17599_v23 = vld [vmem:[#allocation26 + $0x90] ss:$8 sps:$4 sm:$0xff]  }
0x1121   : > { %12639 = vmatmul.mubr.bf16.vlgmr.msra.gmra.mrb[0].mxu1 %v12120_v4 }
0x1122   : > { %15470 = vmatpush3.bf16.msra.mxu1 %v17546_v3  ;;  %15485 = vmatprep.mubr.msk.bf16.mxu1 %vm18518_vm4, %v18517_v36  ;;  %v17610_v3 = vld [vmem:[#allocation26 + $0xc4] ss:$8 sps:$4 sm:$0xff]  }
0x1123   : > { %12547 = vmatpush1.bf16.msra.mxu0 %v17515_v63  ;;  %15471 = vmatprep.subr.bf16.mxu1 %v18517_v36  ;;  %v17602_v63 = vld [vmem:[#allocation26 + $0xa0] ss:$8 sps:$4 sm:$0xff]  }
0x1124   : > { %12548 = vmatprep.subr.bf16.mxu0 %v17518_v5  ;;  %v17605_v5 = vld [vmem:[#allocation26 + $0xb0] ss:$8 sps:$4 sm:$0xff]  }
0x1126   : > { %15472 = vmatpush3.bf16.msra.mxu1 %v17550_v6  ;;  %v17616_v6 = vld [vmem:[#allocation26 + $0xe4] ss:$8 sps:$4 sm:$0xff]  }
0x1127   : > { %12549 = vmatpush1.bf16.msra.mxu0 %v17520_v7  ;;  %15473 = vmatprep.subr.bf16.mxu1 %v18517_v36  ;;  %v17613_v7 = vld [vmem:[#allocation26 + $0xd4] ss:$8 sps:$4 sm:$0xff]  }
0x1128   : > { %12550 = vmatprep.subr.bf16.mxu0 %v17523_v43  ;;  %v17611_v43 = vld [vmem:[#allocation26 + $0xd0] ss:$8 sps:$4 sm:$0xff]  }
0x112a   : > { %15474 = vmatpush3.bf16.msra.mxu1 %v17554_v49  ;;  %v17617_v49 = vld [vmem:[#allocation26 + $0xf0] ss:$8 sps:$4 sm:$0xff]  }
0x112b   : > { %12551 = vmatpush1.bf16.msra.mxu0 %v17525_v21  ;;  %15475 = vmatprep.subr.bf16.mxu1 %v18517_v36  ;;  %v17614_v21 = vld [vmem:[#allocation26 + $0xe0] ss:$8 sps:$4 sm:$0xff]  }
0x112c   : > { %12552 = vmatprep.subr.bf16.mxu0 %v17528_v52  ;;  %v17619_v52 = vld [vmem:[#allocation26 + $0xf4] ss:$8 sps:$4 sm:$0xff]  }
0x112e   : > { %15476 = vmatpush3.bf16.msra.mxu1 %v17558_v38  ;;  %v17645_v38 = vld [vmem:[#allocation29] sm:$0xff]  }
0x112f   : > { %12553 = vmatpush1.bf16.msra.mxu0 %v17530_v61  ;;  %15477 = vmatprep.subr.bf16.mxu1 %v18517_v36  ;;  %v17622_v61 = vld [vmem:[#allocation26 + $0x104] ss:$8 sps:$4 sm:$0xff]  }
0x1130   : > { %12554 = vmatprep.subr.bf16.mxu0 %v17533_v40  ;;  %v17644_v40 = vld [vmem:[#allocation29 + $0x40] sm:$0xff]  }
0x1132   : > { %15478 = vmatpush3.bf16.msra.mxu1 %v17562_v33  ;;  %v17648_v33 = vld [vmem:[#allocation29 + $0x50] sm:$0xff]  }
0x1133   : > { %12555 = vmatpush1.bf16.msra.mxu0 %v17535_v60  ;;  %15479 = vmatprep.subr.bf16.mxu1 %v18517_v36  ;;  %v17646_v60 = vld [vmem:[#allocation29 + $0x48] sm:$0xff]  }
0x1134   : > { %12565 = vmatprep.subr.bf16.mxu0 %v17540_v11  ;;  %v17647_v11 = vld [vmem:[#allocation29 + $0x8] sm:$0xff]  }
0x1136   : > { %12557 = vmatmul.mubr.bf16.vlgmr.msra.gmra.mrb[0].mxu0 %v12120_v4  ;;  %15480 = vmatpush3.bf16.msra.mxu1 %v17566_v12  ;;  %v17608_v4 = vld [vmem:[#allocation26 + $0xc0] ss:$8 sps:$4 sm:$0xff]  }
0x1137   : > { %12566 = vmatpush1.bf16.msra.mxu0 %v17538_v22  ;;  %12597 = vmatprep.mubr.bf16.mxu0 %v18519_v0  ;;  %v17649_v22 = vld [vmem:[#allocation29 + $0x10] sm:$0xff]   ;;  %v17651_v12 = vld [vmem:[#allocation29 + $0x18] sm:$0xff]  }
0x1138   : > { %12567 = vmatprep.subr.bf16.mxu0 %v17545_v46  ;;  %15481 = vmatprep.subr.bf16.mxu1 %v18517_v36  ;;  %v17650_v46 = vld [vmem:[#allocation29 + $0x58] sm:$0xff]  }
0x113a   : > { %15482 = vmatpush3.bf16.msra.mxu1 %v17570_v14  ;;  %v17654_v14 = vld [vmem:[#allocation29 + $0x68] sm:$0xff]  }
0x113b   : > { %12568 = vmatpush1.bf16.msra.mxu0 %v17543_v39  ;;  %15483 = vmatprep.subr.bf16.mxu1 %v18517_v36  ;;  %v17652_v39 = vld [vmem:[#allocation29 + $0x60] sm:$0xff]  }
0x113c   : > { %12569 = vmatprep.subr.bf16.mxu0 %v17549_v18  ;;  %v17653_v18 = vld [vmem:[#allocation29 + $0x20] sm:$0xff]  }
0x113e   : > { %15484 = vmatpush3.bf16.msra.mxu1 %v17571_v15 }
0x113f   : > { %12570 = vmatpush1.bf16.msra.mxu0 %v17547_v32  ;;  %12992 = vmatprep.subr.bf16.mxu1 %v17574_v20  ;;  %v12123_v20 = vld [vmem:[#allocation24] sm:$0x7] }
0x1140   : > { %12571 = vmatprep.subr.bf16.mxu0 %v17553_v37  ;;  %v12136_v28 = vrot.slane %v12123_v20, %v19767_v34  ;;  %v17620_v34 = vld [vmem:[#allocation26 + $0x100] ss:$8 sps:$4 sm:$0xff]  }
0x1141   : > { %15486 = vmatmul.mubr.bf16.vlgmr.msra.gmra.mrb[4].mxu1 %v12122_v9 }
0x1142   : > { %12993 = vmatpush1.bf16.msra.mxu1 %v17572_v58 }
0x1143   : > { %12572 = vmatpush1.bf16.msra.mxu0 %v17551_v48  ;;  %12994 = vmatprep.subr.bf16.mxu1 %v17577_v10 }
0x1144   : > { %12573 = vmatprep.subr.bf16.mxu0 %v17557_v30 }
0x1146   : > { %12995 = vmatpush1.bf16.msra.mxu1 %v17575_v41 }
0x1147   : > { %12574 = vmatpush1.bf16.msra.mxu0 %v17555_v16  ;;  %12996 = vmatprep.subr.bf16.mxu1 %v17580_v1  ;;  %v12128_v1 = vrot.slane %v12123_v20, %v19690_v25 }
0x1148   : > { %12575 = vmatprep.subr.bf16.mxu0 %v17561_v35 }
0x114a   : > { %12997 = vmatpush1.bf16.msra.mxu1 %v17578_v31 }
0x114b   : > { %12576 = vmatpush1.bf16.msra.mxu0 %v17559_v13  ;;  %12998 = vmatprep.subr.bf16.mxu1 %v17583_v62  ;;  %v12132_v13 = vrot.slane %v12123_v20, %v19693_v26  ;;  %v14921_v20 = vld [vmem:[#allocation30] ss:$0 sm:$0xff] }
0x114c   : > { %12577 = vmatprep.subr.bf16.mxu0 %v17565_v27 }
0x114e   : > { %12999 = vmatpush1.bf16.msra.mxu1 %v17581_v8 }
0x114f   : > { %12578 = vmatpush1.bf16.msra.mxu0 %v17563_v56  ;;  %13000 = vmatprep.subr.bf16.mxu1 %v17586_v54 }
0x1150   : > { %12579 = vmatprep.subr.bf16.mxu0 %v17569_v24 }
0x1152   : > { %13001 = vmatpush1.bf16.msra.mxu1 %v17584_v19 }
0x1153   : > { %12580 = vmatpush1.bf16.msra.mxu0 %v17567_v55  ;;  %13002 = vmatprep.subr.bf16.mxu1 %v17589_v47 }
0x1154   : > { %15198 = vmatprep.subr.bf16.mxu0 %v17644_v40 }
0x1156   : > { %12598 = vmatmul.mubr.bf16.vlgmr.msra.gmra.mrb[0].mxu0 %v12122_v9  ;;  %13003 = vmatpush1.bf16.msra.mxu1 %v17587_v53  ;;  %v17625_v53 = vld [vmem:[#allocation26 + $0x114] ss:$8 sps:$4 sm:$0xff]  }
0x1157   : > { %13004 = vmatprep.subr.bf16.mxu1 %v17592_v50  ;;  %15199 = vmatpush3.bf16.msra.mxu0 %v17645_v38  ;;  %v17623_v50 = vld [vmem:[#allocation26 + $0x110] ss:$8 sps:$4 sm:$0xff]  }
0x1158   : > { %15200 = vmatprep.subr.bf16.mxu0 %v17646_v60 }
0x115a   : > { %13005 = vmatpush1.bf16.msra.mxu1 %v17590_v29  ;;  %v17628_v29 = vld [vmem:[#allocation26 + $0x124] ss:$8 sps:$4 sm:$0xff]  }
0x115b   : > { %13006 = vmatprep.subr.bf16.mxu1 %v17595_v45  ;;  %15201 = vmatpush3.bf16.msra.mxu0 %v17647_v11  ;;  %v17626_v45 = vld [vmem:[#allocation26 + $0x120] ss:$8 sps:$4 sm:$0xff]  }
0x115c   : > { %15202 = vmatprep.subr.bf16.mxu0 %v17648_v33 }
0x115e   : > { %13007 = vmatpush1.bf16.msra.mxu1 %v17593_v42  ;;  %v17631_v42 = vld [vmem:[#allocation26 + $0x134] ss:$8 sps:$4 sm:$0xff]  }
0x115f   : > { %13008 = vmatprep.subr.bf16.mxu1 %v17598_v57  ;;  %15203 = vmatpush3.bf16.msra.mxu0 %v17649_v22  ;;  %v17629_v57 = vld [vmem:[#allocation26 + $0x130] ss:$8 sps:$4 sm:$0xff]  }
0x1160   : > { %15204 = vmatprep.subr.bf16.mxu0 %v17650_v46 }
0x1162   : > { %13009 = vmatpush1.bf16.msra.mxu1 %v17596_v51  ;;  %v17634_v51 = vld [vmem:[#allocation26 + $0x144] ss:$8 sps:$4 sm:$0xff]  }
0x1163   : > { %13010 = vmatprep.subr.bf16.mxu1 %v17601_v2  ;;  %15205 = vmatpush3.bf16.msra.mxu0 %v17651_v12  ;;  %v17632_v2 = vld [vmem:[#allocation26 + $0x140] ss:$8 sps:$4 sm:$0xff]  }
0x1164   : > { %15206 = vmatprep.subr.bf16.mxu0 %v17652_v39 }
0x1166   : > { %13011 = vmatpush1.bf16.msra.mxu1 %v17599_v23  ;;  %v17637_v23 = vld [vmem:[#allocation26 + $0x154] ss:$8 sps:$4 sm:$0xff]  }
0x1167   : > { %13012 = vmatprep.subr.bf16.mxu1 %v17604_v59  ;;  %15207 = vmatpush3.bf16.msra.mxu0 %v17653_v18  ;;  %v17635_v59 = vld [vmem:[#allocation26 + $0x150] ss:$8 sps:$4 sm:$0xff]   ;;  %v17660_v18 = vld [vmem:[#allocation32] sm:$0xff]  }
0x1168   : > { %15208 = vmatprep.subr.bf16.mxu0 %v17654_v14 }
0x116a   : > { %13013 = vmatpush1.bf16.msra.mxu1 %v17602_v63  ;;  %v17640_v63 = vld [vmem:[#allocation26 + $0x164] ss:$8 sps:$4 sm:$0xff]  }
0x116b   : > { %13014 = vmatprep.subr.bf16.mxu1 %v17607_v17  ;;  %15209 = vmatpush3.bf16.msra.mxu0 %v17655_v44  ;;  %v17643_v17 = vld [vmem:[#allocation26 + $0x174] ss:$8 sps:$4 sm:$0xff]   ;;  %v17661_v44 = vld [vmem:[#allocation32 + $0x8] sm:$0xff]  }
0x116e   : > { %13015 = vmatpush1.bf16.msra.mxu1 %v17605_v5  ;;  %v17641_v5 = vld [vmem:[#allocation26 + $0x170] ss:$8 sps:$4 sm:$0xff]  }
0x116f   : > { %13016 = vmatprep.subr.bf16.mxu1 %v17610_v3 }
0x1172   : > { %13017 = vmatpush1.bf16.msra.mxu1 %v17608_v4 }
0x1173   : > { %13018 = vmatprep.subr.bf16.mxu1 %v17613_v7  ;;  %v17656_v7 = vld [vmem:[#allocation29 + $0x70] sm:$0xff]  }
0x1174   : > { %15210 = vmatprep.subr.bf16.mxu0 %v17656_v7 }
0x1176   : > { %13019 = vmatpush1.bf16.msra.mxu1 %v17611_v43  ;;  %v17657_v43 = vld [vmem:[#allocation29 + $0x30] sm:$0xff]  }
0x1177   : > { %13020 = vmatprep.subr.bf16.mxu1 %v17616_v6  ;;  %15211 = vmatpush3.bf16.msra.mxu0 %v17657_v43  ;;  %v17658_v6 = vld [vmem:[#allocation29 + $0x78] sm:$0xff]  }
0x1178   : > { %15212 = vmatprep.subr.bf16.mxu0 %v17658_v6 }
0x117a   : > { %13021 = vmatpush1.bf16.msra.mxu1 %v17614_v21  ;;  %v17659_v21 = vld [vmem:[#allocation29 + $0x38] sm:$0xff]  }
0x117b   : > { %13022 = vmatprep.subr.bf16.mxu1 %v17619_v52  ;;  %15213 = vmatpush3.bf16.msra.mxu0 %v17659_v21  ;;  %v12740_v52 = vld [vmem:[#allocation27] sm:$0x3] }
0x117c   : > { %15489 = vmatprep.subr.bf16.mxu0 %v18517_v36 }
0x117e   : > { %13023 = vmatpush1.bf16.msra.mxu1 %v17617_v49  ;;  %v12745_v49 = vrot.slane %v12740_v52, %v19690_v25  ;;  %v17662_v25 = vld [vmem:[#allocation32 + $0x10] sm:$0xff]  }
0x117f   : > { %13033 = vmatprep.subr.bf16.mxu1 %v17622_v61  ;;  %v12749_v61 = vrot.slane %v12740_v52, %v19693_v26  ;;  %v17663_v26 = vld [vmem:[#allocation32 + $0x18] sm:$0xff]  }
0x11f4   : > { %v15183_v32 = vpop.f32.mrb[0].mxu1 }
0x11f5   : > { %v15184_v37 = vpop.f32.mrb[1].mxu1 }
0x11f6   : > { %v15185_v48 = vadd.f32 %v15184_v37, %v15183_v32  ;;  %v15186_v15 = vpop.f32.mrb[2].mxu1  ;;  %v17664_v32 = vld [vmem:[#allocation32 + $0x20] sm:$0xff]   ;;  %v17665_v37 = vld [vmem:[#allocation32 + $0x28] sm:$0xff]  }
0x11f7   : > { %v15187_v30 = vpop.f32.mrb[3].mxu1  ;;  %v17667_v15 = vld [vmem:[#allocation32 + $0x38] sm:$0xff]  }
0x11f8   : > { %v12641_v58 = vadd.f32 %v15185_v48, %v12136_v28  ;;  %v17666_v48 = vld [vmem:[#allocation32 + $0x30] sm:$0xff]  }
0x1214   : > { %v12680_v10 = vpop.f32.mrb[4].mxu1 }
0x1215   : > { %v12681_v16 = vadd.f32 %v12680_v10, %v12641_v58  ;;  %v15487_v9 = vpop.f32.mrb[5].mxu1 }
0x1216   : > { %v12683_v35 = vpop.f32.mrb[6].mxu1 }
0x1217   : > { %v15488_v41 = vpop.f32.mrb[7].mxu1  ;;  %v12688_v3 = vmax.f32 %v12681_v16, 0.0 }
0x1219   : > { %v12739_v4 = vpack.c.bf16 %v12688_v3, %v12688_v3 }
0x1229   : > { %v12599_v27 = vpop.f32.mrb[0].mxu0 }
0x122a   : > { %v15673_v31 = vadd.f32 %v12599_v27, %v12128_v1  ;;  %v12601_v62 = vpop.f32.mrb[1].mxu0  ;;  %v14938_v1 = vld [vmem:[#allocation33] ss:$0 sm:$0xff] }
0x122b   : > { %v15674_v56 = vadd.f32 %v12601_v62, %v12132_v13  ;;  %v12603_v24 = vpop.f32.mrb[2].mxu0 }
0x122c   : > { %v12686_v8 = vmax.f32 %v15673_v31, 0.0  ;;  %v12604_v54 = vpop.f32.mrb[3].mxu0 }
0x122d   : > { %v12687_v55 = vmax.f32 %v15674_v56, 0.0 }
0x122e   : > { %v12737_v47 = vpack.c.bf16 %v12686_v8, %v12686_v8 }
0x122f   : > { %v12738_v19 = vpack.c.bf16 %v12687_v55, %v12687_v55 }
0x1231   : > { %13024 = vmatprep.mubr.bf16.mxu1 %v12738_v19 }
0x1232   : > { %13025 = vmatmul.mubr.bf16.vlgmr.msra.gmra.mrb[8].mxu1 %v12737_v47 }
0x1233   : > { %13034 = vmatpush1.bf16.msra.mxu1 %v17620_v34  ;;  %13065 = vmatprep.mubr.bf16.mxu1 %v18519_v0  ;;  %v17638_v0 = vld [vmem:[#allocation26 + $0x160] ss:$8 sps:$4 sm:$0xff]  }
0x1234   : > { %13035 = vmatprep.subr.bf16.mxu1 %v17625_v53 }
0x1237   : > { %13036 = vmatpush1.bf16.msra.mxu1 %v17623_v50 }
0x1238   : > { %13037 = vmatprep.subr.bf16.mxu1 %v17628_v29 }
0x123b   : > { %13038 = vmatpush1.bf16.msra.mxu1 %v17626_v45 }
0x123c   : > { %13039 = vmatprep.subr.bf16.mxu1 %v17631_v42 }
0x123f   : > { %13040 = vmatpush1.bf16.msra.mxu1 %v17629_v57 }
0x1240   : > { %13041 = vmatprep.subr.bf16.mxu1 %v17634_v51 }
0x1243   : > { %13042 = vmatpush1.bf16.msra.mxu1 %v17632_v2 }
0x1244   : > { %13043 = vmatprep.subr.bf16.mxu1 %v17637_v23 }
0x1247   : > { %13044 = vmatpush1.bf16.msra.mxu1 %v17635_v59 }
0x1248   : > { %13045 = vmatprep.subr.bf16.mxu1 %v17640_v63 }
0x124b   : > { %13046 = vmatpush1.bf16.msra.mxu1 %v17638_v0 }
0x124c   : > { %13047 = vmatprep.subr.bf16.mxu1 %v17643_v17 }
0x124f   : > { %13048 = vmatpush1.bf16.msra.mxu1 %v17641_v5 }
0x1252   : > { %13066 = vmatmul.mubr.bf16.vlgmr.msra.gmra.mrb[8].mxu1 %v12739_v4 }
0x1325   : > { %v13067_v40 = vpop.f32.mrb[8].mxu1 }
0x1326   : > { %v15675_v38 = vadd.f32 %v13067_v40, %v12745_v49  ;;  %v13069_v60 = vpop.f32.mrb[9].mxu1 }
0x1327   : > { %v15676_v11 = vadd.f32 %v13069_v60, %v12749_v61  ;;  %v13071_v33 = vpop.f32.mrb[10].mxu1 }
0x1328   : > { %v13074_v22 = vmax.f32 %v15675_v38, 0.0  ;;  %v13072_v46 = vpop.f32.mrb[11].mxu1 }
0x1329   : > { %v13075_v12 = vmax.f32 %v15676_v11, 0.0 }
0x132a   : > { %v13108_v14 = vpack.c.bf16 %v13074_v22, %v13074_v22 }
0x132b   : > { %v13109_v39 = vpack.c.bf16 %v13075_v12, %v13075_v12 }
0x132d   : > { %13245 = vmatprep.mubr.bf16.mxu0 %v13109_v39 }
0x132e   : > { %13246 = vmatmul.mubr.bf16.vlgmr.msra.gmra.mrb[4].mxu0 %v13108_v14 }
0x132f   : > { %15490 = vmatpush3.bf16.msra.mxu0 %v17660_v18  ;;  %15505 = vmatprep.mubr.msk.bf16.mxu0 %vm18518_vm4, %v18517_v36 }
0x1330   : > { %15491 = vmatprep.subr.bf16.mxu0 %v18517_v36 }
0x1333   : > { %15492 = vmatpush3.bf16.msra.mxu0 %v17661_v44 }
0x1334   : > { %15493 = vmatprep.subr.bf16.mxu0 %v18517_v36 }
0x1337   : > { %15494 = vmatpush3.bf16.msra.mxu0 %v17662_v25 }
0x1338   : > { %15495 = vmatprep.subr.bf16.mxu0 %v18517_v36 }
0x133b   : > { %15496 = vmatpush3.bf16.msra.mxu0 %v17663_v26 }
0x133c   : > { %15497 = vmatprep.subr.bf16.mxu0 %v18517_v36 }
0x133f   : > { %15498 = vmatpush3.bf16.msra.mxu0 %v17664_v32 }
0x1340   : > { %15499 = vmatprep.subr.bf16.mxu0 %v18517_v36 }
0x1343   : > { %15500 = vmatpush3.bf16.msra.mxu0 %v17665_v37 }
0x1344   : > { %15501 = vmatprep.subr.bf16.mxu0 %v18517_v36 }
0x1347   : > { %15502 = vmatpush3.bf16.msra.mxu0 %v17666_v48 }
0x1348   : > { %15503 = vmatprep.subr.bf16.mxu0 %v18517_v36 }
0x134b   : > { %15504 = vmatpush3.bf16.msra.mxu0 %v17667_v15 }
0x1401   : > { %v15214_v30 = vpop.f32.mrb[4].mxu0 }
0x1402   : > { %v15215_v28 = vpop.f32.mrb[5].mxu0 }
0x1403   : > { %v15216_v58 = vadd.f32 %v15215_v28, %v15214_v30  ;;  %v15217_v10 = vpop.f32.mrb[6].mxu0 }
0x1404   : > { %v15218_v16 = vpop.f32.mrb[7].mxu0 }
0x1405   : > { %v13248_v9 = vadd.f32 %v15216_v58, %v14921_v20 }
0x1407   : > { %v13253_v35 = vmax.f32 %v13248_v9, 0.0 }
0x1409   : > { %v13270_v41 = vpack.c.bf16 %v13253_v35, %v13253_v35 }
0x140b   : > { %15506 = vmatmul.mubr.bf16.vlgmr.msra.gmra.mrb[8].mxu0 %v13270_v41 }
0x14de   : > { %v13360_v13 = vpop.f32.mrb[8].mxu0 }
0x14df   : > { %v13361_v27 = vadd.f32 %v14938_v1, %v13360_v13  ;;  %v15507_v31 = vpop.f32.mrb[9].mxu0 }
0x14e0   : > { %v13363_v62 = vpop.f32.mrb[10].mxu0 }
0x14e1   : > { %13366 = vst [vmem:[#allocation35] sm:$0x3] %v13361_v27  ;;  %v15508_v56 = vpop.f32.mrb[11].mxu0 }
0x14e2 PF: > { %s21695_s1 = sld [smem:[#allocation50_spill]]  ;;  %s18520_s28 = smov [#allocation35]  }
0x14e3   : > { %s13376_s27 = sshll.u32 %s18520_s28, 4  ;;  %s13377_s27 = int_to_ptr.vmem [resolvable:$true] %s13376_s27 }
0x14e4   : > { %s18364_s3 = scalar_lea.vmem %s13377_s27, 32  ;;  %p18371_p2 = scmp.lt.s32.totalorder %s13377_s27, %s13377_s27 }
0x14e5   : > { %p18365_p1 = scmp.ne.s32.totalorder %s13377_s27, %s18364_s3  ;;  %p18372_p9 = scmp.lt.s32.totalorder %s18364_s3, %s18364_s3 }
0x14e7   : > { %p18373_p5 = por %p18372_p9, %p18371_p2 }
0x14e8   : > { %p15888_p8 = scmp.eq.s32.totalorder %s21695_s1, 1 }
0x14ea   : > { %p18366_p0 = pnand %p18365_p1, %p15888_p8 }
0x14ec   : > { %p18367_p3 = pneg %p18366_p0 }
0x14ee   : > { %p18374_p11 = pnand %p18373_p5, %p18367_p3 }
0x14f0   : > { %18377 = shalt.err (!%p18374_p11)
}
0x14f1   : > { %s21696_s2 = sld [smem:[#allocation78_spill]] }
0x14f7   : > { %s21697_s24 = smov %s21696_s2  ;;  %s18378_s13 = scalar_lea.hbm %s21696_s2, 32 }
0x14f8   : > { %p18379_p10 = scmp.ne.s32.totalorder %s21697_s24, %s18378_s13  ;;  %p18384_p7 = scmp.lt.u32.totalorder %s18378_s13, %s21697_s24 }
0x14fa   : > { %p18380_p4 = pnand %p18379_p10, %p15888_p8 }
0x14fc   : > { %p18381_p12 = pneg %p18380_p4 }
0x14fe   : > { %p18386_p13 = pnand %p18384_p7, %p18381_p12 }
0x1500   : > { %18389 = shalt.err (!%p18386_p13)
}
0x1501   : > { %15786 = dma.vmem_to_hbm [thread:$0]  (%p15888_p8), %s13377_s27, 32, %s21697_s24, [#allocation5]  }
0x1502   : > { %18451 = dma.done.wait (%p15888_p8), [#allocation5], 32  }
0x1503   : > { %18453 = vsyncadd (%p15888_p8), [#allocation5], 4294967264 }
0x1504 PF: > { %s21698_s0 = sld [smem:[#allocation49_spill]]  ;;  %s21699_s5 = sld [smem:[#allocation46_spill]] }
0x1505   : > { %s21700_s26 = sld [smem:[#allocation47_spill]]  ;;  %s21701_s27 = sld [smem:[#allocation54_spill]] }
0x1506   : > { %s21702_s7 = sld [smem:[#allocation52_spill]]  ;;  %s21703_s28 = smov %s18472_s6 }
0x150a   : > { %s42_s2 = sadd.s32 1, %s21698_s0  }
0x150b   : > { %p39_p6 = scmp.ge.s32.totalorder %s42_s2, 4  }
0x150c   : > { %s21704_s6 = smov %s21702_s7 }
0x150d   :  { %41 = sbr.rel (!%p39_p6) target bundleno = 35 (0x23), region = 332 }
0x1514   :  { %13389 = vsyncpa [#allocation4], 1 }
0x1515   :  { %13391 = vsyncpa [#allocation4 + $0x1], 1 }
0x1516   :  { %13392 = vsyncpa [#allocation7], 1 }
0x1517   :  { %13393 = vsyncpa [#allocation22], 1 }
0x1518   :  { %13394 = vsyncpa [#allocation25], 1 }
0x1519   :  { %13395 = vsyncpa [#allocation28], 1 }
0x151a   :  { %13396 = vsyncpa [#allocation31], 1 }
0x151b   :  { %13397 = vsyncpa [#allocation34], 1 }
0x151c   :  { %13398 = vsyncpa [#allocation5], 1 }
0x151d   :  { %13400 = vsyncpa [#allocation5 + $0x1], 1 }

</bundles_post_ra>
